<compile_context>
chip_gen: v7x
topology: tpu7x:2x2x1
jax: 0.10.0
libtpu: 0.0.40
codegen_flags: <defaults>
</compile_context>

<pallas_src>
import functools
import math

import jax
import jax.numpy as jnp
from jax.experimental import pallas as pl
from jax.experimental.pallas import tpu as pltpu


# ----------------------------------------------------------------------------
# Kernel 1: fused matmul + bias + ReLU (all 1x1 convolutions).
# Full-K / full-N blocks: the whole weight stays resident in VMEM, there is no
# K reduction grid axis and therefore no accumulator init/finalize branches.
# ----------------------------------------------------------------------------
def _mm_bias_act_kernel(a_ref, b_ref, bias_ref, o_ref, *, relu):
    acc = jnp.dot(a_ref[...], b_ref[...], preferred_element_type=jnp.float32)
    out = acc + bias_ref[...]
    if relu:
        out = jnp.maximum(out, 0.0)
    o_ref[...] = out.astype(o_ref.dtype)


def matmul_bias_relu(a, b, bias, relu=True, out_dtype=jnp.bfloat16):
    """a: (M, K), b: (K, N), bias: (N,) -> (M, N) in out_dtype (bf16 MXU, f32 acc)."""
    M, K = a.shape
    K2, N = b.shape
    assert K == K2
    a = a.astype(jnp.bfloat16)
    b = b.astype(jnp.bfloat16)
    bias2 = bias.reshape(1, N).astype(jnp.float32)

    # Large M tile (up to 512) that divides M exactly -> no padded copy of A,
    # few grid steps, better HBM roofline.
    tm = M
    for cand in (512, 256, 128, 64, 32, 16, 8):
        if M % cand == 0:
            tm = cand
            break

    # Per-step VMEM working set (double-buffered A/out + resident B + bias).
    vmem_bytes = (2 * tm * K + K * N + 2 * tm * N) * 2 + 4 * N
    assert vmem_bytes < 32 * 1024 * 1024, \
        "TODO(synk): add a K/N-tiled matmul path for very large layers"

    out_bytes = jnp.dtype(out_dtype).itemsize
    cost = pl.CostEstimate(
        flops=2 * M * N * K,
        transcendentals=0,
        bytes_accessed=int(2 * M * K + 2 * K * N + out_bytes * M * N + 4 * N))

    return pl.pallas_call(
        functools.partial(_mm_bias_act_kernel, relu=relu),
        out_shape=jax.ShapeDtypeStruct((M, N), out_dtype),
        grid_spec=pltpu.PrefetchScalarGridSpec(
            num_scalar_prefetch=0,
            grid=(M // tm,),
            in_specs=[
                pl.BlockSpec((tm, K), lambda i: (i, 0)),
                pl.BlockSpec((K, N), lambda i: (0, 0)),
                pl.BlockSpec((1, N), lambda i: (0, 0)),
            ],
            out_specs=pl.BlockSpec((tm, N), lambda i: (i, 0)),
        ),
        compiler_params=pltpu.CompilerParams(
            dimension_semantics=("parallel",)),
        cost_estimate=cost,
    )(a, b, bias2)


# ----------------------------------------------------------------------------
# Kernel 2: 3x3 conv (stride 1, padding 1) + bias + ReLU, 9 in-kernel taps.
# No im2col tensor is ever written to HBM: one grid step holds a whole
# zero-padded (H+2, W+2, C) image in VMEM and accumulates 9 shifted matmuls.
# ----------------------------------------------------------------------------
def _conv3x3_kernel(xp_ref, w_ref, bias_ref, o_ref, *, H, W, relu):
    # xp_ref: (H+2, W+2, C) zero-padded tile (batch dim squeezed)
    # w_ref : (9, C, OC) per-tap weights;  bias_ref: (1, OC) f32
    # o_ref : (H*W, OC)
    C = w_ref.shape[1]
    OC = w_ref.shape[2]
    acc = jnp.zeros((H * W, OC), jnp.float32)
    for kh in range(3):                 # static 3x3 tap loop, unrolled at trace
        for kw in range(3):
            tap = xp_ref[kh:kh + H, kw:kw + W, :].reshape(H * W, C)
            acc = acc + jnp.dot(tap, w_ref[kh * 3 + kw],
                                preferred_element_type=jnp.float32)
    out = acc + bias_ref[...]
    if relu:
        out = jnp.maximum(out, 0.0)
    o_ref[...] = out.astype(o_ref.dtype)


def conv3x3_relu(x, w, b, out_dtype=jnp.bfloat16):
    """3x3 conv, stride 1, padding 1, fused bias+ReLU.  x: NHWC, w: (OC, IC, 3, 3)."""
    B, H, W, C = x.shape
    OC = w.shape[0]
    Hp, Wp = H + 2, W + 2
    xp = jnp.pad(x.astype(jnp.bfloat16), ((0, 0), (1, 1), (1, 1), (0, 0)))
    w9 = jnp.transpose(w, (2, 3, 1, 0)).reshape(9, C, OC).astype(jnp.bfloat16)
    bias = b.reshape(1, OC).astype(jnp.float32)

    # TODO(synk): one grid step keeps the whole padded image in VMEM; for
    # feature maps much larger than GoogLeNet-scale this needs row tiling
    # with a 1-row halo.
    out_bytes = jnp.dtype(out_dtype).itemsize
    cost = pl.CostEstimate(
        flops=2 * B * H * W * 9 * C * OC,
        transcendentals=0,
        bytes_accessed=int(2 * B * Hp * Wp * C + 2 * 9 * C * OC
                           + out_bytes * B * H * W * OC + 4 * OC))

    out = pl.pallas_call(
        functools.partial(_conv3x3_kernel, H=H, W=W, relu=True),
        out_shape=jax.ShapeDtypeStruct((B, H * W, OC), out_dtype),
        grid_spec=pltpu.PrefetchScalarGridSpec(
            num_scalar_prefetch=0,
            grid=(B,),
            in_specs=[
                pl.BlockSpec((None, Hp, Wp, C), lambda i: (i, 0, 0, 0)),
                pl.BlockSpec((9, C, OC), lambda i: (0, 0, 0)),
                pl.BlockSpec((1, OC), lambda i: (0, 0)),
            ],
            out_specs=pl.BlockSpec((None, H * W, OC), lambda i: (i, 0, 0)),
        ),
        compiler_params=pltpu.CompilerParams(
            dimension_semantics=("parallel",)),
        cost_estimate=cost,
    )(xp, w9, bias)
    return out.reshape(B, H, W, OC)


# ----------------------------------------------------------------------------
# Kernel 3: MaxPool2d(3, stride=1, padding=1, ceil_mode=True) fused with the
# pool-proj 1x1 conv + bias + ReLU (branch 4).  With stride 1 / pad 1, ceil
# mode gives the same H x W output, and -inf padding matches PyTorch maxpool.
# ----------------------------------------------------------------------------
def _maxpool3_conv1x1_kernel(xp_ref, w_ref, bias_ref, o_ref, *, H, W, relu):
    # xp_ref: (H+2, W+2, C) -inf padded tile;  w_ref: (C, OC);  o_ref: (H*W, OC)
    C = w_ref.shape[0]
    m = xp_ref[0:H, 0:W, :]
    for kh in range(3):
        for kw in range(3):
            if kh == 0 and kw == 0:
                continue
            m = jnp.maximum(m, xp_ref[kh:kh + H, kw:kw + W, :])
    acc = jnp.dot(m.reshape(H * W, C), w_ref[...],
                  preferred_element_type=jnp.float32)
    out = acc + bias_ref[...]
    if relu:
        out = jnp.maximum(out, 0.0)
    o_ref[...] = out.astype(o_ref.dtype)


def maxpool3_conv1x1_relu(x, w, b, out_dtype=jnp.bfloat16):
    """Fused 3x3/s1/p1 maxpool + 1x1 conv + ReLU.  x: NHWC, w: (OC, C, 1, 1)."""
    B, H, W, C = x.shape
    OC = w.shape[0]
    Hp, Wp = H + 2, W + 2
    xp = jnp.pad(x.astype(jnp.bfloat16), ((0, 0), (1, 1), (1, 1), (0, 0)),
                 constant_values=-jnp.inf)
    wm = w.reshape(OC, C).T.astype(jnp.bfloat16)
    bias = b.reshape(1, OC).astype(jnp.float32)

    out_bytes = jnp.dtype(out_dtype).itemsize
    cost = pl.CostEstimate(
        flops=2 * B * H * W * C * OC + 9 * B * H * W * C,
        transcendentals=0,
        bytes_accessed=int(2 * B * Hp * Wp * C + 2 * C * OC
                           + out_bytes * B * H * W * OC + 4 * OC))

    out = pl.pallas_call(
        functools.partial(_maxpool3_conv1x1_kernel, H=H, W=W, relu=True),
        out_shape=jax.ShapeDtypeStruct((B, H * W, OC), out_dtype),
        grid_spec=pltpu.PrefetchScalarGridSpec(
            num_scalar_prefetch=0,
            grid=(B,),
            in_specs=[
                pl.BlockSpec((None, Hp, Wp, C), lambda i: (i, 0, 0, 0)),
                pl.BlockSpec((C, OC), lambda i: (0, 0)),
                pl.BlockSpec((1, OC), lambda i: (0, 0)),
            ],
            out_specs=pl.BlockSpec((None, H * W, OC), lambda i: (i, 0, 0)),
        ),
        compiler_params=pltpu.CompilerParams(
            dimension_semantics=("parallel",)),
        cost_estimate=cost,
    )(xp, wm, bias)
    return out.reshape(B, H, W, OC)


# ----------------------------------------------------------------------------
# Parameters (deterministic synthetic init, PyTorch conv-default-like scale)
# ----------------------------------------------------------------------------
def init_inception_params(key, in_channels, ch1x1, ch3x3red, ch3x3,
                          ch5x5red, ch5x5, pool_proj):
    keys = iter(jax.random.split(key, 8))

    def conv(oc, ic, k):
        bound = 1.0 / math.sqrt(ic * k * k)
        kw_, kb_ = jax.random.split(next(keys))
        w = jax.random.uniform(kw_, (oc, ic, k, k), jnp.float32, -bound, bound)
        b = jax.random.uniform(kb_, (oc,), jnp.float32, -bound, bound)
        return {'w': w, 'b': b}

    return {
        'b1':  conv(ch1x1, in_channels, 1),
        'b2a': conv(ch3x3red, in_channels, 1),
        'b2b': conv(ch3x3, ch3x3red, 3),
        'b3a': conv(ch5x5red, in_channels, 1),
        'b3b': conv(ch5x5, ch5x5red, 3),
        'b4':  conv(pool_proj, in_channels, 1),
    }


# ----------------------------------------------------------------------------
# Forward pass (matches Inception.forward: cat([b1, b2, b3, b4], dim=1))
# ----------------------------------------------------------------------------
def inception_forward(params, x_nchw):
    x = jnp.transpose(x_nchw, (0, 2, 3, 1)).astype(jnp.bfloat16)   # NHWC bf16
    B, H, W, C = x.shape

    c1 = params['b1']['w'].shape[0]
    c3r = params['b2a']['w'].shape[0]
    c5r = params['b3a']['w'].shape[0]

    # Branch1, branch2-reduce and branch3-reduce read the same x: fuse their
    # 1x1 convs into one matmul (x read from HBM once, dense combined N).
    w_fused = jnp.concatenate(
        [params['b1']['w'].reshape(c1, C).T,
         params['b2a']['w'].reshape(c3r, C).T,
         params['b3a']['w'].reshape(c5r, C).T], axis=1)
    b_fused = jnp.concatenate(
        [params['b1']['b'], params['b2a']['b'], params['b3a']['b']])
    y = matmul_bias_relu(x.reshape(B * H * W, C), w_fused, b_fused,
                         relu=True).reshape(B, H, W, c1 + c3r + c5r)
    branch1 = y[..., :c1]
    red2 = y[..., c1:c1 + c3r]
    red3 = y[..., c1 + c3r:]

    branch2 = conv3x3_relu(red2, params['b2b']['w'], params['b2b']['b'])
    branch3 = conv3x3_relu(red3, params['b3b']['w'], params['b3b']['b'])
    branch4 = maxpool3_conv1x1_relu(x, params['b4']['w'], params['b4']['b'])

    out = jnp.concatenate([branch1, branch2, branch3, branch4], axis=-1)
    return jnp.transpose(out, (0, 3, 1, 2)).astype(jnp.float32)    # NCHW f32


# ----------------------------------------------------------------------------
# Pure-JAX f32 reference (for a loose bf16 tolerance check)
# ----------------------------------------------------------------------------
def _reference_inception(params, x_nchw):
    def conv(x, w, b, pad):
        y = jax.lax.conv_general_dilated(
            x, w, window_strides=(1, 1), padding=[(pad, pad), (pad, pad)],
            dimension_numbers=('NCHW', 'OIHW', 'NCHW'))
        return jax.nn.relu(y + b[None, :, None, None])

    b1 = conv(x_nchw, params['b1']['w'], params['b1']['b'], 0)
    b2 = conv(conv(x_nchw, params['b2a']['w'], params['b2a']['b'], 0),
              params['b2b']['w'], params['b2b']['b'], 1)
    b3 = conv(conv(x_nchw, params['b3a']['w'], params['b3a']['b'], 0),
              params['b3b']['w'], params['b3b']['b'], 1)
    mp = jax.lax.reduce_window(
        x_nchw, -jnp.inf, jax.lax.max,
        window_dimensions=(1, 1, 3, 3), window_strides=(1, 1, 1, 1),
        padding=((0, 0), (0, 0), (1, 1), (1, 1)))
    b4 = conv(mp, params['b4']['w'], params['b4']['b'], 0)
    return jnp.concatenate([b1, b2, b3, b4], axis=1)


# ----------------------------------------------------------------------------
# Main
# ----------------------------------------------------------------------------
if __name__ == "__main__":
    key = jax.random.PRNGKey(0)
    pkey, xkey = jax.random.split(key)

    batch, in_channels, H, W = 2, 64, 16, 16
    ch1x1, ch3x3red, ch3x3, ch5x5red, ch5x5, pool_proj = 32, 32, 64, 16, 32, 32

    params = init_inception_params(pkey, in_channels, ch1x1, ch3x3red, ch3x3,
                                   ch5x5red, ch5x5, pool_proj)
    x = jax.random.normal(xkey, (batch, in_channels, H, W), jnp.float32)

    fwd = jax.jit(inception_forward)
    out = fwd(params, x)
    jax.block_until_ready(out)

    out_channels = ch1x1 + ch3x3 + ch5x5 + pool_proj
    assert out.shape == (batch, out_channels, H, W), out.shape
    assert out.dtype == jnp.float32
    assert bool(jnp.all(jnp.isfinite(out)))
    assert bool(jnp.all(out >= 0.0))          # every branch ends in a ReLU

    # Loose tolerance vs an f32 reference (kernels use bf16 operands, f32 acc).
    ref = jax.jit(_reference_inception)(params, x)
    jax.block_until_ready(ref)
    rel_err = float(jnp.max(jnp.abs(out - ref)) / (jnp.max(jnp.abs(ref)) + 1e-6))
    assert rel_err < 0.1, f"mismatch vs f32 reference: rel_max_err={rel_err}"

    print("KERNEL_OK")
</pallas_src>

<mosaic_0001>
module attributes {stable_mosaic.version = 11 : i64} {
  func.func @_maxpool3_conv1x1_kernel(%arg0: i32, %arg1: memref<1x18x18x64xbf16, #tpu.memory_space<vmem>>, %arg2: memref<64x32xbf16, #tpu.memory_space<vmem>>, %arg3: memref<1x32xf32, #tpu.memory_space<vmem>>, %arg4: memref<1x256x32xbf16, #tpu.memory_space<vmem>>) attributes {dimension_semantics = [#tpu.dimension_semantics<parallel>], iteration_bounds = array<i64: 2>, scalar_prefetch = 0 : i64, scratch_operands = 0 : i64, tpu.core_type = #tpu.core_type<tc>, window_params = [{transform_indices = @transform_0, window_bounds = array<i64: 1, 18, 18, 64>}, {pipeline_mode = #tpu.pipeline_mode<synchronous>, transform_indices = @transform_1, window_bounds = array<i64: 64, 32>}, {pipeline_mode = #tpu.pipeline_mode<synchronous>, transform_indices = @transform_2, window_bounds = array<i64: 1, 32>}, {transform_indices = @transform_3, window_bounds = array<i64: 1, 256, 32>}]} {
    %c0 = arith.constant 0 : index
    %c0_0 = arith.constant 0 : index
    %c0_1 = arith.constant 0 : index
    %c0_2 = arith.constant 0 : index
    %0 = vector.load %arg1[%c0, %c0_0, %c0_1, %c0_2] : memref<1x18x18x64xbf16, #tpu.memory_space<vmem>>, vector<1x16x16x64xbf16>
    %1 = vector.shape_cast %0 : vector<1x16x16x64xbf16> to vector<16x16x64xbf16>
    %c0_3 = arith.constant 0 : index
    %c0_4 = arith.constant 0 : index
    %c1 = arith.constant 1 : index
    %c0_5 = arith.constant 0 : index
    %2 = vector.load %arg1[%c0_3, %c0_4, %c1, %c0_5] : memref<1x18x18x64xbf16, #tpu.memory_space<vmem>>, vector<1x16x16x64xbf16>
    %3 = vector.shape_cast %2 : vector<1x16x16x64xbf16> to vector<16x16x64xbf16>
    %4 = arith.maximumf %1, %3 : vector<16x16x64xbf16>
    %c0_6 = arith.constant 0 : index
    %c0_7 = arith.constant 0 : index
    %c2 = arith.constant 2 : index
    %c0_8 = arith.constant 0 : index
    %5 = vector.load %arg1[%c0_6, %c0_7, %c2, %c0_8] : memref<1x18x18x64xbf16, #tpu.memory_space<vmem>>, vector<1x16x16x64xbf16>
    %6 = vector.shape_cast %5 : vector<1x16x16x64xbf16> to vector<16x16x64xbf16>
    %7 = arith.maximumf %4, %6 : vector<16x16x64xbf16>
    %c0_9 = arith.constant 0 : index
    %c1_10 = arith.constant 1 : index
    %c0_11 = arith.constant 0 : index
    %c0_12 = arith.constant 0 : index
    %8 = vector.load %arg1[%c0_9, %c1_10, %c0_11, %c0_12] : memref<1x18x18x64xbf16, #tpu.memory_space<vmem>>, vector<1x16x16x64xbf16>
    %9 = vector.shape_cast %8 : vector<1x16x16x64xbf16> to vector<16x16x64xbf16>
    %10 = arith.maximumf %7, %9 : vector<16x16x64xbf16>
    %c0_13 = arith.constant 0 : index
    %c1_14 = arith.constant 1 : index
    %c1_15 = arith.constant 1 : index
    %c0_16 = arith.constant 0 : index
    %11 = vector.load %arg1[%c0_13, %c1_14, %c1_15, %c0_16] : memref<1x18x18x64xbf16, #tpu.memory_space<vmem>>, vector<1x16x16x64xbf16>
    %12 = vector.shape_cast %11 : vector<1x16x16x64xbf16> to vector<16x16x64xbf16>
    %13 = arith.maximumf %10, %12 : vector<16x16x64xbf16>
    %c0_17 = arith.constant 0 : index
    %c1_18 = arith.constant 1 : index
    %c2_19 = arith.constant 2 : index
    %c0_20 = arith.constant 0 : index
    %14 = vector.load %arg1[%c0_17, %c1_18, %c2_19, %c0_20] : memref<1x18x18x64xbf16, #tpu.memory_space<vmem>>, vector<1x16x16x64xbf16>
    %15 = vector.shape_cast %14 : vector<1x16x16x64xbf16> to vector<16x16x64xbf16>
    %16 = arith.maximumf %13, %15 : vector<16x16x64xbf16>
    %c0_21 = arith.constant 0 : index
    %c2_22 = arith.constant 2 : index
    %c0_23 = arith.constant 0 : index
    %c0_24 = arith.constant 0 : index
    %17 = vector.load %arg1[%c0_21, %c2_22, %c0_23, %c0_24] : memref<1x18x18x64xbf16, #tpu.memory_space<vmem>>, vector<1x16x16x64xbf16>
    %18 = vector.shape_cast %17 : vector<1x16x16x64xbf16> to vector<16x16x64xbf16>
    %19 = arith.maximumf %16, %18 : vector<16x16x64xbf16>
    %c0_25 = arith.constant 0 : index
    %c2_26 = arith.constant 2 : index
    %c1_27 = arith.constant 1 : index
    %c0_28 = arith.constant 0 : index
    %20 = vector.load %arg1[%c0_25, %c2_26, %c1_27, %c0_28] : memref<1x18x18x64xbf16, #tpu.memory_space<vmem>>, vector<1x16x16x64xbf16>
    %21 = vector.shape_cast %20 : vector<1x16x16x64xbf16> to vector<16x16x64xbf16>
    %22 = arith.maximumf %19, %21 : vector<16x16x64xbf16>
    %c0_29 = arith.constant 0 : index
    %c2_30 = arith.constant 2 : index
    %c2_31 = arith.constant 2 : index
    %c0_32 = arith.constant 0 : index
    %23 = vector.load %arg1[%c0_29, %c2_30, %c2_31, %c0_32] : memref<1x18x18x64xbf16, #tpu.memory_space<vmem>>, vector<1x16x16x64xbf16>
    %24 = vector.shape_cast %23 : vector<1x16x16x64xbf16> to vector<16x16x64xbf16>
    %25 = arith.maximumf %22, %24 : vector<16x16x64xbf16>
    %26 = vector.shape_cast %25 : vector<16x16x64xbf16> to vector<256x64xbf16>
    %c0_33 = arith.constant 0 : index
    %c0_34 = arith.constant 0 : index
    %27 = vector.load %arg2[%c0_33, %c0_34] : memref<64x32xbf16, #tpu.memory_space<vmem>>, vector<64x32xbf16>
    %cst = arith.constant dense<0.000000e+00> : vector<256x32xf32>
    %28 = tpu.matmul %26, %27, %cst {dimension_numbers = #tpu.dot_dimension_numbers<[1], [0], [0], [1], [0, 0, 1, 1], [], []>} : vector<256x64xbf16>, vector<64x32xbf16>, vector<256x32xf32> -> vector<256x32xf32>
    %c0_35 = arith.constant 0 : index
    %c0_36 = arith.constant 0 : index
    %29 = vector.load %arg3[%c0_35, %c0_36] : memref<1x32xf32, #tpu.memory_space<vmem>>, vector<1x32xf32>
    %30 = vector.broadcast %29 : vector<1x32xf32> to vector<256x32xf32>
    %31 = arith.addf %28, %30 : vector<256x32xf32>
    %cst_37 = arith.constant 0.000000e+00 : f32
    %32 = vector.broadcast %cst_37 : f32 to vector<256x32xf32>
    %33 = arith.maximumf %31, %32 : vector<256x32xf32>
    %34 = arith.truncf %33 : vector<256x32xf32> to vector<256x32xbf16>
    %c0_38 = arith.constant 0 : index
    %c0_39 = arith.constant 0 : index
    %c0_40 = arith.constant 0 : index
    %35 = vector.load %arg4[%c0_38, %c0_39, %c0_40] : memref<1x256x32xbf16, #tpu.memory_space<vmem>>, vector<1x256x32xbf16>
    %36 = vector.shape_cast %35 : vector<1x256x32xbf16> to vector<256x32xbf16>
    %37 = vector.shape_cast %34 : vector<256x32xbf16> to vector<1x256x32xbf16>
    tpu.vector_store %arg4[%c0_38, %c0_39, %c0_40], %37 {strides = array<i32>} : memref<1x256x32xbf16, #tpu.memory_space<vmem>>, vector<1x256x32xbf16>,
    return
  }
  func.func @transform_0(%arg0: i32) -> (i32, i32, i32, i32) {
    %c0_i32 = arith.constant 0 : i32
    %c0_i32_0 = arith.constant 0 : i32
    %c0_i32_1 = arith.constant 0 : i32
    %c0_i32_2 = arith.constant 0 : i32
    return %arg0, %c0_i32, %c0_i32_0, %c0_i32_1 : i32, i32, i32, i32
  }
  func.func @transform_1(%arg0: i32) -> (i32, i32) {
    %c0_i32 = arith.constant 0 : i32
    %c0_i32_0 = arith.constant 0 : i32
    %c0_i32_1 = arith.constant 0 : i32
    return %c0_i32, %c0_i32_0 : i32, i32
  }
  func.func @transform_2(%arg0: i32) -> (i32, i32) {
    %c0_i32 = arith.constant 0 : i32
    %c0_i32_0 = arith.constant 0 : i32
    %c0_i32_1 = arith.constant 0 : i32
    return %c0_i32, %c0_i32_0 : i32, i32
  }
  func.func @transform_3(%arg0: i32) -> (i32, i32, i32) {
    %c0_i32 = arith.constant 0 : i32
    %c0_i32_0 = arith.constant 0 : i32
    %c0_i32_1 = arith.constant 0 : i32
    return %arg0, %c0_i32, %c0_i32_0 : i32, i32, i32
  }
}

module attributes {stable_mosaic.version = 11 : i64} {
  func.func @_mm_bias_act_kernel(%arg0: i32, %arg1: memref<512x64xbf16, #tpu.memory_space<vmem>>, %arg2: memref<64x80xbf16, #tpu.memory_space<vmem>>, %arg3: memref<1x80xf32, #tpu.memory_space<vmem>>, %arg4: memref<512x80xbf16, #tpu.memory_space<vmem>>) attributes {dimension_semantics = [#tpu.dimension_semantics<parallel>], iteration_bounds = array<i64: 1>, scalar_prefetch = 0 : i64, scratch_operands = 0 : i64, tpu.core_type = #tpu.core_type<tc>, window_params = [{transform_indices = @transform_0, window_bounds = array<i64: 512, 64>}, {pipeline_mode = #tpu.pipeline_mode<synchronous>, transform_indices = @transform_1, window_bounds = array<i64: 64, 80>}, {pipeline_mode = #tpu.pipeline_mode<synchronous>, transform_indices = @transform_2, window_bounds = array<i64: 1, 80>}, {transform_indices = @transform_3, window_bounds = array<i64: 512, 80>}]} {
    %c0 = arith.constant 0 : index
    %c0_0 = arith.constant 0 : index
    %0 = vector.load %arg1[%c0, %c0_0] : memref<512x64xbf16, #tpu.memory_space<vmem>>, vector<512x64xbf16>
    %c0_1 = arith.constant 0 : index
    %c0_2 = arith.constant 0 : index
    %1 = vector.load %arg2[%c0_1, %c0_2] : memref<64x80xbf16, #tpu.memory_space<vmem>>, vector<64x80xbf16>
    %cst = arith.constant dense<0.000000e+00> : vector<512x80xf32>
    %2 = tpu.matmul %0, %1, %cst {dimension_numbers = #tpu.dot_dimension_numbers<[1], [0], [0], [1], [0, 0, 1, 1], [], []>} : vector<512x64xbf16>, vector<64x80xbf16>, vector<512x80xf32> -> vector<512x80xf32>
    %c0_3 = arith.constant 0 : index
    %c0_4 = arith.constant 0 : index
    %3 = vector.load %arg3[%c0_3, %c0_4] : memref<1x80xf32, #tpu.memory_space<vmem>>, vector<1x80xf32>
    %4 = vector.broadcast %3 : vector<1x80xf32> to vector<512x80xf32>
    %5 = arith.addf %2, %4 : vector<512x80xf32>
    %cst_5 = arith.constant 0.000000e+00 : f32
    %6 = vector.broadcast %cst_5 : f32 to vector<512x80xf32>
    %7 = arith.maximumf %5, %6 : vector<512x80xf32>
    %8 = arith.truncf %7 : vector<512x80xf32> to vector<512x80xbf16>
    %c0_6 = arith.constant 0 : index
    %c0_7 = arith.constant 0 : index
    %9 = vector.load %arg4[%c0_6, %c0_7] : memref<512x80xbf16, #tpu.memory_space<vmem>>, vector<512x80xbf16>
    tpu.vector_store %arg4[%c0_6, %c0_7], %8 {strides = array<i32>} : memref<512x80xbf16, #tpu.memory_space<vmem>>, vector<512x80xbf16>,
    return
  }
  func.func @transform_0(%arg0: i32) -> (i32, i32) {
    %c0_i32 = arith.constant 0 : i32
    %c0_i32_0 = arith.constant 0 : i32
    return %arg0, %c0_i32 : i32, i32
  }
  func.func @transform_1(%arg0: i32) -> (i32, i32) {
    %c0_i32 = arith.constant 0 : i32
    %c0_i32_0 = arith.constant 0 : i32
    %c0_i32_1 = arith.constant 0 : i32
    return %c0_i32, %c0_i32_0 : i32, i32
  }
  func.func @transform_2(%arg0: i32) -> (i32, i32) {
    %c0_i32 = arith.constant 0 : i32
    %c0_i32_0 = arith.constant 0 : i32
    %c0_i32_1 = arith.constant 0 : i32
    return %c0_i32, %c0_i32_0 : i32, i32
  }
  func.func @transform_3(%arg0: i32) -> (i32, i32) {
    %c0_i32 = arith.constant 0 : i32
    %c0_i32_0 = arith.constant 0 : i32
    return %arg0, %c0_i32 : i32, i32
  }
}

module attributes {stable_mosaic.version = 11 : i64} {
  func.func @_conv3x3_kernel(%arg0: i32, %arg1: memref<1x18x18x16xbf16, #tpu.memory_space<vmem>>, %arg2: memref<9x16x32xbf16, #tpu.memory_space<vmem>>, %arg3: memref<1x32xf32, #tpu.memory_space<vmem>>, %arg4: memref<1x256x32xbf16, #tpu.memory_space<vmem>>) attributes {dimension_semantics = [#tpu.dimension_semantics<parallel>], iteration_bounds = array<i64: 2>, scalar_prefetch = 0 : i64, scratch_operands = 0 : i64, tpu.core_type = #tpu.core_type<tc>, window_params = [{transform_indices = @transform_0, window_bounds = array<i64: 1, 18, 18, 16>}, {pipeline_mode = #tpu.pipeline_mode<synchronous>, transform_indices = @transform_1, window_bounds = array<i64: 9, 16, 32>}, {pipeline_mode = #tpu.pipeline_mode<synchronous>, transform_indices = @transform_2, window_bounds = array<i64: 1, 32>}, {transform_indices = @transform_3, window_bounds = array<i64: 1, 256, 32>}]} {
    %cst = arith.constant 0.000000e+00 : f32
    %0 = vector.broadcast %cst : f32 to vector<256x32xf32>
    %c0 = arith.constant 0 : index
    %c0_0 = arith.constant 0 : index
    %c0_1 = arith.constant 0 : index
    %c0_2 = arith.constant 0 : index
    %1 = vector.load %arg1[%c0, %c0_0, %c0_1, %c0_2] : memref<1x18x18x16xbf16, #tpu.memory_space<vmem>>, vector<1x16x16x16xbf16>
    %2 = vector.shape_cast %1 : vector<1x16x16x16xbf16> to vector<16x16x16xbf16>
    %3 = vector.shape_cast %2 : vector<16x16x16xbf16> to vector<256x16xbf16>
    %c0_3 = arith.constant 0 : index
    %c0_4 = arith.constant 0 : index
    %c0_5 = arith.constant 0 : index
    %4 = vector.load %arg2[%c0_3, %c0_4, %c0_5] : memref<9x16x32xbf16, #tpu.memory_space<vmem>>, vector<1x16x32xbf16>
    %5 = vector.shape_cast %4 : vector<1x16x32xbf16> to vector<16x32xbf16>
    %cst_6 = arith.constant dense<0.000000e+00> : vector<256x32xf32>
    %6 = tpu.matmul %3, %5, %cst_6 {dimension_numbers = #tpu.dot_dimension_numbers<[1], [0], [0], [1], [0, 0, 1, 1], [], []>} : vector<256x16xbf16>, vector<16x32xbf16>, vector<256x32xf32> -> vector<256x32xf32>
    %7 = arith.addf %0, %6 : vector<256x32xf32>
    %c0_7 = arith.constant 0 : index
    %c0_8 = arith.constant 0 : index
    %c1 = arith.constant 1 : index
    %c0_9 = arith.constant 0 : index
    %8 = vector.load %arg1[%c0_7, %c0_8, %c1, %c0_9] : memref<1x18x18x16xbf16, #tpu.memory_space<vmem>>, vector<1x16x16x16xbf16>
    %9 = vector.shape_cast %8 : vector<1x16x16x16xbf16> to vector<16x16x16xbf16>
    %10 = vector.shape_cast %9 : vector<16x16x16xbf16> to vector<256x16xbf16>
    %c1_10 = arith.constant 1 : index
    %c0_11 = arith.constant 0 : index
    %c0_12 = arith.constant 0 : index
    %11 = vector.load %arg2[%c1_10, %c0_11, %c0_12] : memref<9x16x32xbf16, #tpu.memory_space<vmem>>, vector<1x16x32xbf16>
    %12 = vector.shape_cast %11 : vector<1x16x32xbf16> to vector<16x32xbf16>
    %cst_13 = arith.constant dense<0.000000e+00> : vector<256x32xf32>
    %13 = tpu.matmul %10, %12, %cst_13 {dimension_numbers = #tpu.dot_dimension_numbers<[1], [0], [0], [1], [0, 0, 1, 1], [], []>} : vector<256x16xbf16>, vector<16x32xbf16>, vector<256x32xf32> -> vector<256x32xf32>
    %14 = arith.addf %7, %13 : vector<256x32xf32>
    %c0_14 = arith.constant 0 : index
    %c0_15 = arith.constant 0 : index
    %c2 = arith.constant 2 : index
    %c0_16 = arith.constant 0 : index
    %15 = vector.load %arg1[%c0_14, %c0_15, %c2, %c0_16] : memref<1x18x18x16xbf16, #tpu.memory_space<vmem>>, vector<1x16x16x16xbf16>
    %16 = vector.shape_cast %15 : vector<1x16x16x16xbf16> to vector<16x16x16xbf16>
    %17 = vector.shape_cast %16 : vector<16x16x16xbf16> to vector<256x16xbf16>
    %c2_17 = arith.constant 2 : index
    %c0_18 = arith.constant 0 : index
    %c0_19 = arith.constant 0 : index
    %18 = vector.load %arg2[%c2_17, %c0_18, %c0_19] : memref<9x16x32xbf16, #tpu.memory_space<vmem>>, vector<1x16x32xbf16>
    %19 = vector.shape_cast %18 : vector<1x16x32xbf16> to vector<16x32xbf16>
    %cst_20 = arith.constant dense<0.000000e+00> : vector<256x32xf32>
    %20 = tpu.matmul %17, %19, %cst_20 {dimension_numbers = #tpu.dot_dimension_numbers<[1], [0], [0], [1], [0, 0, 1, 1], [], []>} : vector<256x16xbf16>, vector<16x32xbf16>, vector<256x32xf32> -> vector<256x32xf32>
    %21 = arith.addf %14, %20 : vector<256x32xf32>
    %c0_21 = arith.constant 0 : index
    %c1_22 = arith.constant 1 : index
    %c0_23 = arith.constant 0 : index
    %c0_24 = arith.constant 0 : index
    %22 = vector.load %arg1[%c0_21, %c1_22, %c0_23, %c0_24] : memref<1x18x18x16xbf16, #tpu.memory_space<vmem>>, vector<1x16x16x16xbf16>
    %23 = vector.shape_cast %22 : vector<1x16x16x16xbf16> to vector<16x16x16xbf16>
    %24 = vector.shape_cast %23 : vector<16x16x16xbf16> to vector<256x16xbf16>
    %c3 = arith.constant 3 : index
    %c0_25 = arith.constant 0 : index
    %c0_26 = arith.constant 0 : index
    %25 = vector.load %arg2[%c3, %c0_25, %c0_26] : memref<9x16x32xbf16, #tpu.memory_space<vmem>>, vector<1x16x32xbf16>
    %26 = vector.shape_cast %25 : vector<1x16x32xbf16> to vector<16x32xbf16>
    %cst_27 = arith.constant dense<0.000000e+00> : vector<256x32xf32>
    %27 = tpu.matmul %24, %26, %cst_27 {dimension_numbers = #tpu.dot_dimension_numbers<[1], [0], [0], [1], [0, 0, 1, 1], [], []>} : vector<256x16xbf16>, vector<16x32xbf16>, vector<256x32xf32> -> vector<256x32xf32>
    %28 = arith.addf %21, %27 : vector<256x32xf32>
    %c0_28 = arith.constant 0 : index
    %c1_29 = arith.constant 1 : index
    %c1_30 = arith.constant 1 : index
    %c0_31 = arith.constant 0 : index
    %29 = vector.load %arg1[%c0_28, %c1_29, %c1_30, %c0_31] : memref<1x18x18x16xbf16, #tpu.memory_space<vmem>>, vector<1x16x16x16xbf16>
    %30 = vector.shape_cast %29 : vector<1x16x16x16xbf16> to vector<16x16x16xbf16>
    %31 = vector.shape_cast %30 : vector<16x16x16xbf16> to vector<256x16xbf16>
    %c4 = arith.constant 4 : index
    %c0_32 = arith.constant 0 : index
    %c0_33 = arith.constant 0 : index
    %32 = vector.load %arg2[%c4, %c0_32, %c0_33] : memref<9x16x32xbf16, #tpu.memory_space<vmem>>, vector<1x16x32xbf16>
    %33 = vector.shape_cast %32 : vector<1x16x32xbf16> to vector<16x32xbf16>
    %cst_34 = arith.constant dense<0.000000e+00> : vector<256x32xf32>
    %34 = tpu.matmul %31, %33, %cst_34 {dimension_numbers = #tpu.dot_dimension_numbers<[1], [0], [0], [1], [0, 0, 1, 1], [], []>} : vector<256x16xbf16>, vector<16x32xbf16>, vector<256x32xf32> -> vector<256x32xf32>
    %35 = arith.addf %28, %34 : vector<256x32xf32>
    %c0_35 = arith.constant 0 : index
    %c1_36 = arith.constant 1 : index
    %c2_37 = arith.constant 2 : index
    %c0_38 = arith.constant 0 : index
    %36 = vector.load %arg1[%c0_35, %c1_36, %c2_37, %c0_38] : memref<1x18x18x16xbf16, #tpu.memory_space<vmem>>, vector<1x16x16x16xbf16>
    %37 = vector.shape_cast %36 : vector<1x16x16x16xbf16> to vector<16x16x16xbf16>
    %38 = vector.shape_cast %37 : vector<16x16x16xbf16> to vector<256x16xbf16>
    %c5 = arith.constant 5 : index
    %c0_39 = arith.constant 0 : index
    %c0_40 = arith.constant 0 : index
    %39 = vector.load %arg2[%c5, %c0_39, %c0_40] : memref<9x16x32xbf16, #tpu.memory_space<vmem>>, vector<1x16x32xbf16>
    %40 = vector.shape_cast %39 : vector<1x16x32xbf16> to vector<16x32xbf16>
    %cst_41 = arith.constant dense<0.000000e+00> : vector<256x32xf32>
    %41 = tpu.matmul %38, %40, %cst_41 {dimension_numbers = #tpu.dot_dimension_numbers<[1], [0], [0], [1], [0, 0, 1, 1], [], []>} : vector<256x16xbf16>, vector<16x32xbf16>, vector<256x32xf32> -> vector<256x32xf32>
    %42 = arith.addf %35, %41 : vector<256x32xf32>
    %c0_42 = arith.constant 0 : index
    %c2_43 = arith.constant 2 : index
    %c0_44 = arith.constant 0 : index
    %c0_45 = arith.constant 0 : index
    %43 = vector.load %arg1[%c0_42, %c2_43, %c0_44, %c0_45] : memref<1x18x18x16xbf16, #tpu.memory_space<vmem>>, vector<1x16x16x16xbf16>
    %44 = vector.shape_cast %43 : vector<1x16x16x16xbf16> to vector<16x16x16xbf16>
    %45 = vector.shape_cast %44 : vector<16x16x16xbf16> to vector<256x16xbf16>
    %c6 = arith.constant 6 : index
    %c0_46 = arith.constant 0 : index
    %c0_47 = arith.constant 0 : index
    %46 = vector.load %arg2[%c6, %c0_46, %c0_47] : memref<9x16x32xbf16, #tpu.memory_space<vmem>>, vector<1x16x32xbf16>
    %47 = vector.shape_cast %46 : vector<1x16x32xbf16> to vector<16x32xbf16>
    %cst_48 = arith.constant dense<0.000000e+00> : vector<256x32xf32>
    %48 = tpu.matmul %45, %47, %cst_48 {dimension_numbers = #tpu.dot_dimension_numbers<[1], [0], [0], [1], [0, 0, 1, 1], [], []>} : vector<256x16xbf16>, vector<16x32xbf16>, vector<256x32xf32> -> vector<256x32xf32>
    %49 = arith.addf %42, %48 : vector<256x32xf32>
    %c0_49 = arith.constant 0 : index
    %c2_50 = arith.constant 2 : index
    %c1_51 = arith.constant 1 : index
    %c0_52 = arith.constant 0 : index
    %50 = vector.load %arg1[%c0_49, %c2_50, %c1_51, %c0_52] : memref<1x18x18x16xbf16, #tpu.memory_space<vmem>>, vector<1x16x16x16xbf16>
    %51 = vector.shape_cast %50 : vector<1x16x16x16xbf16> to vector<16x16x16xbf16>
    %52 = vector.shape_cast %51 : vector<16x16x16xbf16> to vector<256x16xbf16>
    %c7 = arith.constant 7 : index
    %c0_53 = arith.constant 0 : index
    %c0_54 = arith.constant 0 : index
    %53 = vector.load %arg2[%c7, %c0_53, %c0_54] : memref<9x16x32xbf16, #tpu.memory_space<vmem>>, vector<1x16x32xbf16>
    %54 = vector.shape_cast %53 : vector<1x16x32xbf16> to vector<16x32xbf16>
    %cst_55 = arith.constant dense<0.000000e+00> : vector<256x32xf32>
    %55 = tpu.matmul %52, %54, %cst_55 {dimension_numbers = #tpu.dot_dimension_numbers<[1], [0], [0], [1], [0, 0, 1, 1], [], []>} : vector<256x16xbf16>, vector<16x32xbf16>, vector<256x32xf32> -> vector<256x32xf32>
    %56 = arith.addf %49, %55 : vector<256x32xf32>
    %c0_56 = arith.constant 0 : index
    %c2_57 = arith.constant 2 : index
    %c2_58 = arith.constant 2 : index
    %c0_59 = arith.constant 0 : index
    %57 = vector.load %arg1[%c0_56, %c2_57, %c2_58, %c0_59] : memref<1x18x18x16xbf16, #tpu.memory_space<vmem>>, vector<1x16x16x16xbf16>
    %58 = vector.shape_cast %57 : vector<1x16x16x16xbf16> to vector<16x16x16xbf16>
    %59 = vector.shape_cast %58 : vector<16x16x16xbf16> to vector<256x16xbf16>
    %c8 = arith.constant 8 : index
    %c0_60 = arith.constant 0 : index
    %c0_61 = arith.constant 0 : index
    %60 = vector.load %arg2[%c8, %c0_60, %c0_61] : memref<9x16x32xbf16, #tpu.memory_space<vmem>>, vector<1x16x32xbf16>
    %61 = vector.shape_cast %60 : vector<1x16x32xbf16> to vector<16x32xbf16>
    %cst_62 = arith.constant dense<0.000000e+00> : vector<256x32xf32>
    %62 = tpu.matmul %59, %61, %cst_62 {dimension_numbers = #tpu.dot_dimension_numbers<[1], [0], [0], [1], [0, 0, 1, 1], [], []>} : vector<256x16xbf16>, vector<16x32xbf16>, vector<256x32xf32> -> vector<256x32xf32>
    %63 = arith.addf %56, %62 : vector<256x32xf32>
    %c0_63 = arith.constant 0 : index
    %c0_64 = arith.constant 0 : index
    %64 = vector.load %arg3[%c0_63, %c0_64] : memref<1x32xf32, #tpu.memory_space<vmem>>, vector<1x32xf32>
    %65 = vector.broadcast %64 : vector<1x32xf32> to vector<256x32xf32>
    %66 = arith.addf %63, %65 : vector<256x32xf32>
    %cst_65 = arith.constant 0.000000e+00 : f32
    %67 = vector.broadcast %cst_65 : f32 to vector<256x32xf32>
    %68 = arith.maximumf %66, %67 : vector<256x32xf32>
    %69 = arith.truncf %68 : vector<256x32xf32> to vector<256x32xbf16>
    %c0_66 = arith.constant 0 : index
    %c0_67 = arith.constant 0 : index
    %c0_68 = arith.constant 0 : index
    %70 = vector.load %arg4[%c0_66, %c0_67, %c0_68] : memref<1x256x32xbf16, #tpu.memory_space<vmem>>, vector<1x256x32xbf16>
    %71 = vector.shape_cast %70 : vector<1x256x32xbf16> to vector<256x32xbf16>
    %72 = vector.shape_cast %69 : vector<256x32xbf16> to vector<1x256x32xbf16>
    tpu.vector_store %arg4[%c0_66, %c0_67, %c0_68], %72 {strides = array<i32>} : memref<1x256x32xbf16, #tpu.memory_space<vmem>>, vector<1x256x32xbf16>,
    return
  }
  func.func @transform_0(%arg0: i32) -> (i32, i32, i32, i32) {
    %c0_i32 = arith.constant 0 : i32
    %c0_i32_0 = arith.constant 0 : i32
    %c0_i32_1 = arith.constant 0 : i32
    %c0_i32_2 = arith.constant 0 : i32
    return %arg0, %c0_i32, %c0_i32_0, %c0_i32_1 : i32, i32, i32, i32
  }
  func.func @transform_1(%arg0: i32) -> (i32, i32, i32) {
    %c0_i32 = arith.constant 0 : i32
    %c0_i32_0 = arith.constant 0 : i32
    %c0_i32_1 = arith.constant 0 : i32
    %c0_i32_2 = arith.constant 0 : i32
    return %c0_i32, %c0_i32_0, %c0_i32_1 : i32, i32, i32
  }
  func.func @transform_2(%arg0: i32) -> (i32, i32) {
    %c0_i32 = arith.constant 0 : i32
    %c0_i32_0 = arith.constant 0 : i32
    %c0_i32_1 = arith.constant 0 : i32
    return %c0_i32, %c0_i32_0 : i32, i32
  }
  func.func @transform_3(%arg0: i32) -> (i32, i32, i32) {
    %c0_i32 = arith.constant 0 : i32
    %c0_i32_0 = arith.constant 0 : i32
    %c0_i32_1 = arith.constant 0 : i32
    return %arg0, %c0_i32, %c0_i32_0 : i32, i32, i32
  }
}

module attributes {stable_mosaic.version = 11 : i64} {
  func.func @_conv3x3_kernel(%arg0: i32, %arg1: memref<1x18x18x32xbf16, #tpu.memory_space<vmem>>, %arg2: memref<9x32x64xbf16, #tpu.memory_space<vmem>>, %arg3: memref<1x64xf32, #tpu.memory_space<vmem>>, %arg4: memref<1x256x64xbf16, #tpu.memory_space<vmem>>) attributes {dimension_semantics = [#tpu.dimension_semantics<parallel>], iteration_bounds = array<i64: 2>, scalar_prefetch = 0 : i64, scratch_operands = 0 : i64, tpu.core_type = #tpu.core_type<tc>, window_params = [{transform_indices = @transform_0, window_bounds = array<i64: 1, 18, 18, 32>}, {pipeline_mode = #tpu.pipeline_mode<synchronous>, transform_indices = @transform_1, window_bounds = array<i64: 9, 32, 64>}, {pipeline_mode = #tpu.pipeline_mode<synchronous>, transform_indices = @transform_2, window_bounds = array<i64: 1, 64>}, {transform_indices = @transform_3, window_bounds = array<i64: 1, 256, 64>}]} {
    %cst = arith.constant 0.000000e+00 : f32
    %0 = vector.broadcast %cst : f32 to vector<256x64xf32>
    %c0 = arith.constant 0 : index
    %c0_0 = arith.constant 0 : index
    %c0_1 = arith.constant 0 : index
    %c0_2 = arith.constant 0 : index
    %1 = vector.load %arg1[%c0, %c0_0, %c0_1, %c0_2] : memref<1x18x18x32xbf16, #tpu.memory_space<vmem>>, vector<1x16x16x32xbf16>
    %2 = vector.shape_cast %1 : vector<1x16x16x32xbf16> to vector<16x16x32xbf16>
    %3 = vector.shape_cast %2 : vector<16x16x32xbf16> to vector<256x32xbf16>
    %c0_3 = arith.constant 0 : index
    %c0_4 = arith.constant 0 : index
    %c0_5 = arith.constant 0 : index
    %4 = vector.load %arg2[%c0_3, %c0_4, %c0_5] : memref<9x32x64xbf16, #tpu.memory_space<vmem>>, vector<1x32x64xbf16>
    %5 = vector.shape_cast %4 : vector<1x32x64xbf16> to vector<32x64xbf16>
    %cst_6 = arith.constant dense<0.000000e+00> : vector<256x64xf32>
    %6 = tpu.matmul %3, %5, %cst_6 {dimension_numbers = #tpu.dot_dimension_numbers<[1], [0], [0], [1], [0, 0, 1, 1], [], []>} : vector<256x32xbf16>, vector<32x64xbf16>, vector<256x64xf32> -> vector<256x64xf32>
    %7 = arith.addf %0, %6 : vector<256x64xf32>
    %c0_7 = arith.constant 0 : index
    %c0_8 = arith.constant 0 : index
    %c1 = arith.constant 1 : index
    %c0_9 = arith.constant 0 : index
    %8 = vector.load %arg1[%c0_7, %c0_8, %c1, %c0_9] : memref<1x18x18x32xbf16, #tpu.memory_space<vmem>>, vector<1x16x16x32xbf16>
    %9 = vector.shape_cast %8 : vector<1x16x16x32xbf16> to vector<16x16x32xbf16>
    %10 = vector.shape_cast %9 : vector<16x16x32xbf16> to vector<256x32xbf16>
    %c1_10 = arith.constant 1 : index
    %c0_11 = arith.constant 0 : index
    %c0_12 = arith.constant 0 : index
    %11 = vector.load %arg2[%c1_10, %c0_11, %c0_12] : memref<9x32x64xbf16, #tpu.memory_space<vmem>>, vector<1x32x64xbf16>
    %12 = vector.shape_cast %11 : vector<1x32x64xbf16> to vector<32x64xbf16>
    %cst_13 = arith.constant dense<0.000000e+00> : vector<256x64xf32>
    %13 = tpu.matmul %10, %12, %cst_13 {dimension_numbers = #tpu.dot_dimension_numbers<[1], [0], [0], [1], [0, 0, 1, 1], [], []>} : vector<256x32xbf16>, vector<32x64xbf16>, vector<256x64xf32> -> vector<256x64xf32>
    %14 = arith.addf %7, %13 : vector<256x64xf32>
    %c0_14 = arith.constant 0 : index
    %c0_15 = arith.constant 0 : index
    %c2 = arith.constant 2 : index
    %c0_16 = arith.constant 0 : index
    %15 = vector.load %arg1[%c0_14, %c0_15, %c2, %c0_16] : memref<1x18x18x32xbf16, #tpu.memory_space<vmem>>, vector<1x16x16x32xbf16>
    %16 = vector.shape_cast %15 : vector<1x16x16x32xbf16> to vector<16x16x32xbf16>
    %17 = vector.shape_cast %16 : vector<16x16x32xbf16> to vector<256x32xbf16>
    %c2_17 = arith.constant 2 : index
    %c0_18 = arith.constant 0 : index
    %c0_19 = arith.constant 0 : index
    %18 = vector.load %arg2[%c2_17, %c0_18, %c0_19] : memref<9x32x64xbf16, #tpu.memory_space<vmem>>, vector<1x32x64xbf16>
    %19 = vector.shape_cast %18 : vector<1x32x64xbf16> to vector<32x64xbf16>
    %cst_20 = arith.constant dense<0.000000e+00> : vector<256x64xf32>
    %20 = tpu.matmul %17, %19, %cst_20 {dimension_numbers = #tpu.dot_dimension_numbers<[1], [0], [0], [1], [0, 0, 1, 1], [], []>} : vector<256x32xbf16>, vector<32x64xbf16>, vector<256x64xf32> -> vector<256x64xf32>
    %21 = arith.addf %14, %20 : vector<256x64xf32>
    %c0_21 = arith.constant 0 : index
    %c1_22 = arith.constant 1 : index
    %c0_23 = arith.constant 0 : index
    %c0_24 = arith.constant 0 : index
    %22 = vector.load %arg1[%c0_21, %c1_22, %c0_23, %c0_24] : memref<1x18x18x32xbf16, #tpu.memory_space<vmem>>, vector<1x16x16x32xbf16>
    %23 = vector.shape_cast %22 : vector<1x16x16x32xbf16> to vector<16x16x32xbf16>
    %24 = vector.shape_cast %23 : vector<16x16x32xbf16> to vector<256x32xbf16>
    %c3 = arith.constant 3 : index
    %c0_25 = arith.constant 0 : index
    %c0_26 = arith.constant 0 : index
    %25 = vector.load %arg2[%c3, %c0_25, %c0_26] : memref<9x32x64xbf16, #tpu.memory_space<vmem>>, vector<1x32x64xbf16>
    %26 = vector.shape_cast %25 : vector<1x32x64xbf16> to vector<32x64xbf16>
    %cst_27 = arith.constant dense<0.000000e+00> : vector<256x64xf32>
    %27 = tpu.matmul %24, %26, %cst_27 {dimension_numbers = #tpu.dot_dimension_numbers<[1], [0], [0], [1], [0, 0, 1, 1], [], []>} : vector<256x32xbf16>, vector<32x64xbf16>, vector<256x64xf32> -> vector<256x64xf32>
    %28 = arith.addf %21, %27 : vector<256x64xf32>
    %c0_28 = arith.constant 0 : index
    %c1_29 = arith.constant 1 : index
    %c1_30 = arith.constant 1 : index
    %c0_31 = arith.constant 0 : index
    %29 = vector.load %arg1[%c0_28, %c1_29, %c1_30, %c0_31] : memref<1x18x18x32xbf16, #tpu.memory_space<vmem>>, vector<1x16x16x32xbf16>
    %30 = vector.shape_cast %29 : vector<1x16x16x32xbf16> to vector<16x16x32xbf16>
    %31 = vector.shape_cast %30 : vector<16x16x32xbf16> to vector<256x32xbf16>
    %c4 = arith.constant 4 : index
    %c0_32 = arith.constant 0 : index
    %c0_33 = arith.constant 0 : index
    %32 = vector.load %arg2[%c4, %c0_32, %c0_33] : memref<9x32x64xbf16, #tpu.memory_space<vmem>>, vector<1x32x64xbf16>
    %33 = vector.shape_cast %32 : vector<1x32x64xbf16> to vector<32x64xbf16>
    %cst_34 = arith.constant dense<0.000000e+00> : vector<256x64xf32>
    %34 = tpu.matmul %31, %33, %cst_34 {dimension_numbers = #tpu.dot_dimension_numbers<[1], [0], [0], [1], [0, 0, 1, 1], [], []>} : vector<256x32xbf16>, vector<32x64xbf16>, vector<256x64xf32> -> vector<256x64xf32>
    %35 = arith.addf %28, %34 : vector<256x64xf32>
    %c0_35 = arith.constant 0 : index
    %c1_36 = arith.constant 1 : index
    %c2_37 = arith.constant 2 : index
    %c0_38 = arith.constant 0 : index
    %36 = vector.load %arg1[%c0_35, %c1_36, %c2_37, %c0_38] : memref<1x18x18x32xbf16, #tpu.memory_space<vmem>>, vector<1x16x16x32xbf16>
    %37 = vector.shape_cast %36 : vector<1x16x16x32xbf16> to vector<16x16x32xbf16>
    %38 = vector.shape_cast %37 : vector<16x16x32xbf16> to vector<256x32xbf16>
    %c5 = arith.constant 5 : index
    %c0_39 = arith.constant 0 : index
    %c0_40 = arith.constant 0 : index
    %39 = vector.load %arg2[%c5, %c0_39, %c0_40] : memref<9x32x64xbf16, #tpu.memory_space<vmem>>, vector<1x32x64xbf16>
    %40 = vector.shape_cast %39 : vector<1x32x64xbf16> to vector<32x64xbf16>
    %cst_41 = arith.constant dense<0.000000e+00> : vector<256x64xf32>
    %41 = tpu.matmul %38, %40, %cst_41 {dimension_numbers = #tpu.dot_dimension_numbers<[1], [0], [0], [1], [0, 0, 1, 1], [], []>} : vector<256x32xbf16>, vector<32x64xbf16>, vector<256x64xf32> -> vector<256x64xf32>
    %42 = arith.addf %35, %41 : vector<256x64xf32>
    %c0_42 = arith.constant 0 : index
    %c2_43 = arith.constant 2 : index
    %c0_44 = arith.constant 0 : index
    %c0_45 = arith.constant 0 : index
    %43 = vector.load %arg1[%c0_42, %c2_43, %c0_44, %c0_45] : memref<1x18x18x32xbf16, #tpu.memory_space<vmem>>, vector<1x16x16x32xbf16>
    %44 = vector.shape_cast %43 : vector<1x16x16x32xbf16> to vector<16x16x32xbf16>
    %45 = vector.shape_cast %44 : vector<16x16x32xbf16> to vector<256x32xbf16>
    %c6 = arith.constant 6 : index
    %c0_46 = arith.constant 0 : index
    %c0_47 = arith.constant 0 : index
    %46 = vector.load %arg2[%c6, %c0_46, %c0_47] : memref<9x32x64xbf16, #tpu.memory_space<vmem>>, vector<1x32x64xbf16>
    %47 = vector.shape_cast %46 : vector<1x32x64xbf16> to vector<32x64xbf16>
    %cst_48 = arith.constant dense<0.000000e+00> : vector<256x64xf32>
    %48 = tpu.matmul %45, %47, %cst_48 {dimension_numbers = #tpu.dot_dimension_numbers<[1], [0], [0], [1], [0, 0, 1, 1], [], []>} : vector<256x32xbf16>, vector<32x64xbf16>, vector<256x64xf32> -> vector<256x64xf32>
    %49 = arith.addf %42, %48 : vector<256x64xf32>
    %c0_49 = arith.constant 0 : index
    %c2_50 = arith.constant 2 : index
    %c1_51 = arith.constant 1 : index
    %c0_52 = arith.constant 0 : index
    %50 = vector.load %arg1[%c0_49, %c2_50, %c1_51, %c0_52] : memref<1x18x18x32xbf16, #tpu.memory_space<vmem>>, vector<1x16x16x32xbf16>
    %51 = vector.shape_cast %50 : vector<1x16x16x32xbf16> to vector<16x16x32xbf16>
    %52 = vector.shape_cast %51 : vector<16x16x32xbf16> to vector<256x32xbf16>
    %c7 = arith.constant 7 : index
    %c0_53 = arith.constant 0 : index
    %c0_54 = arith.constant 0 : index
    %53 = vector.load %arg2[%c7, %c0_53, %c0_54] : memref<9x32x64xbf16, #tpu.memory_space<vmem>>, vector<1x32x64xbf16>
    %54 = vector.shape_cast %53 : vector<1x32x64xbf16> to vector<32x64xbf16>
    %cst_55 = arith.constant dense<0.000000e+00> : vector<256x64xf32>
    %55 = tpu.matmul %52, %54, %cst_55 {dimension_numbers = #tpu.dot_dimension_numbers<[1], [0], [0], [1], [0, 0, 1, 1], [], []>} : vector<256x32xbf16>, vector<32x64xbf16>, vector<256x64xf32> -> vector<256x64xf32>
    %56 = arith.addf %49, %55 : vector<256x64xf32>
    %c0_56 = arith.constant 0 : index
    %c2_57 = arith.constant 2 : index
    %c2_58 = arith.constant 2 : index
    %c0_59 = arith.constant 0 : index
    %57 = vector.load %arg1[%c0_56, %c2_57, %c2_58, %c0_59] : memref<1x18x18x32xbf16, #tpu.memory_space<vmem>>, vector<1x16x16x32xbf16>
    %58 = vector.shape_cast %57 : vector<1x16x16x32xbf16> to vector<16x16x32xbf16>
    %59 = vector.shape_cast %58 : vector<16x16x32xbf16> to vector<256x32xbf16>
    %c8 = arith.constant 8 : index
    %c0_60 = arith.constant 0 : index
    %c0_61 = arith.constant 0 : index
    %60 = vector.load %arg2[%c8, %c0_60, %c0_61] : memref<9x32x64xbf16, #tpu.memory_space<vmem>>, vector<1x32x64xbf16>
    %61 = vector.shape_cast %60 : vector<1x32x64xbf16> to vector<32x64xbf16>
    %cst_62 = arith.constant dense<0.000000e+00> : vector<256x64xf32>
    %62 = tpu.matmul %59, %61, %cst_62 {dimension_numbers = #tpu.dot_dimension_numbers<[1], [0], [0], [1], [0, 0, 1, 1], [], []>} : vector<256x32xbf16>, vector<32x64xbf16>, vector<256x64xf32> -> vector<256x64xf32>
    %63 = arith.addf %56, %62 : vector<256x64xf32>
    %c0_63 = arith.constant 0 : index
    %c0_64 = arith.constant 0 : index
    %64 = vector.load %arg3[%c0_63, %c0_64] : memref<1x64xf32, #tpu.memory_space<vmem>>, vector<1x64xf32>
    %65 = vector.broadcast %64 : vector<1x64xf32> to vector<256x64xf32>
    %66 = arith.addf %63, %65 : vector<256x64xf32>
    %cst_65 = arith.constant 0.000000e+00 : f32
    %67 = vector.broadcast %cst_65 : f32 to vector<256x64xf32>
    %68 = arith.maximumf %66, %67 : vector<256x64xf32>
    %69 = arith.truncf %68 : vector<256x64xf32> to vector<256x64xbf16>
    %c0_66 = arith.constant 0 : index
    %c0_67 = arith.constant 0 : index
    %c0_68 = arith.constant 0 : index
    %70 = vector.load %arg4[%c0_66, %c0_67, %c0_68] : memref<1x256x64xbf16, #tpu.memory_space<vmem>>, vector<1x256x64xbf16>
    %71 = vector.shape_cast %70 : vector<1x256x64xbf16> to vector<256x64xbf16>
    %72 = vector.shape_cast %69 : vector<256x64xbf16> to vector<1x256x64xbf16>
    tpu.vector_store %arg4[%c0_66, %c0_67, %c0_68], %72 {strides = array<i32>} : memref<1x256x64xbf16, #tpu.memory_space<vmem>>, vector<1x256x64xbf16>,
    return
  }
  func.func @transform_0(%arg0: i32) -> (i32, i32, i32, i32) {
    %c0_i32 = arith.constant 0 : i32
    %c0_i32_0 = arith.constant 0 : i32
    %c0_i32_1 = arith.constant 0 : i32
    %c0_i32_2 = arith.constant 0 : i32
    return %arg0, %c0_i32, %c0_i32_0, %c0_i32_1 : i32, i32, i32, i32
  }
  func.func @transform_1(%arg0: i32) -> (i32, i32, i32) {
    %c0_i32 = arith.constant 0 : i32
    %c0_i32_0 = arith.constant 0 : i32
    %c0_i32_1 = arith.constant 0 : i32
    %c0_i32_2 = arith.constant 0 : i32
    return %c0_i32, %c0_i32_0, %c0_i32_1 : i32, i32, i32
  }
  func.func @transform_2(%arg0: i32) -> (i32, i32) {
    %c0_i32 = arith.constant 0 : i32
    %c0_i32_0 = arith.constant 0 : i32
    %c0_i32_1 = arith.constant 0 : i32
    return %c0_i32, %c0_i32_0 : i32, i32
  }
  func.func @transform_3(%arg0: i32) -> (i32, i32, i32) {
    %c0_i32 = arith.constant 0 : i32
    %c0_i32_0 = arith.constant 0 : i32
    %c0_i32_1 = arith.constant 0 : i32
    return %arg0, %c0_i32, %c0_i32_0 : i32, i32, i32
  }
}

</mosaic_0001>

<bundles_post_ra>
// kernel: inception_forward.4
= control target key start
LH: loop header
LB: loop body
LE: loop exit
PB: predicated region body
PF: predicated region fallthrough
CT: control target
= control target key end

     0   :  { %vm278_vm0 = vcmask 523264   ;;  %vm984_vm1 = vcmask 650240   ;;  %s1887_s1 = inlined_call_operand.vmem [shape: bf16[64,80], index: 1, kind: input, shape index: {}]   ;;  %s1888_s0 = inlined_call_operand.vmem [shape: bf16[512,64], index: 0, kind: input, shape index: {}]   ;;  %s1889_s2 = inlined_call_operand.vmem [shape: f32[1,80], index: 2, kind: input, shape index: {}]   ;;  %s1890_s3 = inlined_call_operand.vmem [shape: bf16[512,80], index: 3, kind: output, shape index: {}]  }
   0x1   :  { %v1366_v0 = vld [vmem:[%s1887_s1] sm:$0xff]   ;;  %v1367_v1 = vld [vmem:[%s1887_s1 + $0x8] sm:$0xff]   ;;  %v1368_v2 = vld [vmem:[%s1887_s1 + $0x10] sm:$0xff]  }
   0x2   :  { %1286 = vmatprep.subr.bf16.mxu0 %v1366_v0  ;;  %1358 = vmatprep.subr.bf16.mxu1 %v1366_v0  ;;  %v1370_v3 = vld [vmem:[%s1888_s0] sm:$0xff]   ;;  %v1369_v5 = vld [vmem:[%s1887_s1 + $0x18] sm:$0xff]   ;;  %v1372_v6 = vld [vmem:[%s1888_s0 + $0x8] sm:$0xff]  }
   0x3   :  { %1287 = vmatpush3.bf16.msra.mxu0 %v1366_v0  ;;  %1362 = vmatpush3.bf16.msra.mxu1 %v1366_v0  ;;  %v1371_v4 = vld [vmem:[%s1888_s0 + $0x80] sm:$0xff]   ;;  %v1373_v7 = vld [vmem:[%s1888_s0 + $0x88] sm:$0xff]   ;;  %v1374_v8 = vld [vmem:[%s1888_s0 + $0x10] sm:$0xff]  }
   0x4   :  { %1288 = vmatprep.subr.bf16.mxu0 %v1367_v1  ;;  %1359 = vmatprep.subr.bf16.mxu1 %v1367_v1  ;;  %v1375_v9 = vld [vmem:[%s1888_s0 + $0x90] sm:$0xff]   ;;  %v1376_v10 = vld [vmem:[%s1888_s0 + $0x18] sm:$0xff]   ;;  %v1378_v12 = vld [vmem:[%s1888_s0 + $0x20] sm:$0xff]  }
   0x5   :  { %1294 = vmatprep.mubr.msk.bf16.mxu0 %vm278_vm0, %v1370_v3  ;;  %1326 = vmatprep.mubr.msk.bf16.mxu1 %vm278_vm0, %v1371_v4  ;;  %v1377_v11 = vld [vmem:[%s1888_s0 + $0x98] sm:$0xff]   ;;  %v1379_v13 = vld [vmem:[%s1888_s0 + $0xa0] sm:$0xff]   ;;  %v1380_v14 = vld [vmem:[%s1888_s0 + $0x28] sm:$0xff]  }
   0x6   :  { %v1381_v15 = vld [vmem:[%s1888_s0 + $0xa8] sm:$0xff]   ;;  %v1382_v16 = vld [vmem:[%s1888_s0 + $0x30] sm:$0xff]   ;;  %v1384_v18 = vld [vmem:[%s1888_s0 + $0x38] sm:$0xff]  }
   0x7   :  { %1289 = vmatpush3.bf16.msra.mxu0 %v1367_v1  ;;  %1363 = vmatpush3.bf16.msra.mxu1 %v1367_v1  ;;  %v1383_v17 = vld [vmem:[%s1888_s0 + $0xb0] sm:$0xff]   ;;  %v1385_v19 = vld [vmem:[%s1888_s0 + $0xb8] sm:$0xff]   ;;  %v1386_v20 = vld [vmem:[%s1888_s0 + $0x40] sm:$0xff]  }
   0x8   :  { %1290 = vmatprep.subr.bf16.mxu0 %v1368_v2  ;;  %1360 = vmatprep.subr.bf16.mxu1 %v1368_v2  ;;  %v1387_v21 = vld [vmem:[%s1888_s0 + $0xc0] sm:$0xff]   ;;  %v1388_v22 = vld [vmem:[%s1888_s0 + $0x48] sm:$0xff]   ;;  %v1390_v24 = vld [vmem:[%s1888_s0 + $0x50] sm:$0xff]  }
   0x9   :  { %v1389_v23 = vld [vmem:[%s1888_s0 + $0xc8] sm:$0xff]   ;;  %v1391_v25 = vld [vmem:[%s1888_s0 + $0xd0] sm:$0xff]   ;;  %v1392_v26 = vld [vmem:[%s1888_s0 + $0x58] sm:$0xff]  }
   0xa   :  { %v1393_v27 = vld [vmem:[%s1888_s0 + $0xd8] sm:$0xff]   ;;  %v1394_v28 = vld [vmem:[%s1888_s0 + $0x60] sm:$0xff]   ;;  %v1396_v30 = vld [vmem:[%s1888_s0 + $0x68] sm:$0xff]  }
   0xb   :  { %1291 = vmatpush3.bf16.msra.mxu0 %v1368_v2  ;;  %1364 = vmatpush3.bf16.msra.mxu1 %v1368_v2  ;;  %v1395_v29 = vld [vmem:[%s1888_s0 + $0xe0] sm:$0xff]   ;;  %v1397_v31 = vld [vmem:[%s1888_s0 + $0xe8] sm:$0xff]   ;;  %v1398_v32 = vld [vmem:[%s1888_s0 + $0x70] sm:$0xff]  }
   0xc   :  { %1292 = vmatprep.subr.bf16.mxu0 %v1369_v5  ;;  %1361 = vmatprep.subr.bf16.mxu1 %v1369_v5  ;;  %v1399_v33 = vld [vmem:[%s1888_s0 + $0xf0] sm:$0xff]   ;;  %v1400_v34 = vld [vmem:[%s1888_s0 + $0x78] sm:$0xff]   ;;  %v1565_v36 = vld [vmem:[%s1889_s2] ss:$0 sm:$0xff] }
   0xd   :  { %v1401_v35 = vld [vmem:[%s1888_s0 + $0xf8] sm:$0xff]  }
   0xf   :  { %1293 = vmatpush3.bf16.msra.mxu0 %v1369_v5  ;;  %1365 = vmatpush3.bf16.msra.mxu1 %v1369_v5 }
  0x12   :  { %1295 = vmatmul.mubr.msk.bf16.vlgmr.msra.gmra.mrb[0].mxu0 %vm278_vm0, %v1372_v6  ;;  %1327 = vmatmul.mubr.msk.bf16.vlgmr.msra.gmra.mrb[0].mxu1 %vm278_vm0, %v1373_v7 }
  0x13   :  { %1298 = vmatprep.mubr.msk.bf16.mxu0 %vm278_vm0, %v1374_v8  ;;  %1330 = vmatprep.mubr.msk.bf16.mxu1 %vm278_vm0, %v1375_v9 }
  0x1a   :  { %1299 = vmatmul.mubr.msk.bf16.gmra.mrb[4].mxu0 %vm278_vm0, %v1376_v10  ;;  %1331 = vmatmul.mubr.msk.bf16.gmra.mrb[4].mxu1 %vm278_vm0, %v1377_v11 }
  0x1b   :  { %1302 = vmatprep.mubr.msk.bf16.mxu0 %vm278_vm0, %v1378_v12  ;;  %1334 = vmatprep.mubr.msk.bf16.mxu1 %vm278_vm0, %v1379_v13 }
  0x22   :  { %1303 = vmatmul.mubr.msk.bf16.gmra.mrb[8].mxu0 %vm278_vm0, %v1380_v14  ;;  %1335 = vmatmul.mubr.msk.bf16.gmra.mrb[8].mxu1 %vm278_vm0, %v1381_v15 }
  0x23   :  { %1306 = vmatprep.mubr.msk.bf16.mxu0 %vm278_vm0, %v1382_v16  ;;  %1338 = vmatprep.mubr.msk.bf16.mxu1 %vm278_vm0, %v1383_v17 }
  0x2a   :  { %1307 = vmatmul.mubr.msk.bf16.gmra.mrb[12].mxu0 %vm278_vm0, %v1384_v18  ;;  %1339 = vmatmul.mubr.msk.bf16.gmra.mrb[12].mxu1 %vm278_vm0, %v1385_v19 }
  0x2b   :  { %1310 = vmatprep.mubr.msk.bf16.mxu0 %vm278_vm0, %v1386_v20  ;;  %1342 = vmatprep.mubr.msk.bf16.mxu1 %vm278_vm0, %v1387_v21 }
  0x32   :  { %1311 = vmatmul.mubr.msk.bf16.gmra.mrb[16].mxu0 %vm278_vm0, %v1388_v22  ;;  %1343 = vmatmul.mubr.msk.bf16.gmra.mrb[16].mxu1 %vm278_vm0, %v1389_v23 }
  0x33   :  { %1314 = vmatprep.mubr.msk.bf16.mxu0 %vm278_vm0, %v1390_v24  ;;  %1346 = vmatprep.mubr.msk.bf16.mxu1 %vm278_vm0, %v1391_v25 }
  0x3a   :  { %1315 = vmatmul.mubr.msk.bf16.gmra.mrb[20].mxu0 %vm278_vm0, %v1392_v26  ;;  %1347 = vmatmul.mubr.msk.bf16.gmra.mrb[20].mxu1 %vm278_vm0, %v1393_v27 }
  0x3b   :  { %1318 = vmatprep.mubr.msk.bf16.mxu0 %vm278_vm0, %v1394_v28  ;;  %1350 = vmatprep.mubr.msk.bf16.mxu1 %vm278_vm0, %v1395_v29 }
  0x42   :  { %1319 = vmatmul.mubr.msk.bf16.gmra.mrb[24].mxu0 %vm278_vm0, %v1396_v30  ;;  %1351 = vmatmul.mubr.msk.bf16.gmra.mrb[24].mxu1 %vm278_vm0, %v1397_v31 }
  0x43   :  { %1322 = vmatprep.mubr.msk.bf16.mxu0 %vm278_vm0, %v1398_v32  ;;  %1354 = vmatprep.mubr.msk.bf16.mxu1 %vm278_vm0, %v1399_v33 }
  0x4a   :  { %1323 = vmatmul.mubr.msk.bf16.gmra.mrb[28].mxu0 %vm278_vm0, %v1400_v34  ;;  %1355 = vmatmul.mubr.msk.bf16.gmra.mrb[28].mxu1 %vm278_vm0, %v1401_v35 }
  0xe5   :  { %v1296_v37 = vpop.f32.mrb[0].mxu0  ;;  %v1328_v38 = vpop.f32.mrb[0].mxu1 }
  0xe6   :  { %v418_v39 = vadd.f32 %v1296_v37, %v1565_v36  ;;  %v546_v40 = vadd.f32 %v1328_v38, %v1565_v36  ;;  %v409_v41 = vpop.f32.mrb[1].mxu0  ;;  %v537_v42 = vpop.f32.mrb[1].mxu1 }
  0xe7   :  { %v410_v43 = vadd.f32 %v1565_v36, %v409_v41  ;;  %v538_v44 = vadd.f32 %v1565_v36, %v537_v42  ;;  %v1297_v45 = vpop.f32.mrb[2].mxu0  ;;  %v1329_v46 = vpop.f32.mrb[2].mxu1 }
  0xe8   :  { %v666_v47 = vmax.f32 %v418_v39, 0.0  ;;  %v698_v48 = vmax.f32 %v546_v40, 0.0  ;;  %v421_v49 = vadd.f32 %v1297_v45, %v1565_v36  ;;  %v549_v50 = vadd.f32 %v1329_v46, %v1565_v36  ;;  %v412_v51 = vpop.f32.mrb[3].mxu0  ;;  %v540_v52 = vpop.f32.mrb[3].mxu1 }
  0xe9   :  { %v664_v53 = vmax.f32 %v410_v43, 0.0  ;;  %v696_v54 = vmax.f32 %v538_v44, 0.0  ;;  %v413_v55 = vadd.f32 %v1565_v36, %v412_v51  ;;  %v541_v56 = vadd.f32 %v1565_v36, %v540_v52 }
  0xea   :  { %v1188_v57 = vpack.c.bf16 %v666_v47, %v666_v47  ;;  %v1220_v58 = vpack.c.bf16 %v698_v48, %v698_v48  ;;  %v667_v59 = vmax.f32 %v421_v49, 0.0  ;;  %v699_v60 = vmax.f32 %v549_v50, 0.0 }
  0xeb   :  { %v1186_v61 = vpack.c.bf16 %v664_v53, %v664_v53  ;;  %v1218_v62 = vpack.c.bf16 %v696_v54, %v696_v54  ;;  %v665_v63 = vmax.f32 %v413_v55, 0.0  ;;  %v697_v0 = vmax.f32 %v541_v56, 0.0 }
  0xec   :  { %987 = vst.msk [vmem:[%s1890_s3 + $0x8] sm:$0xf] %vm984_vm1, %v1188_v57  ;;  %1019 = vst.msk [vmem:[%s1890_s3 + $0x88] sm:$0xf] %vm984_vm1, %v1220_v58  ;;  %v1189_v1 = vpack.c.bf16 %v667_v59, %v667_v59  ;;  %v1221_v2 = vpack.c.bf16 %v699_v60, %v699_v60 }
  0xed   :  { %985 = vst.msk [vmem:[%s1890_s3] sm:$0xf] %vm984_vm1, %v1186_v61  ;;  %1017 = vst.msk [vmem:[%s1890_s3 + $0x80] sm:$0xf] %vm984_vm1, %v1218_v62  ;;  %v1187_v3 = vpack.c.bf16 %v665_v63, %v665_v63  ;;  %v1219_v4 = vpack.c.bf16 %v697_v0, %v697_v0  ;;  %v1300_v5 = vpop.f32.mrb[4].mxu0  ;;  %v1332_v6 = vpop.f32.mrb[4].mxu1 }
  0xee   :  { %988 = vst.msk [vmem:[%s1890_s3 + $0xc] sm:$0xf] %vm984_vm1, %v1189_v1  ;;  %1020 = vst.msk [vmem:[%s1890_s3 + $0x8c] sm:$0xf] %vm984_vm1, %v1221_v2  ;;  %v434_v7 = vadd.f32 %v1300_v5, %v1565_v36  ;;  %v562_v8 = vadd.f32 %v1332_v6, %v1565_v36  ;;  %v425_v9 = vpop.f32.mrb[5].mxu0  ;;  %v553_v10 = vpop.f32.mrb[5].mxu1 }
  0xef   :  { %986 = vst.msk [vmem:[%s1890_s3 + $0x4] sm:$0xf] %vm984_vm1, %v1187_v3  ;;  %1018 = vst.msk [vmem:[%s1890_s3 + $0x84] sm:$0xf] %vm984_vm1, %v1219_v4  ;;  %v426_v11 = vadd.f32 %v1565_v36, %v425_v9  ;;  %v554_v12 = vadd.f32 %v1565_v36, %v553_v10  ;;  %v1301_v13 = vpop.f32.mrb[6].mxu0  ;;  %v1333_v14 = vpop.f32.mrb[6].mxu1 }
  0xf0   :  { %v670_v15 = vmax.f32 %v434_v7, 0.0  ;;  %v702_v16 = vmax.f32 %v562_v8, 0.0  ;;  %v437_v17 = vadd.f32 %v1301_v13, %v1565_v36  ;;  %v565_v18 = vadd.f32 %v1333_v14, %v1565_v36  ;;  %v428_v19 = vpop.f32.mrb[7].mxu0  ;;  %v556_v20 = vpop.f32.mrb[7].mxu1 }
  0xf1   :  { %v668_v21 = vmax.f32 %v426_v11, 0.0  ;;  %v700_v22 = vmax.f32 %v554_v12, 0.0  ;;  %v429_v23 = vadd.f32 %v1565_v36, %v428_v19  ;;  %v557_v24 = vadd.f32 %v1565_v36, %v556_v20 }
  0xf2   :  { %v1192_v25 = vpack.c.bf16 %v670_v15, %v670_v15  ;;  %v1224_v26 = vpack.c.bf16 %v702_v16, %v702_v16  ;;  %v671_v27 = vmax.f32 %v437_v17, 0.0  ;;  %v703_v28 = vmax.f32 %v565_v18, 0.0 }
  0xf3   :  { %v1190_v29 = vpack.c.bf16 %v668_v21, %v668_v21  ;;  %v1222_v30 = vpack.c.bf16 %v700_v22, %v700_v22  ;;  %v669_v31 = vmax.f32 %v429_v23, 0.0  ;;  %v701_v32 = vmax.f32 %v557_v24, 0.0 }
  0xf4   :  { %991 = vst.msk [vmem:[%s1890_s3 + $0x18] sm:$0xf] %vm984_vm1, %v1192_v25  ;;  %1023 = vst.msk [vmem:[%s1890_s3 + $0x98] sm:$0xf] %vm984_vm1, %v1224_v26  ;;  %v1193_v33 = vpack.c.bf16 %v671_v27, %v671_v27  ;;  %v1225_v34 = vpack.c.bf16 %v703_v28, %v703_v28 }
  0xf5   :  { %989 = vst.msk [vmem:[%s1890_s3 + $0x10] sm:$0xf] %vm984_vm1, %v1190_v29  ;;  %1021 = vst.msk [vmem:[%s1890_s3 + $0x90] sm:$0xf] %vm984_vm1, %v1222_v30  ;;  %v1191_v35 = vpack.c.bf16 %v669_v31, %v669_v31  ;;  %v1223_v37 = vpack.c.bf16 %v701_v32, %v701_v32  ;;  %v1304_v38 = vpop.f32.mrb[8].mxu0  ;;  %v1336_v39 = vpop.f32.mrb[8].mxu1 }
  0xf6   :  { %992 = vst.msk [vmem:[%s1890_s3 + $0x1c] sm:$0xf] %vm984_vm1, %v1193_v33  ;;  %1024 = vst.msk [vmem:[%s1890_s3 + $0x9c] sm:$0xf] %vm984_vm1, %v1225_v34  ;;  %v450_v40 = vadd.f32 %v1304_v38, %v1565_v36  ;;  %v578_v41 = vadd.f32 %v1336_v39, %v1565_v36  ;;  %v441_v42 = vpop.f32.mrb[9].mxu0  ;;  %v569_v43 = vpop.f32.mrb[9].mxu1 }
  0xf7   :  { %990 = vst.msk [vmem:[%s1890_s3 + $0x14] sm:$0xf] %vm984_vm1, %v1191_v35  ;;  %1022 = vst.msk [vmem:[%s1890_s3 + $0x94] sm:$0xf] %vm984_vm1, %v1223_v37  ;;  %v442_v44 = vadd.f32 %v1565_v36, %v441_v42  ;;  %v570_v45 = vadd.f32 %v1565_v36, %v569_v43  ;;  %v1305_v46 = vpop.f32.mrb[10].mxu0  ;;  %v1337_v47 = vpop.f32.mrb[10].mxu1 }
  0xf8   :  { %v674_v48 = vmax.f32 %v450_v40, 0.0  ;;  %v706_v49 = vmax.f32 %v578_v41, 0.0  ;;  %v453_v50 = vadd.f32 %v1305_v46, %v1565_v36  ;;  %v581_v51 = vadd.f32 %v1337_v47, %v1565_v36  ;;  %v444_v52 = vpop.f32.mrb[11].mxu0  ;;  %v572_v53 = vpop.f32.mrb[11].mxu1 }
  0xf9   :  { %v672_v54 = vmax.f32 %v442_v44, 0.0  ;;  %v704_v55 = vmax.f32 %v570_v45, 0.0  ;;  %v445_v56 = vadd.f32 %v1565_v36, %v444_v52  ;;  %v573_v57 = vadd.f32 %v1565_v36, %v572_v53 }
  0xfa   :  { %v1196_v58 = vpack.c.bf16 %v674_v48, %v674_v48  ;;  %v1228_v59 = vpack.c.bf16 %v706_v49, %v706_v49  ;;  %v675_v60 = vmax.f32 %v453_v50, 0.0  ;;  %v707_v61 = vmax.f32 %v581_v51, 0.0 }
  0xfb   :  { %v1194_v62 = vpack.c.bf16 %v672_v54, %v672_v54  ;;  %v1226_v63 = vpack.c.bf16 %v704_v55, %v704_v55  ;;  %v673_v0 = vmax.f32 %v445_v56, 0.0  ;;  %v705_v1 = vmax.f32 %v573_v57, 0.0 }
  0xfc   :  { %995 = vst.msk [vmem:[%s1890_s3 + $0x28] sm:$0xf] %vm984_vm1, %v1196_v58  ;;  %1027 = vst.msk [vmem:[%s1890_s3 + $0xa8] sm:$0xf] %vm984_vm1, %v1228_v59  ;;  %v1197_v2 = vpack.c.bf16 %v675_v60, %v675_v60  ;;  %v1229_v3 = vpack.c.bf16 %v707_v61, %v707_v61 }
  0xfd   :  { %993 = vst.msk [vmem:[%s1890_s3 + $0x20] sm:$0xf] %vm984_vm1, %v1194_v62  ;;  %1025 = vst.msk [vmem:[%s1890_s3 + $0xa0] sm:$0xf] %vm984_vm1, %v1226_v63  ;;  %v1195_v4 = vpack.c.bf16 %v673_v0, %v673_v0  ;;  %v1227_v5 = vpack.c.bf16 %v705_v1, %v705_v1  ;;  %v1308_v6 = vpop.f32.mrb[12].mxu0  ;;  %v1340_v7 = vpop.f32.mrb[12].mxu1 }
  0xfe   :  { %996 = vst.msk [vmem:[%s1890_s3 + $0x2c] sm:$0xf] %vm984_vm1, %v1197_v2  ;;  %1028 = vst.msk [vmem:[%s1890_s3 + $0xac] sm:$0xf] %vm984_vm1, %v1229_v3  ;;  %v466_v8 = vadd.f32 %v1308_v6, %v1565_v36  ;;  %v594_v9 = vadd.f32 %v1340_v7, %v1565_v36  ;;  %v457_v10 = vpop.f32.mrb[13].mxu0  ;;  %v585_v11 = vpop.f32.mrb[13].mxu1 }
  0xff   :  { %994 = vst.msk [vmem:[%s1890_s3 + $0x24] sm:$0xf] %vm984_vm1, %v1195_v4  ;;  %1026 = vst.msk [vmem:[%s1890_s3 + $0xa4] sm:$0xf] %vm984_vm1, %v1227_v5  ;;  %v458_v12 = vadd.f32 %v1565_v36, %v457_v10  ;;  %v586_v13 = vadd.f32 %v1565_v36, %v585_v11  ;;  %v1309_v14 = vpop.f32.mrb[14].mxu0  ;;  %v1341_v15 = vpop.f32.mrb[14].mxu1 }
 0x100   :  { %v678_v16 = vmax.f32 %v466_v8, 0.0  ;;  %v710_v17 = vmax.f32 %v594_v9, 0.0  ;;  %v469_v18 = vadd.f32 %v1309_v14, %v1565_v36  ;;  %v597_v19 = vadd.f32 %v1341_v15, %v1565_v36  ;;  %v460_v20 = vpop.f32.mrb[15].mxu0  ;;  %v588_v21 = vpop.f32.mrb[15].mxu1 }
 0x101   :  { %v676_v22 = vmax.f32 %v458_v12, 0.0  ;;  %v708_v23 = vmax.f32 %v586_v13, 0.0  ;;  %v461_v24 = vadd.f32 %v1565_v36, %v460_v20  ;;  %v589_v25 = vadd.f32 %v1565_v36, %v588_v21 }
 0x102   :  { %v1200_v26 = vpack.c.bf16 %v678_v16, %v678_v16  ;;  %v1232_v27 = vpack.c.bf16 %v710_v17, %v710_v17  ;;  %v679_v28 = vmax.f32 %v469_v18, 0.0  ;;  %v711_v29 = vmax.f32 %v597_v19, 0.0 }
 0x103   :  { %v1198_v30 = vpack.c.bf16 %v676_v22, %v676_v22  ;;  %v1230_v31 = vpack.c.bf16 %v708_v23, %v708_v23  ;;  %v677_v32 = vmax.f32 %v461_v24, 0.0  ;;  %v709_v33 = vmax.f32 %v589_v25, 0.0 }
 0x104   :  { %999 = vst.msk [vmem:[%s1890_s3 + $0x38] sm:$0xf] %vm984_vm1, %v1200_v26  ;;  %1031 = vst.msk [vmem:[%s1890_s3 + $0xb8] sm:$0xf] %vm984_vm1, %v1232_v27  ;;  %v1201_v34 = vpack.c.bf16 %v679_v28, %v679_v28  ;;  %v1233_v35 = vpack.c.bf16 %v711_v29, %v711_v29 }
 0x105   :  { %997 = vst.msk [vmem:[%s1890_s3 + $0x30] sm:$0xf] %vm984_vm1, %v1198_v30  ;;  %1029 = vst.msk [vmem:[%s1890_s3 + $0xb0] sm:$0xf] %vm984_vm1, %v1230_v31  ;;  %v1199_v37 = vpack.c.bf16 %v677_v32, %v677_v32  ;;  %v1231_v38 = vpack.c.bf16 %v709_v33, %v709_v33  ;;  %v1312_v39 = vpop.f32.mrb[16].mxu0  ;;  %v1344_v40 = vpop.f32.mrb[16].mxu1 }
 0x106   :  { %1000 = vst.msk [vmem:[%s1890_s3 + $0x3c] sm:$0xf] %vm984_vm1, %v1201_v34  ;;  %1032 = vst.msk [vmem:[%s1890_s3 + $0xbc] sm:$0xf] %vm984_vm1, %v1233_v35  ;;  %v482_v41 = vadd.f32 %v1312_v39, %v1565_v36  ;;  %v610_v42 = vadd.f32 %v1344_v40, %v1565_v36  ;;  %v473_v43 = vpop.f32.mrb[17].mxu0  ;;  %v601_v44 = vpop.f32.mrb[17].mxu1 }
 0x107   :  { %998 = vst.msk [vmem:[%s1890_s3 + $0x34] sm:$0xf] %vm984_vm1, %v1199_v37  ;;  %1030 = vst.msk [vmem:[%s1890_s3 + $0xb4] sm:$0xf] %vm984_vm1, %v1231_v38  ;;  %v474_v45 = vadd.f32 %v1565_v36, %v473_v43  ;;  %v602_v46 = vadd.f32 %v1565_v36, %v601_v44  ;;  %v1313_v47 = vpop.f32.mrb[18].mxu0  ;;  %v1345_v48 = vpop.f32.mrb[18].mxu1 }
 0x108   :  { %v682_v49 = vmax.f32 %v482_v41, 0.0  ;;  %v714_v50 = vmax.f32 %v610_v42, 0.0  ;;  %v485_v51 = vadd.f32 %v1313_v47, %v1565_v36  ;;  %v613_v52 = vadd.f32 %v1345_v48, %v1565_v36  ;;  %v476_v53 = vpop.f32.mrb[19].mxu0  ;;  %v604_v54 = vpop.f32.mrb[19].mxu1 }
 0x109   :  { %v680_v55 = vmax.f32 %v474_v45, 0.0  ;;  %v712_v56 = vmax.f32 %v602_v46, 0.0  ;;  %v477_v57 = vadd.f32 %v1565_v36, %v476_v53  ;;  %v605_v58 = vadd.f32 %v1565_v36, %v604_v54 }
 0x10a   :  { %v1204_v59 = vpack.c.bf16 %v682_v49, %v682_v49  ;;  %v1236_v60 = vpack.c.bf16 %v714_v50, %v714_v50  ;;  %v683_v61 = vmax.f32 %v485_v51, 0.0  ;;  %v715_v62 = vmax.f32 %v613_v52, 0.0 }
 0x10b   :  { %v1202_v63 = vpack.c.bf16 %v680_v55, %v680_v55  ;;  %v1234_v0 = vpack.c.bf16 %v712_v56, %v712_v56  ;;  %v681_v1 = vmax.f32 %v477_v57, 0.0  ;;  %v713_v2 = vmax.f32 %v605_v58, 0.0 }
 0x10c   :  { %1003 = vst.msk [vmem:[%s1890_s3 + $0x48] sm:$0xf] %vm984_vm1, %v1204_v59  ;;  %1035 = vst.msk [vmem:[%s1890_s3 + $0xc8] sm:$0xf] %vm984_vm1, %v1236_v60  ;;  %v1205_v3 = vpack.c.bf16 %v683_v61, %v683_v61  ;;  %v1237_v4 = vpack.c.bf16 %v715_v62, %v715_v62 }
 0x10d   :  { %1001 = vst.msk [vmem:[%s1890_s3 + $0x40] sm:$0xf] %vm984_vm1, %v1202_v63  ;;  %1033 = vst.msk [vmem:[%s1890_s3 + $0xc0] sm:$0xf] %vm984_vm1, %v1234_v0  ;;  %v1203_v5 = vpack.c.bf16 %v681_v1, %v681_v1  ;;  %v1235_v6 = vpack.c.bf16 %v713_v2, %v713_v2  ;;  %v1316_v7 = vpop.f32.mrb[20].mxu0  ;;  %v1348_v8 = vpop.f32.mrb[20].mxu1 }
 0x10e   :  { %1004 = vst.msk [vmem:[%s1890_s3 + $0x4c] sm:$0xf] %vm984_vm1, %v1205_v3  ;;  %1036 = vst.msk [vmem:[%s1890_s3 + $0xcc] sm:$0xf] %vm984_vm1, %v1237_v4  ;;  %v498_v9 = vadd.f32 %v1316_v7, %v1565_v36  ;;  %v626_v10 = vadd.f32 %v1348_v8, %v1565_v36  ;;  %v489_v11 = vpop.f32.mrb[21].mxu0  ;;  %v617_v12 = vpop.f32.mrb[21].mxu1 }
 0x10f   :  { %1002 = vst.msk [vmem:[%s1890_s3 + $0x44] sm:$0xf] %vm984_vm1, %v1203_v5  ;;  %1034 = vst.msk [vmem:[%s1890_s3 + $0xc4] sm:$0xf] %vm984_vm1, %v1235_v6  ;;  %v490_v13 = vadd.f32 %v1565_v36, %v489_v11  ;;  %v618_v14 = vadd.f32 %v1565_v36, %v617_v12  ;;  %v1317_v15 = vpop.f32.mrb[22].mxu0  ;;  %v1349_v16 = vpop.f32.mrb[22].mxu1 }
 0x110   :  { %v686_v17 = vmax.f32 %v498_v9, 0.0  ;;  %v718_v18 = vmax.f32 %v626_v10, 0.0  ;;  %v501_v19 = vadd.f32 %v1317_v15, %v1565_v36  ;;  %v629_v20 = vadd.f32 %v1349_v16, %v1565_v36  ;;  %v492_v21 = vpop.f32.mrb[23].mxu0  ;;  %v620_v22 = vpop.f32.mrb[23].mxu1 }
 0x111   :  { %v684_v23 = vmax.f32 %v490_v13, 0.0  ;;  %v716_v24 = vmax.f32 %v618_v14, 0.0  ;;  %v493_v25 = vadd.f32 %v1565_v36, %v492_v21  ;;  %v621_v26 = vadd.f32 %v1565_v36, %v620_v22 }
 0x112   :  { %v1208_v27 = vpack.c.bf16 %v686_v17, %v686_v17  ;;  %v1240_v28 = vpack.c.bf16 %v718_v18, %v718_v18  ;;  %v687_v29 = vmax.f32 %v501_v19, 0.0  ;;  %v719_v30 = vmax.f32 %v629_v20, 0.0 }
 0x113   :  { %v1206_v31 = vpack.c.bf16 %v684_v23, %v684_v23  ;;  %v1238_v32 = vpack.c.bf16 %v716_v24, %v716_v24  ;;  %v685_v33 = vmax.f32 %v493_v25, 0.0  ;;  %v717_v34 = vmax.f32 %v621_v26, 0.0 }
 0x114   :  { %1007 = vst.msk [vmem:[%s1890_s3 + $0x58] sm:$0xf] %vm984_vm1, %v1208_v27  ;;  %1039 = vst.msk [vmem:[%s1890_s3 + $0xd8] sm:$0xf] %vm984_vm1, %v1240_v28  ;;  %v1209_v35 = vpack.c.bf16 %v687_v29, %v687_v29  ;;  %v1241_v37 = vpack.c.bf16 %v719_v30, %v719_v30 }
 0x115   :  { %1005 = vst.msk [vmem:[%s1890_s3 + $0x50] sm:$0xf] %vm984_vm1, %v1206_v31  ;;  %1037 = vst.msk [vmem:[%s1890_s3 + $0xd0] sm:$0xf] %vm984_vm1, %v1238_v32  ;;  %v1207_v38 = vpack.c.bf16 %v685_v33, %v685_v33  ;;  %v1239_v39 = vpack.c.bf16 %v717_v34, %v717_v34  ;;  %v1320_v40 = vpop.f32.mrb[24].mxu0  ;;  %v1352_v41 = vpop.f32.mrb[24].mxu1 }
 0x116   :  { %1008 = vst.msk [vmem:[%s1890_s3 + $0x5c] sm:$0xf] %vm984_vm1, %v1209_v35  ;;  %1040 = vst.msk [vmem:[%s1890_s3 + $0xdc] sm:$0xf] %vm984_vm1, %v1241_v37  ;;  %v514_v42 = vadd.f32 %v1320_v40, %v1565_v36  ;;  %v642_v43 = vadd.f32 %v1352_v41, %v1565_v36  ;;  %v505_v44 = vpop.f32.mrb[25].mxu0  ;;  %v633_v45 = vpop.f32.mrb[25].mxu1 }
 0x117   :  { %1006 = vst.msk [vmem:[%s1890_s3 + $0x54] sm:$0xf] %vm984_vm1, %v1207_v38  ;;  %1038 = vst.msk [vmem:[%s1890_s3 + $0xd4] sm:$0xf] %vm984_vm1, %v1239_v39  ;;  %v506_v46 = vadd.f32 %v1565_v36, %v505_v44  ;;  %v634_v47 = vadd.f32 %v1565_v36, %v633_v45  ;;  %v1321_v48 = vpop.f32.mrb[26].mxu0  ;;  %v1353_v49 = vpop.f32.mrb[26].mxu1 }
 0x118   :  { %v690_v50 = vmax.f32 %v514_v42, 0.0  ;;  %v722_v51 = vmax.f32 %v642_v43, 0.0  ;;  %v517_v52 = vadd.f32 %v1321_v48, %v1565_v36  ;;  %v645_v53 = vadd.f32 %v1353_v49, %v1565_v36  ;;  %v508_v54 = vpop.f32.mrb[27].mxu0  ;;  %v636_v55 = vpop.f32.mrb[27].mxu1 }
 0x119   :  { %v688_v56 = vmax.f32 %v506_v46, 0.0  ;;  %v720_v57 = vmax.f32 %v634_v47, 0.0  ;;  %v509_v58 = vadd.f32 %v1565_v36, %v508_v54  ;;  %v637_v59 = vadd.f32 %v1565_v36, %v636_v55 }
 0x11a   :  { %v1212_v60 = vpack.c.bf16 %v690_v50, %v690_v50  ;;  %v1244_v61 = vpack.c.bf16 %v722_v51, %v722_v51  ;;  %v691_v62 = vmax.f32 %v517_v52, 0.0  ;;  %v723_v63 = vmax.f32 %v645_v53, 0.0 }
 0x11b   :  { %v1210_v0 = vpack.c.bf16 %v688_v56, %v688_v56  ;;  %v1242_v1 = vpack.c.bf16 %v720_v57, %v720_v57  ;;  %v689_v2 = vmax.f32 %v509_v58, 0.0  ;;  %v721_v3 = vmax.f32 %v637_v59, 0.0 }
 0x11c   :  { %1011 = vst.msk [vmem:[%s1890_s3 + $0x68] sm:$0xf] %vm984_vm1, %v1212_v60  ;;  %1043 = vst.msk [vmem:[%s1890_s3 + $0xe8] sm:$0xf] %vm984_vm1, %v1244_v61  ;;  %v1213_v4 = vpack.c.bf16 %v691_v62, %v691_v62  ;;  %v1245_v5 = vpack.c.bf16 %v723_v63, %v723_v63 }
 0x11d   :  { %1009 = vst.msk [vmem:[%s1890_s3 + $0x60] sm:$0xf] %vm984_vm1, %v1210_v0  ;;  %1041 = vst.msk [vmem:[%s1890_s3 + $0xe0] sm:$0xf] %vm984_vm1, %v1242_v1  ;;  %v1211_v6 = vpack.c.bf16 %v689_v2, %v689_v2  ;;  %v1243_v7 = vpack.c.bf16 %v721_v3, %v721_v3  ;;  %v1324_v8 = vpop.f32.mrb[28].mxu0  ;;  %v1356_v9 = vpop.f32.mrb[28].mxu1 }
 0x11e   :  { %1012 = vst.msk [vmem:[%s1890_s3 + $0x6c] sm:$0xf] %vm984_vm1, %v1213_v4  ;;  %1044 = vst.msk [vmem:[%s1890_s3 + $0xec] sm:$0xf] %vm984_vm1, %v1245_v5  ;;  %v530_v10 = vadd.f32 %v1324_v8, %v1565_v36  ;;  %v658_v11 = vadd.f32 %v1356_v9, %v1565_v36  ;;  %v521_v12 = vpop.f32.mrb[29].mxu0  ;;  %v649_v13 = vpop.f32.mrb[29].mxu1 }
 0x11f   :  { %1010 = vst.msk [vmem:[%s1890_s3 + $0x64] sm:$0xf] %vm984_vm1, %v1211_v6  ;;  %1042 = vst.msk [vmem:[%s1890_s3 + $0xe4] sm:$0xf] %vm984_vm1, %v1243_v7  ;;  %v522_v14 = vadd.f32 %v1565_v36, %v521_v12  ;;  %v650_v15 = vadd.f32 %v1565_v36, %v649_v13  ;;  %v1325_v16 = vpop.f32.mrb[30].mxu0  ;;  %v1357_v17 = vpop.f32.mrb[30].mxu1 }
 0x120   :  { %v694_v18 = vmax.f32 %v530_v10, 0.0  ;;  %v726_v19 = vmax.f32 %v658_v11, 0.0  ;;  %v533_v20 = vadd.f32 %v1325_v16, %v1565_v36  ;;  %v661_v21 = vadd.f32 %v1357_v17, %v1565_v36  ;;  %v524_v22 = vpop.f32.mrb[31].mxu0  ;;  %v652_v23 = vpop.f32.mrb[31].mxu1 }
 0x121   :  { %v692_v24 = vmax.f32 %v522_v14, 0.0  ;;  %v724_v25 = vmax.f32 %v650_v15, 0.0  ;;  %v525_v26 = vadd.f32 %v1565_v36, %v524_v22  ;;  %v653_v27 = vadd.f32 %v1565_v36, %v652_v23 }
 0x122   :  { %v1216_v28 = vpack.c.bf16 %v694_v18, %v694_v18  ;;  %v1248_v29 = vpack.c.bf16 %v726_v19, %v726_v19  ;;  %v695_v30 = vmax.f32 %v533_v20, 0.0  ;;  %v727_v31 = vmax.f32 %v661_v21, 0.0 }
 0x123   :  { %v1214_v32 = vpack.c.bf16 %v692_v24, %v692_v24  ;;  %v1246_v33 = vpack.c.bf16 %v724_v25, %v724_v25  ;;  %v693_v34 = vmax.f32 %v525_v26, 0.0  ;;  %v725_v35 = vmax.f32 %v653_v27, 0.0 }
 0x124   :  { %1015 = vst.msk [vmem:[%s1890_s3 + $0x78] sm:$0xf] %vm984_vm1, %v1216_v28  ;;  %1047 = vst.msk [vmem:[%s1890_s3 + $0xf8] sm:$0xf] %vm984_vm1, %v1248_v29  ;;  %v1217_v37 = vpack.c.bf16 %v695_v30, %v695_v30  ;;  %v1249_v36 = vpack.c.bf16 %v727_v31, %v727_v31 }
 0x125   :  { %1013 = vst.msk [vmem:[%s1890_s3 + $0x70] sm:$0xf] %vm984_vm1, %v1214_v32  ;;  %1045 = vst.msk [vmem:[%s1890_s3 + $0xf0] sm:$0xf] %vm984_vm1, %v1246_v33  ;;  %v1215_v38 = vpack.c.bf16 %v693_v34, %v693_v34  ;;  %v1247_v39 = vpack.c.bf16 %v725_v35, %v725_v35 }
 0x126   :  { %1016 = vst.msk [vmem:[%s1890_s3 + $0x7c] sm:$0xf] %vm984_vm1, %v1217_v37  ;;  %1048 = vst.msk [vmem:[%s1890_s3 + $0xfc] sm:$0xf] %vm984_vm1, %v1249_v36 }
 0x127   :  { %1014 = vst.msk [vmem:[%s1890_s3 + $0x74] sm:$0xf] %vm984_vm1, %v1215_v38  ;;  %1046 = vst.msk [vmem:[%s1890_s3 + $0xf4] sm:$0xf] %vm984_vm1, %v1247_v39 }

// kernel: inception_forward.7
= control target key start
LH: loop header
LB: loop body
LE: loop exit
PB: predicated region body
PF: predicated region fallthrough
CT: control target
= control target key end

     0   :  { %s3426_s12 = smov 0   ;;  %s4212_s0 = inlined_call_operand.vmem [shape: bf16[2,18,18,64], index: 0, kind: input, shape index: {}]   ;;  %s4213_s1 = inlined_call_operand.vmem [shape: bf16[64,32], index: 1, kind: input, shape index: {}]   ;;  %s4214_s2 = inlined_call_operand.vmem [shape: f32[1,32], index: 2, kind: input, shape index: {}]   ;;  %s4215_s3 = inlined_call_operand.vmem [shape: bf16[2,256,32], index: 3, kind: output, shape index: {}]  }
   0x1 LB: > { %s3029_s13 = sadd.s32 4294967295, %s3404_s12   ;;  %p3033_p0 = scmp.ge.s32.totalorder %s3404_s12, 1  ;;  %s3404_s12 = sphi %s3426_s12, %s13_s12  }
   0x2   : > { %p137_p1 = scmp.lt.s32.totalorder %s3404_s12, 3 }
   0x4   : > { %p138_p2 = pnand %p3033_p0, %p137_p1 }
   0x5   : > { %v3394_v0 = vld [vmem:[%s4213_s1] sm:$0xff] (!%p138_p2)   ;;  %p161_p3 = scmp.lt.s32.totalorder (!%p138_p2), %s3029_s13, 1  ;;  %v3395_v1 = vld [vmem:[%s4213_s1 + $0x8] sm:$0xff] (!%p138_p2)   ;;  %v3396_v2 = vld [vmem:[%s4213_s1 + $0x10] sm:$0xff] (!%p138_p2)   ;;  %vm735_vm0 = vcmask (!%p138_p2), 1042432   ;;  %vm736_vm1 = vcmask (!%p138_p2), 1046532  }
   0x6   : > { %141 = sbr.rel (%p138_p2) target bundleno = 580 (0x244), region = 32  ;;  %3337 = vmatprep.subr.bf16.mxu0 (!%p138_p2), %v3394_v0  ;;  %3377 = vmatprep.subr.bf16.mxu1 (!%p138_p2), %v3394_v0  ;;  %v3397_v3 = vld [vmem:[%s4213_s1 + $0x18] sm:$0xff] (!%p138_p2)   ;;  %vm220_vm2 = vsmask.f32 (!%p138_p2), 3328  ;;  %vm221_vm3 = vsmask.f32 (!%p138_p2), 7440  ;;  %vm3460_vm4 = vmor (!%p138_p2), %vm735_vm0, %vm736_vm1 }
   0x7   : > { %3338 = vmatpush3.bf16.msra.mxu0 (!%p138_p2), %v3394_v0  ;;  %3381 = vmatpush3.bf16.msra.mxu1 (!%p138_p2), %v3394_v0  ;;  %vm3472_vm5 = vmor (!%p138_p2), %vm220_vm2, %vm221_vm3  ;;  %vm2571_vm6 = vcmask (!%p138_p2), 523264   ;;  %vm2941_vm7 = vcmask (!%p138_p2), 257024  }
   0x8   : > { %3339 = vmatprep.subr.bf16.mxu0 (!%p138_p2), %v3395_v1  ;;  %3378 = vmatprep.subr.bf16.mxu1 (!%p138_p2), %v3395_v1 }
   0xb   : > { %3340 = vmatpush3.bf16.msra.mxu0 (!%p138_p2), %v3395_v1  ;;  %3382 = vmatpush3.bf16.msra.mxu1 (!%p138_p2), %v3395_v1 }
   0xc   : > { %3341 = vmatprep.subr.bf16.mxu0 (!%p138_p2), %v3396_v2  ;;  %3379 = vmatprep.subr.bf16.mxu1 (!%p138_p2), %v3396_v2 }
   0xd   : > { %s4221_s13 = smov (!%p161_p3, %s3029_s13), 1 }
   0xe   : > { %s3385_s20 = smul.u32 216, %s4221_s13  ;;  %s3284_s28 = sshll.u32 %s4221_s13, 7 }
   0xf   : > { %3342 = vmatpush3.bf16.msra.mxu0 %v3396_v2  ;;  %3383 = vmatpush3.bf16.msra.mxu1 %v3396_v2  ;;  %s4104_s4 = scalar_lea.vmem %s4215_s3, %s3284_s28 }
  0x10   : > { %s3452_s25 = scalar_lea.vmem %s4212_s0, %s3385_s20  ;;  %3343 = vmatprep.subr.bf16.mxu0 %v3397_v3  ;;  %3380 = vmatprep.subr.bf16.mxu1 %v3397_v3 }
  0x11   : > { %v172_v4 = vld [vmem:[%s3452_s25] sm:$0xf]  ;;  %v173_v5 = vld [vmem:[%s3452_s25 + $0x4] sm:$0xf]  ;;  %v204_v6 = vld [vmem:[%s3452_s25 + $0x8] sm:$0x1] }
  0x12   : > { %v224_v7 = vshrl.u32 %v172_v4, 16  ;;  %v227_v8 = vshll.u32 %v172_v4, 16  ;;  %v233_v9 = vshll.u32 %v173_v5, 16  ;;  %v237_v10 = vshrl.u32 %v173_v5, 16  ;;  %v671_v11 = vld [vmem:[%s3452_s25] sm:$0xe] }
  0x13   : > { %v243_v13 = vshll.u32 %v204_v6, 16  ;;  %v3037_v14 = vrot.slane %v671_v11, 9  ;;  %v740_v15 = vrot.slane %v173_v5, 5  ;;  %v743_v16 = vrot.slane %v204_v6, 5  ;;  %v3053_v17 = vld [vmem:[%s3452_s25 + $0xc] sm:$0xf]  ;;  %3344 = vmatpush3.bf16.msra.mxu0 %v3397_v3  ;;  %3384 = vmatpush3.bf16.msra.mxu1 %v3397_v3 }
  0x14   : > { %v226_v18 = vrot.slane %v224_v7, 4  ;;  %v229_v19 = vrot.slane %v227_v8, 5  ;;  %v235_v20 = vrot.slane %v233_v9, 5  ;;  %v239_v21 = vrot.slane %v237_v10, 4  ;;  %v3054_v22 = vld [vmem:[%s3452_s25 + $0x10] sm:$0xf] }
  0x15   : > { %v245_v23 = vrot.slane %v243_v13, 5  ;;  %v741_v24 = vsel %vm3460_vm4, %v3037_v14, %v740_v15  ;;  %v742_v25 = vrot.slane %v740_v15, 4  ;;  %v3085_v26 = vld [vmem:[%s3452_s25 + $0x14] sm:$0x1]  ;;  %v996_v27 = vshrl.u32 %v3053_v17, 16 }
  0x16   : > { %v230_v28 = vor.u32 %v229_v19, %v226_v18  ;;  %v240_v29 = vor.u32 %v239_v21, %v235_v20  ;;  %v999_v30 = vshll.u32 %v3053_v17, 16  ;;  %v1005_v31 = vshll.u32 %v3054_v22, 16  ;;  %v3101_v32 = vld [vmem:[%s3452_s25 + $0xc] sm:$0xe]  ;;  %v3133_v46 = vld [vmem:[%s3452_s25 + $0x18] sm:$0xf] }
  0x17   : > { %v744_v34 = vsel %vm3460_vm4, %v742_v25, %v743_v16  ;;  %v998_v35 = vrot.slane %v996_v27, 4  ;;  %v1009_v36 = vshrl.u32 %v3054_v22, 16  ;;  %v1015_v37 = vshll.u32 %v3085_v26, 16  ;;  %v3134_v51 = vld [vmem:[%s3452_s25 + $0x1c] sm:$0xf] }
  0x18   : > { %v231_v38 = vrot.slane %v230_v28, 4  ;;  %v241_v39 = vrot.slane %v240_v29, 4  ;;  %v1001_v40 = vrot.slane %v999_v30, 5  ;;  %v1007_v41 = vrot.slane %v1005_v31, 5  ;;  %v3165_v63 = vld [vmem:[%s3452_s25 + $0x20] sm:$0x1] }
  0x19   : > { %v1011_v42 = vrot.slane %v1009_v36, 4  ;;  %v1017_v43 = vrot.slane %v1015_v37, 5  ;;  %v3117_v44 = vrot.slane %v3101_v32, 9  ;;  %v1509_v45 = vrot.slane %v3054_v22, 5  ;;  %v3181_v1 = vld [vmem:[%s3452_s25 + $0x18] sm:$0xe] }
  0x1a   : > { %v236_v47 = vsel %vm3472_vm5, %v231_v38, %v235_v20  ;;  %v246_v48 = vsel %vm3472_vm5, %v241_v39, %v245_v23  ;;  %v1002_v49 = vor.u32 %v1001_v40, %v998_v35  ;;  %v1512_v50 = vrot.slane %v3085_v26, 5  ;;  %v188_v10 = vld [vmem:[%s3452_s25 + $0x60] sm:$0xf]  ;;  %v212_v29 = vld [vmem:[%s3452_s25 + $0x68] sm:$0x1] }
  0x1b   : > { %v639_v52 = vmax.bf16 %v236_v47, %v172_v4  ;;  %v640_v53 = vmax.bf16 %v246_v48, %v173_v5  ;;  %v1012_v54 = vor.u32 %v1011_v42, %v1007_v41  ;;  %v1510_v55 = vsel %vm3460_vm4, %v3117_v44, %v1509_v45  ;;  %v679_v35 = vld [vmem:[%s3452_s25 + $0x60] sm:$0xe] }
  0x1c   : > { %v1003_v56 = vrot.slane %v1002_v49, 4  ;;  %v1511_v57 = vrot.slane %v1509_v45, 4  ;;  %v1765_v58 = vshrl.u32 %v3133_v46, 16  ;;  %v1768_v59 = vshll.u32 %v3133_v46, 16  ;;  %v3069_v49 = vld [vmem:[%s3452_s25 + $0x6c] sm:$0xf] }
  0x1d   : > { %v882_v60 = vmax.bf16 %v741_v24, %v639_v52  ;;  %v883_v61 = vmax.bf16 %v744_v34, %v640_v53  ;;  %v1013_v62 = vrot.slane %v1012_v54, 4  ;;  %v1774_v0 = vshll.u32 %v3134_v51, 16  ;;  %v189_v24 = vld [vmem:[%s3452_s25 + $0x64] sm:$0xf]  ;;  %v3070_v53 = vld [vmem:[%s3452_s25 + $0x70] sm:$0xf] }
  0x1e   : > { %v1008_v2 = vsel %vm3472_vm5, %v1003_v56, %v1007_v41  ;;  %v1513_v3 = vsel %vm3460_vm4, %v1511_v57, %v1512_v50  ;;  %v1767_v4 = vrot.slane %v1765_v58, 4  ;;  %v1770_v5 = vrot.slane %v1768_v59, 5 }
  0x1f   : > { %v947_v6 = vmax.bf16 %v3053_v17, %v882_v60  ;;  %v948_v7 = vmax.bf16 %v3054_v22, %v883_v61  ;;  %v1018_v8 = vsel %vm3472_vm5, %v1013_v62, %v1017_v43  ;;  %v1776_v9 = vrot.slane %v1774_v0, 5  ;;  %v3093_v61 = vld [vmem:[%s3452_s25 + $0x74] sm:$0x1] }
  0x20   : > { %v1771_v11 = vor.u32 %v1770_v5, %v1767_v4  ;;  %v1778_v13 = vshrl.u32 %v3134_v51, 16  ;;  %v1784_v14 = vshll.u32 %v3165_v63, 16  ;;  %v3197_v15 = vrot.slane %v3181_v1, 9 }
  0x21   : > { %v1411_v16 = vmax.bf16 %v1008_v2, %v947_v6  ;;  %v1412_v18 = vmax.bf16 %v1018_v8, %v948_v7  ;;  %v2278_v19 = vrot.slane %v3134_v51, 5  ;;  %v2281_v20 = vrot.slane %v3165_v63, 5 }
  0x22   : > { %v1772_v21 = vrot.slane %v1771_v11, 4  ;;  %v1780_v23 = vrot.slane %v1778_v13, 4  ;;  %v1786_v17 = vrot.slane %v1784_v14, 5  ;;  %v416_v22 = vshrl.u32 %v188_v10, 16  ;;  %v3149_v14 = vld [vmem:[%s3452_s25 + $0x78] sm:$0xf] }
  0x23   : > { %v1651_v25 = vmax.bf16 %v1510_v55, %v1411_v16  ;;  %v1652_v26 = vmax.bf16 %v1513_v3, %v1412_v18  ;;  %v2279_v27 = vsel %vm3460_vm4, %v3197_v15, %v2278_v19  ;;  %v2280_v28 = vrot.slane %v2278_v19, 4  ;;  %v3109_v3 = vld [vmem:[%s3452_s25 + $0x6c] sm:$0xe] }
  0x24   : > { %v1777_v30 = vsel %vm3472_vm5, %v1772_v21, %v1776_v9  ;;  %v1781_v31 = vor.u32 %v1780_v23, %v1776_v9  ;;  %v418_v32 = vrot.slane %v416_v22, 4  ;;  %v419_v34 = vshll.u32 %v188_v10, 16 }
  0x25   : > { %v1716_v36 = vmax.bf16 %v3133_v46, %v1651_v25  ;;  %v1717_v37 = vmax.bf16 %v3134_v51, %v1652_v26  ;;  %v2282_v38 = vsel %vm3460_vm4, %v2280_v28, %v2281_v20  ;;  %v425_v39 = vshll.u32 %v189_v24, 16  ;;  %v3150_v26 = vld [vmem:[%s3452_s25 + $0x7c] sm:$0xf] }
  0x26   : > { %v1782_v40 = vrot.slane %v1781_v31, 4  ;;  %v421_v41 = vrot.slane %v419_v34, 5  ;;  %v429_v42 = vshrl.u32 %v189_v24, 16  ;;  %v435_v43 = vshll.u32 %v212_v29, 16 }
  0x27   : > { %v2180_v44 = vmax.bf16 %v1777_v30, %v1716_v36  ;;  %v427_v45 = vrot.slane %v425_v39, 5  ;;  %v3045_v47 = vrot.slane %v679_v35, 9  ;;  %v796_v48 = vrot.slane %v189_v24, 5  ;;  %v3173_v35 = vld [vmem:[%s3452_s25 + $0x80] sm:$0x1] }
  0x28   : > { %v1787_v50 = vsel %vm3472_vm5, %v1782_v40, %v1786_v17  ;;  %v422_v46 = vor.u32 %v421_v41, %v418_v32  ;;  %v431_v51 = vrot.slane %v429_v42, 4  ;;  %v437_v52 = vrot.slane %v435_v43, 5  ;;  %v3189_v41 = vld [vmem:[%s3452_s25 + $0x78] sm:$0xe] }
  0x29   : > { %v2181_v54 = vmax.bf16 %v1787_v50, %v1717_v37  ;;  %v2420_v55 = vmax.bf16 %v2279_v27, %v2180_v44  ;;  %v797_v56 = vsel %vm3460_vm4, %v3045_v47, %v796_v48  ;;  %v798_v57 = vrot.slane %v796_v48, 4 }
  0x2a   : > { %v423_v58 = vrot.slane %v422_v46, 4  ;;  %v432_v59 = vor.u32 %v431_v51, %v427_v45  ;;  %v799_v60 = vrot.slane %v212_v29, 5  ;;  %v1188_v62 = vshrl.u32 %v3069_v49, 16 }
  0x2b   : > { %v2421_v63 = vmax.bf16 %v2282_v38, %v2181_v54  ;;  %v1191_v0 = vshll.u32 %v3069_v49, 16  ;;  %v1197_v1 = vshll.u32 %v3070_v53, 16  ;;  %v1201_v2 = vshrl.u32 %v3070_v53, 16  ;;  %v174_v54 = vld [vmem:[%s3452_s25 + $0xc] sm:$0xf] }
  0x2c   : > { %v428_v4 = vsel %vm3472_vm5, %v423_v58, %v427_v45  ;;  %v433_v5 = vrot.slane %v432_v59, 4  ;;  %v800_v6 = vsel %vm3460_vm4, %v798_v57, %v799_v60  ;;  %v1190_v7 = vrot.slane %v1188_v62, 4  ;;  %v175_v59 = vld [vmem:[%s3452_s25 + $0x10] sm:$0xf] }
  0x2d   : > { %v3214_v8 = vcombine.low %v2420_v55, %v2421_v63  ;;  %v655_v9 = vmax.bf16 %v428_v4, %v188_v10  ;;  %v1193_v11 = vrot.slane %v1191_v0, 5  ;;  %v1199_v13 = vrot.slane %v1197_v1, 5 }
  0x2e   : > { %v438_v15 = vsel %vm3472_vm5, %v433_v5, %v437_v52  ;;  %v1203_v16 = vrot.slane %v1201_v2, 4  ;;  %v1207_v18 = vshll.u32 %v3093_v61, 16  ;;  %v3125_v19 = vrot.slane %v3109_v3, 9  ;;  %v205_v2 = vld [vmem:[%s3452_s25 + $0x14] sm:$0x1] }
  0x2f   : > { %3345 = vmatprep.mubr.msk.bf16.mxu0 %vm2571_vm6, %v3214_v8  ;;  %v656_v20 = vmax.bf16 %v438_v15, %v189_v24  ;;  %v898_v21 = vmax.bf16 %v797_v56, %v655_v9  ;;  %v1194_v23 = vor.u32 %v1193_v11, %v1190_v7  ;;  %v1565_v17 = vrot.slane %v3070_v53, 5  ;;  %v672_v9 = vld [vmem:[%s3452_s25 + $0xc] sm:$0xe] }
  0x30   : > { %v1204_v22 = vor.u32 %v1203_v16, %v1199_v13  ;;  %v1209_v25 = vrot.slane %v1207_v18, 5  ;;  %v1568_v10 = vrot.slane %v3093_v61, 5  ;;  %v1957_v27 = vshrl.u32 %v3149_v14, 16 }
  0x31   : > { %v899_v28 = vmax.bf16 %v800_v6, %v656_v20  ;;  %v963_v29 = vmax.bf16 %v3069_v49, %v898_v21  ;;  %v1195_v30 = vrot.slane %v1194_v23, 4  ;;  %v1566_v31 = vsel %vm3460_vm4, %v3125_v19, %v1565_v17  ;;  %v3055_v21 = vld [vmem:[%s3452_s25 + $0x18] sm:$0xf] }
  0x32   : > { %v1205_v32 = vrot.slane %v1204_v22, 4  ;;  %v1567_v34 = vrot.slane %v1565_v17, 4  ;;  %v1959_v36 = vrot.slane %v1957_v27, 4  ;;  %v1960_v24 = vshll.u32 %v3149_v14, 16 }
  0x33   : > { %v964_v37 = vmax.bf16 %v3070_v53, %v899_v28  ;;  %v1200_v38 = vsel %vm3472_vm5, %v1195_v30, %v1199_v13  ;;  %v1966_v39 = vshll.u32 %v3150_v26, 16  ;;  %v1970_v40 = vshrl.u32 %v3150_v26, 16 }
  0x34   : > { %v1210_v42 = vsel %vm3472_vm5, %v1205_v32, %v1209_v25  ;;  %v1427_v43 = vmax.bf16 %v1200_v38, %v963_v29  ;;  %v1569_v44 = vsel %vm3460_vm4, %v1567_v34, %v1568_v10  ;;  %v1962_v45 = vrot.slane %v1960_v24, 5  ;;  %v3056_v10 = vld [vmem:[%s3452_s25 + $0x1c] sm:$0xf]  ;;  %v3086_v34 = vld [vmem:[%s3452_s25 + $0x20] sm:$0x1] }
  0x35   : > { %v1428_v47 = vmax.bf16 %v1210_v42, %v964_v37  ;;  %v1968_v48 = vrot.slane %v1966_v39, 5  ;;  %v1972_v49 = vrot.slane %v1970_v40, 4  ;;  %v1976_v50 = vshll.u32 %v3173_v35, 16  ;;  %v3102_v39 = vld [vmem:[%s3452_s25 + $0x18] sm:$0xe] }
  0x36   : > { %v1667_v46 = vmax.bf16 %v1566_v31, %v1427_v43  ;;  %v1963_v51 = vor.u32 %v1962_v45, %v1959_v36  ;;  %v3205_v52 = vrot.slane %v3189_v41, 9  ;;  %v2334_v53 = vrot.slane %v3150_v26, 5 }
  0x37   : > { %v1668_v55 = vmax.bf16 %v1569_v44, %v1428_v47  ;;  %v1973_v56 = vor.u32 %v1972_v49, %v1968_v48  ;;  %v1978_v57 = vrot.slane %v1976_v50, 5  ;;  %v2337_v58 = vrot.slane %v3173_v35, 5  ;;  %v3135_v49 = vld [vmem:[%s3452_s25 + $0x24] sm:$0xf] }
  0x38   : > { %v1732_v60 = vmax.bf16 %v3149_v14, %v1667_v46  ;;  %v1964_v61 = vrot.slane %v1963_v51, 4  ;;  %v2335_v62 = vsel %vm3460_vm4, %v3205_v52, %v2334_v53  ;;  %v2336_v63 = vrot.slane %v2334_v53, 4 }
  0x39   : > { %v1733_v0 = vmax.bf16 %v3150_v26, %v1668_v55  ;;  %v1974_v1 = vrot.slane %v1973_v56, 4  ;;  %v248_v3 = vshrl.u32 %v174_v54, 16  ;;  %v251_v4 = vshll.u32 %v174_v54, 16 }
  0x3a   : > { %v1969_v5 = vsel %vm3472_vm5, %v1964_v61, %v1968_v48  ;;  %v2338_v6 = vsel %vm3460_vm4, %v2336_v63, %v2337_v58  ;;  %v257_v7 = vshll.u32 %v175_v59, 16  ;;  %v261_v8 = vshrl.u32 %v175_v59, 16 }
  0x3b   : > { %v1979_v11 = vsel %vm3472_vm5, %v1974_v1, %v1978_v57  ;;  %v2196_v13 = vmax.bf16 %v1969_v5, %v1732_v60  ;;  %v250_v14 = vrot.slane %v248_v3, 4  ;;  %v253_v15 = vrot.slane %v251_v4, 5 }
  0x3c   : > { %v2197_v16 = vmax.bf16 %v1979_v11, %v1733_v0  ;;  %v259_v18 = vrot.slane %v257_v7, 5  ;;  %v263_v19 = vrot.slane %v261_v8, 4  ;;  %v267_v20 = vshll.u32 %v205_v2, 16  ;;  %v3182_v7 = vld [vmem:[%s3452_s25 + $0x24] sm:$0xe] }
  0x3d   : > { %v2436_v23 = vmax.bf16 %v2335_v62, %v2196_v13  ;;  %v254_v17 = vor.u32 %v253_v15, %v250_v14  ;;  %v3038_v22 = vrot.slane %v672_v9, 9  ;;  %v747_v25 = vrot.slane %v175_v59, 5  ;;  %v3136_v62 = vld [vmem:[%s3452_s25 + $0x28] sm:$0xf] }
  0x3e   : > { %v2437_v26 = vmax.bf16 %v2338_v6, %v2197_v16  ;;  %v264_v27 = vor.u32 %v263_v19, %v259_v18  ;;  %v269_v28 = vrot.slane %v267_v20, 5  ;;  %v750_v29 = vrot.slane %v205_v2, 5  ;;  %v3166_v2 = vld [vmem:[%s3452_s25 + $0x2c] sm:$0x1] }
  0x3f   : > { %v255_v30 = vrot.slane %v254_v17, 4  ;;  %v748_v31 = vsel %vm3460_vm4, %v3038_v22, %v747_v25  ;;  %v749_v32 = vrot.slane %v747_v25, 4  ;;  %v1020_v35 = vshrl.u32 %v3055_v21, 16  ;;  %v3569_v19 = vld [vmem:[%s3452_s25 + $0x6c] sm:$0xf] }
  0x40   : > { %v3222_v36 = vcombine.low %v2436_v23, %v2437_v26  ;;  %v265_v24 = vrot.slane %v264_v27, 4  ;;  %v1023_v37 = vshll.u32 %v3055_v21, 16  ;;  %v1029_v38 = vshll.u32 %v3056_v10, 16 }
  0x41   : > { %v260_v40 = vsel %vm3472_vm5, %v255_v30, %v259_v18  ;;  %v751_v41 = vsel %vm3460_vm4, %v749_v32, %v750_v29  ;;  %v1022_v42 = vrot.slane %v1020_v35, 4  ;;  %v1033_v43 = vshrl.u32 %v3056_v10, 16  ;;  %v191_v30 = vld [vmem:[%s3452_s25 + $0x70] sm:$0xf] }
  0x42   : > { %3361 = vmatprep.mubr.msk.bf16.mxu1 %vm2571_vm6, %v3222_v36  ;;  %v270_v44 = vsel %vm3472_vm5, %v265_v24, %v269_v28  ;;  %v641_v45 = vmax.bf16 %v260_v40, %v174_v54  ;;  %v1025_v47 = vrot.slane %v1023_v37, 5  ;;  %v1031_v48 = vrot.slane %v1029_v38, 5  ;;  %v213_v24 = vld [vmem:[%s3452_s25 + $0x74] sm:$0x1] }
  0x43   : > { %v642_v50 = vmax.bf16 %v270_v44, %v175_v59  ;;  %v1035_v46 = vrot.slane %v1033_v43, 4  ;;  %v1039_v51 = vshll.u32 %v3086_v34, 16  ;;  %v3118_v52 = vrot.slane %v3102_v39, 9 }
  0x44   : > { %v884_v53 = vmax.bf16 %v748_v31, %v641_v45  ;;  %v1026_v55 = vor.u32 %v1025_v47, %v1022_v42  ;;  %v1516_v56 = vrot.slane %v3056_v10, 5  ;;  %v1519_v57 = vrot.slane %v3086_v34, 5 }
  0x45   : > { %v885_v58 = vmax.bf16 %v751_v41, %v642_v50  ;;  %v1036_v60 = vor.u32 %v1035_v46, %v1031_v48  ;;  %v1041_v61 = vrot.slane %v1039_v51, 5  ;;  %v1789_v63 = vshrl.u32 %v3135_v49, 16  ;;  %v680_v41 = vld [vmem:[%s3452_s25 + $0x6c] sm:$0xe]  ;;  %v3071_v46 = vld [vmem:[%s3452_s25 + $0x78] sm:$0xf] }
  0x46   : > { %v949_v0 = vmax.bf16 %v3055_v21, %v884_v53  ;;  %v1027_v54 = vrot.slane %v1026_v55, 4  ;;  %v1517_v1 = vsel %vm3460_vm4, %v3118_v52, %v1516_v56  ;;  %v1518_v59 = vrot.slane %v1516_v56, 4 }
  0x47   : > { %v950_v3 = vmax.bf16 %v3056_v10, %v885_v58  ;;  %v1037_v4 = vrot.slane %v1036_v60, 4  ;;  %v1791_v5 = vrot.slane %v1789_v63, 4  ;;  %v1792_v6 = vshll.u32 %v3135_v49, 16 }
  0x48   : > { %v1032_v8 = vsel %vm3472_vm5, %v1027_v54, %v1031_v48  ;;  %v1520_v9 = vsel %vm3460_vm4, %v1518_v59, %v1519_v57  ;;  %v1798_v11 = vshll.u32 %v3136_v62, 16  ;;  %v1802_v13 = vshrl.u32 %v3136_v62, 16 }
  0x49   : > { %v1042_v14 = vsel %vm3472_vm5, %v1037_v4, %v1041_v61  ;;  %v1413_v15 = vmax.bf16 %v1032_v8, %v949_v0  ;;  %v1794_v16 = vrot.slane %v1792_v6, 5  ;;  %v1808_v18 = vshll.u32 %v3166_v2, 16  ;;  %v3072_v61 = vld [vmem:[%s3452_s25 + $0x7c] sm:$0xf] }
  0x4a   : > { %v1414_v20 = vmax.bf16 %v1042_v14, %v950_v3  ;;  %v1800_v21 = vrot.slane %v1798_v11, 5  ;;  %v1804_v23 = vrot.slane %v1802_v13, 4  ;;  %v3198_v17 = vrot.slane %v3182_v7, 9  ;;  %v3094_v3 = vld [vmem:[%s3452_s25 + $0x80] sm:$0x1] }
  0x4b   : > { %v1653_v22 = vmax.bf16 %v1517_v1, %v1413_v15  ;;  %v1795_v25 = vor.u32 %v1794_v16, %v1791_v5  ;;  %v1810_v10 = vrot.slane %v1808_v18, 5  ;;  %v2285_v26 = vrot.slane %v3136_v62, 5 }
  0x4c   : > { %v1654_v27 = vmax.bf16 %v1520_v9, %v1414_v20  ;;  %v1805_v28 = vor.u32 %v1804_v23, %v1800_v21  ;;  %v2288_v29 = vrot.slane %v3166_v2, 5  ;;  %v440_v31 = vshrl.u32 %v3569_v19, 16  ;;  %v3110_v9 = vld [vmem:[%s3452_s25 + $0x78] sm:$0xe]  ;;  %v3151_v23 = vld [vmem:[%s3452_s25 + $0x84] sm:$0xf] }
  0x4d   : > { %v1718_v32 = vmax.bf16 %v3135_v49, %v1653_v22  ;;  %v1796_v34 = vrot.slane %v1795_v25, 4  ;;  %v2286_v35 = vsel %vm3460_vm4, %v3198_v17, %v2285_v26  ;;  %v2287_v36 = vrot.slane %v2285_v26, 4 }
  0x4e   : > { %v1719_v37 = vmax.bf16 %v3136_v62, %v1654_v27  ;;  %v1806_v38 = vrot.slane %v1805_v28, 4  ;;  %v442_v39 = vrot.slane %v440_v31, 4  ;;  %v443_v40 = vshll.u32 %v3569_v19, 16 }
  0x4f   : > { %v1801_v42 = vsel %vm3472_vm5, %v1796_v34, %v1800_v21  ;;  %v2289_v43 = vsel %vm3460_vm4, %v2287_v36, %v2288_v29  ;;  %v449_v44 = vshll.u32 %v191_v30, 16  ;;  %v453_v45 = vshrl.u32 %v191_v30, 16 }
  0x50   : > { %v1811_v47 = vsel %vm3472_vm5, %v1806_v38, %v1810_v10  ;;  %v2182_v48 = vmax.bf16 %v1801_v42, %v1718_v32  ;;  %v445_v49 = vrot.slane %v443_v40, 5  ;;  %v459_v50 = vshll.u32 %v213_v24, 16 }
  0x51   : > { %v2183_v51 = vmax.bf16 %v1811_v47, %v1719_v37  ;;  %v451_v52 = vrot.slane %v449_v44, 5  ;;  %v455_v53 = vrot.slane %v453_v45, 4  ;;  %v3046_v55 = vrot.slane %v680_v41, 9 }
  0x52   : > { %v2422_v56 = vmax.bf16 %v2286_v35, %v2182_v48  ;;  %v446_v57 = vor.u32 %v445_v49, %v442_v39  ;;  %v461_v58 = vrot.slane %v459_v50, 5  ;;  %v803_v60 = vrot.slane %v191_v30, 5  ;;  %v3152_v35 = vld [vmem:[%s3452_s25 + $0x88] sm:$0xf]  ;;  %v3190_v39 = vld [vmem:[%s3452_s25 + $0x84] sm:$0xe] }
  0x53   : > { %v2423_v62 = vmax.bf16 %v2289_v43, %v2183_v51  ;;  %v456_v63 = vor.u32 %v455_v53, %v451_v52  ;;  %v806_v0 = vrot.slane %v213_v24, 5  ;;  %v1212_v54 = vshrl.u32 %v3071_v46, 16 }
  0x54   : > { %v447_v1 = vrot.slane %v446_v57, 4  ;;  %v804_v59 = vsel %vm3460_vm4, %v3046_v55, %v803_v60  ;;  %v805_v2 = vrot.slane %v803_v60, 4  ;;  %v1215_v4 = vshll.u32 %v3071_v46, 16 }
  0x55   : > { %v3215_v5 = vcombine.low %v2422_v56, %v2423_v62  ;;  %v457_v6 = vrot.slane %v456_v63, 4  ;;  %v1214_v7 = vrot.slane %v1212_v54, 4  ;;  %v1221_v8 = vshll.u32 %v3072_v61, 16  ;;  %v177_v63 = vld [vmem:[%s3452_s25 + $0x1c] sm:$0xf] }
  0x56   : > { %v452_v11 = vsel %vm3472_vm5, %v447_v1, %v451_v52  ;;  %v807_v13 = vsel %vm3460_vm4, %v805_v2, %v806_v0  ;;  %v1217_v14 = vrot.slane %v1215_v4, 5  ;;  %v1225_v15 = vshrl.u32 %v3072_v61, 16  ;;  %v176_v52 = vld [vmem:[%s3452_s25 + $0x18] sm:$0xf] }
  0x57   : > { %3346 = vmatmul.mubr.msk.bf16.vlgmr.msra.gmra.mrb[0].mxu0 %vm2571_vm6, %v3215_v5  ;;  %v462_v16 = vsel %vm3472_vm5, %v457_v6, %v461_v58  ;;  %v657_v18 = vmax.bf16 %v452_v11, %v3569_v19  ;;  %v1223_v20 = vrot.slane %v1221_v8, 5  ;;  %v1231_v21 = vshll.u32 %v3094_v3, 16  ;;  %v206_v5 = vld [vmem:[%s3452_s25 + $0x20] sm:$0x1] }
  0x58   : > { %v658_v17 = vmax.bf16 %v462_v16, %v191_v30  ;;  %v1218_v22 = vor.u32 %v1217_v14, %v1214_v7  ;;  %v1227_v25 = vrot.slane %v1225_v15, 4  ;;  %v3126_v10 = vrot.slane %v3110_v9, 9  ;;  %v3174_v30 = vld [vmem:[%s3452_s25 + $0x8c] sm:$0x1]  ;;  %v673_v7 = vld [vmem:[%s3452_s25 + $0x18] sm:$0xe] }
  0x59   : > { %v900_v26 = vmax.bf16 %v804_v59, %v657_v18  ;;  %v1233_v27 = vrot.slane %v1231_v21, 5  ;;  %v1572_v28 = vrot.slane %v3072_v61, 5  ;;  %v1575_v29 = vrot.slane %v3094_v3, 5 }
  0x5a   : > { %v901_v31 = vmax.bf16 %v807_v13, %v658_v17  ;;  %v1219_v32 = vrot.slane %v1218_v22, 4  ;;  %v1228_v34 = vor.u32 %v1227_v25, %v1223_v20  ;;  %v1981_v36 = vshrl.u32 %v3151_v23, 16  ;;  %v3057_v22 = vld [vmem:[%s3452_s25 + $0x24] sm:$0xf] }
  0x5b   : > { %v965_v24 = vmax.bf16 %v3071_v46, %v900_v26  ;;  %v1573_v19 = vsel %vm3460_vm4, %v3126_v10, %v1572_v28  ;;  %v1574_v37 = vrot.slane %v1572_v28, 4  ;;  %v1984_v38 = vshll.u32 %v3151_v23, 16  ;;  %v3058_v28 = vld [vmem:[%s3452_s25 + $0x28] sm:$0xf] }
  0x5c   : > { %v966_v40 = vmax.bf16 %v3072_v61, %v901_v31  ;;  %v1224_v41 = vsel %vm3472_vm5, %v1219_v32, %v1223_v20  ;;  %v1229_v42 = vrot.slane %v1228_v34, 4  ;;  %v1983_v43 = vrot.slane %v1981_v36, 4 }
  0x5d   : > { %v1429_v44 = vmax.bf16 %v1224_v41, %v965_v24  ;;  %v1576_v45 = vsel %vm3460_vm4, %v1574_v37, %v1575_v29  ;;  %v1986_v47 = vrot.slane %v1984_v38, 5  ;;  %v1990_v48 = vshll.u32 %v3152_v35, 16  ;;  %v3087_v38 = vld [vmem:[%s3452_s25 + $0x2c] sm:$0x1]  ;;  %v3103_v41 = vld [vmem:[%s3452_s25 + $0x24] sm:$0xe] }
  0x5e   : > { %v1234_v49 = vsel %vm3472_vm5, %v1229_v42, %v1233_v27  ;;  %v1994_v50 = vshrl.u32 %v3152_v35, 16  ;;  %v2000_v46 = vshll.u32 %v3174_v30, 16  ;;  %v3206_v51 = vrot.slane %v3190_v39, 9 }
  0x5f   : > { %v1430_v53 = vmax.bf16 %v1234_v49, %v966_v40  ;;  %v1669_v55 = vmax.bf16 %v1573_v19, %v1429_v44  ;;  %v1987_v56 = vor.u32 %v1986_v47, %v1983_v43  ;;  %v1992_v57 = vrot.slane %v1990_v48, 5 }
  0x60   : > { %v1996_v58 = vrot.slane %v1994_v50, 4  ;;  %v2002_v60 = vrot.slane %v2000_v46, 5  ;;  %v2341_v61 = vrot.slane %v3152_v35, 5  ;;  %v2344_v62 = vrot.slane %v3174_v30, 5 }
  0x61   : > { %v1670_v0 = vmax.bf16 %v1576_v45, %v1430_v53  ;;  %v1734_v54 = vmax.bf16 %v3151_v23, %v1669_v55  ;;  %v1988_v1 = vrot.slane %v1987_v56, 4  ;;  %v272_v59 = vshrl.u32 %v176_v52, 16 }
  0x62   : > { %v1997_v2 = vor.u32 %v1996_v58, %v1992_v57  ;;  %v2342_v3 = vsel %vm3460_vm4, %v3206_v51, %v2341_v61  ;;  %v2343_v4 = vrot.slane %v2341_v61, 4  ;;  %v275_v6 = vshll.u32 %v176_v52, 16  ;;  %v3137_v61 = vld [vmem:[%s3452_s25 + $0x30] sm:$0xf] }
  0x63   : > { %v1735_v8 = vmax.bf16 %v3152_v35, %v1670_v0  ;;  %v1993_v9 = vsel %vm3472_vm5, %v1988_v1, %v1992_v57  ;;  %v274_v11 = vrot.slane %v272_v59, 4  ;;  %v281_v13 = vshll.u32 %v177_v63, 16  ;;  %v3138_v1 = vld [vmem:[%s3452_s25 + $0x34] sm:$0xf] }
  0x64   : > { %v1998_v14 = vrot.slane %v1997_v2, 4  ;;  %v2198_v15 = vmax.bf16 %v1993_v9, %v1734_v54  ;;  %v2345_v16 = vsel %vm3460_vm4, %v2343_v4, %v2344_v62  ;;  %v277_v18 = vrot.slane %v275_v6, 5 }
  0x65   : > { %v283_v20 = vrot.slane %v281_v13, 5  ;;  %v285_v21 = vshrl.u32 %v177_v63, 16  ;;  %v291_v23 = vshll.u32 %v206_v5, 16  ;;  %v3039_v17 = vrot.slane %v673_v7, 9  ;;  %v3167_v7 = vld [vmem:[%s3452_s25 + $0x38] sm:$0x1] }
  0x66   : > { %v2003_v25 = vsel %vm3472_vm5, %v1998_v14, %v2002_v60  ;;  %v2438_v10 = vmax.bf16 %v2342_v3, %v2198_v15  ;;  %v278_v26 = vor.u32 %v277_v18, %v274_v11  ;;  %v754_v27 = vrot.slane %v177_v63, 5  ;;  %v3183_v15 = vld [vmem:[%s3452_s25 + $0x30] sm:$0xe] }
  0x67   : > { %v2199_v29 = vmax.bf16 %v2003_v25, %v1735_v8  ;;  %v287_v31 = vrot.slane %v285_v21, 4  ;;  %v293_v32 = vrot.slane %v291_v23, 5  ;;  %v757_v34 = vrot.slane %v206_v5, 5 }
  0x68   : > { %v279_v35 = vrot.slane %v278_v26, 4  ;;  %v755_v36 = vsel %vm3460_vm4, %v3039_v17, %v754_v27  ;;  %v756_v24 = vrot.slane %v754_v27, 4  ;;  %v1044_v19 = vshrl.u32 %v3057_v22, 16 }
  0x69   : > { %v2439_v37 = vmax.bf16 %v2345_v16, %v2199_v29  ;;  %v288_v30 = vor.u32 %v287_v31, %v283_v20  ;;  %v1047_v39 = vshll.u32 %v3057_v22, 16  ;;  %v1053_v40 = vshll.u32 %v3058_v28, 16  ;;  %v192_v31 = vld [vmem:[%s3452_s25 + $0x78] sm:$0xf] }
  0x6a   : > { %v284_v42 = vsel %vm3472_vm5, %v279_v35, %v283_v20  ;;  %v758_v43 = vsel %vm3460_vm4, %v756_v24, %v757_v34  ;;  %v1046_v44 = vrot.slane %v1044_v19, 4  ;;  %v1057_v45 = vshrl.u32 %v3058_v28, 16 }
  0x6b   : > { %v3223_v47 = vcombine.low %v2438_v10, %v2439_v37  ;;  %v289_v48 = vrot.slane %v288_v30, 4  ;;  %v643_v49 = vmax.bf16 %v284_v42, %v176_v52  ;;  %v1049_v50 = vrot.slane %v1047_v39, 5 }
  0x6c   : > { %v1055_v46 = vrot.slane %v1053_v40, 5  ;;  %v1059_v51 = vrot.slane %v1057_v45, 4  ;;  %v1063_v53 = vshll.u32 %v3087_v38, 16  ;;  %v3119_v55 = vrot.slane %v3103_v41, 9 }
  0x6d   : > { %3362 = vmatmul.mubr.msk.bf16.vlgmr.msra.gmra.mrb[0].mxu1 %vm2571_vm6, %v3223_v47  ;;  %v294_v56 = vsel %vm3472_vm5, %v289_v48, %v293_v32  ;;  %v886_v57 = vmax.bf16 %v755_v36, %v643_v49  ;;  %v1050_v58 = vor.u32 %v1049_v50, %v1046_v44  ;;  %v1523_v60 = vrot.slane %v3058_v28, 5  ;;  %v193_v36 = vld [vmem:[%s3452_s25 + $0x7c] sm:$0xf]  ;;  %v214_v44 = vld [vmem:[%s3452_s25 + $0x80] sm:$0x1] }
  0x6e   : > { %v644_v62 = vmax.bf16 %v294_v56, %v177_v63  ;;  %v1060_v0 = vor.u32 %v1059_v51, %v1055_v46  ;;  %v1065_v54 = vrot.slane %v1063_v53, 5  ;;  %v1526_v52 = vrot.slane %v3087_v38, 5  ;;  %v681_v48 = vld [vmem:[%s3452_s25 + $0x78] sm:$0xe] }
  0x6f   : > { %v951_v59 = vmax.bf16 %v3057_v22, %v886_v57  ;;  %v1051_v2 = vrot.slane %v1050_v58, 4  ;;  %v1524_v3 = vsel %vm3460_vm4, %v3119_v55, %v1523_v60  ;;  %v1525_v4 = vrot.slane %v1523_v60, 4 }
  0x70   : > { %v887_v5 = vmax.bf16 %v758_v43, %v644_v62  ;;  %v1061_v6 = vrot.slane %v1060_v0, 4  ;;  %v1813_v8 = vshrl.u32 %v3137_v61, 16  ;;  %v1816_v9 = vshll.u32 %v3137_v61, 16  ;;  %v3073_v0 = vld [vmem:[%s3452_s25 + $0x84] sm:$0xf] }
  0x71   : > { %v1056_v11 = vsel %vm3472_vm5, %v1051_v2, %v1055_v46  ;;  %v1527_v63 = vsel %vm3460_vm4, %v1525_v4, %v1526_v52  ;;  %v1822_v13 = vshll.u32 %v3138_v1, 16  ;;  %v1826_v14 = vshrl.u32 %v3138_v1, 16  ;;  %v3074_v2 = vld [vmem:[%s3452_s25 + $0x88] sm:$0xf] }
  0x72   : > { %v952_v16 = vmax.bf16 %v3058_v28, %v887_v5  ;;  %v1066_v18 = vsel %vm3472_vm5, %v1061_v6, %v1065_v54  ;;  %v1415_v20 = vmax.bf16 %v1056_v11, %v951_v59  ;;  %v1815_v21 = vrot.slane %v1813_v8, 4 }
  0x73   : > { %v1818_v23 = vrot.slane %v1816_v9, 5  ;;  %v1824_v17 = vrot.slane %v1822_v13, 5  ;;  %v1828_v22 = vrot.slane %v1826_v14, 4  ;;  %v1832_v25 = vshll.u32 %v3167_v7, 16  ;;  %v3095_v9 = vld [vmem:[%s3452_s25 + $0x8c] sm:$0x1] }
  0x74   : > { %v1416_v10 = vmax.bf16 %v1066_v18, %v952_v16  ;;  %v1655_v26 = vmax.bf16 %v1524_v3, %v1415_v20  ;;  %v3199_v27 = vrot.slane %v3183_v15, 9  ;;  %v2292_v29 = vrot.slane %v3138_v1, 5  ;;  %v3111_v18 = vld [vmem:[%s3452_s25 + $0x84] sm:$0xe] }
  0x75   : > { %v1819_v32 = vor.u32 %v1818_v23, %v1815_v21  ;;  %v1829_v34 = vor.u32 %v1828_v22, %v1824_v17  ;;  %v1834_v35 = vrot.slane %v1832_v25, 5  ;;  %v2295_v28 = vrot.slane %v3167_v7, 5 }
  0x76   : > { %v1656_v24 = vmax.bf16 %v1527_v63, %v1416_v10  ;;  %v1720_v19 = vmax.bf16 %v3137_v61, %v1655_v26  ;;  %v2293_v37 = vsel %vm3460_vm4, %v3199_v27, %v2292_v29  ;;  %v2294_v30 = vrot.slane %v2292_v29, 4 }
  0x77   : > { %v1820_v38 = vrot.slane %v1819_v32, 4  ;;  %v1830_v39 = vrot.slane %v1829_v34, 4  ;;  %v464_v40 = vshrl.u32 %v192_v31, 16  ;;  %v467_v41 = vshll.u32 %v192_v31, 16 }
  0x78   : > { %v1721_v42 = vmax.bf16 %v3138_v1, %v1656_v24  ;;  %v2296_v43 = vsel %vm3460_vm4, %v2294_v30, %v2295_v28  ;;  %v473_v45 = vshll.u32 %v193_v36, 16  ;;  %v477_v47 = vshrl.u32 %v193_v36, 16  ;;  %v3154_v30 = vld [vmem:[%s3452_s25 + $0x94] sm:$0xf] }
  0x79   : > { %v1825_v49 = vsel %vm3472_vm5, %v1820_v38, %v1824_v17  ;;  %v1835_v50 = vsel %vm3472_vm5, %v1830_v39, %v1834_v35  ;;  %v466_v46 = vrot.slane %v464_v40, 4  ;;  %v469_v51 = vrot.slane %v467_v41, 5  ;;  %v3153_v35 = vld [vmem:[%s3452_s25 + $0x90] sm:$0xf] }
  0x7a   : > { %v2184_v53 = vmax.bf16 %v1825_v49, %v1720_v19  ;;  %v2185_v55 = vmax.bf16 %v1835_v50, %v1721_v42  ;;  %v475_v56 = vrot.slane %v473_v45, 5  ;;  %v479_v57 = vrot.slane %v477_v47, 4  ;;  %v3175_v42 = vld [vmem:[%s3452_s25 + $0x98] sm:$0x1]  ;;  %v3191_v50 = vld [vmem:[%s3452_s25 + $0x90] sm:$0xe] }
  0x7b   : > { %v470_v58 = vor.u32 %v469_v51, %v466_v46  ;;  %v483_v60 = vshll.u32 %v214_v44, 16  ;;  %v3047_v61 = vrot.slane %v681_v48, 9  ;;  %v810_v62 = vrot.slane %v193_v36, 5 }
  0x7c   : > { %v2424_v54 = vmax.bf16 %v2293_v37, %v2184_v53  ;;  %v2425_v52 = vmax.bf16 %v2296_v43, %v2185_v55  ;;  %v480_v1 = vor.u32 %v479_v57, %v475_v56  ;;  %v813_v59 = vrot.slane %v214_v44, 5 }
  0x7d   : > { %v471_v3 = vrot.slane %v470_v58, 4  ;;  %v485_v4 = vrot.slane %v483_v60, 5  ;;  %v811_v5 = vsel %vm3460_vm4, %v3047_v61, %v810_v62  ;;  %v812_v6 = vrot.slane %v810_v62, 4 }
  0x7e   : > { %v3216_v7 = vcombine.low %v2424_v54, %v2425_v52  ;;  %v481_v8 = vrot.slane %v480_v1, 4  ;;  %v1236_v11 = vshrl.u32 %v3073_v0, 16  ;;  %v1239_v63 = vshll.u32 %v3073_v0, 16  ;;  %v178_v52 = vld [vmem:[%s3452_s25 + $0x24] sm:$0xf] }
  0x7f   : > { %v476_v13 = vsel %vm3472_vm5, %v471_v3, %v475_v56  ;;  %v814_v14 = vsel %vm3460_vm4, %v812_v6, %v813_v59  ;;  %v1245_v15 = vshll.u32 %v3074_v2, 16  ;;  %v1249_v16 = vshrl.u32 %v3074_v2, 16 }
  0x80   : > { %3349 = vmatprep.mubr.msk.bf16.mxu0 %vm2571_vm6, %v3216_v7  ;;  %v486_v20 = vsel %vm3472_vm5, %v481_v8, %v485_v4  ;;  %v659_v21 = vmax.bf16 %v476_v13, %v192_v31  ;;  %v1238_v23 = vrot.slane %v1236_v11, 4  ;;  %v1241_v17 = vrot.slane %v1239_v63, 5  ;;  %v179_v4 = vld [vmem:[%s3452_s25 + $0x28] sm:$0xf]  ;;  %v207_v63 = vld [vmem:[%s3452_s25 + $0x2c] sm:$0x1] }
  0x81   : > { %v660_v22 = vmax.bf16 %v486_v20, %v193_v36  ;;  %v1247_v25 = vrot.slane %v1245_v15, 5  ;;  %v1251_v10 = vrot.slane %v1249_v16, 4  ;;  %v1255_v26 = vshll.u32 %v3095_v9, 16 }
  0x82   : > { %v902_v27 = vmax.bf16 %v811_v5, %v659_v21  ;;  %v1242_v29 = vor.u32 %v1241_v17, %v1238_v23  ;;  %v3127_v32 = vrot.slane %v3111_v18, 9  ;;  %v1579_v34 = vrot.slane %v3074_v2, 5  ;;  %v674_v21 = vld [vmem:[%s3452_s25 + $0x24] sm:$0xe] }
  0x83   : > { %v903_v28 = vmax.bf16 %v814_v14, %v660_v22  ;;  %v1252_v24 = vor.u32 %v1251_v10, %v1247_v25  ;;  %v1257_v19 = vrot.slane %v1255_v26, 5  ;;  %v1582_v37 = vrot.slane %v3095_v9, 5 }
  0x84   : > { %v967_v31 = vmax.bf16 %v3073_v0, %v902_v27  ;;  %v1243_v38 = vrot.slane %v1242_v29, 4  ;;  %v1580_v36 = vsel %vm3460_vm4, %v3127_v32, %v1579_v34  ;;  %v1581_v39 = vrot.slane %v1579_v34, 4  ;;  %v3059_v32 = vld [vmem:[%s3452_s25 + $0x30] sm:$0xf] }
  0x85   : > { %v968_v40 = vmax.bf16 %v3074_v2, %v903_v28  ;;  %v1253_v41 = vrot.slane %v1252_v24, 4  ;;  %v2005_v43 = vshrl.u32 %v3153_v35, 16  ;;  %v2008_v44 = vshll.u32 %v3153_v35, 16 }
  0x86   : > { %v1248_v45 = vsel %vm3472_vm5, %v1243_v38, %v1247_v25  ;;  %v1583_v47 = vsel %vm3460_vm4, %v1581_v39, %v1582_v37  ;;  %v2014_v48 = vshll.u32 %v3154_v30, 16  ;;  %v2018_v49 = vshrl.u32 %v3154_v30, 16 }
  0x87   : > { %v1258_v46 = vsel %vm3472_vm5, %v1253_v41, %v1257_v19  ;;  %v1431_v51 = vmax.bf16 %v1248_v45, %v967_v31  ;;  %v2007_v53 = vrot.slane %v2005_v43, 4  ;;  %v2010_v55 = vrot.slane %v2008_v44, 5  ;;  %v3060_v19 = vld [vmem:[%s3452_s25 + $0x34] sm:$0xf]  ;;  %v3088_v41 = vld [vmem:[%s3452_s25 + $0x38] sm:$0x1] }
  0x88   : > { %v1432_v56 = vmax.bf16 %v1258_v46, %v968_v40  ;;  %v2016_v57 = vrot.slane %v2014_v48, 5  ;;  %v2020_v58 = vrot.slane %v2018_v49, 4  ;;  %v2024_v60 = vshll.u32 %v3175_v42, 16  ;;  %v3104_v48 = vld [vmem:[%s3452_s25 + $0x30] sm:$0xe] }
  0x89   : > { %v1671_v61 = vmax.bf16 %v1580_v36, %v1431_v51  ;;  %v2011_v62 = vor.u32 %v2010_v55, %v2007_v53  ;;  %v3207_v0 = vrot.slane %v3191_v50, 9  ;;  %v2348_v54 = vrot.slane %v3154_v30, 5 }
  0x8a   : > { %v1672_v1 = vmax.bf16 %v1583_v47, %v1432_v56  ;;  %v2021_v59 = vor.u32 %v2020_v58, %v2016_v57  ;;  %v2026_v2 = vrot.slane %v2024_v60, 5  ;;  %v2351_v3 = vrot.slane %v3175_v42, 5  ;;  %v3139_v58 = vld [vmem:[%s3452_s25 + $0x3c] sm:$0xf] }
  0x8b   : > { %v1736_v5 = vmax.bf16 %v3153_v35, %v1671_v61  ;;  %v2012_v6 = vrot.slane %v2011_v62, 4  ;;  %v2349_v7 = vsel %vm3460_vm4, %v3207_v0, %v2348_v54  ;;  %v2350_v8 = vrot.slane %v2348_v54, 4 }
  0x8c   : > { %v1737_v9 = vmax.bf16 %v3154_v30, %v1672_v1  ;;  %v2022_v11 = vrot.slane %v2021_v59, 4  ;;  %v296_v13 = vshrl.u32 %v178_v52, 16  ;;  %v299_v14 = vshll.u32 %v178_v52, 16 }
  0x8d   : > { %v2017_v15 = vsel %vm3472_vm5, %v2012_v6, %v2016_v57  ;;  %v2352_v16 = vsel %vm3460_vm4, %v2350_v8, %v2351_v3  ;;  %v305_v18 = vshll.u32 %v179_v4, 16  ;;  %v309_v20 = vshrl.u32 %v179_v4, 16 }
  0x8e   : > { %v2027_v23 = vsel %vm3472_vm5, %v2022_v11, %v2026_v2  ;;  %v2200_v17 = vmax.bf16 %v2017_v15, %v1736_v5  ;;  %v298_v22 = vrot.slane %v296_v13, 4  ;;  %v301_v25 = vrot.slane %v299_v14, 5 }
  0x8f   : > { %v2201_v10 = vmax.bf16 %v2027_v23, %v1737_v9  ;;  %v307_v26 = vrot.slane %v305_v18, 5  ;;  %v311_v27 = vrot.slane %v309_v20, 4  ;;  %v315_v29 = vshll.u32 %v207_v63, 16  ;;  %v3184_v18 = vld [vmem:[%s3452_s25 + $0x3c] sm:$0xe] }
  0x90   : > { %v2440_v34 = vmax.bf16 %v2349_v7, %v2200_v17  ;;  %v302_v35 = vor.u32 %v301_v25, %v298_v22  ;;  %v3040_v28 = vrot.slane %v674_v21, 9  ;;  %v761_v24 = vrot.slane %v179_v4, 5  ;;  %v3140_v7 = vld [vmem:[%s3452_s25 + $0x40] sm:$0xf] }
  0x91   : > { %v2441_v37 = vmax.bf16 %v2352_v16, %v2201_v10  ;;  %v312_v30 = vor.u32 %v311_v27, %v307_v26  ;;  %v317_v31 = vrot.slane %v315_v29, 5  ;;  %v764_v38 = vrot.slane %v207_v63, 5  ;;  %v3168_v63 = vld [vmem:[%s3452_s25 + $0x44] sm:$0x1] }
  0x92   : > { %v303_v36 = vrot.slane %v302_v35, 4  ;;  %v762_v39 = vsel %vm3460_vm4, %v3040_v28, %v761_v24  ;;  %v763_v40 = vrot.slane %v761_v24, 4  ;;  %v1068_v42 = vshrl.u32 %v3059_v32, 16  ;;  %v3722_v27 = vld [vmem:[%s3452_s25 + $0x84] sm:$0xf] }
  0x93   : > { %v3224_v43 = vcombine.low %v2440_v34, %v2441_v37  ;;  %v313_v44 = vrot.slane %v312_v30, 4  ;;  %v1071_v45 = vshll.u32 %v3059_v32, 16  ;;  %v1077_v47 = vshll.u32 %v3060_v19, 16 }
  0x94   : > { %v308_v49 = vsel %vm3472_vm5, %v303_v36, %v307_v26  ;;  %v765_v50 = vsel %vm3460_vm4, %v763_v40, %v764_v38  ;;  %v1070_v46 = vrot.slane %v1068_v42, 4  ;;  %v1081_v51 = vshrl.u32 %v3060_v19, 16  ;;  %v195_v36 = vld [vmem:[%s3452_s25 + $0x88] sm:$0xf] }
  0x95   : > { %3365 = vmatprep.mubr.msk.bf16.mxu1 %vm2571_vm6, %v3224_v43  ;;  %v318_v53 = vsel %vm3472_vm5, %v313_v44, %v317_v31  ;;  %v645_v55 = vmax.bf16 %v308_v49, %v178_v52  ;;  %v1073_v56 = vrot.slane %v1071_v45, 5  ;;  %v1079_v57 = vrot.slane %v1077_v47, 5  ;;  %v215_v44 = vld [vmem:[%s3452_s25 + $0x8c] sm:$0x1] }
  0x96   : > { %v646_v60 = vmax.bf16 %v318_v53, %v179_v4  ;;  %v1083_v61 = vrot.slane %v1081_v51, 4  ;;  %v1087_v62 = vshll.u32 %v3088_v41, 16  ;;  %v3120_v0 = vrot.slane %v3104_v48, 9 }
  0x97   : > { %v888_v54 = vmax.bf16 %v762_v39, %v645_v55  ;;  %v1074_v1 = vor.u32 %v1073_v56, %v1070_v46  ;;  %v1530_v59 = vrot.slane %v3060_v19, 5  ;;  %v1533_v2 = vrot.slane %v3088_v41, 5 }
  0x98   : > { %v889_v3 = vmax.bf16 %v765_v50, %v646_v60  ;;  %v1084_v5 = vor.u32 %v1083_v61, %v1079_v57  ;;  %v1089_v6 = vrot.slane %v1087_v62, 5  ;;  %v1837_v8 = vshrl.u32 %v3139_v58, 16  ;;  %v682_v50 = vld [vmem:[%s3452_s25 + $0x84] sm:$0xe]  ;;  %v3075_v61 = vld [vmem:[%s3452_s25 + $0x90] sm:$0xf] }
  0x99   : > { %v953_v9 = vmax.bf16 %v3059_v32, %v888_v54  ;;  %v1075_v52 = vrot.slane %v1074_v1, 4  ;;  %v1531_v11 = vsel %vm3460_vm4, %v3120_v0, %v1530_v59  ;;  %v1532_v4 = vrot.slane %v1530_v59, 4 }
  0x9a   : > { %v954_v13 = vmax.bf16 %v3060_v19, %v889_v3  ;;  %v1085_v14 = vrot.slane %v1084_v5, 4  ;;  %v1839_v15 = vrot.slane %v1837_v8, 4  ;;  %v1840_v16 = vshll.u32 %v3139_v58, 16 }
  0x9b   : > { %v1080_v20 = vsel %vm3472_vm5, %v1075_v52, %v1079_v57  ;;  %v1534_v21 = vsel %vm3460_vm4, %v1532_v4, %v1533_v2  ;;  %v1846_v23 = vshll.u32 %v3140_v7, 16  ;;  %v1850_v17 = vshrl.u32 %v3140_v7, 16 }
  0x9c   : > { %v1090_v22 = vsel %vm3472_vm5, %v1085_v14, %v1089_v6  ;;  %v1417_v25 = vmax.bf16 %v1080_v20, %v953_v9  ;;  %v1842_v10 = vrot.slane %v1840_v16, 5  ;;  %v1856_v26 = vshll.u32 %v3168_v63, 16  ;;  %v3076_v6 = vld [vmem:[%s3452_s25 + $0x94] sm:$0xf] }
  0x9d   : > { %v1418_v29 = vmax.bf16 %v1090_v22, %v954_v13  ;;  %v1848_v32 = vrot.slane %v1846_v23, 5  ;;  %v1852_v34 = vrot.slane %v1850_v17, 4  ;;  %v3200_v35 = vrot.slane %v3184_v18, 9  ;;  %v3096_v13 = vld [vmem:[%s3452_s25 + $0x98] sm:$0x1] }
  0x9e   : > { %v1657_v28 = vmax.bf16 %v1531_v11, %v1417_v25  ;;  %v1843_v24 = vor.u32 %v1842_v10, %v1839_v15  ;;  %v1858_v19 = vrot.slane %v1856_v26, 5  ;;  %v2299_v37 = vrot.slane %v3140_v7, 5 }
  0x9f   : > { %v1658_v30 = vmax.bf16 %v1534_v21, %v1418_v29  ;;  %v1853_v31 = vor.u32 %v1852_v34, %v1848_v32  ;;  %v2302_v38 = vrot.slane %v3168_v63, 5  ;;  %v488_v39 = vshrl.u32 %v3722_v27, 16  ;;  %v3112_v21 = vld [vmem:[%s3452_s25 + $0x90] sm:$0xe]  ;;  %v3155_v34 = vld [vmem:[%s3452_s25 + $0x9c] sm:$0xf] }
  0xa0   : > { %v1722_v40 = vmax.bf16 %v3139_v58, %v1657_v28  ;;  %v1844_v41 = vrot.slane %v1843_v24, 4  ;;  %v2300_v42 = vsel %vm3460_vm4, %v3200_v35, %v2299_v37  ;;  %v2301_v43 = vrot.slane %v2299_v37, 4 }
  0xa1   : > { %v1723_v45 = vmax.bf16 %v3140_v7, %v1658_v30  ;;  %v1854_v47 = vrot.slane %v1853_v31, 4  ;;  %v490_v48 = vrot.slane %v488_v39, 4  ;;  %v491_v49 = vshll.u32 %v3722_v27, 16 }
  0xa2   : > { %v1849_v46 = vsel %vm3472_vm5, %v1844_v41, %v1848_v32  ;;  %v2303_v51 = vsel %vm3460_vm4, %v2301_v43, %v2302_v38  ;;  %v497_v53 = vshll.u32 %v195_v36, 16  ;;  %v501_v55 = vshrl.u32 %v195_v36, 16 }
  0xa3   : > { %v1859_v56 = vsel %vm3472_vm5, %v1854_v47, %v1858_v19  ;;  %v2186_v57 = vmax.bf16 %v1849_v46, %v1722_v40  ;;  %v493_v58 = vrot.slane %v491_v49, 5  ;;  %v507_v60 = vshll.u32 %v215_v44, 16 }
  0xa4   : > { %v2187_v62 = vmax.bf16 %v1859_v56, %v1723_v45  ;;  %v499_v0 = vrot.slane %v497_v53, 5  ;;  %v503_v54 = vrot.slane %v501_v55, 4  ;;  %v3048_v1 = vrot.slane %v682_v50, 9 }
  0xa5   : > { %v2426_v59 = vmax.bf16 %v2300_v42, %v2186_v57  ;;  %v494_v2 = vor.u32 %v493_v58, %v490_v48  ;;  %v509_v3 = vrot.slane %v507_v60, 5  ;;  %v817_v5 = vrot.slane %v195_v36, 5  ;;  %v3156_v42 = vld [vmem:[%s3452_s25 + $0xa0] sm:$0xf]  ;;  %v3192_v48 = vld [vmem:[%s3452_s25 + $0x9c] sm:$0xe] }
  0xa6   : > { %v2427_v7 = vmax.bf16 %v2303_v51, %v2187_v62  ;;  %v504_v8 = vor.u32 %v503_v54, %v499_v0  ;;  %v820_v9 = vrot.slane %v215_v44, 5  ;;  %v1260_v52 = vshrl.u32 %v3075_v61, 16 }
  0xa7   : > { %v495_v11 = vrot.slane %v494_v2, 4  ;;  %v818_v4 = vsel %vm3460_vm4, %v3048_v1, %v817_v5  ;;  %v819_v63 = vrot.slane %v817_v5, 4  ;;  %v1263_v14 = vshll.u32 %v3075_v61, 16 }
  0xa8   : > { %v3217_v15 = vcombine.low %v2426_v59, %v2427_v7  ;;  %v505_v16 = vrot.slane %v504_v8, 4  ;;  %v1262_v18 = vrot.slane %v1260_v52, 4  ;;  %v1269_v20 = vshll.u32 %v3076_v6, 16  ;;  %v181_v8 = vld [vmem:[%s3452_s25 + $0x34] sm:$0xf] }
  0xa9   : > { %v500_v23 = vsel %vm3472_vm5, %v495_v11, %v499_v0  ;;  %v821_v17 = vsel %vm3460_vm4, %v819_v63, %v820_v9  ;;  %v1265_v22 = vrot.slane %v1263_v14, 5  ;;  %v1273_v25 = vshrl.u32 %v3076_v6, 16  ;;  %v180_v0 = vld [vmem:[%s3452_s25 + $0x30] sm:$0xf] }
  0xaa   : > { %3350 = vmatmul.mubr.msk.bf16.gmra.mrb[4].mxu0 %vm2571_vm6, %v3217_v15  ;;  %v510_v10 = vsel %vm3472_vm5, %v505_v16, %v509_v3  ;;  %v661_v26 = vmax.bf16 %v500_v23, %v3722_v27  ;;  %v1271_v29 = vrot.slane %v1269_v20, 5  ;;  %v1279_v32 = vshll.u32 %v3096_v13, 16  ;;  %v208_v15 = vld [vmem:[%s3452_s25 + $0x38] sm:$0x1] }
  0xab   : > { %v662_v35 = vmax.bf16 %v510_v10, %v195_v36  ;;  %v1266_v28 = vor.u32 %v1265_v22, %v1262_v18  ;;  %v1275_v24 = vrot.slane %v1273_v25, 4  ;;  %v3128_v19 = vrot.slane %v3112_v21, 9  ;;  %v3176_v36 = vld [vmem:[%s3452_s25 + $0xa4] sm:$0x1]  ;;  %v675_v18 = vld [vmem:[%s3452_s25 + $0x30] sm:$0xe] }
  0xac   : > { %v904_v37 = vmax.bf16 %v818_v4, %v661_v26  ;;  %v1281_v30 = vrot.slane %v1279_v32, 5  ;;  %v1586_v31 = vrot.slane %v3076_v6, 5  ;;  %v1589_v38 = vrot.slane %v3096_v13, 5 }
  0xad   : > { %v905_v39 = vmax.bf16 %v821_v17, %v662_v35  ;;  %v1267_v40 = vrot.slane %v1266_v28, 4  ;;  %v1276_v41 = vor.u32 %v1275_v24, %v1271_v29  ;;  %v2029_v43 = vshrl.u32 %v3155_v34, 16  ;;  %v3061_v28 = vld [vmem:[%s3452_s25 + $0x3c] sm:$0xf] }
  0xae   : > { %v969_v44 = vmax.bf16 %v3075_v61, %v904_v37  ;;  %v1587_v27 = vsel %vm3460_vm4, %v3128_v19, %v1586_v31  ;;  %v1588_v45 = vrot.slane %v1586_v31, 4  ;;  %v2032_v47 = vshll.u32 %v3155_v34, 16  ;;  %v3062_v31 = vld [vmem:[%s3452_s25 + $0x40] sm:$0xf] }
  0xaf   : > { %v970_v49 = vmax.bf16 %v3076_v6, %v905_v39  ;;  %v1272_v50 = vsel %vm3472_vm5, %v1267_v40, %v1271_v29  ;;  %v1277_v46 = vrot.slane %v1276_v41, 4  ;;  %v2031_v51 = vrot.slane %v2029_v43, 4 }
  0xb0   : > { %v1433_v53 = vmax.bf16 %v1272_v50, %v969_v44  ;;  %v1590_v55 = vsel %vm3460_vm4, %v1588_v45, %v1589_v38  ;;  %v2034_v56 = vrot.slane %v2032_v47, 5  ;;  %v2038_v57 = vshll.u32 %v3156_v42, 16  ;;  %v3089_v47 = vld [vmem:[%s3452_s25 + $0x44] sm:$0x1]  ;;  %v3105_v50 = vld [vmem:[%s3452_s25 + $0x3c] sm:$0xe] }
  0xb1   : > { %v1282_v58 = vsel %vm3472_vm5, %v1277_v46, %v1281_v30  ;;  %v2042_v60 = vshrl.u32 %v3156_v42, 16  ;;  %v2048_v61 = vshll.u32 %v3176_v36, 16  ;;  %v3208_v62 = vrot.slane %v3192_v48, 9 }
  0xb2   : > { %v1434_v54 = vmax.bf16 %v1282_v58, %v970_v49  ;;  %v1673_v1 = vmax.bf16 %v1587_v27, %v1433_v53  ;;  %v2035_v59 = vor.u32 %v2034_v56, %v2031_v51  ;;  %v2040_v2 = vrot.slane %v2038_v57, 5 }
  0xb3   : > { %v2044_v3 = vrot.slane %v2042_v60, 4  ;;  %v2050_v5 = vrot.slane %v2048_v61, 5  ;;  %v2355_v6 = vrot.slane %v3156_v42, 5  ;;  %v2358_v7 = vrot.slane %v3176_v36, 5 }
  0xb4   : > { %v1674_v9 = vmax.bf16 %v1590_v55, %v1434_v54  ;;  %v1738_v52 = vmax.bf16 %v3155_v34, %v1673_v1  ;;  %v2036_v11 = vrot.slane %v2035_v59, 4  ;;  %v320_v4 = vshrl.u32 %v180_v0, 16 }
  0xb5   : > { %v2045_v63 = vor.u32 %v2044_v3, %v2040_v2  ;;  %v2356_v13 = vsel %vm3460_vm4, %v3208_v62, %v2355_v6  ;;  %v2357_v14 = vrot.slane %v2355_v6, 4  ;;  %v323_v16 = vshll.u32 %v180_v0, 16  ;;  %v3141_v6 = vld [vmem:[%s3452_s25 + $0x48] sm:$0xf] }
  0xb6   : > { %v1739_v20 = vmax.bf16 %v3156_v42, %v1674_v9  ;;  %v2041_v21 = vsel %vm3472_vm5, %v2036_v11, %v2040_v2  ;;  %v322_v23 = vrot.slane %v320_v4, 4  ;;  %v329_v17 = vshll.u32 %v181_v8, 16  ;;  %v3142_v11 = vld [vmem:[%s3452_s25 + $0x4c] sm:$0xf] }
  0xb7   : > { %v2046_v22 = vrot.slane %v2045_v63, 4  ;;  %v2202_v25 = vmax.bf16 %v2041_v21, %v1738_v52  ;;  %v2359_v10 = vsel %vm3460_vm4, %v2357_v14, %v2358_v7  ;;  %v325_v26 = vrot.slane %v323_v16, 5 }
  0xb8   : > { %v331_v29 = vrot.slane %v329_v17, 5  ;;  %v333_v32 = vshrl.u32 %v181_v8, 16  ;;  %v339_v34 = vshll.u32 %v208_v15, 16  ;;  %v3041_v35 = vrot.slane %v675_v18, 9  ;;  %v3169_v18 = vld [vmem:[%s3452_s25 + $0x50] sm:$0x1] }
  0xb9   : > { %v2051_v24 = vsel %vm3472_vm5, %v2046_v22, %v2050_v5  ;;  %v2442_v19 = vmax.bf16 %v2356_v13, %v2202_v25  ;;  %v326_v37 = vor.u32 %v325_v26, %v322_v23  ;;  %v768_v30 = vrot.slane %v181_v8, 5  ;;  %v3185_v25 = vld [vmem:[%s3452_s25 + $0x48] sm:$0xe] }
  0xba   : > { %v2203_v38 = vmax.bf16 %v2051_v24, %v1739_v20  ;;  %v335_v39 = vrot.slane %v333_v32, 4  ;;  %v341_v40 = vrot.slane %v339_v34, 5  ;;  %v771_v41 = vrot.slane %v208_v15, 5 }
  0xbb   : > { %v327_v42 = vrot.slane %v326_v37, 4  ;;  %v769_v43 = vsel %vm3460_vm4, %v3041_v35, %v768_v30  ;;  %v770_v44 = vrot.slane %v768_v30, 4  ;;  %v1092_v27 = vshrl.u32 %v3061_v28, 16 }
  0xbc   : > { %v2443_v45 = vmax.bf16 %v2359_v10, %v2203_v38  ;;  %v336_v36 = vor.u32 %v335_v39, %v331_v29  ;;  %v1095_v48 = vshll.u32 %v3061_v28, 16  ;;  %v1101_v49 = vshll.u32 %v3062_v31, 16  ;;  %v196_v39 = vld [vmem:[%s3452_s25 + $0x90] sm:$0xf] }
  0xbd   : > { %v332_v46 = vsel %vm3472_vm5, %v327_v42, %v331_v29  ;;  %v772_v51 = vsel %vm3460_vm4, %v770_v44, %v771_v41  ;;  %v1094_v53 = vrot.slane %v1092_v27, 4  ;;  %v1105_v55 = vshrl.u32 %v3062_v31, 16 }
  0xbe   : > { %v3225_v56 = vcombine.low %v2442_v19, %v2443_v45  ;;  %v337_v57 = vrot.slane %v336_v36, 4  ;;  %v647_v58 = vmax.bf16 %v332_v46, %v180_v0  ;;  %v1097_v60 = vrot.slane %v1095_v48, 5 }
  0xbf   : > { %v1103_v61 = vrot.slane %v1101_v49, 5  ;;  %v1107_v62 = vrot.slane %v1105_v55, 4  ;;  %v1111_v54 = vshll.u32 %v3089_v47, 16  ;;  %v3121_v1 = vrot.slane %v3105_v50, 9 }
  0xc0   : > { %3366 = vmatmul.mubr.msk.bf16.gmra.mrb[4].mxu1 %vm2571_vm6, %v3225_v56  ;;  %v342_v59 = vsel %vm3472_vm5, %v337_v57, %v341_v40  ;;  %v890_v2 = vmax.bf16 %v769_v43, %v647_v58  ;;  %v1098_v3 = vor.u32 %v1097_v60, %v1094_v53  ;;  %v1537_v5 = vrot.slane %v3062_v31, 5  ;;  %v197_v43 = vld [vmem:[%s3452_s25 + $0x94] sm:$0xf]  ;;  %v216_v53 = vld [vmem:[%s3452_s25 + $0x98] sm:$0x1] }
  0xc1   : > { %v648_v7 = vmax.bf16 %v342_v59, %v181_v8  ;;  %v1108_v9 = vor.u32 %v1107_v62, %v1103_v61  ;;  %v1113_v52 = vrot.slane %v1111_v54, 5  ;;  %v1540_v0 = vrot.slane %v3089_v47, 5  ;;  %v683_v57 = vld [vmem:[%s3452_s25 + $0x90] sm:$0xe] }
  0xc2   : > { %v955_v4 = vmax.bf16 %v3061_v28, %v890_v2  ;;  %v1099_v63 = vrot.slane %v1098_v3, 4  ;;  %v1538_v13 = vsel %vm3460_vm4, %v3121_v1, %v1537_v5  ;;  %v1539_v14 = vrot.slane %v1537_v5, 4 }
  0xc3   : > { %v891_v15 = vmax.bf16 %v772_v51, %v648_v7  ;;  %v1109_v16 = vrot.slane %v1108_v9, 4  ;;  %v1861_v20 = vshrl.u32 %v3141_v6, 16  ;;  %v1864_v21 = vshll.u32 %v3141_v6, 16  ;;  %v3077_v9 = vld [vmem:[%s3452_s25 + $0x9c] sm:$0xf] }
  0xc4   : > { %v1104_v23 = vsel %vm3472_vm5, %v1099_v63, %v1103_v61  ;;  %v1541_v8 = vsel %vm3460_vm4, %v1539_v14, %v1540_v0  ;;  %v1870_v17 = vshll.u32 %v3142_v11, 16  ;;  %v1874_v22 = vshrl.u32 %v3142_v11, 16  ;;  %v3078_v63 = vld [vmem:[%s3452_s25 + $0xa0] sm:$0xf] }
  0xc5   : > { %v956_v10 = vmax.bf16 %v3062_v31, %v891_v15  ;;  %v1114_v26 = vsel %vm3472_vm5, %v1109_v16, %v1113_v52  ;;  %v1419_v29 = vmax.bf16 %v1104_v23, %v955_v4  ;;  %v1863_v32 = vrot.slane %v1861_v20, 4 }
  0xc6   : > { %v1866_v34 = vrot.slane %v1864_v21, 5  ;;  %v1872_v35 = vrot.slane %v1870_v17, 5  ;;  %v1876_v28 = vrot.slane %v1874_v22, 4  ;;  %v1880_v24 = vshll.u32 %v3169_v18, 16  ;;  %v3097_v21 = vld [vmem:[%s3452_s25 + $0xa4] sm:$0x1] }
  0xc7   : > { %v1420_v19 = vmax.bf16 %v1114_v26, %v956_v10  ;;  %v1659_v37 = vmax.bf16 %v1538_v13, %v1419_v29  ;;  %v3201_v30 = vrot.slane %v3185_v25, 9  ;;  %v2306_v38 = vrot.slane %v3142_v11, 5  ;;  %v3113_v26 = vld [vmem:[%s3452_s25 + $0x9c] sm:$0xe] }
  0xc8   : > { %v1867_v40 = vor.u32 %v1866_v34, %v1863_v32  ;;  %v1877_v41 = vor.u32 %v1876_v28, %v1872_v35  ;;  %v1882_v42 = vrot.slane %v1880_v24, 5  ;;  %v2309_v31 = vrot.slane %v3169_v18, 5 }
  0xc9   : > { %v1660_v44 = vmax.bf16 %v1541_v8, %v1420_v19  ;;  %v1724_v27 = vmax.bf16 %v3141_v6, %v1659_v37  ;;  %v2307_v45 = vsel %vm3460_vm4, %v3201_v30, %v2306_v38  ;;  %v2308_v36 = vrot.slane %v2306_v38, 4 }
  0xca   : > { %v1868_v47 = vrot.slane %v1867_v40, 4  ;;  %v1878_v48 = vrot.slane %v1877_v41, 4  ;;  %v512_v49 = vshrl.u32 %v196_v39, 16  ;;  %v515_v50 = vshll.u32 %v196_v39, 16 }
  0xcb   : > { %v1725_v46 = vmax.bf16 %v3142_v11, %v1660_v44  ;;  %v2310_v51 = vsel %vm3460_vm4, %v2308_v36, %v2309_v31  ;;  %v521_v55 = vshll.u32 %v197_v43, 16  ;;  %v525_v56 = vshrl.u32 %v197_v43, 16  ;;  %v3158_v36 = vld [vmem:[%s3452_s25 + $0xac] sm:$0xf] }
  0xcc   : > { %v1873_v58 = vsel %vm3472_vm5, %v1868_v47, %v1872_v35  ;;  %v1883_v60 = vsel %vm3472_vm5, %v1878_v48, %v1882_v42  ;;  %v514_v61 = vrot.slane %v512_v49, 4  ;;  %v517_v62 = vrot.slane %v515_v50, 5  ;;  %v3157_v42 = vld [vmem:[%s3452_s25 + $0xa8] sm:$0xf] }
  0xcd   : > { %v2188_v54 = vmax.bf16 %v1873_v58, %v1724_v27  ;;  %v2189_v1 = vmax.bf16 %v1883_v60, %v1725_v46  ;;  %v523_v59 = vrot.slane %v521_v55, 5  ;;  %v527_v2 = vrot.slane %v525_v56, 4  ;;  %v3177_v46 = vld [vmem:[%s3452_s25 + $0xb0] sm:$0x1]  ;;  %v3193_v60 = vld [vmem:[%s3452_s25 + $0xa8] sm:$0xe] }
  0xce   : > { %v518_v3 = vor.u32 %v517_v62, %v514_v61  ;;  %v531_v5 = vshll.u32 %v216_v53, 16  ;;  %v3049_v6 = vrot.slane %v683_v57, 9  ;;  %v824_v7 = vrot.slane %v197_v43, 5 }
  0xcf   : > { %v2428_v52 = vmax.bf16 %v2307_v45, %v2188_v54  ;;  %v2429_v0 = vmax.bf16 %v2310_v51, %v2189_v1  ;;  %v528_v11 = vor.u32 %v527_v2, %v523_v59  ;;  %v827_v4 = vrot.slane %v216_v53, 5 }
  0xd0   : > { %v519_v13 = vrot.slane %v518_v3, 4  ;;  %v533_v14 = vrot.slane %v531_v5, 5  ;;  %v825_v15 = vsel %vm3460_vm4, %v3049_v6, %v824_v7  ;;  %v826_v16 = vrot.slane %v824_v7, 4 }
  0xd1   : > { %v3218_v18 = vcombine.low %v2428_v52, %v2429_v0  ;;  %v529_v20 = vrot.slane %v528_v11, 4  ;;  %v1284_v23 = vshrl.u32 %v3077_v9, 16  ;;  %v1287_v8 = vshll.u32 %v3077_v9, 16  ;;  %v182_v0 = vld [vmem:[%s3452_s25 + $0x3c] sm:$0xf] }
  0xd2   : > { %v524_v17 = vsel %vm3472_vm5, %v519_v13, %v523_v59  ;;  %v828_v22 = vsel %vm3460_vm4, %v826_v16, %v827_v4  ;;  %v1293_v25 = vshll.u32 %v3078_v63, 16  ;;  %v1297_v10 = vshrl.u32 %v3078_v63, 16 }
  0xd3   : > { %3353 = vmatprep.mubr.msk.bf16.mxu0 %vm2571_vm6, %v3218_v18  ;;  %v534_v29 = vsel %vm3472_vm5, %v529_v20, %v533_v14  ;;  %v663_v32 = vmax.bf16 %v524_v17, %v196_v39  ;;  %v1286_v34 = vrot.slane %v1284_v23, 4  ;;  %v1289_v35 = vrot.slane %v1287_v8, 5  ;;  %v183_v14 = vld [vmem:[%s3452_s25 + $0x40] sm:$0xf]  ;;  %v209_v8 = vld [vmem:[%s3452_s25 + $0x44] sm:$0x1] }
  0xd4   : > { %v664_v28 = vmax.bf16 %v534_v29, %v197_v43  ;;  %v1295_v24 = vrot.slane %v1293_v25, 5  ;;  %v1299_v19 = vrot.slane %v1297_v10, 4  ;;  %v1303_v37 = vshll.u32 %v3097_v21, 16 }
  0xd5   : > { %v906_v30 = vmax.bf16 %v825_v15, %v663_v32  ;;  %v1290_v38 = vor.u32 %v1289_v35, %v1286_v34  ;;  %v3129_v40 = vrot.slane %v3113_v26, 9  ;;  %v1593_v41 = vrot.slane %v3078_v63, 5  ;;  %v676_v32 = vld [vmem:[%s3452_s25 + $0x3c] sm:$0xe] }
  0xd6   : > { %v907_v31 = vmax.bf16 %v828_v22, %v664_v28  ;;  %v1300_v44 = vor.u32 %v1299_v19, %v1295_v24  ;;  %v1305_v27 = vrot.slane %v1303_v37, 5  ;;  %v1596_v45 = vrot.slane %v3097_v21, 5 }
  0xd7   : > { %v971_v39 = vmax.bf16 %v3077_v9, %v906_v30  ;;  %v1291_v47 = vrot.slane %v1290_v38, 4  ;;  %v1594_v43 = vsel %vm3460_vm4, %v3129_v40, %v1593_v41  ;;  %v1595_v48 = vrot.slane %v1593_v41, 4  ;;  %v3063_v40 = vld [vmem:[%s3452_s25 + $0x48] sm:$0xf] }
  0xd8   : > { %v972_v49 = vmax.bf16 %v3078_v63, %v907_v31  ;;  %v1301_v50 = vrot.slane %v1300_v44, 4  ;;  %v2053_v51 = vshrl.u32 %v3157_v42, 16  ;;  %v2056_v53 = vshll.u32 %v3157_v42, 16 }
  0xd9   : > { %v1296_v55 = vsel %vm3472_vm5, %v1291_v47, %v1295_v24  ;;  %v1597_v56 = vsel %vm3460_vm4, %v1595_v48, %v1596_v45  ;;  %v2062_v57 = vshll.u32 %v3158_v36, 16  ;;  %v2066_v58 = vshrl.u32 %v3158_v36, 16 }
  0xda   : > { %v1306_v61 = vsel %vm3472_vm5, %v1301_v50, %v1305_v27  ;;  %v1435_v62 = vmax.bf16 %v1296_v55, %v971_v39  ;;  %v2055_v54 = vrot.slane %v2053_v51, 4  ;;  %v2058_v1 = vrot.slane %v2056_v53, 5  ;;  %v3064_v27 = vld [vmem:[%s3452_s25 + $0x4c] sm:$0xf]  ;;  %v3090_v50 = vld [vmem:[%s3452_s25 + $0x50] sm:$0x1] }
  0xdb   : > { %v1436_v59 = vmax.bf16 %v1306_v61, %v972_v49  ;;  %v2064_v2 = vrot.slane %v2062_v57, 5  ;;  %v2068_v3 = vrot.slane %v2066_v58, 4  ;;  %v2072_v5 = vshll.u32 %v3177_v46, 16  ;;  %v3106_v57 = vld [vmem:[%s3452_s25 + $0x48] sm:$0xe] }
  0xdc   : > { %v1675_v6 = vmax.bf16 %v1594_v43, %v1435_v62  ;;  %v2059_v7 = vor.u32 %v2058_v1, %v2055_v54  ;;  %v3209_v9 = vrot.slane %v3193_v60, 9  ;;  %v2362_v52 = vrot.slane %v3158_v36, 5 }
  0xdd   : > { %v1676_v11 = vmax.bf16 %v1597_v56, %v1436_v59  ;;  %v2069_v4 = vor.u32 %v2068_v3, %v2064_v2  ;;  %v2074_v63 = vrot.slane %v2072_v5, 5  ;;  %v2365_v13 = vrot.slane %v3177_v46, 5  ;;  %v3143_v3 = vld [vmem:[%s3452_s25 + $0x54] sm:$0xf] }
  0xde   : > { %v1740_v15 = vmax.bf16 %v3157_v42, %v1675_v6  ;;  %v2060_v16 = vrot.slane %v2059_v7, 4  ;;  %v2363_v18 = vsel %vm3460_vm4, %v3209_v9, %v2362_v52  ;;  %v2364_v20 = vrot.slane %v2362_v52, 4 }
  0xdf   : > { %v1741_v21 = vmax.bf16 %v3158_v36, %v1676_v11  ;;  %v2070_v23 = vrot.slane %v2069_v4, 4  ;;  %v344_v17 = vshrl.u32 %v182_v0, 16  ;;  %v347_v22 = vshll.u32 %v182_v0, 16 }
  0xe0   : > { %v2065_v25 = vsel %vm3472_vm5, %v2060_v16, %v2064_v2  ;;  %v2366_v10 = vsel %vm3460_vm4, %v2364_v20, %v2365_v13  ;;  %v353_v26 = vshll.u32 %v183_v14, 16  ;;  %v357_v29 = vshrl.u32 %v183_v14, 16 }
  0xe1   : > { %v2075_v34 = vsel %vm3472_vm5, %v2070_v23, %v2074_v63  ;;  %v2204_v35 = vmax.bf16 %v2065_v25, %v1740_v15  ;;  %v346_v28 = vrot.slane %v344_v17, 4  ;;  %v349_v24 = vrot.slane %v347_v22, 5 }
  0xe2   : > { %v2205_v19 = vmax.bf16 %v2075_v34, %v1741_v21  ;;  %v355_v37 = vrot.slane %v353_v26, 5  ;;  %v359_v30 = vrot.slane %v357_v29, 4  ;;  %v363_v38 = vshll.u32 %v209_v8, 16  ;;  %v3186_v26 = vld [vmem:[%s3452_s25 + $0x54] sm:$0xe] }
  0xe3   : > { %v2444_v41 = vmax.bf16 %v2363_v18, %v2204_v35  ;;  %v350_v42 = vor.u32 %v349_v24, %v346_v28  ;;  %v3042_v31 = vrot.slane %v676_v32, 9  ;;  %v775_v44 = vrot.slane %v183_v14, 5  ;;  %v3144_v18 = vld [vmem:[%s3452_s25 + $0x58] sm:$0xf] }
  0xe4   : > { %v2445_v45 = vmax.bf16 %v2366_v10, %v2205_v19  ;;  %v360_v36 = vor.u32 %v359_v30, %v355_v37  ;;  %v365_v39 = vrot.slane %v363_v38, 5  ;;  %v778_v47 = vrot.slane %v209_v8, 5  ;;  %v3170_v8 = vld [vmem:[%s3452_s25 + $0x5c] sm:$0x1] }
  0xe5   : > { %v351_v43 = vrot.slane %v350_v42, 4  ;;  %v776_v48 = vsel %vm3460_vm4, %v3042_v31, %v775_v44  ;;  %v777_v49 = vrot.slane %v775_v44, 4  ;;  %v1116_v46 = vshrl.u32 %v3063_v40, 16  ;;  %v3875_v30 = vld [vmem:[%s3452_s25 + $0x9c] sm:$0xf] }
  0xe6   : > { %v3226_v51 = vcombine.low %v2444_v41, %v2445_v45  ;;  %v361_v53 = vrot.slane %v360_v36, 4  ;;  %v1119_v55 = vshll.u32 %v3063_v40, 16  ;;  %v1125_v56 = vshll.u32 %v3064_v27, 16 }
  0xe7   : > { %v356_v58 = vsel %vm3472_vm5, %v351_v43, %v355_v37  ;;  %v779_v60 = vsel %vm3460_vm4, %v777_v49, %v778_v47  ;;  %v1118_v61 = vrot.slane %v1116_v46, 4  ;;  %v1129_v62 = vshrl.u32 %v3064_v27, 16  ;;  %v199_v43 = vld [vmem:[%s3452_s25 + $0xa0] sm:$0xf] }
  0xe8   : > { %3369 = vmatprep.mubr.msk.bf16.mxu1 %vm2571_vm6, %v3226_v51  ;;  %v366_v54 = vsel %vm3472_vm5, %v361_v53, %v365_v39  ;;  %v649_v1 = vmax.bf16 %v356_v58, %v182_v0  ;;  %v1121_v59 = vrot.slane %v1119_v55, 5  ;;  %v1127_v2 = vrot.slane %v1125_v56, 5  ;;  %v217_v53 = vld [vmem:[%s3452_s25 + $0xa4] sm:$0x1] }
  0xe9   : > { %v650_v5 = vmax.bf16 %v366_v54, %v183_v14  ;;  %v1131_v6 = vrot.slane %v1129_v62, 4  ;;  %v1135_v7 = vshll.u32 %v3090_v50, 16  ;;  %v3122_v9 = vrot.slane %v3106_v57, 9 }
  0xea   : > { %v892_v52 = vmax.bf16 %v776_v48, %v649_v1  ;;  %v1122_v11 = vor.u32 %v1121_v59, %v1118_v61  ;;  %v1544_v4 = vrot.slane %v3064_v27, 5  ;;  %v1547_v63 = vrot.slane %v3090_v50, 5 }
  0xeb   : > { %v893_v13 = vmax.bf16 %v779_v60, %v650_v5  ;;  %v1132_v15 = vor.u32 %v1131_v6, %v1127_v2  ;;  %v1137_v16 = vrot.slane %v1135_v7, 5  ;;  %v1885_v20 = vshrl.u32 %v3143_v3, 16  ;;  %v684_v60 = vld [vmem:[%s3452_s25 + $0x9c] sm:$0xe]  ;;  %v3079_v6 = vld [vmem:[%s3452_s25 + $0xa8] sm:$0xf] }
  0xec   : > { %v957_v21 = vmax.bf16 %v3063_v40, %v892_v52  ;;  %v1123_v0 = vrot.slane %v1122_v11, 4  ;;  %v1545_v23 = vsel %vm3460_vm4, %v3122_v9, %v1544_v4  ;;  %v1546_v14 = vrot.slane %v1544_v4, 4 }
  0xed   : > { %v958_v17 = vmax.bf16 %v3064_v27, %v893_v13  ;;  %v1133_v22 = vrot.slane %v1132_v15, 4  ;;  %v1887_v25 = vrot.slane %v1885_v20, 4  ;;  %v1888_v10 = vshll.u32 %v3143_v3, 16 }
  0xee   : > { %v1128_v29 = vsel %vm3472_vm5, %v1123_v0, %v1127_v2  ;;  %v1548_v32 = vsel %vm3460_vm4, %v1546_v14, %v1547_v63  ;;  %v1894_v34 = vshll.u32 %v3144_v18, 16  ;;  %v1898_v35 = vshrl.u32 %v3144_v18, 16 }
  0xef   : > { %v1138_v28 = vsel %vm3472_vm5, %v1133_v22, %v1137_v16  ;;  %v1421_v24 = vmax.bf16 %v1128_v29, %v957_v21  ;;  %v1890_v19 = vrot.slane %v1888_v10, 5  ;;  %v1904_v37 = vshll.u32 %v3170_v8, 16  ;;  %v3080_v16 = vld [vmem:[%s3452_s25 + $0xac] sm:$0xf] }
  0xf0   : > { %v1422_v38 = vmax.bf16 %v1138_v28, %v958_v17  ;;  %v1896_v40 = vrot.slane %v1894_v34, 5  ;;  %v1900_v41 = vrot.slane %v1898_v35, 4  ;;  %v3202_v42 = vrot.slane %v3186_v26, 9  ;;  %v3098_v17 = vld [vmem:[%s3452_s25 + $0xb0] sm:$0x1] }
  0xf1   : > { %v1661_v31 = vmax.bf16 %v1545_v23, %v1421_v24  ;;  %v1891_v44 = vor.u32 %v1890_v19, %v1887_v25  ;;  %v1906_v27 = vrot.slane %v1904_v37, 5  ;;  %v2313_v45 = vrot.slane %v3144_v18, 5 }
  0xf2   : > { %v1662_v36 = vmax.bf16 %v1548_v32, %v1422_v38  ;;  %v1901_v39 = vor.u32 %v1900_v41, %v1896_v40  ;;  %v2316_v47 = vrot.slane %v3170_v8, 5  ;;  %v536_v48 = vshrl.u32 %v3875_v30, 16  ;;  %v3114_v32 = vld [vmem:[%s3452_s25 + $0xa8] sm:$0xe]  ;;  %v3159_v41 = vld [vmem:[%s3452_s25 + $0xb4] sm:$0xf] }
  0xf3   : > { %v1726_v49 = vmax.bf16 %v3143_v3, %v1661_v31  ;;  %v1892_v50 = vrot.slane %v1891_v44, 4  ;;  %v2314_v46 = vsel %vm3460_vm4, %v3202_v42, %v2313_v45  ;;  %v2315_v51 = vrot.slane %v2313_v45, 4 }
  0xf4   : > { %v1727_v55 = vmax.bf16 %v3144_v18, %v1662_v36  ;;  %v1902_v56 = vrot.slane %v1901_v39, 4  ;;  %v538_v57 = vrot.slane %v536_v48, 4  ;;  %v539_v58 = vshll.u32 %v3875_v30, 16 }
  0xf5   : > { %v1897_v61 = vsel %vm3472_vm5, %v1892_v50, %v1896_v40  ;;  %v2317_v62 = vsel %vm3460_vm4, %v2315_v51, %v2316_v47  ;;  %v545_v54 = vshll.u32 %v199_v43, 16  ;;  %v549_v1 = vshrl.u32 %v199_v43, 16 }
  0xf6   : > { %v1907_v59 = vsel %vm3472_vm5, %v1902_v56, %v1906_v27  ;;  %v2190_v2 = vmax.bf16 %v1897_v61, %v1726_v49  ;;  %v541_v3 = vrot.slane %v539_v58, 5  ;;  %v555_v5 = vshll.u32 %v217_v53, 16 }
  0xf7   : > { %v2191_v7 = vmax.bf16 %v1907_v59, %v1727_v55  ;;  %v547_v9 = vrot.slane %v545_v54, 5  ;;  %v551_v52 = vrot.slane %v549_v1, 4  ;;  %v3050_v11 = vrot.slane %v684_v60, 9 }
  0xf8   : > { %v2430_v4 = vmax.bf16 %v2314_v46, %v2190_v2  ;;  %v542_v63 = vor.u32 %v541_v3, %v538_v57  ;;  %v557_v13 = vrot.slane %v555_v5, 5  ;;  %v831_v15 = vrot.slane %v199_v43, 5  ;;  %v3160_v46 = vld [vmem:[%s3452_s25 + $0xb8] sm:$0xf]  ;;  %v3194_v57 = vld [vmem:[%s3452_s25 + $0xb4] sm:$0xe] }
  0xf9   : > { %v2431_v18 = vmax.bf16 %v2317_v62, %v2191_v7  ;;  %v552_v20 = vor.u32 %v551_v52, %v547_v9  ;;  %v834_v21 = vrot.slane %v217_v53, 5  ;;  %v1308_v0 = vshrl.u32 %v3079_v6, 16 }
  0xfa   : > { %v543_v23 = vrot.slane %v542_v63, 4  ;;  %v832_v14 = vsel %vm3460_vm4, %v3050_v11, %v831_v15  ;;  %v833_v8 = vrot.slane %v831_v15, 4  ;;  %v1311_v22 = vshll.u32 %v3079_v6, 16 }
  0xfb   : > { %v3219_v25 = vcombine.low %v2430_v4, %v2431_v18  ;;  %v553_v10 = vrot.slane %v552_v20, 4  ;;  %v1310_v26 = vrot.slane %v1308_v0, 4  ;;  %v1317_v29 = vshll.u32 %v3080_v16, 16  ;;  %v185_v20 = vld [vmem:[%s3452_s25 + $0x4c] sm:$0xf] }
  0xfc   : > { %v548_v34 = vsel %vm3472_vm5, %v543_v23, %v547_v9  ;;  %v835_v35 = vsel %vm3460_vm4, %v833_v8, %v834_v21  ;;  %v1313_v28 = vrot.slane %v1311_v22, 5  ;;  %v1321_v24 = vshrl.u32 %v3080_v16, 16  ;;  %v184_v9 = vld [vmem:[%s3452_s25 + $0x48] sm:$0xf] }
  0xfd   : > { %3354 = vmatmul.mubr.msk.bf16.gmra.mrb[8].mxu0 %vm2571_vm6, %v3219_v25  ;;  %v558_v19 = vsel %vm3472_vm5, %v553_v10, %v557_v13  ;;  %v665_v37 = vmax.bf16 %v548_v34, %v3875_v30  ;;  %v1319_v38 = vrot.slane %v1317_v29, 5  ;;  %v1327_v40 = vshll.u32 %v3098_v17, 16  ;;  %v210_v25 = vld [vmem:[%s3452_s25 + $0x50] sm:$0x1] }
  0xfe   : > { %v666_v42 = vmax.bf16 %v558_v19, %v199_v43  ;;  %v1314_v31 = vor.u32 %v1313_v28, %v1310_v26  ;;  %v1323_v44 = vrot.slane %v1321_v24, 4  ;;  %v3130_v27 = vrot.slane %v3114_v32, 9  ;;  %v3178_v43 = vld [vmem:[%s3452_s25 + $0xbc] sm:$0x1]  ;;  %v677_v26 = vld [vmem:[%s3452_s25 + $0x48] sm:$0xe] }
  0xff   : > { %v908_v45 = vmax.bf16 %v832_v14, %v665_v37  ;;  %v1329_v36 = vrot.slane %v1327_v40, 5  ;;  %v1600_v39 = vrot.slane %v3080_v16, 5  ;;  %v1603_v47 = vrot.slane %v3098_v17, 5 }
 0x100   : > { %v909_v48 = vmax.bf16 %v835_v35, %v666_v42  ;;  %v1315_v49 = vrot.slane %v1314_v31, 4  ;;  %v1324_v50 = vor.u32 %v1323_v44, %v1319_v38  ;;  %v2077_v51 = vshrl.u32 %v3159_v41, 16  ;;  %v3065_v31 = vld [vmem:[%s3452_s25 + $0x54] sm:$0xf] }
 0x101   : > { %v973_v53 = vmax.bf16 %v3079_v6, %v908_v45  ;;  %v1601_v30 = vsel %vm3460_vm4, %v3130_v27, %v1600_v39  ;;  %v1602_v55 = vrot.slane %v1600_v39, 4  ;;  %v2080_v56 = vshll.u32 %v3159_v41, 16  ;;  %v3066_v39 = vld [vmem:[%s3452_s25 + $0x58] sm:$0xf] }
 0x102   : > { %v974_v58 = vmax.bf16 %v3080_v16, %v909_v48  ;;  %v1320_v60 = vsel %vm3472_vm5, %v1315_v49, %v1319_v38  ;;  %v1325_v61 = vrot.slane %v1324_v50, 4  ;;  %v2079_v62 = vrot.slane %v2077_v51, 4 }
 0x103   : > { %v1437_v54 = vmax.bf16 %v1320_v60, %v973_v53  ;;  %v1604_v1 = vsel %vm3460_vm4, %v1602_v55, %v1603_v47  ;;  %v2082_v59 = vrot.slane %v2080_v56, 5  ;;  %v2086_v2 = vshll.u32 %v3160_v46, 16  ;;  %v3091_v56 = vld [vmem:[%s3452_s25 + $0x5c] sm:$0x1]  ;;  %v3107_v60 = vld [vmem:[%s3452_s25 + $0x54] sm:$0xe] }
 0x104   : > { %v1330_v3 = vsel %vm3472_vm5, %v1325_v61, %v1329_v36  ;;  %v2090_v5 = vshrl.u32 %v3160_v46, 16  ;;  %v2096_v6 = vshll.u32 %v3178_v43, 16  ;;  %v3210_v7 = vrot.slane %v3194_v57, 9 }
 0x105   : > { %v1438_v52 = vmax.bf16 %v1330_v3, %v974_v58  ;;  %v1677_v11 = vmax.bf16 %v1601_v30, %v1437_v54  ;;  %v2083_v4 = vor.u32 %v2082_v59, %v2079_v62  ;;  %v2088_v63 = vrot.slane %v2086_v2, 5 }
 0x106   : > { %v2092_v13 = vrot.slane %v2090_v5, 4  ;;  %v2098_v15 = vrot.slane %v2096_v6, 5  ;;  %v2369_v16 = vrot.slane %v3160_v46, 5  ;;  %v2372_v18 = vrot.slane %v3178_v43, 5 }
 0x107   : > { %v1678_v21 = vmax.bf16 %v1604_v1, %v1438_v52  ;;  %v1742_v0 = vmax.bf16 %v3159_v41, %v1677_v11  ;;  %v2084_v23 = vrot.slane %v2083_v4, 4  ;;  %v368_v14 = vshrl.u32 %v184_v9, 16 }
 0x108   : > { %v2093_v8 = vor.u32 %v2092_v13, %v2088_v63  ;;  %v2370_v17 = vsel %vm3460_vm4, %v3210_v7, %v2369_v16  ;;  %v2371_v22 = vrot.slane %v2369_v16, 4  ;;  %v371_v10 = vshll.u32 %v184_v9, 16  ;;  %v3145_v16 = vld [vmem:[%s3452_s25 + $0x60] sm:$0xf] }
 0x109   : > { %v1743_v29 = vmax.bf16 %v3160_v46, %v1678_v21  ;;  %v2089_v32 = vsel %vm3472_vm5, %v2084_v23, %v2088_v63  ;;  %v370_v34 = vrot.slane %v368_v14, 4  ;;  %v377_v35 = vshll.u32 %v185_v20, 16  ;;  %v3146_v23 = vld [vmem:[%s3452_s25 + $0x64] sm:$0xf] }
 0x10a   : > { %v2094_v28 = vrot.slane %v2093_v8, 4  ;;  %v2206_v24 = vmax.bf16 %v2089_v32, %v1742_v0  ;;  %v2373_v19 = vsel %vm3460_vm4, %v2371_v22, %v2372_v18  ;;  %v373_v37 = vrot.slane %v371_v10, 5 }
 0x10b   : > { %v379_v38 = vrot.slane %v377_v35, 5  ;;  %v381_v40 = vshrl.u32 %v185_v20, 16  ;;  %v387_v41 = vshll.u32 %v210_v25, 16  ;;  %v3043_v42 = vrot.slane %v677_v26, 9  ;;  %v3171_v26 = vld [vmem:[%s3452_s25 + $0x68] sm:$0x1] }
 0x10c   : > { %v2099_v44 = vsel %vm3472_vm5, %v2094_v28, %v2098_v15  ;;  %v2446_v27 = vmax.bf16 %v2370_v17, %v2206_v24  ;;  %v374_v45 = vor.u32 %v373_v37, %v370_v34  ;;  %v782_v36 = vrot.slane %v185_v20, 5  ;;  %v3187_v24 = vld [vmem:[%s3452_s25 + $0x60] sm:$0xe] }
 0x10d   : > { %v2207_v47 = vmax.bf16 %v2099_v44, %v1743_v29  ;;  %v383_v48 = vrot.slane %v381_v40, 4  ;;  %v389_v49 = vrot.slane %v387_v41, 5  ;;  %v785_v50 = vrot.slane %v210_v25, 5 }
 0x10e   : > { %v375_v46 = vrot.slane %v374_v45, 4  ;;  %v783_v51 = vsel %vm3460_vm4, %v3043_v42, %v782_v36  ;;  %v784_v53 = vrot.slane %v782_v36, 4  ;;  %v1140_v30 = vshrl.u32 %v3065_v31, 16 }
 0x10f   : > { %v2447_v55 = vmax.bf16 %v2373_v19, %v2207_v47  ;;  %v384_v43 = vor.u32 %v383_v48, %v379_v38  ;;  %v1143_v57 = vshll.u32 %v3065_v31, 16  ;;  %v1149_v58 = vshll.u32 %v3066_v39, 16  ;;  %v200_v48 = vld [vmem:[%s3452_s25 + $0xa8] sm:$0xf] }
 0x110   : > { %v380_v61 = vsel %vm3472_vm5, %v375_v46, %v379_v38  ;;  %v786_v62 = vsel %vm3460_vm4, %v784_v53, %v785_v50  ;;  %v1142_v54 = vrot.slane %v1140_v30, 4  ;;  %v1153_v1 = vshrl.u32 %v3066_v39, 16 }
 0x111   : > { %v3227_v59 = vcombine.low %v2446_v27, %v2447_v55  ;;  %v385_v2 = vrot.slane %v384_v43, 4  ;;  %v651_v3 = vmax.bf16 %v380_v61, %v184_v9  ;;  %v1145_v5 = vrot.slane %v1143_v57, 5 }
 0x112   : > { %v1151_v6 = vrot.slane %v1149_v58, 5  ;;  %v1155_v7 = vrot.slane %v1153_v1, 4  ;;  %v1159_v52 = vshll.u32 %v3091_v56, 16  ;;  %v3123_v11 = vrot.slane %v3107_v60, 9 }
 0x113   : > { %3370 = vmatmul.mubr.msk.bf16.gmra.mrb[8].mxu1 %vm2571_vm6, %v3227_v59  ;;  %v390_v4 = vsel %vm3472_vm5, %v385_v2, %v389_v49  ;;  %v894_v63 = vmax.bf16 %v783_v51, %v651_v3  ;;  %v1146_v13 = vor.u32 %v1145_v5, %v1142_v54  ;;  %v1551_v15 = vrot.slane %v3066_v39, 5  ;;  %v201_v51 = vld [vmem:[%s3452_s25 + $0xac] sm:$0xf]  ;;  %v218_v54 = vld [vmem:[%s3452_s25 + $0xb0] sm:$0x1] }
 0x114   : > { %v652_v18 = vmax.bf16 %v390_v4, %v185_v20  ;;  %v1156_v21 = vor.u32 %v1155_v7, %v1151_v6  ;;  %v1161_v0 = vrot.slane %v1159_v52, 5  ;;  %v1554_v9 = vrot.slane %v3091_v56, 5  ;;  %v685_v2 = vld [vmem:[%s3452_s25 + $0xa8] sm:$0xe] }
 0x115   : > { %v959_v14 = vmax.bf16 %v3065_v31, %v894_v63  ;;  %v1147_v8 = vrot.slane %v1146_v13, 4  ;;  %v1552_v17 = vsel %vm3460_vm4, %v3123_v11, %v1551_v15  ;;  %v1553_v22 = vrot.slane %v1551_v15, 4 }
 0x116   : > { %v895_v25 = vmax.bf16 %v786_v62, %v652_v18  ;;  %v1157_v10 = vrot.slane %v1156_v21, 4  ;;  %v1909_v29 = vshrl.u32 %v3145_v16, 16  ;;  %v1912_v32 = vshll.u32 %v3145_v16, 16  ;;  %v3081_v21 = vld [vmem:[%s3452_s25 + $0xb4] sm:$0xf] }
 0x117   : > { %v1152_v34 = vsel %vm3472_vm5, %v1147_v8, %v1151_v6  ;;  %v1555_v20 = vsel %vm3460_vm4, %v1553_v22, %v1554_v9  ;;  %v1918_v35 = vshll.u32 %v3146_v23, 16  ;;  %v1922_v28 = vshrl.u32 %v3146_v23, 16  ;;  %v3082_v8 = vld [vmem:[%s3452_s25 + $0xb8] sm:$0xf] }
 0x118   : > { %v960_v19 = vmax.bf16 %v3066_v39, %v895_v25  ;;  %v1162_v37 = vsel %vm3472_vm5, %v1157_v10, %v1161_v0  ;;  %v1423_v38 = vmax.bf16 %v1152_v34, %v959_v14  ;;  %v1911_v40 = vrot.slane %v1909_v29, 4 }
 0x119   : > { %v1914_v41 = vrot.slane %v1912_v32, 5  ;;  %v1920_v42 = vrot.slane %v1918_v35, 5  ;;  %v1924_v31 = vrot.slane %v1922_v28, 4  ;;  %v1928_v44 = vshll.u32 %v3171_v26, 16  ;;  %v3099_v32 = vld [vmem:[%s3452_s25 + $0xbc] sm:$0x1] }
 0x11a   : > { %v1424_v27 = vmax.bf16 %v1162_v37, %v960_v19  ;;  %v1663_v45 = vmax.bf16 %v1552_v17, %v1423_v38  ;;  %v3203_v36 = vrot.slane %v3187_v24, 9  ;;  %v2320_v47 = vrot.slane %v3146_v23, 5  ;;  %v3115_v37 = vld [vmem:[%s3452_s25 + $0xb4] sm:$0xe] }
 0x11b   : > { %v1915_v49 = vor.u32 %v1914_v41, %v1911_v40  ;;  %v1925_v50 = vor.u32 %v1924_v31, %v1920_v42  ;;  %v1930_v46 = vrot.slane %v1928_v44, 5  ;;  %v2323_v39 = vrot.slane %v3171_v26, 5 }
 0x11c   : > { %v1664_v53 = vmax.bf16 %v1555_v20, %v1424_v27  ;;  %v1728_v30 = vmax.bf16 %v3145_v16, %v1663_v45  ;;  %v2321_v55 = vsel %vm3460_vm4, %v3203_v36, %v2320_v47  ;;  %v2322_v43 = vrot.slane %v2320_v47, 4 }
 0x11d   : > { %v1916_v56 = vrot.slane %v1915_v49, 4  ;;  %v1926_v57 = vrot.slane %v1925_v50, 4  ;;  %v560_v58 = vshrl.u32 %v200_v48, 16  ;;  %v563_v60 = vshll.u32 %v200_v48, 16 }
 0x11e   : > { %v1729_v61 = vmax.bf16 %v3146_v23, %v1664_v53  ;;  %v2324_v62 = vsel %vm3460_vm4, %v2322_v43, %v2323_v39  ;;  %v569_v1 = vshll.u32 %v201_v51, 16  ;;  %v573_v59 = vshrl.u32 %v201_v51, 16  ;;  %v3162_v43 = vld [vmem:[%s3452_s25 + $0xc4] sm:$0xf] }
 0x11f   : > { %v1921_v3 = vsel %vm3472_vm5, %v1916_v56, %v1920_v42  ;;  %v1931_v5 = vsel %vm3472_vm5, %v1926_v57, %v1930_v46  ;;  %v562_v6 = vrot.slane %v560_v58, 4  ;;  %v565_v7 = vrot.slane %v563_v60, 5  ;;  %v3161_v46 = vld [vmem:[%s3452_s25 + $0xc0] sm:$0xf] }
 0x120   : > { %v2192_v52 = vmax.bf16 %v1921_v3, %v1728_v30  ;;  %v2193_v11 = vmax.bf16 %v1931_v5, %v1729_v61  ;;  %v571_v4 = vrot.slane %v569_v1, 5  ;;  %v575_v63 = vrot.slane %v573_v59, 4 }
 0x121   : > { %v566_v13 = vor.u32 %v565_v7, %v562_v6  ;;  %v579_v15 = vshll.u32 %v218_v54, 16  ;;  %v3051_v16 = vrot.slane %v685_v2, 9  ;;  %v838_v18 = vrot.slane %v201_v51, 5  ;;  %v3195_v7 = vld [vmem:[%s3452_s25 + $0xc0] sm:$0xe] }
 0x122   : > { %v2432_v0 = vmax.bf16 %v2321_v55, %v2192_v52  ;;  %v2433_v9 = vmax.bf16 %v2324_v62, %v2193_v11  ;;  %v576_v23 = vor.u32 %v575_v63, %v571_v4  ;;  %v841_v14 = vrot.slane %v218_v54, 5  ;;  %v3179_v62 = vld [vmem:[%s3452_s25 + $0xc8] sm:$0x1] }
 0x123   : > { %v567_v17 = vrot.slane %v566_v13, 4  ;;  %v581_v22 = vrot.slane %v579_v15, 5  ;;  %v839_v25 = vsel %vm3460_vm4, %v3051_v16, %v838_v18  ;;  %v840_v10 = vrot.slane %v838_v18, 4 }
 0x124   : > { %v3220_v26 = vcombine.low %v2432_v0, %v2433_v9  ;;  %v577_v29 = vrot.slane %v576_v23, 4  ;;  %v1332_v34 = vshrl.u32 %v3081_v21, 16  ;;  %v1335_v20 = vshll.u32 %v3081_v21, 16 }
 0x125   : > { %v572_v35 = vsel %vm3472_vm5, %v567_v17, %v571_v4  ;;  %v842_v28 = vsel %vm3460_vm4, %v840_v10, %v841_v14  ;;  %v1341_v24 = vshll.u32 %v3082_v8, 16  ;;  %v1345_v19 = vshrl.u32 %v3082_v8, 16  ;;  %v186_v17 = vld [vmem:[%s3452_s25 + $0x54] sm:$0xf] }
 0x126   : > { %3357 = vmatprep.mubr.msk.bf16.mxu0 %vm2571_vm6, %v3220_v26  ;;  %v582_v38 = vsel %vm3472_vm5, %v577_v29, %v581_v22  ;;  %v667_v40 = vmax.bf16 %v572_v35, %v200_v48  ;;  %v1334_v41 = vrot.slane %v1332_v34, 4  ;;  %v1337_v42 = vrot.slane %v1335_v20, 5  ;;  %v187_v29 = vld [vmem:[%s3452_s25 + $0x58] sm:$0xf] }
 0x127   : > { %v668_v31 = vmax.bf16 %v582_v38, %v201_v51  ;;  %v1343_v44 = vrot.slane %v1341_v24, 5  ;;  %v1347_v27 = vrot.slane %v1345_v19, 4  ;;  %v1351_v45 = vshll.u32 %v3099_v32, 16  ;;  %v211_v19 = vld [vmem:[%s3452_s25 + $0x5c] sm:$0x1] }
 0x128   : > { %v910_v36 = vmax.bf16 %v839_v25, %v667_v40  ;;  %v1338_v47 = vor.u32 %v1337_v42, %v1334_v41  ;;  %v3131_v49 = vrot.slane %v3115_v37, 9  ;;  %v1607_v50 = vrot.slane %v3082_v8, 5 }
 0x129   : > { %v911_v39 = vmax.bf16 %v842_v28, %v668_v31  ;;  %v1348_v53 = vor.u32 %v1347_v27, %v1343_v44  ;;  %v1353_v30 = vrot.slane %v1351_v45, 5  ;;  %v1610_v55 = vrot.slane %v3099_v32, 5 }
 0x12a   : > { %v975_v48 = vmax.bf16 %v3081_v21, %v910_v36  ;;  %v1339_v56 = vrot.slane %v1338_v47, 4  ;;  %v1608_v51 = vsel %vm3460_vm4, %v3131_v49, %v1607_v50  ;;  %v1609_v57 = vrot.slane %v1607_v50, 4  ;;  %v3982_v58 = vpop.f32.mrb[0].mxu0 }
 0x12b   : > { %v976_v60 = vmax.bf16 %v3082_v8, %v911_v39  ;;  %v1349_v61 = vrot.slane %v1348_v53, 4  ;;  %v2101_v54 = vshrl.u32 %v3161_v46, 16  ;;  %v2104_v1 = vshll.u32 %v3161_v46, 16  ;;  %v3985_v59 = vpop.f32.mrb[1].mxu0  ;;  %v3067_v53 = vld [vmem:[%s3452_s25 + $0x60] sm:$0xf] }
 0x12c   : > { %v1344_v2 = vsel %vm3472_vm5, %v1339_v56, %v1343_v44  ;;  %v1611_v3 = vsel %vm3460_vm4, %v1609_v57, %v1610_v55  ;;  %v2110_v5 = vshll.u32 %v3162_v43, 16  ;;  %v2114_v6 = vshrl.u32 %v3162_v43, 16  ;;  %v3992_v52 = vpop.f32.mrb[2].mxu0  ;;  %v678_v44 = vld [vmem:[%s3452_s25 + $0x54] sm:$0xe] }
 0x12d   : > { %v1354_v11 = vsel %vm3472_vm5, %v1349_v61, %v1353_v30  ;;  %v1439_v4 = vmax.bf16 %v1344_v2, %v975_v48  ;;  %v2103_v63 = vrot.slane %v2101_v54, 4  ;;  %v2106_v13 = vrot.slane %v2104_v1, 5  ;;  %v3996_v15 = vpop.f32.mrb[3].mxu0  ;;  %v3068_v56 = vld [vmem:[%s3452_s25 + $0x64] sm:$0xf] }
 0x12e   : > { %v1440_v16 = vmax.bf16 %v1354_v11, %v976_v60  ;;  %v2112_v18 = vrot.slane %v2110_v5, 5  ;;  %v2116_v21 = vrot.slane %v2114_v6, 4  ;;  %v2120_v0 = vshll.u32 %v3179_v62, 16  ;;  %v3092_v2 = vld [vmem:[%s3452_s25 + $0x68] sm:$0x1] }
 0x12f   : > { %v1679_v9 = vmax.bf16 %v1608_v51, %v1439_v4  ;;  %v2107_v23 = vor.u32 %v2106_v13, %v2103_v63  ;;  %v3211_v14 = vrot.slane %v3195_v7, 9  ;;  %v2376_v8 = vrot.slane %v3162_v43, 5  ;;  %v3108_v4 = vld [vmem:[%s3452_s25 + $0x60] sm:$0xe] }
 0x130   : > { %v1680_v22 = vmax.bf16 %v1611_v3, %v1440_v16  ;;  %v2117_v25 = vor.u32 %v2116_v21, %v2112_v18  ;;  %v2122_v10 = vrot.slane %v2120_v0, 5  ;;  %v2379_v26 = vrot.slane %v3179_v62, 5 }
 0x131   : > { %v1744_v32 = vmax.bf16 %v3161_v46, %v1679_v9  ;;  %v2108_v34 = vrot.slane %v2107_v23, 4  ;;  %v2377_v20 = vsel %vm3460_vm4, %v3211_v14, %v2376_v8  ;;  %v2378_v35 = vrot.slane %v2376_v8, 4  ;;  %v3147_v14 = vld [vmem:[%s3452_s25 + $0x6c] sm:$0xf] }
 0x132   : > { %v1745_v28 = vmax.bf16 %v3162_v43, %v1680_v22  ;;  %v2118_v24 = vrot.slane %v2117_v25, 4  ;;  %v392_v37 = vshrl.u32 %v186_v17, 16  ;;  %v395_v38 = vshll.u32 %v186_v17, 16 }
 0x133   : > { %v2113_v40 = vsel %vm3472_vm5, %v2108_v34, %v2112_v18  ;;  %v2380_v41 = vsel %vm3460_vm4, %v2378_v35, %v2379_v26  ;;  %v401_v42 = vshll.u32 %v187_v29, 16  ;;  %v405_v31 = vshrl.u32 %v187_v29, 16 }
 0x134   : > { %v2123_v27 = vsel %vm3472_vm5, %v2118_v24, %v2122_v10  ;;  %v2208_v45 = vmax.bf16 %v2113_v40, %v1744_v32  ;;  %v394_v36 = vrot.slane %v392_v37, 4  ;;  %v397_v47 = vrot.slane %v395_v38, 5 }
 0x135   : > { %v2209_v49 = vmax.bf16 %v2123_v27, %v1745_v28  ;;  %v403_v50 = vrot.slane %v401_v42, 5  ;;  %v407_v46 = vrot.slane %v405_v31, 4  ;;  %v411_v39 = vshll.u32 %v211_v19, 16 }
 0x136   : > { %v2448_v30 = vmax.bf16 %v2377_v20, %v2208_v45  ;;  %v398_v55 = vor.u32 %v397_v47, %v394_v36  ;;  %v3044_v43 = vrot.slane %v678_v44, 9  ;;  %v789_v48 = vrot.slane %v187_v29, 5  ;;  %v3188_v45 = vld [vmem:[%s3452_s25 + $0x6c] sm:$0xe] }
 0x137   : > { %v2449_v51 = vmax.bf16 %v2380_v41, %v2209_v49  ;;  %v408_v57 = vor.u32 %v407_v46, %v403_v50  ;;  %v413_v60 = vrot.slane %v411_v39, 5  ;;  %v792_v61 = vrot.slane %v211_v19, 5  ;;  %v3148_v19 = vld [vmem:[%s3452_s25 + $0x70] sm:$0xf]  ;;  %v3172_v41 = vld [vmem:[%s3452_s25 + $0x74] sm:$0x1] }
 0x138   : > { %v399_v62 = vrot.slane %v398_v55, 4  ;;  %v790_v54 = vsel %vm3460_vm4, %v3044_v43, %v789_v48  ;;  %v791_v1 = vrot.slane %v789_v48, 4  ;;  %v1164_v3 = vshrl.u32 %v3067_v53, 16  ;;  %v4040_v48 = vld [vmem:[%s3452_s25 + $0xb4] sm:$0xf] }
 0x139   : > { %v3228_v5 = vcombine.low %v2448_v30, %v2449_v51  ;;  %v409_v6 = vrot.slane %v408_v57, 4  ;;  %v1167_v7 = vshll.u32 %v3067_v53, 16  ;;  %v1173_v11 = vshll.u32 %v3068_v56, 16 }
 0x13a   : > { %v404_v63 = vsel %vm3472_vm5, %v399_v62, %v403_v50  ;;  %v793_v13 = vsel %vm3460_vm4, %v791_v1, %v792_v61  ;;  %v1166_v16 = vrot.slane %v1164_v3, 4  ;;  %v1177_v18 = vshrl.u32 %v3068_v56, 16 }
 0x13b   : > { %3373 = vmatprep.mubr.msk.bf16.mxu1 %vm2571_vm6, %v3228_v5  ;;  %v414_v21 = vsel %vm3472_vm5, %v409_v6, %v413_v60  ;;  %v653_v0 = vmax.bf16 %v404_v63, %v186_v17  ;;  %v1169_v9 = vrot.slane %v1167_v7, 5  ;;  %v1175_v23 = vrot.slane %v1173_v11, 5  ;;  %v203_v11 = vld [vmem:[%s3452_s25 + $0xb8] sm:$0xf] }
 0x13c   : > { %v654_v8 = vmax.bf16 %v414_v21, %v187_v29  ;;  %v1179_v22 = vrot.slane %v1177_v18, 4  ;;  %v1183_v25 = vshll.u32 %v3092_v2, 16  ;;  %v3124_v10 = vrot.slane %v3108_v4, 9  ;;  %v219_v21 = vld [vmem:[%s3452_s25 + $0xbc] sm:$0x1] }
 0x13d   : > { %v896_v26 = vmax.bf16 %v790_v54, %v653_v0  ;;  %v1170_v32 = vor.u32 %v1169_v9, %v1166_v16  ;;  %v1558_v34 = vrot.slane %v3068_v56, 5  ;;  %v1561_v20 = vrot.slane %v3092_v2, 5 }
 0x13e   : > { %v897_v35 = vmax.bf16 %v793_v13, %v654_v8  ;;  %v1180_v28 = vor.u32 %v1179_v22, %v1175_v23  ;;  %v1185_v24 = vrot.slane %v1183_v25, 5  ;;  %v1933_v37 = vshrl.u32 %v3147_v14, 16  ;;  %v686_v22 = vld [vmem:[%s3452_s25 + $0xb4] sm:$0xe] }
 0x13f   : > { %v961_v38 = vmax.bf16 %v3067_v53, %v896_v26  ;;  %v1171_v17 = vrot.slane %v1170_v32, 4  ;;  %v1559_v40 = vsel %vm3460_vm4, %v3124_v10, %v1558_v34  ;;  %v1560_v29 = vrot.slane %v1558_v34, 4 }
 0x140   : > { %v962_v42 = vmax.bf16 %v3068_v56, %v897_v35  ;;  %v1181_v31 = vrot.slane %v1180_v28, 4  ;;  %v1935_v44 = vrot.slane %v1933_v37, 4  ;;  %v1936_v27 = vshll.u32 %v3147_v14, 16  ;;  %v4029_v36 = vpop.f32.mrb[0].mxu1  ;;  %v3083_v28 = vld [vmem:[%s3452_s25 + $0xc0] sm:$0xf] }
 0x141   : > { %v1176_v47 = vsel %vm3472_vm5, %v1171_v17, %v1175_v23  ;;  %v1562_v49 = vsel %vm3460_vm4, %v1560_v29, %v1561_v20  ;;  %v1942_v50 = vshll.u32 %v3148_v19, 16  ;;  %v1946_v46 = vshrl.u32 %v3148_v19, 16  ;;  %v4035_v39 = vpop.f32.mrb[1].mxu1 }
 0x142   : > { %v1186_v53 = vsel %vm3472_vm5, %v1181_v31, %v1185_v24  ;;  %v1425_v30 = vmax.bf16 %v1176_v47, %v961_v38  ;;  %v1938_v55 = vrot.slane %v1936_v27, 5  ;;  %v1952_v43 = vshll.u32 %v3172_v41, 16  ;;  %v4042_v56 = vpop.f32.mrb[2].mxu1 }
 0x143   : > { %v1426_v51 = vmax.bf16 %v1186_v53, %v962_v42  ;;  %v1944_v57 = vrot.slane %v1942_v50, 5  ;;  %v1948_v60 = vrot.slane %v1946_v46, 4  ;;  %v3204_v61 = vrot.slane %v3188_v45, 9  ;;  %v4044_v62 = vpop.f32.mrb[3].mxu1  ;;  %v3084_v42 = vld [vmem:[%s3452_s25 + $0xc4] sm:$0xf] }
 0x144   : > { %v1665_v54 = vmax.bf16 %v1559_v40, %v1425_v30  ;;  %v1939_v1 = vor.u32 %v1938_v55, %v1935_v44  ;;  %v1954_v2 = vrot.slane %v1952_v43, 5  ;;  %v2327_v3 = vrot.slane %v3148_v19, 5  ;;  %v3100_v46 = vld [vmem:[%s3452_s25 + $0xc8] sm:$0x1] }
 0x145   : > { %v1666_v5 = vmax.bf16 %v1562_v49, %v1426_v51  ;;  %v1949_v6 = vor.u32 %v1948_v60, %v1944_v57  ;;  %v2330_v7 = vrot.slane %v3172_v41, 5  ;;  %v584_v4 = vshrl.u32 %v4040_v48, 16 }
 0x146   : > { %v1730_v63 = vmax.bf16 %v3147_v14, %v1665_v54  ;;  %v1940_v13 = vrot.slane %v1939_v1, 4  ;;  %v2328_v16 = vsel %vm3460_vm4, %v3204_v61, %v2327_v3  ;;  %v2329_v18 = vrot.slane %v2327_v3, 4 }
 0x147   : > { %v1731_v0 = vmax.bf16 %v3148_v19, %v1666_v5  ;;  %v1950_v9 = vrot.slane %v1949_v6, 4  ;;  %v586_v23 = vrot.slane %v584_v4, 4  ;;  %v587_v8 = vshll.u32 %v4040_v48, 16 }
 0x148   : > { %v1945_v25 = vsel %vm3472_vm5, %v1940_v13, %v1944_v57  ;;  %v2331_v10 = vsel %vm3460_vm4, %v2329_v18, %v2330_v7  ;;  %v593_v14 = vshll.u32 %v203_v11, 16  ;;  %v597_v26 = vshrl.u32 %v203_v11, 16  ;;  %v3116_v57 = vld [vmem:[%s3452_s25 + $0xc0] sm:$0xe]  ;;  %v3163_v7 = vld [vmem:[%s3452_s25 + $0xcc] sm:$0xf] }
 0x149   : > { %v1955_v32 = vsel %vm3472_vm5, %v1950_v9, %v1954_v2  ;;  %v2194_v34 = vmax.bf16 %v1945_v25, %v1730_v63  ;;  %v589_v20 = vrot.slane %v587_v8, 5  ;;  %v603_v35 = vshll.u32 %v219_v21, 16  ;;  %v3164_v25 = vld [vmem:[%s3452_s25 + $0xd0] sm:$0xf] }
 0x14a   : > { %v2195_v24 = vmax.bf16 %v1955_v32, %v1731_v0  ;;  %v595_v19 = vrot.slane %v593_v14, 5  ;;  %v599_v37 = vrot.slane %v597_v26, 4  ;;  %v3052_v38 = vrot.slane %v686_v22, 9 }
 0x14b   : > { %v2434_v17 = vmax.bf16 %v2328_v16, %v2194_v34  ;;  %v590_v40 = vor.u32 %v589_v20, %v586_v23  ;;  %v605_v29 = vrot.slane %v603_v35, 5  ;;  %v845_v41 = vrot.slane %v203_v11, 5  ;;  %v3196_v34 = vld [vmem:[%s3452_s25 + $0xcc] sm:$0xe] }
 0x14c   : > { %v2435_v31 = vmax.bf16 %v2331_v10, %v2195_v24  ;;  %v600_v44 = vor.u32 %v599_v37, %v595_v19  ;;  %v848_v27 = vrot.slane %v219_v21, 5  ;;  %v1356_v45 = vshrl.u32 %v3083_v28, 16 }
 0x14d   : > { %v591_v47 = vrot.slane %v590_v40, 4  ;;  %v846_v49 = vsel %vm3460_vm4, %v3052_v38, %v845_v41  ;;  %v847_v50 = vrot.slane %v845_v41, 4  ;;  %v1359_v53 = vshll.u32 %v3083_v28, 16 }
 0x14e   : > { %v3221_v30 = vcombine.low %v2434_v17, %v2435_v31  ;;  %v601_v55 = vrot.slane %v600_v44, 4  ;;  %v1358_v43 = vrot.slane %v1356_v45, 4  ;;  %v1365_v51 = vshll.u32 %v3084_v42, 16 }
 0x14f   : > { %v596_v60 = vsel %vm3472_vm5, %v591_v47, %v595_v19  ;;  %v849_v61 = vsel %vm3460_vm4, %v847_v50, %v848_v27  ;;  %v1361_v54 = vrot.slane %v1359_v53, 5  ;;  %v1369_v1 = vshrl.u32 %v3084_v42, 16 }
 0x150   : > { %3358 = vmatmul.mubr.msk.bf16.gmra.mrb[12].mxu0 %vm2571_vm6, %v3221_v30  ;;  %v606_v2 = vsel %vm3472_vm5, %v601_v55, %v605_v29  ;;  %v669_v3 = vmax.bf16 %v596_v60, %v4040_v48  ;;  %v1367_v5 = vrot.slane %v1365_v51, 5  ;;  %v1375_v6 = vshll.u32 %v3100_v46, 16 }
 0x151   : > { %v670_v4 = vmax.bf16 %v606_v2, %v203_v11  ;;  %v1362_v63 = vor.u32 %v1361_v54, %v1358_v43  ;;  %v1371_v13 = vrot.slane %v1369_v1, 4  ;;  %v3132_v16 = vrot.slane %v3116_v57, 9  ;;  %v3180_v11 = vld [vmem:[%s3452_s25 + $0xd4] sm:$0x1] }
 0x152   : > { %v912_v18 = vmax.bf16 %v846_v49, %v669_v3  ;;  %v1377_v21 = vrot.slane %v1375_v6, 5  ;;  %v1614_v0 = vrot.slane %v3084_v42, 5  ;;  %v1617_v9 = vrot.slane %v3100_v46, 5 }
 0x153   : > { %v913_v23 = vmax.bf16 %v849_v61, %v670_v4  ;;  %v1363_v8 = vrot.slane %v1362_v63, 4  ;;  %v1372_v22 = vor.u32 %v1371_v13, %v1367_v5  ;;  %v2125_v10 = vshrl.u32 %v3163_v7, 16 }
 0x154   : > { %v977_v14 = vmax.bf16 %v3083_v28, %v912_v18  ;;  %v1615_v48 = vsel %vm3460_vm4, %v3132_v16, %v1614_v0  ;;  %v1616_v26 = vrot.slane %v1614_v0, 4  ;;  %v2128_v32 = vshll.u32 %v3163_v7, 16 }
 0x155   : > { %v978_v20 = vmax.bf16 %v3084_v42, %v913_v23  ;;  %v1368_v35 = vsel %vm3472_vm5, %v1363_v8, %v1367_v5  ;;  %v1373_v24 = vrot.slane %v1372_v22, 4  ;;  %v2127_v19 = vrot.slane %v2125_v10, 4  ;;  %v4088_v42 = vld [vmem:[%s4214_s2] ss:$0 sm:$0xff] }
 0x156   : > { %v1441_v37 = vmax.bf16 %v1368_v35, %v977_v14  ;;  %v1618_v38 = vsel %vm3460_vm4, %v1616_v26, %v1617_v9  ;;  %v2130_v17 = vrot.slane %v2128_v32, 5  ;;  %v2134_v40 = vshll.u32 %v3164_v25, 16 }
 0x157   : > { %v1378_v28 = vsel %vm3472_vm5, %v1373_v24, %v1377_v21  ;;  %v2138_v29 = vshrl.u32 %v3164_v25, 16  ;;  %v2144_v41 = vshll.u32 %v3180_v11, 16  ;;  %v3212_v31 = vrot.slane %v3196_v34, 9 }
 0x158   : > { %v1442_v44 = vmax.bf16 %v1378_v28, %v978_v20  ;;  %v1681_v27 = vmax.bf16 %v1615_v48, %v1441_v37  ;;  %v2131_v45 = vor.u32 %v2130_v17, %v2127_v19  ;;  %v2136_v47 = vrot.slane %v2134_v40, 5 }
 0x159   : > { %v2140_v49 = vrot.slane %v2138_v29, 4  ;;  %v2146_v50 = vrot.slane %v2144_v41, 5  ;;  %v2383_v46 = vrot.slane %v3164_v25, 5  ;;  %v2386_v53 = vrot.slane %v3180_v11, 5 }
 0x15a   : > { %v1682_v30 = vmax.bf16 %v1618_v38, %v1442_v44  ;;  %v1746_v55 = vmax.bf16 %v3163_v7, %v1681_v27  ;;  %v2132_v43 = vrot.slane %v2131_v45, 4  ;;  %v2663_v51 = vadd.f32 %v3982_v58, %v4088_v42 }
 0x15b   : > { %v2141_v57 = vor.u32 %v2140_v49, %v2136_v47  ;;  %v2384_v60 = vsel %vm3460_vm4, %v3212_v31, %v2383_v46  ;;  %v2385_v61 = vrot.slane %v2383_v46, 4  ;;  %v2727_v3 = vadd.f32 %v4029_v36, %v4088_v42 }
 0x15c   : > { %v1747_v54 = vmax.bf16 %v3164_v25, %v1682_v30  ;;  %v2137_v1 = vsel %vm3472_vm5, %v2132_v43, %v2136_v47  ;;  %v2783_v2 = vmax.f32 %v2663_v51, 0.0  ;;  %v2655_v58 = vadd.f32 %v4088_v42, %v3985_v59 }
 0x15d   : > { %v2142_v5 = vrot.slane %v2141_v57, 4  ;;  %v2210_v6 = vmax.bf16 %v2137_v1, %v1746_v55  ;;  %v2387_v7 = vsel %vm3460_vm4, %v2385_v61, %v2386_v53  ;;  %v2799_v63 = vmax.f32 %v2727_v3, 0.0 }
 0x15e   : > { %v3287_v4 = vpack.c.bf16 %v2783_v2, %v2783_v2  ;;  %v2719_v13 = vadd.f32 %v4088_v42, %v4035_v39  ;;  %v2666_v36 = vadd.f32 %v3992_v52, %v4088_v42  ;;  %v2781_v18 = vmax.f32 %v2655_v58, 0.0 }
 0x15f   : > { %v2147_v12 = vsel %vm3472_vm5, %v2142_v5, %v2146_v50  ;;  %v2450_v16 = vmax.bf16 %v2384_v60, %v2210_v6  ;;  %v2730_v21 = vadd.f32 %v4042_v56, %v4088_v42  ;;  %v3303_v59 = vpack.c.bf16 %v2799_v63, %v2799_v63 }
 0x160   : > { %v2211_v0 = vmax.bf16 %v2147_v12, %v1747_v54  ;;  %2944 = vst.msk [vmem:[%s4104_s4 + $0x8] sm:$0xf] %vm2941_vm7, %v3287_v4  ;;  %v2797_v9 = vmax.f32 %v2719_v13, 0.0  ;;  %v2784_v39 = vmax.f32 %v2666_v36, 0.0  ;;  %v3285_v23 = vpack.c.bf16 %v2781_v18, %v2781_v18 }
 0x161   : > { %v2800_v52 = vmax.f32 %v2730_v21, 0.0  ;;  %v2658_v33 = vadd.f32 %v4088_v42, %v3996_v15  ;;  %v2722_v8 = vadd.f32 %v4088_v42, %v4044_v62  ;;  %2960 = vst.msk [vmem:[%s4104_s4 + $0x48] sm:$0xf] %vm2941_vm7, %v3303_v59 }
 0x162   : > { %v2451_v22 = vmax.bf16 %v2387_v7, %v2211_v0  ;;  %v3301_v56 = vpack.c.bf16 %v2797_v9, %v2797_v9  ;;  %v3288_v25 = vpack.c.bf16 %v2784_v39, %v2784_v39  ;;  %2942 = vst.msk [vmem:[%s4104_s4] sm:$0xf] %vm2941_vm7, %v3285_v23 }
 0x163   : > { %v3304_v10 = vpack.c.bf16 %v2800_v52, %v2800_v52  ;;  %v2782_v14 = vmax.f32 %v2658_v33, 0.0  ;;  %v2798_v48 = vmax.f32 %v2722_v8, 0.0 }
 0x164   : > { %v3229_v26 = vcombine.low %v2450_v16, %v2451_v22  ;;  %2958 = vst.msk [vmem:[%s4104_s4 + $0x40] sm:$0xf] %vm2941_vm7, %v3301_v56  ;;  %2945 = vst.msk [vmem:[%s4104_s4 + $0xc] sm:$0xf] %vm2941_vm7, %v3288_v25 }
 0x165   : > { %2961 = vst.msk [vmem:[%s4104_s4 + $0x4c] sm:$0xf] %vm2941_vm7, %v3304_v10  ;;  %v3286_v15 = vpack.c.bf16 %v2782_v14, %v2782_v14  ;;  %v3302_v62 = vpack.c.bf16 %v2798_v48, %v2798_v48 }
 0x166   : > { %3374 = vmatmul.mubr.msk.bf16.gmra.mrb[12].mxu1 %vm2571_vm6, %v3229_v26 }
 0x167   : > { %2943 = vst.msk [vmem:[%s4104_s4 + $0x4] sm:$0xf] %vm2941_vm7, %v3286_v15  ;;  %2959 = vst.msk [vmem:[%s4104_s4 + $0x44] sm:$0xf] %vm2941_vm7, %v3302_v62 }
 0x17d   : > { %v3351_v11 = vpop.f32.mrb[4].mxu0 }
 0x17e   : > { %v2679_v32 = vadd.f32 %v3351_v11, %v4088_v42  ;;  %v2670_v34 = vpop.f32.mrb[5].mxu0 }
 0x17f   : > { %v2671_v20 = vadd.f32 %v4088_v42, %v2670_v34  ;;  %v3352_v35 = vpop.f32.mrb[6].mxu0 }
 0x180   : > { %v2787_v24 = vmax.f32 %v2679_v32, 0.0  ;;  %v2682_v19 = vadd.f32 %v3352_v35, %v4088_v42  ;;  %v2673_v37 = vpop.f32.mrb[7].mxu0 }
 0x181   : > { %v2785_v38 = vmax.f32 %v2671_v20, 0.0  ;;  %v2674_v17 = vadd.f32 %v4088_v42, %v2673_v37 }
 0x182   : > { %v3291_v40 = vpack.c.bf16 %v2787_v24, %v2787_v24  ;;  %v2788_v28 = vmax.f32 %v2682_v19, 0.0 }
 0x183   : > { %v3289_v29 = vpack.c.bf16 %v2785_v38, %v2785_v38  ;;  %v2786_v41 = vmax.f32 %v2674_v17, 0.0 }
 0x184   : > { %2948 = vst.msk [vmem:[%s4104_s4 + $0x18] sm:$0xf] %vm2941_vm7, %v3291_v40  ;;  %v3292_v31 = vpack.c.bf16 %v2788_v28, %v2788_v28 }
 0x185   : > { %2946 = vst.msk [vmem:[%s4104_s4 + $0x10] sm:$0xf] %vm2941_vm7, %v3289_v29  ;;  %v3290_v44 = vpack.c.bf16 %v2786_v41, %v2786_v41 }
 0x186   : > { %2949 = vst.msk [vmem:[%s4104_s4 + $0x1c] sm:$0xf] %vm2941_vm7, %v3292_v31 }
 0x187   : > { %2947 = vst.msk [vmem:[%s4104_s4 + $0x14] sm:$0xf] %vm2941_vm7, %v3290_v44 }
 0x193   : > { %v3367_v27 = vpop.f32.mrb[4].mxu1 }
 0x194   : > { %v2743_v45 = vadd.f32 %v3367_v27, %v4088_v42  ;;  %v2734_v47 = vpop.f32.mrb[5].mxu1 }
 0x195   : > { %v2735_v49 = vadd.f32 %v4088_v42, %v2734_v47  ;;  %v3368_v50 = vpop.f32.mrb[6].mxu1 }
 0x196   : > { %v2803_v46 = vmax.f32 %v2743_v45, 0.0  ;;  %v2746_v53 = vadd.f32 %v3368_v50, %v4088_v42  ;;  %v2737_v30 = vpop.f32.mrb[7].mxu1 }
 0x197   : > { %v2801_v55 = vmax.f32 %v2735_v49, 0.0  ;;  %v2738_v43 = vadd.f32 %v4088_v42, %v2737_v30 }
 0x198   : > { %v3307_v51 = vpack.c.bf16 %v2803_v46, %v2803_v46  ;;  %v2804_v57 = vmax.f32 %v2746_v53, 0.0 }
 0x199   : > { %v3305_v60 = vpack.c.bf16 %v2801_v55, %v2801_v55  ;;  %v2802_v61 = vmax.f32 %v2738_v43, 0.0 }
 0x19a   : > { %2964 = vst.msk [vmem:[%s4104_s4 + $0x58] sm:$0xf] %vm2941_vm7, %v3307_v51  ;;  %v3308_v54 = vpack.c.bf16 %v2804_v57, %v2804_v57 }
 0x19b   : > { %2962 = vst.msk [vmem:[%s4104_s4 + $0x50] sm:$0xf] %vm2941_vm7, %v3305_v60  ;;  %v3306_v1 = vpack.c.bf16 %v2802_v61, %v2802_v61 }
 0x19c   : > { %2965 = vst.msk [vmem:[%s4104_s4 + $0x5c] sm:$0xf] %vm2941_vm7, %v3308_v54 }
 0x19d   : > { %2963 = vst.msk [vmem:[%s4104_s4 + $0x54] sm:$0xf] %vm2941_vm7, %v3306_v1 }
 0x1d0   : > { %v3355_v2 = vpop.f32.mrb[8].mxu0 }
 0x1d1   : > { %v2695_v3 = vadd.f32 %v3355_v2, %v4088_v42  ;;  %v2686_v5 = vpop.f32.mrb[9].mxu0 }
 0x1d2   : > { %v2687_v6 = vadd.f32 %v4088_v42, %v2686_v5  ;;  %v3356_v7 = vpop.f32.mrb[10].mxu0 }
 0x1d3   : > { %v2791_v58 = vmax.f32 %v2695_v3, 0.0  ;;  %v2698_v4 = vadd.f32 %v3356_v7, %v4088_v42  ;;  %v2689_v63 = vpop.f32.mrb[11].mxu0 }
 0x1d4   : > { %v2789_v13 = vmax.f32 %v2687_v6, 0.0  ;;  %v2690_v36 = vadd.f32 %v4088_v42, %v2689_v63 }
 0x1d5   : > { %v3295_v12 = vpack.c.bf16 %v2791_v58, %v2791_v58  ;;  %v2792_v16 = vmax.f32 %v2698_v4, 0.0 }
 0x1d6   : > { %v3293_v18 = vpack.c.bf16 %v2789_v13, %v2789_v13  ;;  %v2790_v21 = vmax.f32 %v2690_v36, 0.0 }
 0x1d7   : > { %2952 = vst.msk [vmem:[%s4104_s4 + $0x28] sm:$0xf] %vm2941_vm7, %v3295_v12  ;;  %v3296_v0 = vpack.c.bf16 %v2792_v16, %v2792_v16 }
 0x1d8   : > { %2950 = vst.msk [vmem:[%s4104_s4 + $0x20] sm:$0xf] %vm2941_vm7, %v3293_v18  ;;  %v3294_v59 = vpack.c.bf16 %v2790_v21, %v2790_v21 }
 0x1d9   : > { %2953 = vst.msk [vmem:[%s4104_s4 + $0x2c] sm:$0xf] %vm2941_vm7, %v3296_v0 }
 0x1da   : > { %2951 = vst.msk [vmem:[%s4104_s4 + $0x24] sm:$0xf] %vm2941_vm7, %v3294_v59 }
 0x1e6   : > { %v3371_v9 = vpop.f32.mrb[8].mxu1 }
 0x1e7   : > { %v2759_v39 = vadd.f32 %v3371_v9, %v4088_v42  ;;  %v2750_v23 = vpop.f32.mrb[9].mxu1 }
 0x1e8   : > { %v2751_v52 = vadd.f32 %v4088_v42, %v2750_v23  ;;  %v3372_v33 = vpop.f32.mrb[10].mxu1 }
 0x1e9   : > { %v2807_v8 = vmax.f32 %v2759_v39, 0.0  ;;  %v2762_v22 = vadd.f32 %v3372_v33, %v4088_v42  ;;  %v2753_v56 = vpop.f32.mrb[11].mxu1 }
 0x1ea   : > { %v2805_v25 = vmax.f32 %v2751_v52, 0.0  ;;  %v2754_v10 = vadd.f32 %v4088_v42, %v2753_v56 }
 0x1eb   : > { %v3311_v14 = vpack.c.bf16 %v2807_v8, %v2807_v8  ;;  %v2808_v48 = vmax.f32 %v2762_v22, 0.0 }
 0x1ec   : > { %v3309_v26 = vpack.c.bf16 %v2805_v25, %v2805_v25  ;;  %v2806_v15 = vmax.f32 %v2754_v10, 0.0 }
 0x1ed   : > { %2968 = vst.msk [vmem:[%s4104_s4 + $0x68] sm:$0xf] %vm2941_vm7, %v3311_v14  ;;  %v3312_v62 = vpack.c.bf16 %v2808_v48, %v2808_v48 }
 0x1ee   : > { %2966 = vst.msk [vmem:[%s4104_s4 + $0x60] sm:$0xf] %vm2941_vm7, %v3309_v26  ;;  %v3310_v11 = vpack.c.bf16 %v2806_v15, %v2806_v15 }
 0x1ef   : > { %2969 = vst.msk [vmem:[%s4104_s4 + $0x6c] sm:$0xf] %vm2941_vm7, %v3312_v62 }
 0x1f0   : > { %2967 = vst.msk [vmem:[%s4104_s4 + $0x64] sm:$0xf] %vm2941_vm7, %v3310_v11 }
 0x223   : > { %v3359_v32 = vpop.f32.mrb[12].mxu0 }
 0x224   : > { %v2711_v34 = vadd.f32 %v3359_v32, %v4088_v42  ;;  %v2702_v20 = vpop.f32.mrb[13].mxu0 }
 0x225   : > { %v2703_v35 = vadd.f32 %v4088_v42, %v2702_v20  ;;  %v3360_v24 = vpop.f32.mrb[14].mxu0 }
 0x226   : > { %v2795_v19 = vmax.f32 %v2711_v34, 0.0  ;;  %v2714_v37 = vadd.f32 %v3360_v24, %v4088_v42  ;;  %v2705_v38 = vpop.f32.mrb[15].mxu0 }
 0x227   : > { %v2793_v17 = vmax.f32 %v2703_v35, 0.0  ;;  %v2706_v40 = vadd.f32 %v4088_v42, %v2705_v38 }
 0x228   : > { %v3299_v28 = vpack.c.bf16 %v2795_v19, %v2795_v19  ;;  %v2796_v29 = vmax.f32 %v2714_v37, 0.0 }
 0x229   : > { %v3297_v41 = vpack.c.bf16 %v2793_v17, %v2793_v17  ;;  %v2794_v31 = vmax.f32 %v2706_v40, 0.0 }
 0x22a   : > { %2956 = vst.msk [vmem:[%s4104_s4 + $0x38] sm:$0xf] %vm2941_vm7, %v3299_v28  ;;  %v3300_v44 = vpack.c.bf16 %v2796_v29, %v2796_v29 }
 0x22b   : > { %2954 = vst.msk [vmem:[%s4104_s4 + $0x30] sm:$0xf] %vm2941_vm7, %v3297_v41  ;;  %v3298_v27 = vpack.c.bf16 %v2794_v31, %v2794_v31 }
 0x22c   : > { %2957 = vst.msk [vmem:[%s4104_s4 + $0x3c] sm:$0xf] %vm2941_vm7, %v3300_v44 }
 0x22d   : > { %2955 = vst.msk [vmem:[%s4104_s4 + $0x34] sm:$0xf] %vm2941_vm7, %v3298_v27 }
 0x239   : > { %v3375_v45 = vpop.f32.mrb[12].mxu1 }
 0x23a   : > { %v2775_v47 = vadd.f32 %v3375_v45, %v4088_v42  ;;  %v2766_v49 = vpop.f32.mrb[13].mxu1 }
 0x23b   : > { %v2767_v50 = vadd.f32 %v4088_v42, %v2766_v49  ;;  %v3376_v46 = vpop.f32.mrb[14].mxu1 }
 0x23c   : > { %v2811_v53 = vmax.f32 %v2775_v47, 0.0  ;;  %v2778_v30 = vadd.f32 %v3376_v46, %v4088_v42  ;;  %v2769_v55 = vpop.f32.mrb[15].mxu1 }
 0x23d   : > { %v2809_v43 = vmax.f32 %v2767_v50, 0.0  ;;  %v2770_v51 = vadd.f32 %v4088_v42, %v2769_v55 }
 0x23e   : > { %v3315_v57 = vpack.c.bf16 %v2811_v53, %v2811_v53  ;;  %v2812_v60 = vmax.f32 %v2778_v30, 0.0 }
 0x23f   : > { %v3313_v61 = vpack.c.bf16 %v2809_v43, %v2809_v43  ;;  %v2810_v54 = vmax.f32 %v2770_v51, 0.0 }
 0x240   : > { %2972 = vst.msk [vmem:[%s4104_s4 + $0x78] sm:$0xf] %vm2941_vm7, %v3315_v57  ;;  %v3316_v1 = vpack.c.bf16 %v2812_v60, %v2812_v60 }
 0x241   : > { %2970 = vst.msk [vmem:[%s4104_s4 + $0x70] sm:$0xf] %vm2941_vm7, %v3313_v61  ;;  %v3314_v2 = vpack.c.bf16 %v2810_v54, %v2810_v54 }
 0x242   : > { %2973 = vst.msk [vmem:[%s4104_s4 + $0x7c] sm:$0xf] %vm2941_vm7, %v3316_v1 }
 0x243   : > { %2971 = vst.msk [vmem:[%s4104_s4 + $0x74] sm:$0xf] %vm2941_vm7, %v3314_v2 }
 0x244 PF: > { %s13_s12 = sadd.s32 1, %s3404_s12  }
 0x245   : > { %p10_p4 = scmp.ge.s32.totalorder %s13_s12, 4  }
 0x247   :  { %12 = sbr.rel (!%p10_p4) target bundleno = 1 (0x1), region = 64 }

// kernel: inception_forward.6
= control target key start
LH: loop header
LB: loop body
LE: loop exit
PB: predicated region body
PF: predicated region fallthrough
CT: control target
= control target key end

     0   :  { %s6552_s12 = smov 0   ;;  %s8370_s0 = inlined_call_operand.vmem [shape: bf16[2,18,18,16], index: 0, kind: input, shape index: {}]   ;;  %s8371_s1 = inlined_call_operand.vmem [shape: bf16[9,16,32], index: 1, kind: input, shape index: {}]   ;;  %s8372_s2 = inlined_call_operand.vmem [shape: f32[1,32], index: 2, kind: input, shape index: {}]   ;;  %s8373_s3 = inlined_call_operand.vmem [shape: bf16[2,256,32], index: 3, kind: output, shape index: {}]  }
   0x1 LB: > { %s5053_s13 = sadd.s32 4294967295, %s6530_s12   ;;  %p5057_p0 = scmp.ge.s32.totalorder %s6530_s12, 1  ;;  %s6530_s12 = sphi %s6552_s12, %s13_s12  }
   0x2   : > { %p137_p1 = scmp.lt.s32.totalorder %s6530_s12, 3 }
   0x4   : > { %p138_p2 = pnand %p5057_p0, %p137_p1 }
   0x6   : > { %141 = sbr.rel (%p138_p2) target bundleno = 589 (0x24d), region = 32 }
   0xd   : > { %v6408_v0 = vld [vmem:[%s8371_s1 + $0x8] sm:$0xff]   ;;  %p161_p3 = scmp.lt.s32.totalorder %s5053_s13, 1  ;;  %v6409_v1 = vld [vmem:[%s8371_s1 + $0x20] sm:$0xff]   ;;  %vm222_vm0 = vsmask.f32 3328  ;;  %vm666_vm3 = vcmask 130048  }
   0xe   : > { %5835 = vmatprep.subr.bf16.mxu1 %v6408_v0  ;;  %v6571_v2 = vld [vmem:[%s8371_s1] sm:$0xff]   ;;  %5971 = vmatprep.subr.bf16.mxu0 %v6409_v1  ;;  %v6578_v3 = vld [vmem:[%s8371_s1 + $0x28] sm:$0xff]   ;;  %vm223_vm1 = vsmask.f32 7440  ;;  %vm1219_vm4 = vcmask 1042432   ;;  %vm1220_vm5 = vcmask 1046532  }
   0xf   : > { %s8439_s13 = smov (!%p161_p3, %s5053_s13), 1  ;;  %5836 = vmatpush3.bf16.msra.mxu1 %v6408_v0  ;;  %5972 = vmatpush3.bf16.msra.mxu0 %v6409_v1  ;;  %vm6602_vm2 = vmor %vm222_vm0, %vm223_vm1  ;;  %vm4965_vm7 = vcmask 257024  }
  0x10   : > { %s6399_s20 = smul.u32 216, %s8439_s13  ;;  %5869 = vmatprep.subr.bf16.mxu1 %v6571_v2  ;;  %6005 = vmatprep.subr.bf16.mxu0 %v6578_v3  ;;  %vm6824_vm6 = vmor %vm1219_vm4, %vm1220_vm5  ;;  %s5649_s17 = sshll.u32 %s8439_s13, 7 }
  0x12   : > { %s6583_s25 = scalar_lea.vmem %s8370_s0, %s6399_s20  ;;  %s8266_s20 = scalar_lea.vmem %s8373_s3, %s5649_s17 }
  0x13   : > { %v172_v4 = vld [vmem:[%s6583_s25] sm:$0xf]  ;;  %v173_v5 = vld [vmem:[%s6583_s25 + $0x4] sm:$0xf]  ;;  %v206_v6 = vld [vmem:[%s6583_s25 + $0x8] sm:$0x1] }
  0x14   : > { %v226_v7 = vshrl.u32 %v172_v4, 16  ;;  %v229_v8 = vshll.u32 %v172_v4, 16  ;;  %v235_v9 = vshll.u32 %v173_v5, 16  ;;  %v239_v10 = vshrl.u32 %v173_v5, 16  ;;  %v5247_v11 = vld [vmem:[%s6583_s25 + $0xc] sm:$0xf] }
  0x15   : > { %v245_v12 = vshll.u32 %v206_v6, 16  ;;  %v6591_v13 = vld [vmem:[%s6583_s25 + $0x10] sm:$0xf]  ;;  %v6594_v14 = vld [vmem:[%s6583_s25 + $0x14] sm:$0x1]  ;;  %v2044_v20 = vshrl.u32 %v5247_v11, 16 }
  0x16   : > { %v228_v15 = vrot.slane %v226_v7, 4  ;;  %v231_v16 = vrot.slane %v229_v8, 5  ;;  %v237_v17 = vrot.slane %v235_v9, 5  ;;  %v241_v18 = vrot.slane %v239_v10, 4  ;;  %v174_v27 = vld [vmem:[%s6583_s25 + $0xc] sm:$0xf] }
  0x17   : > { %v247_v19 = vrot.slane %v245_v12, 5  ;;  %v2047_v21 = vshll.u32 %v5247_v11, 16  ;;  %v2053_v22 = vshll.u32 %v6591_v13, 16  ;;  %v2057_v25 = vshrl.u32 %v6591_v13, 16  ;;  %v175_v32 = vld [vmem:[%s6583_s25 + $0x10] sm:$0xf] }
  0x18   : > { %v232_v23 = vor.u32 %v231_v16, %v228_v15  ;;  %v242_v24 = vor.u32 %v241_v18, %v237_v17  ;;  %v2063_v26 = vshll.u32 %v6594_v14, 16  ;;  %v2046_v29 = vrot.slane %v2044_v20, 4  ;;  %v207_v38 = vld [vmem:[%s6583_s25 + $0x14] sm:$0x1]  ;;  %v5250_v49 = vld [vmem:[%s6583_s25 + $0x18] sm:$0xf] }
  0x19   : > { %v2049_v30 = vrot.slane %v2047_v21, 5  ;;  %v2055_v31 = vrot.slane %v2053_v22, 5  ;;  %v2059_v35 = vrot.slane %v2057_v25, 4  ;;  %v250_v39 = vshrl.u32 %v174_v27, 16  ;;  %v6614_v54 = vld [vmem:[%s6583_s25 + $0x1c] sm:$0xf] }
  0x1a   : > { %v233_v33 = vrot.slane %v232_v23, 4  ;;  %v243_v34 = vrot.slane %v242_v24, 4  ;;  %v2065_v37 = vrot.slane %v2063_v26, 5  ;;  %v253_v40 = vshll.u32 %v174_v27, 16  ;;  %v6622_v59 = vld [vmem:[%s6583_s25 + $0x20] sm:$0x1] }
  0x1b   : > { %v2050_v36 = vor.u32 %v2049_v30, %v2046_v29  ;;  %v2060_v43 = vor.u32 %v2059_v35, %v2055_v31  ;;  %v259_v44 = vshll.u32 %v175_v32, 16  ;;  %v252_v47 = vrot.slane %v250_v39, 4  ;;  %v176_v10 = vld [vmem:[%s6583_s25 + $0x18] sm:$0xf]  ;;  %v208_v24 = vld [vmem:[%s6583_s25 + $0x20] sm:$0x1] }
  0x1c   : > { %v238_v41 = vsel %vm6602_vm2, %v233_v33, %v237_v17  ;;  %v248_v42 = vsel %vm6602_vm2, %v243_v34, %v247_v19  ;;  %v255_v48 = vrot.slane %v253_v40, 5  ;;  %v263_v52 = vshrl.u32 %v175_v32, 16  ;;  %v177_v17 = vld [vmem:[%s6583_s25 + $0x1c] sm:$0xf]  ;;  %v5253_v32 = vld [vmem:[%s6583_s25 + $0x24] sm:$0xf] }
  0x1d   : > { %v5063_v45 = vcombine.low %v238_v41, %v248_v42  ;;  %v2051_v46 = vrot.slane %v2050_v36, 4  ;;  %v2061_v50 = vrot.slane %v2060_v43, 4  ;;  %v261_v51 = vrot.slane %v259_v44, 5 }
  0x1e   : > { %v269_v53 = vshll.u32 %v207_v38, 16  ;;  %v2791_v56 = vrot.slane %v6591_v13, 5  ;;  %v2794_v57 = vrot.slane %v6594_v14, 5  ;;  %v256_v58 = vor.u32 %v255_v48, %v252_v47  ;;  %v6414_v38 = vld [vmem:[%s8371_s1 + $0x10] sm:$0xff]   ;;  %v6857_v14 = vld [vmem:[%s6583_s25 + $0x7c] sm:$0xf] }
  0x1f   : > { %5837 = vmatprep.mubr.msk.bf16.mxu1 %vm666_vm3, %v5063_v45  ;;  %v2056_v55 = vsel %vm6602_vm2, %v2051_v46, %v2055_v31  ;;  %v2066_v60 = vsel %vm6602_vm2, %v2061_v50, %v2065_v37  ;;  %v265_v61 = vrot.slane %v263_v52, 4  ;;  %v2068_v63 = vshrl.u32 %v5250_v49, 16  ;;  %v6645_v37 = vld [vmem:[%s6583_s25 + $0x28] sm:$0xf]  ;;  %v6654_v45 = vld [vmem:[%s6583_s25 + $0x2c] sm:$0x1] }
  0x20   : > { %v271_v62 = vrot.slane %v269_v53, 5  ;;  %v5297_v0 = vcombine.low %v2056_v55, %v2066_v60  ;;  %v257_v1 = vrot.slane %v256_v58, 4  ;;  %v2071_v4 = vshll.u32 %v5250_v49, 16  ;;  %v178_v52 = vld [vmem:[%s6583_s25 + $0x24] sm:$0xf] }
  0x21   : > { %v2077_v5 = vshll.u32 %v6614_v54, 16  ;;  %v266_v6 = vor.u32 %v265_v61, %v261_v51  ;;  %v2070_v7 = vrot.slane %v2068_v63, 4  ;;  %v2081_v8 = vshrl.u32 %v6614_v54, 16  ;;  %v179_v61 = vld [vmem:[%s6583_s25 + $0x28] sm:$0xf] }
  0x22   : > { %v2087_v9 = vshll.u32 %v6622_v59, 16  ;;  %5973 = vmatprep.mubr.msk.bf16.mxu0 %vm666_vm3, %v5297_v0  ;;  %v262_v11 = vsel %vm6602_vm2, %v257_v1, %v261_v51  ;;  %v2073_v12 = vrot.slane %v2071_v4, 5  ;;  %v2798_v16 = vrot.slane %v6614_v54, 5 }
  0x23   : > { %v2079_v15 = vrot.slane %v2077_v5, 5  ;;  %v267_v18 = vrot.slane %v266_v6, 4  ;;  %v2083_v19 = vrot.slane %v2081_v8, 4  ;;  %v2801_v21 = vrot.slane %v6622_v59, 5  ;;  %v209_v6 = vld [vmem:[%s6583_s25 + $0x2c] sm:$0x1] }
  0x24   : > { %v2089_v20 = vrot.slane %v2087_v9, 5  ;;  %v2074_v22 = vor.u32 %v2073_v12, %v2070_v7  ;;  %v6638_v23 = vrot.slane %v2798_v16, 4  ;;  %v274_v25 = vshrl.u32 %v176_v10, 16 }
  0x25   : > { %v277_v26 = vshll.u32 %v176_v10, 16  ;;  %v272_v27 = vsel %vm6602_vm2, %v267_v18, %v271_v62  ;;  %v2084_v29 = vor.u32 %v2083_v19, %v2079_v15  ;;  %v283_v30 = vshll.u32 %v177_v17, 16  ;;  %v6665_v62 = vld [vmem:[%s8371_s1 + $0x30] sm:$0xff]  }
  0x26   : > { %v287_v31 = vshrl.u32 %v177_v17, 16  ;;  %v5064_v33 = vcombine.low %v262_v11, %v272_v27  ;;  %v2075_v34 = vrot.slane %v2074_v22, 4  ;;  %v276_v35 = vrot.slane %v274_v25, 4  ;;  %v6678_v22 = vld [vmem:[%s6583_s25 + $0x34] sm:$0xf] }
  0x27   : > { %v279_v36 = vrot.slane %v277_v26, 5  ;;  %v2085_v39 = vrot.slane %v2084_v29, 4  ;;  %v285_v40 = vrot.slane %v283_v30, 5  ;;  %v293_v42 = vshll.u32 %v208_v24, 16  ;;  %v6685_v30 = vld [vmem:[%s6583_s25 + $0x38] sm:$0x1] }
  0x28   : > { %v289_v41 = vrot.slane %v287_v31, 4  ;;  %5838 = vmatmul.mubr.msk.bf16.vlgmr.msra.gmra.mrb[0].mxu1 %vm666_vm3, %v5064_v33  ;;  %v2080_v43 = vsel %vm6602_vm2, %v2075_v34, %v2079_v15  ;;  %v2092_v46 = vshrl.u32 %v5253_v32, 16  ;;  %v2095_v47 = vshll.u32 %v5253_v32, 16  ;;  %v5256_v15 = vld [vmem:[%s6583_s25 + $0x30] sm:$0xf] }
  0x29   : > { %v280_v44 = vor.u32 %v279_v36, %v276_v35  ;;  %5870 = vmatpush3.bf16.msra.mxu1 %v6571_v2  ;;  %v2090_v48 = vsel %vm6602_vm2, %v2085_v39, %v2089_v20  ;;  %v295_v50 = vrot.slane %v293_v42, 5  ;;  %v2101_v51 = vshll.u32 %v6645_v37, 16  ;;  %v180_v42 = vld [vmem:[%s6583_s25 + $0x30] sm:$0xf] }
  0x2a   : > { %v290_v49 = vor.u32 %v289_v41, %v285_v40  ;;  %v5298_v53 = vcombine.low %v2080_v43, %v2090_v48  ;;  %v2094_v58 = vrot.slane %v2092_v46, 4  ;;  %v2097_v60 = vrot.slane %v2095_v47, 5  ;;  %5903 = vmatprep.subr.bf16.mxu1 %v6414_v38  ;;  %v181_v48 = vld [vmem:[%s6583_s25 + $0x34] sm:$0xf] }
  0x2b   : > { %v281_v55 = vrot.slane %v280_v44, 4  ;;  %v2103_v63 = vrot.slane %v2101_v51, 5  ;;  %v2105_v0 = vshrl.u32 %v6645_v37, 16  ;;  %v2111_v1 = vshll.u32 %v6654_v45, 16 }
  0x2c   : > { %v291_v2 = vrot.slane %v290_v49, 4  ;;  %5974 = vmatmul.mubr.msk.bf16.vlgmr.msra.gmra.mrb[0].mxu0 %vm666_vm3, %v5298_v53  ;;  %v2098_v5 = vor.u32 %v2097_v60, %v2094_v58  ;;  %v298_v7 = vshrl.u32 %v178_v52, 16  ;;  %v301_v8 = vshll.u32 %v178_v52, 16  ;;  %v210_v53 = vld [vmem:[%s6583_s25 + $0x38] sm:$0x1] }
  0x2d   : > { %v286_v4 = vsel %vm6602_vm2, %v281_v55, %v285_v40  ;;  %6006 = vmatpush3.bf16.msra.mxu0 %v6578_v3  ;;  %v2107_v10 = vrot.slane %v2105_v0, 4  ;;  %v2113_v11 = vrot.slane %v2111_v1, 5  ;;  %v307_v12 = vshll.u32 %v179_v61, 16 }
  0x2e   : > { %v296_v9 = vsel %vm6602_vm2, %v291_v2, %v295_v50  ;;  %v2099_v18 = vrot.slane %v2098_v5, 4  ;;  %v300_v19 = vrot.slane %v298_v7, 4  ;;  %v303_v20 = vrot.slane %v301_v8, 5  ;;  %6039 = vmatprep.subr.bf16.mxu0 %v6665_v62 }
  0x2f   : > { %v5065_v17 = vcombine.low %v286_v4, %v296_v9  ;;  %v2108_v24 = vor.u32 %v2107_v10, %v2103_v63  ;;  %v309_v25 = vrot.slane %v307_v12, 5  ;;  %v311_v26 = vshrl.u32 %v179_v61, 16  ;;  %v5259_v4 = vld [vmem:[%s6583_s25 + $0x3c] sm:$0xf]  ;;  %v6702_v9 = vld [vmem:[%s6583_s25 + $0x40] sm:$0xf] }
  0x30   : > { %v317_v3 = vshll.u32 %v209_v6, 16  ;;  %v2104_v27 = vsel %vm6602_vm2, %v2099_v18, %v2103_v63  ;;  %v304_v29 = vor.u32 %v303_v20, %v300_v19  ;;  %v2116_v31 = vshrl.u32 %v5256_v15, 16  ;;  %v6707_v20 = vld [vmem:[%s6583_s25 + $0x44] sm:$0x1] }
  0x31   : > { %5841 = vmatprep.mubr.msk.bf16.mxu1 %vm666_vm3, %v5065_v17  ;;  %v2119_v32 = vshll.u32 %v5256_v15, 16  ;;  %v2109_v33 = vrot.slane %v2108_v24, 4  ;;  %v313_v34 = vrot.slane %v311_v26, 4  ;;  %v2125_v36 = vshll.u32 %v6678_v22, 16 }
  0x32   : > { %v319_v35 = vrot.slane %v317_v3, 5  ;;  %v305_v38 = vrot.slane %v304_v29, 4  ;;  %v2118_v39 = vrot.slane %v2116_v31, 4  ;;  %v2129_v41 = vshrl.u32 %v6678_v22, 16  ;;  %v182_v29 = vld [vmem:[%s6583_s25 + $0x3c] sm:$0xf] }
  0x33   : > { %v2121_v40 = vrot.slane %v2119_v32, 5  ;;  %v2114_v43 = vsel %vm6602_vm2, %v2109_v33, %v2113_v11  ;;  %v314_v44 = vor.u32 %v313_v34, %v309_v25  ;;  %v2127_v46 = vrot.slane %v2125_v36, 5 }
  0x34   : > { %v2135_v47 = vshll.u32 %v6685_v30, 16  ;;  %v5299_v49 = vcombine.low %v2104_v27, %v2114_v43  ;;  %v310_v50 = vsel %vm6602_vm2, %v305_v38, %v309_v25  ;;  %v2131_v52 = vrot.slane %v2129_v41, 4 }
  0x35   : > { %v2122_v51 = vor.u32 %v2121_v40, %v2118_v39  ;;  %v315_v55 = vrot.slane %v314_v44, 4  ;;  %v322_v60 = vshrl.u32 %v180_v42, 16  ;;  %v325_v61 = vshll.u32 %v180_v42, 16 }
  0x36   : > { %v2137_v58 = vrot.slane %v2135_v47, 5  ;;  %5977 = vmatprep.mubr.msk.bf16.mxu0 %vm666_vm3, %v5299_v49  ;;  %v2132_v63 = vor.u32 %v2131_v52, %v2127_v46  ;;  %v331_v0 = vshll.u32 %v181_v48, 16  ;;  %v335_v1 = vshrl.u32 %v181_v48, 16  ;;  %v211_v49 = vld [vmem:[%s6583_s25 + $0x44] sm:$0x1] }
  0x37   : > { %v2123_v2 = vrot.slane %v2122_v51, 4  ;;  %v320_v5 = vsel %vm6602_vm2, %v315_v55, %v319_v35  ;;  %v324_v6 = vrot.slane %v322_v60, 4  ;;  %v327_v7 = vrot.slane %v325_v61, 5  ;;  %v183_v35 = vld [vmem:[%s6583_s25 + $0x40] sm:$0xf] }
  0x38   : > { %v341_v8 = vshll.u32 %v210_v53, 16  ;;  %v5066_v10 = vcombine.low %v310_v50, %v320_v5  ;;  %v2133_v12 = vrot.slane %v2132_v63, 4  ;;  %v333_v15 = vrot.slane %v331_v0, 5  ;;  %v5262_v51 = vld [vmem:[%s6583_s25 + $0x48] sm:$0xf] }
  0x39   : > { %v2128_v11 = vsel %vm6602_vm2, %v2123_v2, %v2127_v46  ;;  %v328_v17 = vor.u32 %v327_v7, %v324_v6  ;;  %v337_v18 = vrot.slane %v335_v1, 4  ;;  %v2140_v24 = vshrl.u32 %v5259_v4, 16  ;;  %v6725_v60 = vld [vmem:[%s6583_s25 + $0x4c] sm:$0xf] }
  0x3a   : > { %v343_v19 = vrot.slane %v341_v8, 5  ;;  %5842 = vmatmul.mubr.msk.bf16.gmra.mrb[4].mxu1 %vm666_vm3, %v5066_v10  ;;  %v2138_v25 = vsel %vm6602_vm2, %v2133_v12, %v2137_v58  ;;  %v2143_v26 = vshll.u32 %v5259_v4, 16  ;;  %v2149_v3 = vshll.u32 %v6702_v9, 16  ;;  %v6733_v10 = vld [vmem:[%s6583_s25 + $0x50] sm:$0x1] }
  0x3b   : > { %v2153_v27 = vshrl.u32 %v6702_v9, 16  ;;  %v5300_v31 = vcombine.low %v2128_v11, %v2138_v25  ;;  %v329_v32 = vrot.slane %v328_v17, 4  ;;  %v338_v33 = vor.u32 %v337_v18, %v333_v15  ;;  %v6740_v25 = vld [vmem:[%s6583_s25 + $0x4c] sm:$0xf] }
  0x3c   : > { %v2142_v34 = vrot.slane %v2140_v24, 4  ;;  %v2145_v36 = vrot.slane %v2143_v26, 5  ;;  %v2151_v38 = vrot.slane %v2149_v3, 5  ;;  %v2159_v40 = vshll.u32 %v6707_v20, 16 }
  0x3d   : > { %v2155_v39 = vrot.slane %v2153_v27, 4  ;;  %5978 = vmatmul.mubr.msk.bf16.gmra.mrb[4].mxu0 %vm666_vm3, %v5300_v31  ;;  %v334_v41 = vsel %vm6602_vm2, %v329_v32, %v333_v15  ;;  %v339_v42 = vrot.slane %v338_v33, 4  ;;  %v346_v43 = vshrl.u32 %v182_v29, 16  ;;  %v6737_v15 = vld [vmem:[%s6583_s25 + $0x48] sm:$0xf] }
  0x3e   : > { %v349_v44 = vshll.u32 %v182_v29, 16  ;;  %v2146_v46 = vor.u32 %v2145_v36, %v2142_v34  ;;  %v2161_v48 = vrot.slane %v2159_v40, 5  ;;  %v355_v50 = vshll.u32 %v183_v35, 16  ;;  %v212_v34 = vld [vmem:[%s6583_s25 + $0x50] sm:$0x1] }
  0x3f   : > { %v2156_v47 = vor.u32 %v2155_v39, %v2151_v38  ;;  %v344_v52 = vsel %vm6602_vm2, %v339_v42, %v343_v19  ;;  %v348_v53 = vrot.slane %v346_v43, 4  ;;  %v359_v58 = vshrl.u32 %v183_v35, 16 }
  0x40   : > { %v351_v55 = vrot.slane %v349_v44, 5  ;;  %v5067_v61 = vcombine.low %v334_v41, %v344_v52  ;;  %v2147_v2 = vrot.slane %v2146_v46, 4  ;;  %v357_v0 = vrot.slane %v355_v50, 5  ;;  %v5265_v41 = vld [vmem:[%s6583_s25 + $0x54] sm:$0xf] }
  0x41   : > { %v2157_v63 = vrot.slane %v2156_v47, 4  ;;  %v361_v4 = vrot.slane %v359_v58, 4  ;;  %v365_v5 = vshll.u32 %v211_v49, 16  ;;  %v2164_v6 = vshrl.u32 %v5262_v51, 16 }
  0x42   : > { %v352_v1 = vor.u32 %v351_v55, %v348_v53  ;;  %5845 = vmatprep.mubr.msk.bf16.mxu1 %vm666_vm3, %v5067_v61  ;;  %v2152_v7 = vsel %vm6602_vm2, %v2147_v2, %v2151_v38  ;;  %v2167_v11 = vshll.u32 %v5262_v51, 16  ;;  %v2173_v12 = vshll.u32 %v6725_v60, 16  ;;  %v6756_v51 = vld [vmem:[%s6583_s25 + $0x58] sm:$0xf] }
  0x43   : > { %v2162_v8 = vsel %vm6602_vm2, %v2157_v63, %v2161_v48  ;;  %v362_v19 = vor.u32 %v361_v4, %v357_v0  ;;  %v367_v24 = vrot.slane %v365_v5, 5  ;;  %v2166_v26 = vrot.slane %v2164_v6, 4 }
  0x44   : > { %v5301_v17 = vcombine.low %v2152_v7, %v2162_v8  ;;  %v353_v18 = vrot.slane %v352_v1, 4  ;;  %v2169_v3 = vrot.slane %v2167_v11, 5  ;;  %v2175_v27 = vrot.slane %v2173_v12, 5  ;;  %v6766_v8 = vld [vmem:[%s6583_s25 + $0x54] sm:$0xf] }
  0x45   : > { %v2177_v29 = vshrl.u32 %v6725_v60, 16  ;;  %v363_v32 = vrot.slane %v362_v19, 4  ;;  %v2183_v33 = vshll.u32 %v6733_v10, 16  ;;  %v370_v35 = vshrl.u32 %v6737_v15, 16  ;;  %v6772_v19 = vld [vmem:[%s6583_s25 + $0x58] sm:$0xf] }
  0x46   : > { %5981 = vmatprep.mubr.msk.bf16.mxu0 %vm666_vm3, %v5301_v17  ;;  %v358_v31 = vsel %vm6602_vm2, %v353_v18, %v357_v0  ;;  %v2170_v36 = vor.u32 %v2169_v3, %v2166_v26  ;;  %v373_v39 = vshll.u32 %v6737_v15, 16  ;;  %v379_v40 = vshll.u32 %v6740_v25, 16  ;;  %v6762_v0 = vld [vmem:[%s6583_s25 + $0x5c] sm:$0x1] }
  0x47   : > { %v2179_v38 = vrot.slane %v2177_v29, 4  ;;  %v368_v42 = vsel %vm6602_vm2, %v363_v32, %v367_v24  ;;  %v2185_v43 = vrot.slane %v2183_v33, 5  ;;  %v372_v44 = vrot.slane %v370_v35, 4  ;;  %v213_v33 = vld [vmem:[%s6583_s25 + $0x5c] sm:$0x1] }
  0x48   : > { %v383_v46 = vshrl.u32 %v6740_v25, 16  ;;  %v5068_v47 = vcombine.low %v358_v31, %v368_v42  ;;  %v2171_v48 = vrot.slane %v2170_v36, 4  ;;  %v375_v50 = vrot.slane %v373_v39, 5 }
  0x49   : > { %v2180_v49 = vor.u32 %v2179_v38, %v2175_v27  ;;  %v381_v52 = vrot.slane %v379_v40, 5  ;;  %v389_v55 = vshll.u32 %v212_v34, 16  ;;  %v2188_v58 = vshrl.u32 %v5265_v41, 16  ;;  %v5268_v40 = vld [vmem:[%s6583_s25 + $0x60] sm:$0xf] }
  0x4a   : > { %v385_v53 = vrot.slane %v383_v46, 4  ;;  %5846 = vmatmul.mubr.msk.bf16.gmra.mrb[8].mxu1 %vm666_vm3, %v5068_v47  ;;  %v2176_v61 = vsel %vm6602_vm2, %v2171_v48, %v2175_v27  ;;  %v376_v63 = vor.u32 %v375_v50, %v372_v44  ;;  %v2191_v1 = vshll.u32 %v5265_v41, 16  ;;  %v6786_v46 = vld [vmem:[%s6583_s25 + $0x64] sm:$0xf] }
  0x4b   : > { %v2181_v2 = vrot.slane %v2180_v49, 4  ;;  %v391_v5 = vrot.slane %v389_v55, 5  ;;  %v2190_v6 = vrot.slane %v2188_v58, 4  ;;  %v2197_v7 = vshll.u32 %v6756_v51, 16  ;;  %v6793_v55 = vld [vmem:[%s6583_s25 + $0x68] sm:$0x1] }
  0x4c   : > { %v386_v4 = vor.u32 %v385_v53, %v381_v52  ;;  %v377_v12 = vrot.slane %v376_v63, 4  ;;  %v2193_v17 = vrot.slane %v2191_v1, 5  ;;  %v2201_v18 = vshrl.u32 %v6756_v51, 16 }
  0x4d   : > { %v2186_v11 = vsel %vm6602_vm2, %v2181_v2, %v2185_v43  ;;  %v2199_v3 = vrot.slane %v2197_v7, 5  ;;  %v2207_v27 = vshll.u32 %v6762_v0, 16  ;;  %v394_v34 = vshrl.u32 %v6766_v8, 16 }
  0x4e   : > { %v5302_v24 = vcombine.low %v2176_v61, %v2186_v11  ;;  %v387_v26 = vrot.slane %v386_v4, 4  ;;  %v382_v29 = vsel %vm6602_vm2, %v377_v12, %v381_v52  ;;  %v2194_v31 = vor.u32 %v2193_v17, %v2190_v6  ;;  %v6803_v17 = vld [vmem:[%s6583_s25 + $0x64] sm:$0xf] }
  0x4f   : > { %v2203_v32 = vrot.slane %v2201_v18, 4  ;;  %v2209_v36 = vrot.slane %v2207_v27, 5  ;;  %v397_v38 = vshll.u32 %v6766_v8, 16  ;;  %v403_v39 = vshll.u32 %v6772_v19, 16 }
  0x50   : > { %5982 = vmatmul.mubr.msk.bf16.gmra.mrb[8].mxu0 %vm666_vm3, %v5302_v24  ;;  %v392_v35 = vsel %vm6602_vm2, %v387_v26, %v391_v5  ;;  %v2195_v42 = vrot.slane %v2194_v31, 4  ;;  %v396_v44 = vrot.slane %v394_v34, 4  ;;  %v407_v49 = vshrl.u32 %v6772_v19, 16  ;;  %v6797_v5 = vld [vmem:[%s6583_s25 + $0x60] sm:$0xf] }
  0x51   : > { %v5069_v41 = vcombine.low %v382_v29, %v392_v35  ;;  %v2204_v43 = vor.u32 %v2203_v32, %v2199_v3  ;;  %v399_v47 = vrot.slane %v397_v38, 5  ;;  %v405_v48 = vrot.slane %v403_v39, 5  ;;  %v214_v35 = vld [vmem:[%s6583_s25 + $0x68] sm:$0x1] }
  0x52   : > { %v413_v50 = vshll.u32 %v213_v33, 16  ;;  %v2200_v52 = vsel %vm6602_vm2, %v2195_v42, %v2199_v3  ;;  %v2212_v58 = vshrl.u32 %v5268_v40, 16  ;;  %v2215_v61 = vshll.u32 %v5268_v40, 16 }
  0x53   : > { %5849 = vmatprep.mubr.msk.bf16.mxu1 %vm666_vm3, %v5069_v41  ;;  %v2205_v53 = vrot.slane %v2204_v43, 4  ;;  %v400_v2 = vor.u32 %v399_v47, %v396_v44  ;;  %v409_v63 = vrot.slane %v407_v49, 4  ;;  %v2221_v4 = vshll.u32 %v6786_v46, 16  ;;  %v5330_v43 = vld [vmem:[%s6583_s25 + $0xc] sm:$0xe] }
  0x54   : > { %v415_v1 = vrot.slane %v413_v50, 5  ;;  %v2214_v7 = vrot.slane %v2212_v58, 4  ;;  %v2217_v11 = vrot.slane %v2215_v61, 5  ;;  %v2225_v12 = vshrl.u32 %v6786_v46, 16 }
  0x55   : > { %v2210_v6 = vsel %vm6602_vm2, %v2205_v53, %v2209_v36  ;;  %v401_v24 = vrot.slane %v400_v2, 4  ;;  %v410_v26 = vor.u32 %v409_v63, %v405_v48  ;;  %v2223_v3 = vrot.slane %v2221_v4, 5 }
  0x56   : > { %v5303_v18 = vcombine.low %v2200_v52, %v2210_v6  ;;  %v2218_v27 = vor.u32 %v2217_v11, %v2214_v7  ;;  %v2227_v29 = vrot.slane %v2225_v12, 4  ;;  %v2231_v31 = vshll.u32 %v6793_v55, 16  ;;  %v6831_v7 = vld [vmem:[%s6583_s25 + $0x70] sm:$0xf] }
  0x57   : > { %v418_v32 = vshrl.u32 %v6797_v5, 16  ;;  %v406_v33 = vsel %vm6602_vm2, %v401_v24, %v405_v48  ;;  %v411_v34 = vrot.slane %v410_v26, 4  ;;  %v421_v36 = vshll.u32 %v6797_v5, 16  ;;  %v6818_v48 = vld [vmem:[%s6583_s25 + $0x6c] sm:$0xf] }
  0x58   : > { %5985 = vmatprep.mubr.msk.bf16.mxu0 %vm666_vm3, %v5303_v18  ;;  %v427_v38 = vshll.u32 %v6803_v17, 16  ;;  %v2219_v39 = vrot.slane %v2218_v27, 4  ;;  %v2228_v40 = vor.u32 %v2227_v29, %v2223_v3  ;;  %v2233_v41 = vrot.slane %v2231_v31, 5  ;;  %v215_v31 = vld [vmem:[%s6583_s25 + $0x74] sm:$0x1] }
  0x59   : > { %v420_v42 = vrot.slane %v418_v32, 4  ;;  %v416_v44 = vsel %vm6602_vm2, %v411_v34, %v415_v1  ;;  %v423_v47 = vrot.slane %v421_v36, 5  ;;  %v431_v50 = vshrl.u32 %v6803_v17, 16  ;;  %v5331_v32 = vld [vmem:[%s6583_s25 + $0x18] sm:$0xe] }
  0x5a   : > { %v429_v49 = vrot.slane %v427_v38, 5  ;;  %v5070_v52 = vcombine.low %v406_v33, %v416_v44  ;;  %v2224_v53 = vsel %vm6602_vm2, %v2219_v39, %v2223_v3  ;;  %v2229_v58 = vrot.slane %v2228_v40, 4  ;;  %v6850_v38 = vld [vmem:[%s6583_s25 + $0x78] sm:$0xf] }
  0x5b   : > { %v437_v61 = vshll.u32 %v214_v35, 16  ;;  %v424_v63 = vor.u32 %v423_v47, %v420_v42  ;;  %v433_v1 = vrot.slane %v431_v50, 4  ;;  %v5346_v4 = vrot.slane %v5330_v43, 9  ;;  %v5332_v47 = vld [vmem:[%s6583_s25 + $0x24] sm:$0xe] }
  0x5c   : > { %v2793_v6 = vrot.slane %v2791_v56, 4  ;;  %5850 = vmatmul.mubr.msk.bf16.gmra.mrb[12].mxu1 %vm666_vm3, %v5070_v52  ;;  %v2234_v11 = vsel %vm6602_vm2, %v2229_v58, %v2233_v41  ;;  %v442_v18 = vshrl.u32 %v6818_v48, 16  ;;  %v445_v24 = vshll.u32 %v6818_v48, 16  ;;  %v216_v41 = vld [vmem:[%s6583_s25 + $0x80] sm:$0x1] }
  0x5d   : > { %v439_v12 = vrot.slane %v437_v61, 5  ;;  %v5304_v26 = vcombine.low %v2224_v53, %v2234_v11  ;;  %v425_v3 = vrot.slane %v424_v63, 4  ;;  %v434_v27 = vor.u32 %v433_v1, %v429_v49 }
  0x5e   : > { %v2792_v29 = vsel %vm6824_vm6, %v5346_v4, %v2791_v56  ;;  %v2795_v33 = vsel %vm6824_vm6, %v2793_v6, %v2794_v57  ;;  %v444_v34 = vrot.slane %v442_v18, 4  ;;  %v447_v35 = vrot.slane %v445_v24, 5  ;;  %v6884_v24 = vld [vmem:[%s6583_s25 + $0x88] sm:$0xf] }
  0x5f   : > { %v451_v36 = vshll.u32 %v6831_v7, 16  ;;  %5986 = vmatmul.mubr.msk.bf16.gmra.mrb[12].mxu0 %vm666_vm3, %v5304_v26  ;;  %v430_v13 = vsel %vm6602_vm2, %v425_v3, %v429_v49  ;;  %v435_v56 = vrot.slane %v434_v27, 4  ;;  %v5364_v39 = vcombine.low %v2792_v29, %v2795_v33 }
  0x60   : > { %v455_v40 = vshrl.u32 %v6831_v7, 16  ;;  %v448_v57 = vor.u32 %v447_v35, %v444_v34  ;;  %v461_v43 = vshll.u32 %v215_v31, 16  ;;  %v5347_v44 = vrot.slane %v5331_v32, 9  ;;  %v217_v35 = vld [vmem:[%s6583_s25 + $0x8c] sm:$0x1] }
  0x61   : > { %v453_v42 = vrot.slane %v451_v36, 5  ;;  %v440_v50 = vsel %vm6602_vm2, %v435_v56, %v439_v12  ;;  %6007 = vmatprep.mubr.msk.bf16.mxu0 %vm666_vm3, %v5364_v39  ;;  %v2802_v49 = vsel %vm6824_vm6, %v6638_v23, %v2801_v21  ;;  %v466_v53 = vshrl.u32 %v6850_v38, 16  ;;  %v6876_v12 = vld [vmem:[%s6583_s25 + $0x84] sm:$0xf] }
  0x62   : > { %v457_v52 = vrot.slane %v455_v40, 4  ;;  %v5071_v58 = vcombine.low %v430_v13, %v440_v50  ;;  %v449_v61 = vrot.slane %v448_v57, 4  ;;  %v463_v63 = vrot.slane %v461_v43, 5  ;;  %v5333_v40 = vld [vmem:[%s6583_s25 + $0x30] sm:$0xe] }
  0x63   : > { %v2799_v1 = vsel %vm6824_vm6, %v5347_v44, %v2798_v16  ;;  %v468_v11 = vrot.slane %v466_v53, 4  ;;  %v469_v59 = vshll.u32 %v6850_v38, 16  ;;  %v475_v23 = vshll.u32 %v6857_v14, 16  ;;  %v6889_v16 = vld [vmem:[%s8371_s1 + $0x38] sm:$0xff]   ;;  %v6908_v50 = vld [vmem:[%s6583_s25 + $0x90] sm:$0xf] }
  0x64   : > { %v458_v4 = vor.u32 %v457_v52, %v453_v42  ;;  %v5365_v6 = vcombine.low %v2799_v1, %v2802_v49  ;;  %5853 = vmatprep.mubr.msk.bf16.mxu1 %vm666_vm3, %v5071_v58  ;;  %v454_v21 = vsel %vm6602_vm2, %v449_v61, %v453_v42  ;;  %v479_v54 = vshrl.u32 %v6857_v14, 16  ;;  %v6913_v58 = vld [vmem:[%s6583_s25 + $0x94] sm:$0xf] }
  0x65   : > { %v485_v18 = vshll.u32 %v216_v41, 16  ;;  %v471_v3 = vrot.slane %v469_v59, 5  ;;  %v5348_v27 = vrot.slane %v5332_v47, 9  ;;  %v2805_v29 = vrot.slane %v6645_v37, 5 }
  0x66   : > { %v459_v26 = vrot.slane %v458_v4, 4  ;;  %v477_v31 = vrot.slane %v475_v23, 5  ;;  %v481_v32 = vrot.slane %v479_v54, 4  ;;  %v2808_v34 = vrot.slane %v6654_v45, 5  ;;  %v218_v23 = vld [vmem:[%s6583_s25 + $0x98] sm:$0x1] }
  0x67   : > { %v487_v33 = vrot.slane %v485_v18, 5  ;;  %6008 = vmatmul.mubr.msk.bf16.vlgmr.msra.gmra.mrb[0].mxu0 %vm666_vm3, %v5365_v6  ;;  %v472_v13 = vor.u32 %v471_v3, %v468_v11  ;;  %v2806_v56 = vsel %vm6824_vm6, %v5348_v27, %v2805_v29  ;;  %v2807_v39 = vrot.slane %v2805_v29, 4  ;;  %v5334_v27 = vld [vmem:[%s6583_s25 + $0x3c] sm:$0xe] }
  0x68   : > { %v464_v36 = vsel %vm6602_vm2, %v459_v26, %v463_v63  ;;  %6040 = vmatpush3.bf16.msra.mxu0 %v6665_v62  ;;  %v482_v37 = vor.u32 %v481_v32, %v477_v31  ;;  %v490_v45 = vshrl.u32 %v6876_v12, 16  ;;  %v493_v57 = vshll.u32 %v6876_v12, 16 }
  0x69   : > { %v5072_v41 = vcombine.low %v454_v21, %v464_v36  ;;  %v473_v42 = vrot.slane %v472_v13, 4  ;;  %v2809_v43 = vsel %vm6824_vm6, %v2807_v39, %v2808_v34  ;;  %v499_v44 = vshll.u32 %v6884_v24, 16  ;;  %6073 = vmatprep.subr.bf16.mxu0 %v6889_v16 }
  0x6a   : > { %v503_v47 = vshrl.u32 %v6884_v24, 16  ;;  %v483_v62 = vrot.slane %v482_v37, 4  ;;  %v5366_v52 = vcombine.low %v2806_v56, %v2809_v43  ;;  %v492_v49 = vrot.slane %v490_v45, 4 }
  0x6b   : > { %5854 = vmatmul.mubr.msk.bf16.gmra.mrb[16].mxu1 %vm666_vm3, %v5072_v41  ;;  %v495_v53 = vrot.slane %v493_v57, 5  ;;  %v478_v61 = vsel %vm6602_vm2, %v473_v42, %v477_v31  ;;  %v501_v63 = vrot.slane %v499_v44, 5  ;;  %v509_v4 = vshll.u32 %v217_v35, 16  ;;  %v6941_v42 = vld [vmem:[%s6583_s25 + $0xa0] sm:$0xf] }
  0x6c   : > { %v505_v1 = vrot.slane %v503_v47, 4  ;;  %v488_v6 = vsel %vm6602_vm2, %v483_v62, %v487_v33  ;;  %6011 = vmatprep.mubr.msk.bf16.mxu0 %vm666_vm3, %v5366_v52  ;;  %v5349_v59 = vrot.slane %v5333_v40, 9  ;;  %v2812_v21 = vrot.slane %v6678_v22, 5  ;;  %v6936_v40 = vld [vmem:[%s6583_s25 + $0x9c] sm:$0xf] }
  0x6d   : > { %v496_v11 = vor.u32 %v495_v53, %v492_v49  ;;  %v5073_v54 = vcombine.low %v478_v61, %v488_v6  ;;  %v511_v26 = vrot.slane %v509_v4, 5  ;;  %v2815_v3 = vrot.slane %v6685_v30, 5  ;;  %v219_v52 = vld [vmem:[%s6583_s25 + $0xa4] sm:$0x1] }
  0x6e   : > { %v506_v18 = vor.u32 %v505_v1, %v501_v63  ;;  %v2813_v31 = vsel %vm6824_vm6, %v5349_v59, %v2812_v21  ;;  %v2814_v32 = vrot.slane %v2812_v21, 4  ;;  %v514_v33 = vshrl.u32 %v6908_v50, 16  ;;  %v5335_v59 = vld [vmem:[%s6583_s25 + $0x48] sm:$0xe] }
  0x6f   : > { %v497_v29 = vrot.slane %v496_v11, 4  ;;  %5857 = vmatprep.mubr.msk.bf16.mxu1 %vm666_vm3, %v5073_v54  ;;  %v517_v22 = vshll.u32 %v6908_v50, 16  ;;  %v523_v35 = vshll.u32 %v6913_v58, 16  ;;  %v527_v36 = vshrl.u32 %v6913_v58, 16 }
  0x70   : > { %v507_v34 = vrot.slane %v506_v18, 4  ;;  %v2816_v13 = vsel %vm6824_vm6, %v2814_v32, %v2815_v3  ;;  %v516_v56 = vrot.slane %v514_v33, 4  ;;  %v533_v39 = vshll.u32 %v218_v23, 16  ;;  %v6960_v33 = vld [vmem:[%s6583_s25 + $0xa8] sm:$0xf] }
  0x71   : > { %v502_v30 = vsel %vm6602_vm2, %v497_v29, %v501_v63  ;;  %v5367_v37 = vcombine.low %v2813_v31, %v2816_v13  ;;  %v519_v45 = vrot.slane %v517_v22, 5  ;;  %v525_v57 = vrot.slane %v523_v35, 5 }
  0x72   : > { %v512_v41 = vsel %vm6602_vm2, %v507_v34, %v511_v26  ;;  %v529_v44 = vrot.slane %v527_v36, 4  ;;  %v535_v47 = vrot.slane %v533_v39, 5  ;;  %v5350_v62 = vrot.slane %v5334_v27, 9 }
  0x73   : > { %v5074_v43 = vcombine.low %v502_v30, %v512_v41  ;;  %6012 = vmatmul.mubr.msk.bf16.gmra.mrb[4].mxu0 %vm666_vm3, %v5367_v37  ;;  %v520_v49 = vor.u32 %v519_v45, %v516_v56  ;;  %v2819_v53 = vrot.slane %v6702_v9, 5  ;;  %v2822_v61 = vrot.slane %v6707_v20, 5  ;;  %v6965_v30 = vld [vmem:[%s6583_s25 + $0xac] sm:$0xf]  ;;  %v220_v37 = vld [vmem:[%s6583_s25 + $0xb0] sm:$0x1] }
  0x74   : > { %v538_v63 = vshrl.u32 %v6936_v40, 16  ;;  %v530_v1 = vor.u32 %v529_v44, %v525_v57  ;;  %v541_v4 = vshll.u32 %v6936_v40, 16  ;;  %v547_v6 = vshll.u32 %v6941_v42, 16  ;;  %v5336_v45 = vld [vmem:[%s6583_s25 + $0x54] sm:$0xe] }
  0x75   : > { %5858 = vmatmul.mubr.msk.bf16.gmra.mrb[20].mxu1 %vm666_vm3, %v5074_v43  ;;  %v551_v11 = vshrl.u32 %v6941_v42, 16  ;;  %v521_v21 = vrot.slane %v520_v49, 4  ;;  %v2820_v23 = vsel %vm6824_vm6, %v5350_v62, %v2819_v53  ;;  %v2821_v9 = vrot.slane %v2819_v53, 4  ;;  %v6975_v62 = vld [vmem:[%s6583_s25 + $0xb4] sm:$0xf] }
  0x76   : > { %v540_v20 = vrot.slane %v538_v63, 4  ;;  %v531_v54 = vrot.slane %v530_v1, 4  ;;  %v543_v18 = vrot.slane %v541_v4, 5  ;;  %v549_v26 = vrot.slane %v547_v6, 5  ;;  %v6987_v4 = vld [vmem:[%s6583_s25 + $0xb8] sm:$0xf] }
  0x77   : > { %v553_v3 = vrot.slane %v551_v11, 4  ;;  %v526_v27 = vsel %vm6602_vm2, %v521_v21, %v525_v57  ;;  %v2823_v29 = vsel %vm6824_vm6, %v2821_v9, %v2822_v61  ;;  %v557_v31 = vshll.u32 %v219_v52, 16 }
  0x78   : > { %v5351_v32 = vrot.slane %v5335_v59, 9  ;;  %v536_v34 = vsel %vm6602_vm2, %v531_v54, %v535_v47  ;;  %v5368_v22 = vcombine.low %v2820_v23, %v2823_v29  ;;  %v544_v35 = vor.u32 %v543_v18, %v540_v20  ;;  %v221_v18 = vld [vmem:[%s6583_s25 + $0xbc] sm:$0x1] }
  0x79   : > { %v554_v36 = vor.u32 %v553_v3, %v549_v26  ;;  %v5075_v13 = vcombine.low %v526_v27, %v536_v34  ;;  %v559_v56 = vrot.slane %v557_v31, 5  ;;  %v2826_v39 = vrot.slane %v6725_v60, 5  ;;  %v5337_v31 = vld [vmem:[%s6583_s25 + $0x60] sm:$0xe] }
  0x7a   : > { %v2829_v41 = vrot.slane %v6733_v10, 5  ;;  %6015 = vmatprep.mubr.msk.bf16.mxu0 %vm666_vm3, %v5368_v22  ;;  %v545_v57 = vrot.slane %v544_v35, 4  ;;  %v562_v44 = vshrl.u32 %v6960_v33, 16  ;;  %v565_v47 = vshll.u32 %v6960_v33, 16 }
  0x7b   : > { %v555_v43 = vrot.slane %v554_v36, 4  ;;  %5861 = vmatprep.mubr.msk.bf16.mxu1 %vm666_vm3, %v5075_v13  ;;  %v2827_v60 = vsel %vm6824_vm6, %v5351_v32, %v2826_v39  ;;  %v2828_v52 = vrot.slane %v2826_v39, 4  ;;  %v571_v10 = vshll.u32 %v6965_v30, 16  ;;  %v5338_v36 = vld [vmem:[%s6583_s25 + $0x6c] sm:$0xe] }
  0x7c   : > { %v575_v49 = vshrl.u32 %v6965_v30, 16  ;;  %v550_v53 = vsel %vm6602_vm2, %v545_v57, %v549_v26  ;;  %v564_v63 = vrot.slane %v562_v44, 4  ;;  %v567_v1 = vrot.slane %v565_v47, 5 }
  0x7d   : > { %v560_v61 = vsel %vm6602_vm2, %v555_v43, %v559_v56  ;;  %v2830_v11 = vsel %vm6824_vm6, %v2828_v52, %v2829_v41  ;;  %v573_v59 = vrot.slane %v571_v10, 5  ;;  %v581_v20 = vshll.u32 %v220_v37, 16  ;;  %v5273_v52 = vld [vmem:[%s6583_s25 + $0x74] sm:$0x1] }
  0x7e   : > { %v5076_v6 = vcombine.low %v550_v53, %v560_v61  ;;  %v577_v21 = vrot.slane %v575_v49, 4  ;;  %v5369_v23 = vcombine.low %v2827_v60, %v2830_v11  ;;  %v568_v9 = vor.u32 %v567_v1, %v564_v63  ;;  %v5272_v60 = vld [vmem:[%s6583_s25 + $0x70] sm:$0xf] }
  0x7f   : > { %v5352_v54 = vrot.slane %v5336_v45, 9  ;;  %v2833_v3 = vrot.slane %v6756_v51, 5  ;;  %v2836_v27 = vrot.slane %v6762_v0, 5  ;;  %v586_v29 = vshrl.u32 %v6975_v62, 16 }
  0x80   : > { %5862 = vmatmul.mubr.msk.bf16.gmra.mrb[24].mxu1 %vm666_vm3, %v5076_v6  ;;  %v578_v26 = vor.u32 %v577_v21, %v573_v59  ;;  %6016 = vmatmul.mubr.msk.bf16.gmra.mrb[8].mxu0 %vm666_vm3, %v5369_v23  ;;  %v569_v32 = vrot.slane %v568_v9, 4  ;;  %v583_v34 = vrot.slane %v581_v20, 5  ;;  %v589_v22 = vshll.u32 %v6975_v62, 16 }
  0x81   : > { %v595_v35 = vshll.u32 %v6987_v4, 16  ;;  %v2834_v51 = vsel %vm6824_vm6, %v5352_v54, %v2833_v3  ;;  %v2835_v56 = vrot.slane %v2833_v3, 4  ;;  %v588_v0 = vrot.slane %v586_v29, 4  ;;  %v5339_v54 = vld [vmem:[%s6583_s25 + $0x78] sm:$0xe] }
  0x82   : > { %v579_v13 = vrot.slane %v578_v26, 4  ;;  %v574_v39 = vsel %vm6602_vm2, %v569_v32, %v573_v59  ;;  %v591_v41 = vrot.slane %v589_v22, 5  ;;  %v599_v45 = vshrl.u32 %v6987_v4, 16  ;;  %v6465_v29 = vld [vmem:[%s6583_s25] sm:$0xf] }
  0x83   : > { %v597_v37 = vrot.slane %v595_v35, 5  ;;  %v2837_v43 = vsel %vm6824_vm6, %v2835_v56, %v2836_v27  ;;  %v605_v44 = vshll.u32 %v221_v18, 16  ;;  %v5353_v47 = vrot.slane %v5337_v31, 9  ;;  %v7027_v31 = vld [vmem:[%s6583_s25 + $0x4] sm:$0xf] }
  0x84   : > { %v584_v57 = vsel %vm6602_vm2, %v579_v13, %v583_v34  ;;  %v5370_v49 = vcombine.low %v2834_v51, %v2837_v43  ;;  %v592_v53 = vor.u32 %v591_v41, %v588_v0  ;;  %v601_v61 = vrot.slane %v599_v45, 4  ;;  %v7031_v34 = vld [vmem:[%s6583_s25 + $0x7c] sm:$0xf]  ;;  %v7034_v22 = vld [vmem:[%s6583_s25 + $0x80] sm:$0x1] }
  0x85   : > { %v5077_v10 = vcombine.low %v574_v39, %v584_v57  ;;  %v607_v63 = vrot.slane %v605_v44, 5  ;;  %v2840_v1 = vrot.slane %v6786_v46, 5  ;;  %v2843_v6 = vrot.slane %v6793_v55, 5  ;;  %v5340_v35 = vld [vmem:[%s6583_s25 + $0x84] sm:$0xe] }
  0x86   : > { %v5354_v11 = vrot.slane %v5338_v36, 9  ;;  %6019 = vmatprep.mubr.msk.bf16.mxu0 %vm666_vm3, %v5370_v49  ;;  %v593_v59 = vrot.slane %v592_v53, 4  ;;  %v602_v21 = vor.u32 %v601_v61, %v597_v37  ;;  %v2847_v23 = vrot.slane %v5272_v60, 5  ;;  %v5278_v0 = vld [vmem:[%s6583_s25 + $0x88] sm:$0xf] }
  0x87   : > { %5865 = vmatprep.mubr.msk.bf16.mxu1 %vm666_vm3, %v5077_v10  ;;  %v2850_v9 = vrot.slane %v5273_v52, 5  ;;  %v2841_v20 = vsel %vm6824_vm6, %v5353_v47, %v2840_v1  ;;  %v2842_v46 = vrot.slane %v2840_v1, 4  ;;  %v5096_v32 = vcombine.low %v6465_v29, %v7027_v31  ;;  %v5279_v39 = vld [vmem:[%s6583_s25 + $0x8c] sm:$0x1]  ;;  %v5281_v45 = vld [vmem:[%s6583_s25 + $0x94] sm:$0xf] }
  0x88   : > { %v598_v55 = vsel %vm6602_vm2, %v593_v59, %v597_v37  ;;  %v603_v18 = vrot.slane %v602_v21, 4  ;;  %v2848_v26 = vsel %vm6824_vm6, %v5354_v11, %v2847_v23  ;;  %v2849_v3 = vrot.slane %v2847_v23, 4  ;;  %v5282_v52 = vld [vmem:[%s6583_s25 + $0x98] sm:$0x1]  ;;  %v5341_v10 = vld [vmem:[%s6583_s25 + $0x90] sm:$0xe] }
  0x89   : > { %v2844_v27 = vsel %vm6824_vm6, %v2842_v46, %v2843_v6  ;;  %v5355_v56 = vrot.slane %v5339_v54, 9  ;;  %v2854_v57 = vrot.slane %v7031_v34, 5  ;;  %v2857_v43 = vrot.slane %v7034_v22, 5  ;;  %v5285_v11 = vld [vmem:[%s6583_s25 + $0xa4] sm:$0x1] }
  0x8a   : > { %v608_v36 = vsel %vm6602_vm2, %v603_v18, %v607_v63  ;;  %v5371_v13 = vcombine.low %v2841_v20, %v2844_v27  ;;  %v2851_v51 = vsel %vm6824_vm6, %v2849_v3, %v2850_v9  ;;  %v5356_v44 = vrot.slane %v5340_v35, 9  ;;  %v5284_v63 = vld [vmem:[%s6583_s25 + $0xa0] sm:$0xf]  ;;  %v5342_v59 = vld [vmem:[%s6583_s25 + $0x9c] sm:$0xe] }
  0x8b   : > { %v5078_v41 = vcombine.low %v598_v55, %v608_v36  ;;  %v5372_v37 = vcombine.low %v2848_v26, %v2851_v51  ;;  %v2861_v47 = vrot.slane %v5278_v0, 5  ;;  %v2864_v60 = vrot.slane %v5279_v39, 5  ;;  %v6467_v21 = vld [vmem:[%s6583_s25 + $0xc] sm:$0xf]  ;;  %v7061_v23 = vld [vmem:[%s6583_s25 + $0x10] sm:$0xf] }
  0x8c   : > { %6020 = vmatmul.mubr.msk.bf16.gmra.mrb[12].mxu0 %vm666_vm3, %v5371_v13  ;;  %v2855_v49 = vsel %vm6824_vm6, %v5355_v56, %v2854_v57  ;;  %v2856_v53 = vrot.slane %v2854_v57, 4  ;;  %v2868_v61 = vrot.slane %v5281_v45, 5  ;;  %v5097_v9 = vcombine.low %v6467_v21, %v7061_v23  ;;  %v6469_v27 = vld [vmem:[%s6583_s25 + $0x18] sm:$0xf]  ;;  %v7070_v29 = vld [vmem:[%s6583_s25 + $0x1c] sm:$0xf] }
  0x8d   : > { %5866 = vmatmul.mubr.msk.bf16.gmra.mrb[28].mxu1 %vm666_vm3, %v5078_v41  ;;  %6023 = vmatprep.mubr.msk.bf16.mxu0 %vm666_vm3, %v5372_v37  ;;  %v2862_v1 = vsel %vm6824_vm6, %v5356_v44, %v2861_v47  ;;  %v2863_v6 = vrot.slane %v2861_v47, 4  ;;  %v5357_v46 = vrot.slane %v5341_v10, 9  ;;  %v2871_v54 = vrot.slane %v5282_v52, 5  ;;  %v5287_v51 = vld [vmem:[%s6583_s25 + $0xac] sm:$0xf]  ;;  %v7078_v39 = vld [vmem:[%s8371_s1 + $0x18] sm:$0xff]  }
  0x8e   : > { %5871 = vmatprep.mubr.msk.bf16.mxu1 %vm666_vm3, %v5096_v32  ;;  %v2858_v20 = vsel %vm6824_vm6, %v2856_v53, %v2857_v43  ;;  %v2870_v26 = vrot.slane %v2868_v61, 4  ;;  %v2875_v3 = vrot.slane %v5284_v63, 5  ;;  %v5098_v32 = vcombine.low %v6469_v27, %v7070_v29  ;;  %v5290_v0 = vld [vmem:[%s6583_s25 + $0xb8] sm:$0xf]  ;;  %v6471_v57 = vld [vmem:[%s8371_s1 + $0x10] sm:$0xff]  }
  0x8f   : > { %v5373_v55 = vcombine.low %v2855_v49, %v2858_v20  ;;  %v2865_v18 = vsel %vm6824_vm6, %v2863_v6, %v2864_v60  ;;  %v5358_v36 = vrot.slane %v5342_v59, 9  ;;  %v2878_v13 = vrot.slane %v5285_v11, 5  ;;  %v5288_v47 = vld [vmem:[%s6583_s25 + $0xb0] sm:$0x1]  ;;  %v5343_v60 = vld [vmem:[%s6583_s25 + $0xa8] sm:$0xe] }
  0x90   : > { %v5374_v35 = vcombine.low %v2862_v1, %v2865_v18  ;;  %v2877_v56 = vrot.slane %v2875_v3, 4  ;;  %v2869_v41 = vsel %vm6824_vm6, %v5357_v46, %v2868_v61  ;;  %v2872_v37 = vsel %vm6824_vm6, %v2870_v26, %v2871_v54  ;;  %v5291_v10 = vld [vmem:[%s6583_s25 + $0xbc] sm:$0x1]  ;;  %v5344_v49 = vld [vmem:[%s6583_s25 + $0xb4] sm:$0xe] }
  0x91   : > { %v2882_v45 = vrot.slane %v5287_v51, 5  ;;  %v2876_v43 = vsel %vm6824_vm6, %v5358_v36, %v2875_v3  ;;  %v2889_v52 = vrot.slane %v5290_v0, 5  ;;  %v6472_v53 = vld [vmem:[%s6583_s25 + $0x24] sm:$0xf]  ;;  %v7102_v61 = vld [vmem:[%s6583_s25 + $0x28] sm:$0xf]  ;;  %v5375_v1 = vcombine.low %v2869_v41, %v2872_v37 }
  0x92   : > { %v2879_v44 = vsel %vm6824_vm6, %v2877_v56, %v2878_v13  ;;  %v5099_v63 = vcombine.low %v6472_v53, %v7102_v61  ;;  %v5293_v6 = vld [vmem:[%s6583_s25 + $0xc4] sm:$0xf]  ;;  %v5359_v59 = vrot.slane %v5343_v60, 9  ;;  %v6474_v20 = vld [vmem:[%s6583_s25 + $0x30] sm:$0xf]  ;;  %v2892_v26 = vrot.slane %v5291_v10, 5 }
  0x93   : > { %v5376_v11 = vcombine.low %v2876_v43, %v2879_v44  ;;  %v2884_v21 = vrot.slane %v2882_v45, 4  ;;  %v7108_v46 = vld [vmem:[%s6583_s25 + $0x34] sm:$0xf]  ;;  %v2891_v18 = vrot.slane %v2889_v52, 4  ;;  %v5294_v13 = vld [vmem:[%s6583_s25 + $0xc8] sm:$0x1] }
  0x94   : > { %6024 = vmatmul.mubr.msk.bf16.gmra.mrb[16].mxu0 %vm666_vm3, %v5373_v55  ;;  %v5100_v54 = vcombine.low %v6474_v20, %v7108_v46  ;;  %v5360_v55 = vrot.slane %v5344_v49, 9  ;;  %v2883_v3 = vsel %vm6824_vm6, %v5359_v59, %v2882_v45  ;;  %v5345_v51 = vld [vmem:[%s6583_s25 + $0xc0] sm:$0xe]  ;;  %v6476_v56 = vld [vmem:[%s6583_s25 + $0x3c] sm:$0xf]  ;;  %v2899_v44 = vrot.slane %v5294_v13, 5 }
  0x95   : > { %5872 = vmatmul.mubr.msk.bf16.vlgmr.msra.gmra.mrb[0].mxu1 %vm666_vm3, %v5097_v9  ;;  %6027 = vmatprep.mubr.msk.bf16.mxu0 %vm666_vm3, %v5374_v35  ;;  %v2885_v9 = vrot.slane %v5288_v47, 5  ;;  %v2893_v36 = vsel %vm6824_vm6, %v2891_v18, %v2892_v26  ;;  %v7127_v0 = vld [vmem:[%s6583_s25 + $0x40] sm:$0xf]  ;;  %v5102_v47 = vcombine.low %v6737_v15, %v6740_v25  ;;  %v2269_v10 = vshll.u32 %v7031_v34, 16  ;;  %v6423_v53 = vld [vmem:[%s6583_s25 + $0x18] sm:$0xff]  }
  0x96   : > { %5904 = vmatpush3.bf16.msra.mxu1 %v6471_v57  ;;  %5875 = vmatprep.mubr.msk.bf16.mxu1 %vm666_vm3, %v5098_v32  ;;  %v2896_v32 = vrot.slane %v5293_v6, 5  ;;  %v2890_v35 = vsel %vm6824_vm6, %v5360_v55, %v2889_v52  ;;  %v5101_v41 = vcombine.low %v6476_v56, %v7127_v0  ;;  %v5361_v57 = vrot.slane %v5345_v51, 9 }
  0x97   : > { %5937 = vmatprep.subr.bf16.mxu1 %v7078_v39  ;;  %v2886_v27 = vsel %vm6824_vm6, %v2884_v21, %v2885_v9  ;;  %v5378_v45 = vcombine.low %v2890_v35, %v2893_v36  ;;  %v2273_v15 = vshrl.u32 %v7031_v34, 16  ;;  %v5103_v49 = vcombine.low %v6766_v8, %v6772_v19  ;;  %v1171_v8 = vld [vmem:[%s6583_s25] sm:$0xe]  ;;  %v1172_v19 = vld [vmem:[%s6583_s25 + $0xc] sm:$0xe] }
  0x98   : > { %v5377_v37 = vcombine.low %v2883_v3, %v2886_v27  ;;  %v2898_v43 = vrot.slane %v2896_v32, 4  ;;  %v2897_v60 = vsel %vm6824_vm6, %v5361_v57, %v2896_v32  ;;  %v1231_v21 = vrot.slane %v7061_v23, 5  ;;  %v1173_v34 = vld [vmem:[%s6583_s25 + $0x18] sm:$0xe]  ;;  %v6426_v27 = vld [vmem:[%s6583_s25 + $0x24] sm:$0xff]   ;;  %v6428_v32 = vld [vmem:[%s6583_s25 + $0x30] sm:$0xff]  }
  0x99   : > { %v2275_v6 = vrot.slane %v2273_v15, 4  ;;  %v2279_v9 = vshll.u32 %v7034_v22, 16  ;;  %v1224_v23 = vrot.slane %v7027_v31, 5  ;;  %v1238_v20 = vrot.slane %v7070_v29, 5  ;;  %v1175_v36 = vld [vmem:[%s6583_s25 + $0x30] sm:$0xe] }
  0x9a   : > { %v2900_v52 = vsel %vm6824_vm6, %v2898_v43, %v2899_v44  ;;  %v5105_v18 = vcombine.low %v6818_v48, %v6831_v7  ;;  %v1245_v26 = vrot.slane %v7102_v61, 5  ;;  %v1252_v3 = vrot.slane %v7108_v46, 5  ;;  %v6480_v48 = vld [vmem:[%s6583_s25 + $0x20] sm:$0x1]  ;;  %v6481_v57 = vld [vmem:[%s6583_s25 + $0x2c] sm:$0x1] }
  0x9b   : > { %v5379_v25 = vcombine.low %v2897_v60, %v2900_v52  ;;  %v5106_v22 = vcombine.low %v6850_v38, %v6857_v14  ;;  %v5107_v31 = vcombine.low %v6876_v12, %v6884_v24  ;;  %v5129_v29 = vrot.slane %v1171_v8, 9  ;;  %v7179_v46 = vld [vmem:[%s8371_s1 + $0x40] sm:$0xff]  }
  0x9c   : > { %6028 = vmatmul.mubr.msk.bf16.gmra.mrb[20].mxu0 %vm666_vm3, %v5375_v1  ;;  %v7147_v1 = vrot.slane %v2269_v10, 5  ;;  %v5130_v35 = vrot.slane %v1172_v19, 9  ;;  %v1233_v13 = vrot.slane %v1231_v21, 4  ;;  %v5131_v51 = vrot.slane %v1173_v34, 9  ;;  %v6482_v10 = vld [vmem:[%s6583_s25 + $0x38] sm:$0x1] }
  0x9d   : > { %5876 = vmatmul.mubr.msk.bf16.gmra.mrb[4].mxu1 %vm666_vm3, %v5099_v63  ;;  %6031 = vmatprep.mubr.msk.bf16.mxu0 %vm666_vm3, %v5376_v11  ;;  %v5104_v63 = vcombine.low %v6797_v5, %v6803_v17  ;;  %v6478_v11 = vld [vmem:[%s6583_s25 + $0x8] sm:$0x1]  ;;  %v6479_v5 = vld [vmem:[%s6583_s25 + $0x14] sm:$0x1]  ;;  %v1241_v7 = vrot.slane %v6480_v48, 5  ;;  %v5108_v38 = vcombine.low %v6908_v50, %v6913_v58  ;;  %v5109_v14 = vcombine.low %v6936_v40, %v6941_v42 }
  0x9e   : > { %5879 = vmatprep.mubr.msk.bf16.mxu1 %vm666_vm3, %v5100_v54  ;;  %8390 = vst [vmem:[#allocation2_spill] sm:$0xff] %v7147_v1  ;;  %v1227_v59 = vrot.slane %v6478_v11, 5  ;;  %v1234_v17 = vrot.slane %v6479_v5, 5  ;;  %v1174_v54 = vld [vmem:[%s6583_s25 + $0x24] sm:$0xe]  ;;  %v2276_v55 = vor.u32 %v2275_v6, %v7147_v1  ;;  %v1226_v56 = vrot.slane %v1224_v23, 4 }
  0x9f   : > { %v5132_v61 = vrot.slane %v1174_v54, 9  ;;  %v1248_v43 = vrot.slane %v6481_v57, 5  ;;  %v5133_v44 = vrot.slane %v1175_v36, 9  ;;  %v5110_v60 = vcombine.low %v6960_v33, %v6965_v30  ;;  %v1177_v6 = vld [vmem:[%s6583_s25 + $0x48] sm:$0xe]  ;;  %v6434_v58 = vld [vmem:[%s6583_s25 + $0x54] sm:$0xff]  }
  0xa0   : > { %v7192_v52 = vsel %vm6824_vm6, %v5129_v29, %v1224_v23  ;;  %v1255_v15 = vrot.slane %v6482_v10, 5  ;;  %v7213_v11 = vrot.slane %v2276_v55, 4  ;;  %v5464_v34 = vld [vmem:[%s6583_s25 + $0x18] sm:$0xf]  ;;  %v6432_v5 = vld [vmem:[%s6583_s25 + $0x48] sm:$0xff]  }
  0xa1   : > { %v7228_v19 = vsel %vm6824_vm6, %v5132_v61, %v1245_v26  ;;  %v6483_v23 = vld [vmem:[%s6583_s25 + $0x44] sm:$0x1]  ;;  %v1178_v55 = vld [vmem:[%s6583_s25 + $0x54] sm:$0xe]  ;;  %v3614_v48 = vshll.u32 %v5464_v34, 16 }
  0xa2   : > { %8392 = vst [vmem:[#allocation4_spill] sm:$0xff] %v7213_v11  ;;  %v5136_v10 = vrot.slane %v1178_v55, 9  ;;  %v5470_v55 = vld [vmem:[%s6583_s25 + $0x30] sm:$0xf]  ;;  %v5471_v50 = vld [vmem:[%s6583_s25 + $0x34] sm:$0xf] }
  0xa3   : > { %v3616_v24 = vrot.slane %v3614_v48, 5 }
  0xa4   : > { %6032 = vmatmul.mubr.msk.bf16.gmra.mrb[24].mxu0 %vm666_vm3, %v5377_v37  ;;  %v1176_v37 = vld [vmem:[%s6583_s25 + $0x3c] sm:$0xe] }
  0xa5   : > { %5880 = vmatmul.mubr.msk.bf16.gmra.mrb[8].mxu1 %vm666_vm3, %v5101_v41  ;;  %6035 = vmatprep.mubr.msk.bf16.mxu0 %vm666_vm3, %v5378_v45  ;;  %v1240_v41 = vrot.slane %v1238_v20, 4  ;;  %v1247_v45 = vrot.slane %v1245_v26, 4 }
  0xa6   : > { %5883 = vmatprep.mubr.msk.bf16.mxu1 %vm666_vm3, %v5102_v47  ;;  %v1254_v47 = vrot.slane %v1252_v3, 4 }
  0xa7   : > { %v7224_v8 = vsel %vm6824_vm6, %v1240_v41, %v1241_v7  ;;  %v7243_v26 = vsel %vm6824_vm6, %v1247_v45, %v1248_v43  ;;  %v6485_v45 = vld [vmem:[%s6583_s25 + $0x50] sm:$0x1]  ;;  %v3668_v41 = vshll.u32 %v5471_v50, 16 }
  0xa8   : > { %v1269_v57 = vrot.slane %v6485_v45, 5  ;;  %v8400_v11 = vcombine.low %v7228_v19, %v7243_v26 }
  0xac   : > { %6036 = vmatmul.mubr.msk.bf16.gmra.mrb[28].mxu0 %vm666_vm3, %v5379_v25  ;;  %v1259_v25 = vrot.slane %v7127_v0, 5  ;;  %v7210_v0 = vsel %vm6824_vm6, %v5131_v51, %v1238_v20  ;;  %v1262_v20 = vrot.slane %v6483_v23, 5  ;;  %v3611_v51 = vshrl.u32 %v5464_v34, 16  ;;  %v7287_v34 = vld [vmem:[%s6583_s25 + $0x5c] sm:$0x1] }
  0xad   : > { %5884 = vmatmul.mubr.msk.bf16.gmra.mrb[12].mxu1 %vm666_vm3, %v5103_v49  ;;  %6041 = vmatprep.mubr.msk.bf16.mxu0 %vm666_vm3, %v6423_v53  ;;  %v7196_v49 = vrot.slane %v2279_v9, 5  ;;  %v7202_v53 = vsel %vm6824_vm6, %v5130_v35, %v1231_v21  ;;  %v7220_v21 = vsel %vm6824_vm6, %v1226_v56, %v1227_v59  ;;  %v5134_v9 = vrot.slane %v1176_v37, 9  ;;  %v6484_v59 = vld [vmem:[%s6583_s25 + $0x4c] sm:$0xf] }
  0xae   : > { %5887 = vmatprep.mubr.msk.bf16.mxu1 %vm666_vm3, %v5104_v63  ;;  %v7206_v63 = vsel %vm6824_vm6, %v1233_v13, %v1234_v17  ;;  %v7234_v17 = vsel %vm6824_vm6, %v5133_v44, %v1252_v3  ;;  %v1266_v54 = vrot.slane %v6484_v59, 5  ;;  %v1261_v3 = vrot.slane %v1259_v25, 4  ;;  %v7258_v13 = vld [vmem:[%s6583_s25 + $0x60] sm:$0xe] }
  0xaf   : > { %8391 = vst [vmem:[#allocation3_spill] sm:$0xff] %v7196_v49  ;;  %v7268_v43 = vsel %vm6824_vm6, %v5134_v9, %v1259_v25  ;;  %v6486_v25 = vld [vmem:[%s6583_s25 + $0x58] sm:$0xf]  ;;  %v1276_v9 = vrot.slane %v7287_v34, 5  ;;  %v5137_v23 = vrot.slane %v7258_v13, 9  ;;  %v3613_v12 = vrot.slane %v3611_v51, 4 }
  0xb0   : > { %v1268_v37 = vrot.slane %v1266_v54, 4  ;;  %v7272_v44 = vsel %vm6824_vm6, %v1261_v3, %v1262_v20  ;;  %v6488_v20 = vld [vmem:[%s6583_s25 + $0x64] sm:$0xf]  ;;  %v6489_v34 = vld [vmem:[%s6583_s25 + $0x70] sm:$0xf]  ;;  %v3672_v56 = vshrl.u32 %v5471_v50, 16 }
  0xb1   : > { %v1280_v59 = vrot.slane %v6488_v20, 5  ;;  %v1287_v20 = vrot.slane %v6489_v34, 5  ;;  %v5469_v34 = vld [vmem:[%s6583_s25 + $0x2c] sm:$0x1] }
  0xb2   : > { %v7304_v3 = vsel %vm6824_vm6, %v1268_v37, %v1269_v57  ;;  %v3659_v37 = vshrl.u32 %v5470_v55, 16  ;;  %v3662_v57 = vshll.u32 %v5470_v55, 16 }
  0xb3   : > { %v1282_v36 = vrot.slane %v1280_v59, 4 }
  0xb4   : > { %6042 = vmatmul.mubr.msk.bf16.vlgmr.msra.gmra.mrb[0].mxu0 %vm666_vm3, %v6426_v27  ;;  %v7247_v27 = vsel %vm6824_vm6, %v1254_v47, %v1255_v15  ;;  %v5466_v15 = vld [vmem:[%s6583_s25 + $0x20] sm:$0x1]  ;;  %v3664_v50 = vrot.slane %v3662_v57, 5  ;;  %v6440_v57 = vld [vmem:[%s6583_s25 + $0x78] sm:$0xff]  }
  0xb5   : > { %5888 = vmatmul.mubr.msk.bf16.gmra.mrb[16].mxu1 %vm666_vm3, %v5105_v18  ;;  %6074 = vmatpush3.bf16.msra.mxu0 %v6889_v16  ;;  %v6430_v16 = vld [vmem:[%s6583_s25 + $0x3c] sm:$0xff]   ;;  %v3630_v48 = vshll.u32 %v5466_v15, 16 }
  0xb6   : > { %5891 = vmatprep.mubr.msk.bf16.mxu1 %vm666_vm3, %v5106_v22  ;;  %6045 = vmatprep.mubr.msk.bf16.mxu0 %vm666_vm3, %v6428_v32  ;;  %v5465_v18 = vld [vmem:[%s6583_s25 + $0x1c] sm:$0xf]  ;;  %v5135_v22 = vrot.slane %v1177_v6, 9  ;;  %v5467_v6 = vld [vmem:[%s6583_s25 + $0x24] sm:$0xf] }
  0xb7   : > { %6107 = vmatprep.subr.bf16.mxu0 %v7179_v46  ;;  %v3620_v7 = vshll.u32 %v5465_v18, 16  ;;  %v3624_v61 = vshrl.u32 %v5465_v18, 16  ;;  %v3638_v13 = vshll.u32 %v5467_v6, 16  ;;  %v3617_v18 = vor.u32 %v3616_v24, %v3613_v12 }
  0xb8   : > { %v7276_v47 = vsel %vm6824_vm6, %v5135_v22, %v1266_v54  ;;  %v5468_v54 = vld [vmem:[%s6583_s25 + $0x28] sm:$0xf]  ;;  %v3635_v22 = vshrl.u32 %v5467_v6, 16  ;;  %v1289_v24 = vrot.slane %v1287_v20, 4 }
  0xb9   : > { %v3640_v29 = vrot.slane %v3638_v13, 5  ;;  %v3661_v13 = vrot.slane %v3659_v37, 4  ;;  %v3618_v40 = vrot.slane %v3617_v18, 4 }
  0xba   : > { %v3637_v15 = vrot.slane %v3635_v22, 4  ;;  %v5472_v22 = vld [vmem:[%s6583_s25 + $0x38] sm:$0x1] }
  0xbb   : > { %v3678_v37 = vshll.u32 %v5472_v22, 16 }
  0xbc   : > { %6046 = vmatmul.mubr.msk.bf16.gmra.mrb[4].mxu0 %vm666_vm3, %v6430_v16  ;;  %v1273_v16 = vrot.slane %v6486_v25, 5  ;;  %v1180_v25 = vld [vmem:[%s6583_s25 + $0x6c] sm:$0xe] }
  0xbd   : > { %5892 = vmatmul.mubr.msk.bf16.gmra.mrb[20].mxu1 %vm666_vm3, %v5107_v31  ;;  %6049 = vmatprep.mubr.msk.bf16.mxu0 %vm666_vm3, %v6432_v5  ;;  %v7297_v31 = vrot.slane %v3620_v7, 5  ;;  %v3626_v5 = vrot.slane %v3624_v61, 4  ;;  %v3644_v7 = vshll.u32 %v5468_v54, 16  ;;  %v3648_v61 = vshrl.u32 %v5468_v54, 16 }
  0xbe   : > { %5895 = vmatprep.mubr.msk.bf16.mxu1 %vm666_vm3, %v5108_v38  ;;  %v6436_v38 = vld [vmem:[%s6583_s25 + $0x60] sm:$0xff]   ;;  %v7311_v51 = vsel %vm6824_vm6, %v5136_v10, %v1273_v16  ;;  %v1275_v45 = vrot.slane %v1273_v16, 4  ;;  %v6490_v10 = vld [vmem:[%s6583_s25 + $0x68] sm:$0x1]  ;;  %v7318_v16 = vrot.slane %v3630_v48, 5  ;;  %v5138_v54 = vrot.slane %v1180_v25, 9 }
  0xbf   : > { %v3627_v6 = vor.u32 %v3626_v5, %v7297_v31  ;;  %v1283_v35 = vrot.slane %v6490_v10, 5  ;;  %v7321_v32 = vrot.slane %v3644_v7, 5  ;;  %v3650_v12 = vrot.slane %v3648_v61, 4  ;;  %v6491_v5 = vld [vmem:[%s6583_s25 + $0x74] sm:$0x1]  ;;  %v6438_v25 = vld [vmem:[%s6583_s25 + $0x6c] sm:$0xff]  }
  0xc0   : > { %v1290_v55 = vrot.slane %v6491_v5, 5  ;;  %v7340_v48 = vsel %vm6824_vm6, %v5137_v23, %v1280_v59  ;;  %v3641_v7 = vor.u32 %v3640_v29, %v3637_v15  ;;  %v3654_v61 = vshll.u32 %v5469_v34, 16  ;;  %v6493_v10 = vld [vmem:[%s6583_s25 + $0x88] sm:$0xf] }
  0xc1   : > { %v3628_v42 = vrot.slane %v3627_v6, 4  ;;  %v7345_v33 = vsel %vm6824_vm6, %v1275_v45, %v1276_v9  ;;  %v7353_v23 = vsel %vm6824_vm6, %v1282_v36, %v1283_v35  ;;  %v7357_v29 = vsel %vm6824_vm6, %v5138_v54, %v1287_v20  ;;  %v1182_v45 = vld [vmem:[%s6583_s25 + $0x84] sm:$0xe]  ;;  %v5473_v20 = vld [vmem:[%s6583_s25 + $0x3c] sm:$0xf] }
  0xc2   : > { %v7361_v9 = vsel %vm6824_vm6, %v1289_v24, %v1290_v55  ;;  %v3665_v59 = vor.u32 %v3664_v50, %v3661_v13  ;;  %v3623_v6 = vsel %vm6602_vm2, %v3618_v40, %v7297_v31  ;;  %v1301_v15 = vrot.slane %v6493_v10, 5  ;;  %v6494_v24 = vld [vmem:[%s6583_s25 + $0x80] sm:$0x1] }
  0xc3   : > { %v3633_v35 = vsel %vm6602_vm2, %v3628_v42, %v7318_v16  ;;  %v3642_v54 = vrot.slane %v3641_v7, 4  ;;  %v3656_v34 = vrot.slane %v3654_v61, 5  ;;  %v1297_v5 = vrot.slane %v6494_v24, 5  ;;  %v7375_v55 = vld [vmem:[%s6583_s25 + $0x40] sm:$0xf] }
  0xc4   : > { %6050 = vmatmul.mubr.msk.bf16.gmra.mrb[8].mxu0 %vm666_vm3, %v6434_v58  ;;  %v3674_v58 = vrot.slane %v3672_v56, 4  ;;  %v1181_v56 = vld [vmem:[%s6583_s25 + $0x78] sm:$0xe]  ;;  %8393 = vst [vmem:[#allocation5_spill] sm:$0xff] %v7375_v55  ;;  %v3680_v13 = vrot.slane %v3678_v37, 5  ;;  %v5140_v16 = vrot.slane %v1182_v45, 9  ;;  %v8394_v50 = vcombine.low %v6975_v62, %v6987_v4 }
  0xc5   : > { %5896 = vmatmul.mubr.msk.bf16.gmra.mrb[24].mxu1 %vm666_vm3, %v5109_v14  ;;  %6053 = vmatprep.mubr.msk.bf16.mxu0 %vm666_vm3, %v6436_v38  ;;  %v7334_v14 = vrot.slane %v3668_v41, 5  ;;  %v6492_v41 = vld [vmem:[%s6583_s25 + $0x7c] sm:$0xf]  ;;  %v3666_v40 = vrot.slane %v3665_v59, 4  ;;  %v6495_v42 = vld [vmem:[%s6583_s25 + $0x8c] sm:$0x1]  ;;  %v3647_v45 = vsel %vm6602_vm2, %v3642_v54, %v7321_v32 }
  0xc6   : > { %5899 = vmatprep.mubr.msk.bf16.mxu1 %vm666_vm3, %v5110_v60  ;;  %v3651_v60 = vor.u32 %v3650_v12, %v7321_v32  ;;  %v1294_v18 = vrot.slane %v6492_v41, 5  ;;  %v5139_v12 = vrot.slane %v1181_v56, 9  ;;  %v3683_v7 = vshrl.u32 %v5473_v20, 16  ;;  %v6441_v41 = vld [vmem:[%s6583_s25 + $0x84] sm:$0xff]   ;;  %v6442_v59 = vld [vmem:[%s6583_s25 + $0x90] sm:$0xff]  }
  0xc7   : > { %v3675_v36 = vor.u32 %v3674_v58, %v7334_v14  ;;  %v1304_v58 = vrot.slane %v6495_v42, 5  ;;  %v3686_v61 = vshll.u32 %v5473_v20, 16  ;;  %v1303_v56 = vrot.slane %v1301_v15, 4  ;;  %v7415_v20 = vld [vmem:[%s6583_s25 + $0x4c] sm:$0xf] }
  0xc8   : > { %v3652_v31 = vrot.slane %v3651_v60, 4  ;;  %v1296_v22 = vrot.slane %v1294_v18, 4  ;;  %v3692_v62 = vshll.u32 %v7375_v55, 16  ;;  %v3696_v4 = vshrl.u32 %v7375_v55, 16  ;;  %v7493_v37 = vld [vmem:[%s6583_s25 + $0x5c] sm:$0x1] }
  0xc9   : > { %v3676_v60 = vrot.slane %v3675_v36, 4  ;;  %v7407_v10 = vsel %vm6824_vm6, %v5139_v12, %v1294_v18  ;;  %v3671_v24 = vsel %vm6602_vm2, %v3666_v40, %v7334_v14  ;;  %v7422_v32 = vsel %vm6824_vm6, %v5140_v16, %v1301_v15  ;;  %v7426_v18 = vld [vmem:[%s6583_s25 + $0x58] sm:$0xf]  ;;  %v7440_v40 = vld [vmem:[%s6583_s25 + $0x90] sm:$0xe] }
  0xca   : > { %v3657_v36 = vsel %vm6602_vm2, %v3652_v31, %v3656_v34  ;;  %v3685_v54 = vrot.slane %v3683_v7, 4  ;;  %v3688_v34 = vrot.slane %v3686_v61, 5  ;;  %v5479_v31 = vld [vmem:[%s6583_s25 + $0x54] sm:$0xf]  ;;  %v3698_v14 = vrot.slane %v3696_v4, 4 }
  0xcb   : > { %v3681_v12 = vsel %vm6602_vm2, %v3676_v60, %v3680_v13  ;;  %v3716_v42 = vshll.u32 %v7415_v20, 16  ;;  %v3720_v7 = vshrl.u32 %v7415_v20, 16  ;;  %v3731_v13 = vshrl.u32 %v5479_v31, 16  ;;  %v1184_v38 = vld [vmem:[%s6583_s25 + $0x9c] sm:$0xe] }
  0xcc   : > { %6054 = vmatmul.mubr.msk.bf16.gmra.mrb[12].mxu0 %vm666_vm3, %v6438_v25  ;;  %v8395_v25 = vcombine.low %v7192_v52, %v7220_v21  ;;  %v7395_v52 = vcombine.low %v3623_v6, %v3633_v35  ;;  %v7411_v6 = vsel %vm6824_vm6, %v1296_v22, %v1297_v5  ;;  %v5476_v35 = vld [vmem:[%s6583_s25 + $0x48] sm:$0xf]  ;;  %v7432_v5 = vsel %vm6824_vm6, %v1303_v56, %v1304_v58  ;;  %v7435_v22 = vld [vmem:[%s6583_s25 + $0x44] sm:$0x1] }
  0xcd   : > { %5900 = vmatmul.mubr.msk.bf16.gmra.mrb[28].mxu1 %vm666_vm3, %v8394_v50  ;;  %6057 = vmatprep.mubr.msk.bf16.mxu0 %vm666_vm3, %v6440_v57  ;;  %8396 = vst [vmem:[#allocation6_spill] sm:$0xff] %v7435_v22  ;;  %v7437_v50 = vrot.slane %v3692_v62, 5  ;;  %v3707_v15 = vshrl.u32 %v5476_v35, 16  ;;  %v3710_v16 = vshll.u32 %v5476_v35, 16  ;;  %v3734_v61 = vshll.u32 %v5479_v31, 16 }
  0xce   : > { %5905 = vmatprep.mubr.msk.bf16.mxu1 %vm666_vm3, %v8395_v25  ;;  %v3740_v58 = vshll.u32 %v7426_v18, 16  ;;  %v3744_v25 = vshrl.u32 %v7426_v18, 16  ;;  %v8397_v60 = vcombine.low %v7202_v53, %v7206_v63  ;;  %v7452_v56 = vcombine.low %v3647_v45, %v3657_v36  ;;  %v7469_v35 = vld [vmem:[%s6583_s25 + $0x50] sm:$0x1]  ;;  %v6498_v62 = vld [vmem:[%s6583_s25 + $0x98] sm:$0x1] }
  0xcf   : > { %v7456_v4 = vcombine.low %v3671_v24, %v3681_v12  ;;  %v8398_v53 = vcombine.low %v7210_v0, %v7224_v8  ;;  %v3699_v45 = vor.u32 %v3698_v14, %v7437_v50  ;;  %v5482_v24 = vld [vmem:[%s6583_s25 + $0x60] sm:$0xf]  ;;  %v3709_v31 = vrot.slane %v3707_v15, 4  ;;  %v7475_v8 = vld [vmem:[%s6583_s25 + $0x64] sm:$0xf]  ;;  %v6444_v14 = vld [vmem:[%s6583_s25 + $0xa8] sm:$0xff]  }
  0xd0   : > { %v7472_v12 = vrot.slane %v3716_v42, 5  ;;  %v3722_v0 = vrot.slane %v3720_v7, 4  ;;  %v3736_v15 = vrot.slane %v3734_v61, 5  ;;  %v6497_v7 = vld [vmem:[%s6583_s25 + $0x94] sm:$0xf]  ;;  %v1311_v21 = vrot.slane %v6498_v62, 5 }
  0xd1   : > { %v1308_v63 = vrot.slane %v6497_v7, 5  ;;  %v3726_v57 = vshll.u32 %v7469_v35, 16  ;;  %v3755_v36 = vshrl.u32 %v5482_v24, 16  ;;  %v3768_v61 = vshrl.u32 %v7475_v8, 16  ;;  %v6499_v7 = vld [vmem:[%s6583_s25 + $0xa0] sm:$0xf] }
  0xd2   : > { %v1315_v55 = vrot.slane %v6499_v7, 5  ;;  %v3700_v62 = vrot.slane %v3699_v45, 4  ;;  %v1322_v45 = vrot.slane %v6965_v30, 5  ;;  %v7520_v7 = vld [vmem:[%s6583_s25 + $0x68] sm:$0x1]  ;;  %v6445_v30 = vld [vmem:[%s6583_s25 + $0xb4] sm:$0xff]  }
  0xd3   : > { %v3757_v19 = vrot.slane %v3755_v36, 4  ;;  %8402 = vst [vmem:[#allocation8_spill] sm:$0xff] %v7520_v7  ;;  %v6446_v36 = vld [vmem:[%s6583_s25 + $0xc0] sm:$0xff]  }
  0xd4   : > { %6058 = vmatmul.mubr.msk.bf16.gmra.mrb[16].mxu0 %vm666_vm3, %v6441_v41  ;;  %v3702_v41 = vshll.u32 %v7435_v22, 16  ;;  %v3758_v22 = vshll.u32 %v5482_v24, 16  ;;  %v3750_v24 = vshll.u32 %v7493_v37, 16 }
  0xd5   : > { %5906 = vmatmul.mubr.msk.bf16.vlgmr.msra.gmra.mrb[0].mxu1 %vm666_vm3, %v8397_v60  ;;  %6061 = vmatprep.mubr.msk.bf16.mxu0 %vm666_vm3, %v6442_v59  ;;  %v3689_v59 = vor.u32 %v3688_v34, %v3685_v54  ;;  %v7480_v54 = vld [vmem:[%s8371_s1 + $0x20] sm:$0xff]   ;;  %v3733_v60 = vrot.slane %v3731_v13, 4  ;;  %v3764_v13 = vshll.u32 %v7475_v8, 16 }
  0xd6   : > { %5938 = vmatpush3.bf16.msra.mxu1 %v7078_v39  ;;  %5909 = vmatprep.mubr.msk.bf16.mxu1 %vm666_vm3, %v8398_v53  ;;  %v3712_v39 = vrot.slane %v3710_v16, 5  ;;  %8399 = vst [vmem:[#allocation7_spill] sm:$0xff] %v7480_v54  ;;  %v6443_v34 = vld [vmem:[%s6583_s25 + $0x9c] sm:$0xff]   ;;  %v7485_v53 = vrot.slane %v3740_v58, 5  ;;  %v3746_v16 = vrot.slane %v3744_v25, 4  ;;  %v7487_v42 = vrot.slane %v3702_v41, 5 }
  0xd7   : > { %6141 = vmatprep.subr.bf16.mxu1 %v7480_v54  ;;  %v7498_v58 = vrot.slane %v3689_v59, 4  ;;  %v3723_v41 = vor.u32 %v3722_v0, %v7472_v12  ;;  %v3737_v54 = vor.u32 %v3736_v15, %v3733_v60  ;;  %v1310_v59 = vrot.slane %v1308_v63, 4  ;;  %v1185_v0 = vld [vmem:[%s6583_s25 + $0xa8] sm:$0xe] }
  0xd8   : > { %v3713_v25 = vor.u32 %v3712_v39, %v3709_v31  ;;  %v3747_v1 = vor.u32 %v3746_v16, %v7485_v53  ;;  %v3728_v31 = vrot.slane %v3726_v57, 5  ;;  %v5142_v39 = vrot.slane %v1184_v38, 9  ;;  %v6500_v57 = vld [vmem:[%s6583_s25 + $0xa4] sm:$0x1] }
  0xd9   : > { %v3760_v26 = vrot.slane %v3758_v22, 5  ;;  %v7516_v60 = vrot.slane %v3764_v13, 5  ;;  %v3724_v15 = vrot.slane %v3723_v41, 4  ;;  %v1317_v16 = vrot.slane %v1315_v55, 4  ;;  %v6501_v41 = vld [vmem:[%s6583_s25 + $0xb0] sm:$0x1] }
  0xda   : > { %v1318_v38 = vrot.slane %v6500_v57, 5  ;;  %v5143_v49 = vrot.slane %v1185_v0, 9  ;;  %v3695_v22 = vsel %vm6602_vm2, %v7498_v58, %v7437_v50  ;;  %v8403_v13 = vrot.slane %v7440_v40, 9  ;;  %v1186_v50 = vld [vmem:[%s6583_s25 + $0xb4] sm:$0xe] }
  0xdb   : > { %v1325_v57 = vrot.slane %v6501_v41, 5  ;;  %v3774_v0 = vshll.u32 %v7520_v7, 16  ;;  %v5485_v58 = vld [vmem:[%s6583_s25 + $0x6c] sm:$0xf]  ;;  %v7544_v40 = vsel %vm6824_vm6, %v1310_v59, %v1311_v21  ;;  %v8405_v59 = vcombine.low %v7268_v43, %v7272_v44 }
  0xdc   : > { %6062 = vmatmul.mubr.msk.bf16.gmra.mrb[20].mxu0 %vm666_vm3, %v6443_v34  ;;  %v8401_v34 = vcombine.low %v7234_v17, %v7247_v27  ;;  %v3738_v17 = vrot.slane %v3737_v54, 4  ;;  %v3748_v27 = vrot.slane %v3747_v1, 4  ;;  %v3705_v1 = vsel %vm6602_vm2, %v3700_v62, %v7487_v42 }
  0xdd   : > { %5910 = vmatmul.mubr.msk.bf16.gmra.mrb[4].mxu1 %vm666_vm3, %v8400_v11  ;;  %6065 = vmatprep.mubr.msk.bf16.mxu0 %vm666_vm3, %v6444_v14  ;;  %v3770_v11 = vrot.slane %v3768_v61, 4  ;;  %v3714_v14 = vrot.slane %v3713_v25, 4  ;;  %v7532_v61 = vsel %vm6824_vm6, %v8403_v13, %v1308_v63  ;;  %v1324_v25 = vrot.slane %v1322_v45, 4 }
  0xde   : > { %5913 = vmatprep.mubr.msk.bf16.mxu1 %vm666_vm3, %v8401_v34  ;;  %v3752_v34 = vrot.slane %v3750_v24, 5  ;;  %v3761_v54 = vor.u32 %v3760_v26, %v3757_v19  ;;  %v7551_v42 = vsel %vm6824_vm6, %v5142_v39, %v1315_v55  ;;  %v7555_v62 = vsel %vm6824_vm6, %v1317_v16, %v1318_v38  ;;  %v6502_v39 = vld [vmem:[%s6583_s25 + $0xb8] sm:$0xf] }
  0xdf   : > { %v3771_v24 = vor.u32 %v3770_v11, %v7516_v60  ;;  %v3719_v63 = vsel %vm6602_vm2, %v3714_v14, %v7472_v12  ;;  %v3729_v19 = vsel %vm6602_vm2, %v3724_v15, %v3728_v31  ;;  %v3743_v21 = vsel %vm6602_vm2, %v3738_v17, %v7485_v53  ;;  %v7604_v17 = vld [vmem:[%s6583_s25 + $0x7c] sm:$0xf] }
  0xe0   : > { %v3753_v12 = vsel %vm6602_vm2, %v3748_v27, %v3752_v34  ;;  %v7567_v55 = vsel %vm6824_vm6, %v5143_v49, %v1322_v45  ;;  %v7576_v31 = vsel %vm6824_vm6, %v1324_v25, %v1325_v57  ;;  %v5144_v53 = vrot.slane %v1186_v50, 9  ;;  %v7580_v49 = vld [vmem:[%s6583_s25 + $0x70] sm:$0xf]  ;;  %8409 = vst [vmem:[#allocation12_spill] sm:$0xff] %v7604_v17  ;;  %v5491_v27 = vld [vmem:[%s6583_s25 + $0x84] sm:$0xf] }
  0xe1   : > { %8404 = vst [vmem:[#allocation9_spill] sm:$0xff] %v7567_v55  ;;  %8406 = vst [vmem:[#allocation10_spill] sm:$0xff] %v7576_v31  ;;  %v1329_v26 = vrot.slane %v6502_v39, 5  ;;  %v3779_v45 = vshrl.u32 %v5485_v58, 16  ;;  %v8408_v43 = vcombine.low %v7276_v47, %v7304_v3  ;;  %v7586_v44 = vcombine.low %v3695_v22, %v3705_v1  ;;  %v5488_v3 = vld [vmem:[%s6583_s25 + $0x78] sm:$0xf] }
  0xe2   : > { %8407 = vst [vmem:[#allocation11_spill] sm:$0xff] %v7580_v49  ;;  %v7588_v11 = vrot.slane %v3761_v54, 4  ;;  %v7590_v14 = vrot.slane %v3771_v24, 4  ;;  %v7592_v15 = vrot.slane %v3774_v0, 5  ;;  %v7596_v38 = vcombine.low %v3719_v63, %v3729_v19  ;;  %v6447_v34 = vld [vmem:[%s6583_s25 + $0xcc] sm:$0xff]  }
  0xe3   : > { %v7600_v47 = vcombine.low %v3743_v21, %v3753_v12  ;;  %v7611_v22 = vld [vmem:[%s6583_s25 + $0xbc] sm:$0x1]  ;;  %v3782_v25 = vshll.u32 %v5485_v58, 16  ;;  %v3788_v41 = vshll.u32 %v7580_v49, 16  ;;  %v7616_v57 = vld [vmem:[%s6583_s25 + $0x88] sm:$0xf]  ;;  %v7620_v1 = vsel %vm6824_vm6, %v5144_v53, %v1329_v26 }
  0xe4   : > { %6066 = vmatmul.mubr.msk.bf16.gmra.mrb[24].mxu0 %vm666_vm3, %v6445_v30  ;;  %8410 = vst [vmem:[#allocation13_spill] sm:$0xff] %v7616_v57  ;;  %v7622_v54 = vrot.slane %v1329_v26, 4  ;;  %v7624_v24 = vrot.slane %v3779_v45, 4  ;;  %v3792_v0 = vshrl.u32 %v7580_v49, 16  ;;  %v5494_v50 = vld [vmem:[%s6583_s25 + $0x90] sm:$0xf]  ;;  %v8413_v58 = vcombine.low %v7311_v51, %v7345_v33 }
  0xe5   : > { %5914 = vmatmul.mubr.msk.bf16.gmra.mrb[8].mxu1 %vm666_vm3, %v8405_v59  ;;  %6069 = vmatprep.mubr.msk.bf16.mxu0 %vm666_vm3, %v6446_v36  ;;  %v3803_v19 = vshrl.u32 %v5488_v3, 16  ;;  %v3806_v21 = vshll.u32 %v5488_v3, 16  ;;  %v7637_v12 = vld [vmem:[%s6583_s25 + $0x94] sm:$0xf]  ;;  %v3812_v53 = vshll.u32 %v7604_v17, 16  ;;  %v3816_v39 = vshrl.u32 %v7604_v17, 16 }
  0xe6   : > { %5917 = vmatprep.mubr.msk.bf16.mxu1 %vm666_vm3, %v8408_v43  ;;  %8411 = vst [vmem:[#allocation14_spill] sm:$0xff] %v7637_v12  ;;  %v7640_v59 = vld [vmem:[%s6583_s25 + $0x74] sm:$0x1]  ;;  %v3827_v26 = vshrl.u32 %v5491_v27, 16  ;;  %v3830_v45 = vshll.u32 %v5491_v27, 16  ;;  %v3836_v43 = vshll.u32 %v7616_v57, 16 }
  0xe7   : > { %8412 = vst [vmem:[#allocation15_spill] sm:$0xff] %v7640_v59  ;;  %v3840_v36 = vshrl.u32 %v7616_v57, 16  ;;  %v3851_v30 = vshrl.u32 %v5494_v50, 16  ;;  %v3854_v3 = vshll.u32 %v5494_v50, 16  ;;  %v3784_v63 = vrot.slane %v3782_v25, 5 }
  0xe8   : > { %v7653_v27 = vrot.slane %v3788_v41, 5  ;;  %v3860_v16 = vshll.u32 %v7637_v12, 16  ;;  %v3864_v13 = vshrl.u32 %v7637_v12, 16  ;;  %v8414_v50 = vcombine.low %v7340_v48, %v7353_v23  ;;  %v5497_v41 = vld [vmem:[%s6583_s25 + $0x9c] sm:$0xf] }
  0xe9   : > { %v3794_v51 = vrot.slane %v3792_v0, 4  ;;  %v3798_v33 = vshll.u32 %v7640_v59, 16  ;;  %v3808_v25 = vrot.slane %v3806_v21, 5  ;;  %v3818_v57 = vrot.slane %v3816_v39, 4  ;;  %v7669_v17 = vld [vmem:[%s6583_s25 + $0x8c] sm:$0x1] }
  0xea   : > { %v3829_v49 = vrot.slane %v3827_v26, 4  ;;  %v3832_v12 = vrot.slane %v3830_v45, 5  ;;  %v7671_v31 = vrot.slane %v3836_v43, 5  ;;  %v3842_v48 = vrot.slane %v3840_v36, 4  ;;  %v7677_v0 = vld [vmem:[%s6583_s25 + $0x98] sm:$0x1] }
  0xeb   : > { %v3853_v23 = vrot.slane %v3851_v30, 4  ;;  %v3856_v55 = vrot.slane %v3854_v3, 5  ;;  %v7679_v59 = vrot.slane %v3860_v16, 5  ;;  %v3875_v21 = vshrl.u32 %v5497_v41, 16 }
  0xec   : > { %6070 = vmatmul.mubr.msk.bf16.gmra.mrb[28].mxu0 %vm666_vm3, %v6447_v34  ;;  %v7656_v34 = vld [vmem:[%s6583_s25 + $0x80] sm:$0x1]  ;;  %v3785_v39 = vor.u32 %v3784_v63, %v7624_v24  ;;  %v3795_v7 = vor.u32 %v3794_v51, %v7653_v27  ;;  %v3833_v30 = vor.u32 %v3832_v12, %v3829_v49  ;;  %v3843_v16 = vor.u32 %v3842_v48, %v7671_v31 }
  0xed   : > { %5918 = vmatmul.mubr.msk.bf16.gmra.mrb[12].mxu1 %vm666_vm3, %v8413_v58  ;;  %6075 = vmatprep.mubr.msk.bf16.mxu0 %vm666_vm3, %v7395_v52  ;;  %v3805_v52 = vrot.slane %v3803_v19, 4  ;;  %v7666_v58 = vrot.slane %v3812_v53, 5  ;;  %v3866_v19 = vrot.slane %v3864_v13, 4  ;;  %v3878_v53 = vshll.u32 %v5497_v41, 16 }
  0xee   : > { %5921 = vmatprep.mubr.msk.bf16.mxu1 %vm666_vm3, %v8414_v50  ;;  %v7674_v50 = vld [vmem:[%s6583_s25 + $0xa0] sm:$0xf]  ;;  %v3822_v45 = vshll.u32 %v7656_v34, 16  ;;  %v3846_v13 = vshll.u32 %v7669_v17, 16  ;;  %v3857_v24 = vor.u32 %v3856_v55, %v3853_v23  ;;  %v3870_v63 = vshll.u32 %v7677_v0, 16 }
  0xef   : > { %v3809_v26 = vor.u32 %v3808_v25, %v3805_v52  ;;  %v3819_v36 = vor.u32 %v3818_v57, %v7666_v58  ;;  %v3884_v43 = vshll.u32 %v7674_v50, 16  ;;  %v3888_v3 = vshrl.u32 %v7674_v50, 16 }
  0xf0   : > { %v8415_v51 = vcombine.low %v7357_v29, %v7361_v9  ;;  %v3800_v49 = vrot.slane %v3798_v33, 5  ;;  %v3867_v57 = vor.u32 %v3866_v19, %v7679_v59  ;;  %v3877_v12 = vrot.slane %v3875_v21, 4 }
  0xf1   : > { %v8416_v52 = vcombine.low %v7407_v10, %v7411_v6  ;;  %v3786_v55 = vrot.slane %v3785_v39, 4  ;;  %v3796_v29 = vrot.slane %v3795_v7, 4  ;;  %v3810_v9 = vrot.slane %v3809_v26, 4 }
  0xf2   : > { %v3824_v25 = vrot.slane %v3822_v45, 5  ;;  %v3820_v33 = vrot.slane %v3819_v36, 4  ;;  %v3834_v41 = vrot.slane %v3833_v30, 4  ;;  %v7705_v48 = vrot.slane %v3884_v43, 5 }
  0xf3   : > { %v3890_v23 = vrot.slane %v3888_v3, 4  ;;  %v3844_v19 = vrot.slane %v3843_v16, 4  ;;  %v3848_v21 = vrot.slane %v3846_v13, 5  ;;  %v3858_v10 = vrot.slane %v3857_v24, 4 }
  0xf4   : > { %6076 = vmatmul.mubr.msk.bf16.vlgmr.msra.gmra.mrb[0].mxu0 %vm666_vm3, %v7452_v56  ;;  %v3880_v56 = vrot.slane %v3878_v53, 5  ;;  %v3872_v6 = vrot.slane %v3870_v63, 5  ;;  %v7708_v53 = vld [vmem:[%s6583_s25 + $0xa4] sm:$0x1]  ;;  %v8417_v26 = vrot.slane %v7611_v22, 5  ;;  %v3791_v36 = vsel %vm6602_vm2, %v3786_v55, %v7653_v27 }
  0xf5   : > { %5922 = vmatmul.mubr.msk.bf16.gmra.mrb[16].mxu1 %vm666_vm3, %v8415_v51  ;;  %6108 = vmatpush3.bf16.msra.mxu0 %v7179_v46  ;;  %v5500_v46 = vld [vmem:[%s6583_s25 + $0xa8] sm:$0xf]  ;;  %v3868_v51 = vrot.slane %v3867_v57, 4  ;;  %v3801_v30 = vsel %vm6602_vm2, %v3796_v29, %v3800_v49  ;;  %v3815_v43 = vsel %vm6602_vm2, %v3810_v9, %v7666_v58  ;;  %v3825_v22 = vsel %vm6602_vm2, %v3820_v33, %v3824_v25 }
  0xf6   : > { %5925 = vmatprep.mubr.msk.bf16.mxu1 %vm666_vm3, %v8416_v52  ;;  %6079 = vmatprep.mubr.msk.bf16.mxu0 %vm666_vm3, %v7456_v4  ;;  %v3881_v52 = vor.u32 %v3880_v56, %v3877_v12  ;;  %v7711_v4 = vld [vmem:[%s6583_s25 + $0xac] sm:$0xf]  ;;  %v3899_v7 = vshrl.u32 %v5500_v46, 16  ;;  %v3902_v39 = vshll.u32 %v5500_v46, 16  ;;  %v7718_v45 = vsel %vm6824_vm6, %v7622_v54, %v8417_v26 }
  0xf7   : > { %v3839_v54 = vsel %vm6602_vm2, %v3834_v41, %v7671_v31  ;;  %v3891_v3 = vor.u32 %v3890_v23, %v7705_v48  ;;  %v3894_v16 = vshll.u32 %v7708_v53, 16  ;;  %v3849_v27 = vsel %vm6602_vm2, %v3844_v19, %v3848_v21  ;;  %v5551_v31 = vld [vmem:[%s6583_s25 + $0x48] sm:$0xe]  ;;  %v5554_v26 = vld [vmem:[%s6583_s25 + $0x6c] sm:$0xe] }
  0xf8   : > { %v3863_v58 = vsel %vm6602_vm2, %v3858_v10, %v7679_v59  ;;  %v3908_v13 = vshll.u32 %v7711_v4, 16  ;;  %v3912_v24 = vshrl.u32 %v7711_v4, 16  ;;  %v8418_v63 = vcombine.low %v7422_v32, %v7432_v5  ;;  %v7754_v59 = vld [vmem:[%s6583_s25 + $0xb0] sm:$0x1] }
  0xf9   : > { %v3882_v49 = vrot.slane %v3881_v52, 4  ;;  %v3901_v57 = vrot.slane %v3899_v7, 4  ;;  %v3904_v12 = vrot.slane %v3902_v39, 5  ;;  %v8419_v56 = vcombine.low %v7532_v61, %v7544_v40  ;;  %v5503_v40 = vld [vmem:[%s6583_s25 + $0xb4] sm:$0xf] }
  0xfa   : > { %v8420_v32 = vsel %vm6602_vm2, %v7590_v14, %v7592_v15  ;;  %v8421_v5 = vsel %vm6602_vm2, %v7588_v11, %v7516_v60  ;;  %v5162_v55 = vcombine.low %v7620_v1, %v7718_v45  ;;  %v7772_v29 = vcombine.low %v3791_v36, %v3801_v30  ;;  %v5552_v15 = vld [vmem:[%s6583_s25 + $0x54] sm:$0xe] }
  0xfb   : > { %v7774_v61 = vcombine.low %v3815_v43, %v3825_v22  ;;  %v7777_v9 = vcombine.low %v3839_v54, %v3849_v27  ;;  %v3892_v25 = vrot.slane %v3891_v3, 4  ;;  %v3896_v46 = vrot.slane %v3894_v16, 5  ;;  %v8423_v16 = vld [vmem:[#allocation8_spill] sm:$0xff] }
  0xfc   : > { %6080 = vmatmul.mubr.msk.bf16.gmra.mrb[4].mxu0 %vm666_vm3, %v7586_v44  ;;  %v3873_v44 = vsel %vm6602_vm2, %v3868_v51, %v3872_v6  ;;  %v5567_v14 = vrot.slane %v5551_v31, 9  ;;  %v7782_v60 = vrot.slane %v3908_v13, 5  ;;  %v3914_v11 = vrot.slane %v3912_v24, 4  ;;  %v5553_v6 = vld [vmem:[%s6583_s25 + $0x60] sm:$0xe]  ;;  %v8424_v13 = vld [vmem:[#allocation9_spill] sm:$0xff] }
  0xfd   : > { %5926 = vmatmul.mubr.msk.bf16.gmra.mrb[20].mxu1 %vm666_vm3, %v8418_v63  ;;  %6083 = vmatprep.mubr.msk.bf16.mxu0 %vm666_vm3, %v7596_v38  ;;  %v5520_v38 = vcombine.low %v8421_v5, %v8420_v32  ;;  %v7780_v33 = vcombine.low %v3863_v58, %v3873_v44  ;;  %v3918_v41 = vshll.u32 %v7754_v59, 16  ;;  %v3887_v23 = vsel %vm6602_vm2, %v3882_v49, %v7705_v48  ;;  %v8425_v24 = vld [vmem:[#allocation10_spill] sm:$0xff]  ;;  %v8427_v63 = vld [vmem:[#allocation11_spill] sm:$0xff] }
  0xfe   : > { %5929 = vmatprep.mubr.msk.bf16.mxu1 %vm666_vm3, %v8419_v56  ;;  %v3905_v19 = vor.u32 %v3904_v12, %v3901_v57  ;;  %v4386_v21 = vrot.slane %v7415_v20, 5  ;;  %v4389_v10 = vrot.slane %v7469_v35, 5  ;;  %v3923_v51 = vshrl.u32 %v5503_v40, 16  ;;  %v7804_v35 = vld [vmem:[%s6583_s25 + $0xb8] sm:$0xf]  ;;  %v8428_v49 = vld [vmem:[#allocation15_spill] sm:$0xff] }
  0xff   : > { %v5568_v52 = vrot.slane %v5552_v15, 9  ;;  %v4393_v7 = vrot.slane %v7426_v18, 5  ;;  %v4396_v39 = vrot.slane %v7493_v37, 5  ;;  %v3897_v36 = vsel %vm6602_vm2, %v3892_v25, %v3896_v46  ;;  %v5506_v12 = vld [vmem:[%s6583_s25 + $0xc0] sm:$0xf] }
 0x100   : > { %v3926_v30 = vshll.u32 %v5503_v40, 16  ;;  %v7798_v48 = vsel %vm6824_vm6, %v5567_v14, %v4386_v21  ;;  %v4388_v43 = vrot.slane %v4386_v21, 4  ;;  %v3915_v20 = vor.u32 %v3914_v11, %v7782_v60  ;;  %v5555_v14 = vld [vmem:[%s6583_s25 + $0x78] sm:$0xe] }
 0x101   : > { %v7808_v37 = vsel %vm6824_vm6, %v5568_v52, %v4393_v7  ;;  %v4395_v18 = vrot.slane %v4393_v7, 4  ;;  %v5569_v22 = vrot.slane %v5553_v6, 9  ;;  %v8422_v54 = vcombine.low %v7551_v42, %v7555_v62  ;;  %v6449_v6 = vld [vmem:[%s6583_s25 + $0xc] sm:$0xff]  }
 0x102   : > { %v4400_v3 = vrot.slane %v7475_v8, 5  ;;  %v4403_v27 = vrot.slane %v8423_v16, 5  ;;  %v5570_v58 = vrot.slane %v5554_v26, 9  ;;  %v8426_v31 = vcombine.low %v8424_v13, %v8425_v24  ;;  %v8430_v13 = vld [vmem:[#allocation3_spill] sm:$0xff]  ;;  %v8431_v24 = vld [vmem:[#allocation4_spill] sm:$0xff] }
 0x103   : > { %v7829_v62 = vsel %vm6824_vm6, %v4395_v18, %v4396_v39  ;;  %v4407_v44 = vrot.slane %v8427_v63, 5  ;;  %v4410_v8 = vrot.slane %v8428_v49, 5  ;;  %v3932_v57 = vshll.u32 %v7804_v35, 16  ;;  %v7866_v39 = vld [vmem:[%s6583_s25 + $0xc4] sm:$0xf]  ;;  %v8432_v49 = vld [vmem:[#allocation13_spill] sm:$0xff] }
 0x104   : > { %6084 = vmatmul.mubr.msk.bf16.gmra.mrb[8].mxu0 %vm666_vm3, %v7600_v47  ;;  %v7817_v47 = vsel %vm6824_vm6, %v4388_v43, %v4389_v10  ;;  %v5586_v56 = vcombine.low %v7808_v37, %v7829_v62  ;;  %v7839_v32 = vsel %vm6824_vm6, %v5569_v22, %v4400_v3  ;;  %v4402_v5 = vrot.slane %v4400_v3, 4  ;;  %v5274_v10 = vld [vmem:[%s6583_s25 + $0x78] sm:$0xf]  ;;  %v8429_v22 = vld [vmem:[#allocation12_spill] sm:$0xff]  ;;  %v6514_v62 = vld [vmem:[%s6583_s25 + $0xa0] sm:$0xf] }
 0x105   : > { %5930 = vmatmul.mubr.msk.bf16.gmra.mrb[24].mxu1 %vm666_vm3, %v8422_v54  ;;  %6087 = vmatprep.mubr.msk.bf16.mxu0 %vm666_vm3, %v5520_v38  ;;  %v5585_v42 = vcombine.low %v7798_v48, %v7817_v47  ;;  %v7841_v38 = vrot.slane %v3918_v41, 5  ;;  %v3936_v40 = vshrl.u32 %v7804_v35, 16  ;;  %v7846_v25 = vsel %vm6824_vm6, %v5570_v58, %v4407_v44 }
 0x106   : > { %5933 = vmatprep.mubr.msk.bf16.mxu1 %vm666_vm3, %v8426_v31  ;;  %v4409_v46 = vrot.slane %v4407_v44, 4  ;;  %v7849_v15 = vcombine.low %v3887_v23, %v3897_v36  ;;  %v7851_v11 = vrot.slane %v3905_v19, 4  ;;  %v7853_v21 = vrot.slane %v3923_v51, 4 }
 0x107   : > { %v7857_v41 = vsel %vm6824_vm6, %v4402_v5, %v4403_v27  ;;  %v7861_v52 = vrot.slane %v3915_v20, 4  ;;  %v7863_v7 = vrot.slane %v3926_v30, 5  ;;  %v7874_v51 = vrot.slane %v3932_v57, 5  ;;  %v5556_v20 = vld [vmem:[%s6583_s25 + $0x84] sm:$0xe] }
 0x108   : > { %v5587_v23 = vcombine.low %v7839_v32, %v7857_v41  ;;  %v7872_v19 = vsel %vm6824_vm6, %v4409_v46, %v4410_v8  ;;  %v3947_v26 = vshrl.u32 %v5506_v12, 16  ;;  %v5571_v43 = vrot.slane %v5555_v14, 9  ;;  %v7882_v30 = vld [vmem:[%s6583_s25 + $0xbc] sm:$0x1]  ;;  %v5509_v5 = vld [vmem:[%s6583_s25 + $0xcc] sm:$0xf] }
 0x109   : > { %v5588_v36 = vcombine.low %v7846_v25, %v7872_v19  ;;  %v3950_v18 = vshll.u32 %v5506_v12, 16  ;;  %v4414_v54 = vrot.slane %v8429_v22, 5  ;;  %v4417_v3 = vrot.slane %v7656_v34, 5  ;;  %v6450_v14 = vld [vmem:[%s6583_s25 + $0x18] sm:$0xff]   ;;  %v5557_v22 = vld [vmem:[%s6583_s25 + $0x90] sm:$0xe] }
 0x10a   : > { %v2260_v16 = vshrl.u32 %v5274_v10, 16  ;;  %v3956_v27 = vshll.u32 %v7866_v39, 16  ;;  %v2263_v58 = vshll.u32 %v5274_v10, 16  ;;  %v2282_v34 = vsel %vm6602_vm2, %v8431_v24, %v8430_v13  ;;  %v8433_v24 = vld [vmem:[#allocation14_spill] sm:$0xff]  ;;  %v6518_v19 = vld [vmem:[%s6583_s25 + $0xac] sm:$0xf] }
 0x10b   : > { %v7901_v1 = vsel %vm6824_vm6, %v5571_v43, %v4414_v54  ;;  %v4416_v45 = vrot.slane %v4414_v54, 4  ;;  %v3938_v31 = vrot.slane %v3936_v40, 4  ;;  %v3942_v63 = vshll.u32 %v7882_v30, 16 }
 0x10c   : > { %6088 = vmatmul.mubr.msk.bf16.gmra.mrb[12].mxu0 %vm666_vm3, %v7772_v29  ;;  %v3960_v29 = vshrl.u32 %v7866_v39, 16  ;;  %v2265_v44 = vrot.slane %v2263_v58, 5  ;;  %v4421_v8 = vrot.slane %v8432_v49, 5  ;;  %v3911_v57 = vsel %vm6602_vm2, %v7851_v11, %v7782_v60  ;;  %v6451_v60 = vld [vmem:[%s6583_s25 + $0x24] sm:$0xff]  }
 0x10d   : > { %5934 = vmatmul.mubr.msk.bf16.gmra.mrb[28].mxu1 %vm666_vm3, %v5162_v55  ;;  %6091 = vmatprep.mubr.msk.bf16.mxu0 %vm666_vm3, %v7774_v61  ;;  %v2262_v55 = vrot.slane %v2260_v16, 4  ;;  %v5572_v61 = vrot.slane %v5556_v20, 9  ;;  %v3929_v12 = vor.u32 %v7863_v7, %v7853_v21  ;;  %v7914_v46 = vsel %vm6824_vm6, %v4416_v45, %v4417_v3  ;;  %v7925_v7 = vld [vmem:[%s6583_s25 + $0xd0] sm:$0xf] }
 0x10e   : > { %5939 = vmatprep.mubr.msk.bf16.mxu1 %vm666_vm3, %v6449_v6  ;;  %v4424_v40 = vrot.slane %v7669_v17, 5  ;;  %v3949_v10 = vrot.slane %v3947_v26, 4  ;;  %v3952_v6 = vrot.slane %v3950_v18, 5  ;;  %v5589_v43 = vcombine.low %v7901_v1, %v7914_v46  ;;  %v7937_v18 = vld [vmem:[%s6583_s25 + $0xc8] sm:$0x1] }
 0x10f   : > { %v2266_v20 = vor.u32 %v2265_v44, %v2262_v55  ;;  %v7922_v11 = vrot.slane %v3956_v27, 5  ;;  %v3962_v21 = vrot.slane %v3960_v29, 4  ;;  %v7929_v54 = vsel %vm6824_vm6, %v5572_v61, %v4421_v8  ;;  %v8434_v55 = vld [vmem:[#allocation2_spill] sm:$0xff] }
 0x110   : > { %v4423_v3 = vrot.slane %v4421_v8, 4  ;;  %v3921_v17 = vsel %vm6602_vm2, %v7861_v52, %v7841_v38  ;;  %v3939_v26 = vor.u32 %v3938_v31, %v7874_v51  ;;  %v3971_v16 = vshrl.u32 %v5509_v5, 16  ;;  %v8435_v31 = vld [vmem:[#allocation7_spill] sm:$0xff] }
 0x111   : > { %v2267_v27 = vrot.slane %v2266_v20, 4  ;;  %v3974_v29 = vshll.u32 %v5509_v5, 16  ;;  %v5573_v13 = vrot.slane %v5557_v22, 9  ;;  %v4428_v45 = vrot.slane %v8433_v24, 5 }
 0x112   : > { %v7943_v58 = vsel %vm6824_vm6, %v4423_v3, %v4424_v40  ;;  %v3980_v38 = vshll.u32 %v7925_v7, 16  ;;  %v3984_v52 = vshrl.u32 %v7925_v7, 16  ;;  %v3953_v44 = vor.u32 %v3952_v6, %v3949_v10  ;;  %v5558_v10 = vld [vmem:[%s6583_s25 + $0x9c] sm:$0xe]  ;;  %v6452_v6 = vld [vmem:[%s6583_s25 + $0x30] sm:$0xff]  }
 0x113   : > { %v5590_v61 = vcombine.low %v7929_v54, %v7943_v58  ;;  %v3966_v49 = vshll.u32 %v7937_v18, 16  ;;  %v3944_v5 = vrot.slane %v3942_v63, 5  ;;  %v7964_v40 = vsel %vm6824_vm6, %v5573_v13, %v4428_v45  ;;  %v6453_v13 = vld [vmem:[%s6583_s25 + $0x3c] sm:$0xff]  }
 0x114   : > { %6092 = vmatmul.mubr.msk.bf16.gmra.mrb[16].mxu0 %vm666_vm3, %v7777_v9  ;;  %v2272_v9 = vsel %vm6602_vm2, %v2267_v27, %v8434_v55  ;;  %v4431_v20 = vrot.slane %v7677_v0, 5  ;;  %v5526_v22 = vcombine.low %v3911_v57, %v3921_v17  ;;  %v3930_v3 = vrot.slane %v3929_v12, 4 }
 0x115   : > { %5940 = vmatmul.mubr.msk.bf16.vlgmr.msra.gmra.mrb[0].mxu1 %vm666_vm3, %v6450_v14  ;;  %6095 = vmatprep.mubr.msk.bf16.mxu0 %vm666_vm3, %v7780_v33  ;;  %v3963_v33 = vor.u32 %v3962_v21, %v7922_v11  ;;  %v7960_v8 = vcombine.low %v2272_v9, %v2282_v34  ;;  %v4430_v14 = vrot.slane %v4428_v45, 4  ;;  %v3940_v27 = vrot.slane %v3939_v26, 4  ;;  %v7970_v21 = vld [vmem:[%s6583_s25 + $0xd4] sm:$0x1]  ;;  %v5547_v9 = vld [vmem:[%s6583_s25 + $0x18] sm:$0xe] }
 0x116   : > { %6142 = vmatpush3.bf16.msra.mxu1 %v8435_v31  ;;  %5943 = vmatprep.mubr.msk.bf16.mxu1 %vm666_vm3, %v6451_v60  ;;  %v3973_v60 = vrot.slane %v3971_v16, 4  ;;  %v3976_v24 = vrot.slane %v3974_v29, 5  ;;  %v7972_v34 = vrot.slane %v3980_v38, 5  ;;  %v3986_v55 = vrot.slane %v3984_v52, 4 }
 0x117   : > { %v7976_v63 = vsel %vm6824_vm6, %v4430_v14, %v4431_v20  ;;  %v3954_v45 = vrot.slane %v3953_v44, 4  ;;  %v3964_v0 = vrot.slane %v3963_v33, 4  ;;  %v3968_v57 = vrot.slane %v3966_v49, 5  ;;  %v6504_v33 = vld [vmem:[%s6583_s25 + $0x1c] sm:$0xf] }
 0x118   : > { %v5591_v12 = vcombine.low %v7964_v40, %v7976_v63  ;;  %v5574_v17 = vrot.slane %v5558_v10, 9  ;;  %v4435_v26 = vrot.slane %v7674_v50, 5  ;;  %v3935_v16 = vsel %vm6602_vm2, %v3930_v3, %v7874_v51  ;;  %v5559_v14 = vld [vmem:[%s6583_s25 + $0xa8] sm:$0xe] }
 0x119   : > { %v3945_v29 = vsel %vm6602_vm2, %v3940_v27, %v3944_v5  ;;  %v3990_v38 = vshll.u32 %v7970_v21, 16  ;;  %v4438_v52 = vrot.slane %v7708_v53, 5  ;;  %v3977_v50 = vor.u32 %v3976_v24, %v3973_v60  ;;  %v6454_v60 = vld [vmem:[%s6583_s25 + $0x48] sm:$0xff]   ;;  %v6505_v24 = vld [vmem:[%s6583_s25 + $0x20] sm:$0x1] }
 0x11a   : > { %v7997_v51 = vsel %vm6824_vm6, %v5574_v17, %v4435_v26  ;;  %v4437_v31 = vrot.slane %v4435_v26, 4  ;;  %v3959_v53 = vsel %vm6602_vm2, %v3954_v45, %v7922_v11  ;;  %v3969_v44 = vsel %vm6602_vm2, %v3964_v0, %v3968_v57  ;;  %v5560_v26 = vld [vmem:[%s6583_s25 + $0xb4] sm:$0xe] }
 0x11b   : > { %v4358_v49 = vrot.slane %v6504_v33, 5  ;;  %v5527_v20 = vcombine.low %v3935_v16, %v3945_v29  ;;  %v5563_v3 = vrot.slane %v5547_v9, 9  ;;  %v5528_v11 = vcombine.low %v3959_v53, %v3969_v44  ;;  %v5549_v33 = vld [vmem:[%s6583_s25 + $0x30] sm:$0xe] }
 0x11c   : > { %6096 = vmatmul.mubr.msk.bf16.gmra.mrb[20].mxu0 %vm666_vm3, %v7849_v15  ;;  %v3987_v15 = vor.u32 %v3986_v55, %v7972_v34  ;;  %v8008_v5 = vsel %vm6824_vm6, %v4437_v31, %v4438_v52  ;;  %v3978_v10 = vrot.slane %v3977_v50, 4  ;;  %v4361_v55 = vrot.slane %v6505_v24, 5  ;;  %v5548_v52 = vld [vmem:[%s6583_s25 + $0x24] sm:$0xe]  ;;  %v6506_v50 = vld [vmem:[%s6583_s25 + $0x28] sm:$0xf] }
 0x11d   : > { %5944 = vmatmul.mubr.msk.bf16.gmra.mrb[4].mxu1 %vm666_vm3, %v6452_v6  ;;  %6099 = vmatprep.mubr.msk.bf16.mxu0 %vm666_vm3, %v5526_v22  ;;  %v3992_v22 = vrot.slane %v3990_v38, 5  ;;  %v5592_v27 = vcombine.low %v7997_v51, %v8008_v5  ;;  %v4360_v45 = vrot.slane %v4358_v49, 4  ;;  %v5575_v0 = vrot.slane %v5559_v14, 9  ;;  %v6507_v31 = vld [vmem:[%s6583_s25 + $0x34] sm:$0xf] }
 0x11e   : > { %5947 = vmatprep.mubr.msk.bf16.mxu1 %vm666_vm3, %v6453_v13  ;;  %v3988_v6 = vrot.slane %v3987_v15, 4  ;;  %v6455_v13 = vld [vmem:[%s6583_s25 + $0x54] sm:$0xff]   ;;  %v4442_v57 = vrot.slane %v7711_v4, 5  ;;  %v4445_v17 = vrot.slane %v7754_v59, 5  ;;  %v3983_v4 = vsel %vm6602_vm2, %v3978_v10, %v7972_v34  ;;  %v6456_v10 = vld [vmem:[%s6583_s25 + $0x60] sm:$0xff]  }
 0x11f   : > { %v4359_v38 = vsel %vm6824_vm6, %v5563_v3, %v4358_v49  ;;  %v4365_v15 = vrot.slane %v6506_v50, 5  ;;  %v4362_v9 = vsel %vm6824_vm6, %v4360_v45, %v4361_v55  ;;  %v4372_v53 = vrot.slane %v6507_v31, 5  ;;  %v6508_v3 = vld [vmem:[%s6583_s25 + $0x2c] sm:$0x1]  ;;  %v6523_v51 = vld [vmem:[%s6583_s25 + $0xc8] sm:$0x1] }
 0x120   : > { %v8022_v16 = vsel %vm6824_vm6, %v5575_v0, %v4442_v57  ;;  %v4444_v29 = vrot.slane %v4442_v57, 4  ;;  %v3993_v59 = vsel %vm6602_vm2, %v3988_v6, %v3992_v22  ;;  %v5576_v44 = vrot.slane %v5560_v26, 9  ;;  %v6457_v45 = vld [vmem:[%s6583_s25 + $0x6c] sm:$0xff]   ;;  %v5561_v26 = vld [vmem:[%s6583_s25 + $0xc0] sm:$0xe] }
 0x121   : > { %v4449_v14 = vrot.slane %v7804_v35, 5  ;;  %v5564_v22 = vrot.slane %v5548_v52, 9  ;;  %v5581_v6 = vcombine.low %v4359_v38, %v4362_v9  ;;  %v4367_v24 = vrot.slane %v4365_v15, 4  ;;  %v6509_v35 = vld [vmem:[%s6583_s25 + $0x38] sm:$0x1] }
 0x122   : > { %v8041_v34 = vsel %vm6824_vm6, %v4444_v29, %v4445_v17  ;;  %v5565_v0 = vrot.slane %v5549_v33, 9  ;;  %v4374_v57 = vrot.slane %v4372_v53, 4  ;;  %v4375_v17 = vrot.slane %v6509_v35, 5  ;;  %v8436_v38 = vld [vmem:[#allocation5_spill] sm:$0xff] }
 0x123   : > { %v5593_v49 = vcombine.low %v8022_v16, %v8041_v34  ;;  %v8052_v55 = vsel %vm6824_vm6, %v5576_v44, %v4449_v14  ;;  %v4379_v52 = vrot.slane %v8436_v38, 5  ;;  %v5577_v50 = vrot.slane %v5561_v26, 9  ;;  %v5550_v44 = vld [vmem:[%s6583_s25 + $0x3c] sm:$0xe]  ;;  %v6510_v38 = vld [vmem:[%s6583_s25 + $0x70] sm:$0xf] }
 0x124   : > { %6100 = vmatmul.mubr.msk.bf16.gmra.mrb[24].mxu0 %vm666_vm3, %v5527_v20  ;;  %v5529_v20 = vcombine.low %v3983_v4, %v3993_v59  ;;  %v4366_v4 = vsel %vm6824_vm6, %v5564_v22, %v4365_v15  ;;  %v4373_v9 = vsel %vm6824_vm6, %v5565_v0, %v4372_v53  ;;  %v4376_v31 = vsel %vm6824_vm6, %v4374_v57, %v4375_v17  ;;  %v5271_v22 = vld [vmem:[%s6583_s25 + $0x6c] sm:$0xf] }
 0x125   : > { %5948 = vmatmul.mubr.msk.bf16.gmra.mrb[8].mxu1 %vm666_vm3, %v6454_v60  ;;  %6103 = vmatprep.mubr.msk.bf16.mxu0 %vm666_vm3, %v5528_v11  ;;  %v4368_v60 = vrot.slane %v6508_v3, 5  ;;  %v4452_v11 = vrot.slane %v7882_v30, 5  ;;  %v4456_v33 = vrot.slane %v7866_v39, 5  ;;  %v4459_v15 = vrot.slane %v7937_v18, 5 }
 0x126   : > { %5951 = vmatprep.mubr.msk.bf16.mxu1 %vm666_vm3, %v6455_v13  ;;  %v4451_v13 = vrot.slane %v4449_v14, 4  ;;  %v5562_v14 = vld [vmem:[%s6583_s25 + $0xcc] sm:$0xe]  ;;  %v4381_v53 = vrot.slane %v4379_v52, 4  ;;  %v2236_v0 = vshrl.u32 %v5271_v22, 16  ;;  %v2239_v57 = vshll.u32 %v5271_v22, 16 }
 0x127   : > { %v4369_v59 = vsel %vm6824_vm6, %v4367_v24, %v4368_v60  ;;  %v8083_v3 = vsel %vm6824_vm6, %v5577_v50, %v4456_v33  ;;  %v4458_v60 = vrot.slane %v4456_v33, 4  ;;  %v8437_v24 = vld [vmem:[#allocation6_spill] sm:$0xff]  ;;  %v5578_v18 = vrot.slane %v5562_v14, 9 }
 0x128   : > { %v8059_v29 = vsel %vm6824_vm6, %v4451_v13, %v4452_v11  ;;  %v6458_v11 = vld [vmem:[%s6583_s25 + $0x78] sm:$0xff]   ;;  %v4382_v13 = vrot.slane %v8437_v24, 5  ;;  %v4463_v17 = vrot.slane %v7925_v7, 5  ;;  %v4466_v26 = vrot.slane %v7970_v21, 5 }
 0x129   : > { %v5594_v30 = vcombine.low %v8052_v55, %v8059_v29  ;;  %v8090_v39 = vsel %vm6824_vm6, %v4458_v60, %v4459_v15  ;;  %v2245_v50 = vshll.u32 %v6510_v38, 16  ;;  %v6460_v15 = vld [vmem:[%s6583_s25 + $0x90] sm:$0xff]   ;;  %v6461_v60 = vld [vmem:[%s6583_s25 + $0x9c] sm:$0xff]   ;;  %v2423_v5 = vshll.u32 %v6523_v51, 16 }
 0x12a   : > { %v5595_v35 = vcombine.low %v8083_v3, %v8090_v39  ;;  %v8107_v7 = vsel %vm6824_vm6, %v5578_v18, %v4463_v17  ;;  %v4465_v21 = vrot.slane %v4463_v17, 4  ;;  %v5280_v17 = vld [vmem:[%s6583_s25 + $0x90] sm:$0xf] }
 0x12b   : > { %v2247_v14 = vrot.slane %v2245_v50, 5 }
 0x12c   : > { %6104 = vmatmul.mubr.msk.bf16.gmra.mrb[28].mxu0 %vm666_vm3, %v5529_v20  ;;  %v5582_v20 = vcombine.low %v4366_v4, %v4369_v59  ;;  %v4383_v59 = vsel %vm6824_vm6, %v4381_v53, %v4382_v13 }
 0x12d   : > { %5952 = vmatmul.mubr.msk.bf16.gmra.mrb[12].mxu1 %vm666_vm3, %v6456_v10  ;;  %6109 = vmatprep.mubr.msk.bf16.mxu0 %vm666_vm3, %v5581_v6  ;;  %v5583_v10 = vcombine.low %v4373_v9, %v4376_v31  ;;  %v5566_v6 = vrot.slane %v5550_v44, 9  ;;  %v2249_v9 = vshrl.u32 %v6510_v38, 16  ;;  %v2238_v31 = vrot.slane %v2236_v0, 4  ;;  %v6463_v38 = vld [vmem:[%s6583_s25 + $0xb4] sm:$0xff]  }
 0x12e   : > { %5955 = vmatprep.mubr.msk.bf16.mxu1 %vm666_vm3, %v6457_v45  ;;  %v6459_v45 = vld [vmem:[%s6583_s25 + $0x84] sm:$0xff]   ;;  %v2241_v44 = vrot.slane %v2239_v57, 5 }
 0x12f   : > { %v4380_v4 = vsel %vm6824_vm6, %v5566_v6, %v4379_v52  ;;  %v8111_v52 = vsel %vm6824_vm6, %v4465_v21, %v4466_v26  ;;  %v6511_v6 = vld [vmem:[%s6583_s25 + $0x74] sm:$0x1]  ;;  %v6462_v26 = vld [vmem:[%s6583_s25 + $0xa8] sm:$0xff]   ;;  %v2308_v21 = vshrl.u32 %v5280_v17, 16 }
 0x130   : > { %v5584_v33 = vcombine.low %v4380_v4, %v4383_v59  ;;  %v5596_v22 = vcombine.low %v8107_v7, %v8111_v52  ;;  %v2255_v53 = vshll.u32 %v6511_v6, 16  ;;  %v5283_v59 = vld [vmem:[%s6583_s25 + $0x9c] sm:$0xf]  ;;  %v6515_v6 = vld [vmem:[%s6583_s25 + $0x8c] sm:$0x1] }
 0x132   : > { %v2257_v48 = vrot.slane %v2255_v53, 5  ;;  %v2303_v53 = vshll.u32 %v6515_v6, 16 }
 0x134   : > { %6110 = vmatmul.mubr.msk.bf16.vlgmr.msra.gmra.mrb[0].mxu0 %vm666_vm3, %v5582_v20  ;;  %v2251_v20 = vrot.slane %v2249_v9, 4 }
 0x135   : > { %5956 = vmatmul.mubr.msk.bf16.gmra.mrb[16].mxu1 %vm666_vm3, %v6458_v11  ;;  %6113 = vmatprep.mubr.msk.bf16.mxu0 %vm666_vm3, %v5583_v10  ;;  %v5277_v11 = vld [vmem:[%s6583_s25 + $0x84] sm:$0xf]  ;;  %v2242_v10 = vor.u32 %v2241_v44, %v2238_v31  ;;  %v2311_v31 = vshll.u32 %v5280_v17, 16 }
 0x136   : > { %5959 = vmatprep.mubr.msk.bf16.mxu1 %vm666_vm3, %v6459_v45  ;;  %v2252_v2 = vor.u32 %v2251_v20, %v2247_v14  ;;  %v2284_v24 = vshrl.u32 %v5277_v11, 16  ;;  %v2287_v13 = vshll.u32 %v5277_v11, 16  ;;  %v6512_v45 = vld [vmem:[%s6583_s25 + $0x88] sm:$0xf]  ;;  %v2335_v11 = vshll.u32 %v5283_v59, 16 }
 0x137   : > { %v2293_v18 = vshll.u32 %v6512_v45, 16  ;;  %v2297_v0 = vshrl.u32 %v6512_v45, 16  ;;  %v2243_v57 = vrot.slane %v2242_v10, 4  ;;  %v2341_v10 = vshll.u32 %v6514_v62, 16 }
 0x138   : > { %v2253_v4 = vrot.slane %v2252_v2, 4  ;;  %v2286_v47 = vrot.slane %v2284_v24, 4  ;;  %v2310_v24 = vrot.slane %v2308_v21, 4  ;;  %v2313_v32 = vrot.slane %v2311_v31, 5  ;;  %v6517_v31 = vld [vmem:[%s6583_s25 + $0xa4] sm:$0x1] }
 0x139   : > { %v8131_v50 = vrot.slane %v2293_v18, 5  ;;  %v2299_v9 = vrot.slane %v2297_v0, 4  ;;  %v2248_v44 = vsel %vm6602_vm2, %v2243_v57, %v2247_v14  ;;  %v2337_v45 = vrot.slane %v2335_v11, 5  ;;  %v6464_v18 = vld [vmem:[%s6583_s25 + $0xc0] sm:$0xff]  }
 0x13a   : > { %v2258_v14 = vsel %vm6602_vm2, %v2253_v4, %v2257_v48  ;;  %v8154_v17 = vrot.slane %v2341_v10, 5  ;;  %v5286_v4 = vld [vmem:[%s6583_s25 + $0xa8] sm:$0xf] }
 0x13b   : > { %v2300_v2 = vor.u32 %v2299_v9, %v8131_v50  ;;  %v5305_v0 = vcombine.low %v2248_v44, %v2258_v14  ;;  %v2351_v44 = vshll.u32 %v6517_v31, 16  ;;  %v2359_v25 = vshll.u32 %v5286_v4, 16 }
 0x13c   : > { %6114 = vmatmul.mubr.msk.bf16.gmra.mrb[4].mxu0 %vm666_vm3, %v5584_v33  ;;  %v6513_v33 = vld [vmem:[%s6583_s25 + $0x94] sm:$0xf] }
 0x13d   : > { %5960 = vmatmul.mubr.msk.bf16.gmra.mrb[20].mxu1 %vm666_vm3, %v6460_v15  ;;  %6117 = vmatprep.mubr.msk.bf16.mxu0 %vm666_vm3, %v5585_v42  ;;  %v2289_v42 = vrot.slane %v2287_v13, 5  ;;  %v2317_v15 = vshll.u32 %v6513_v33, 16  ;;  %v2321_v20 = vshrl.u32 %v6513_v33, 16  ;;  %v2301_v48 = vrot.slane %v2300_v2, 4 }
 0x13e   : > { %5963 = vmatprep.mubr.msk.bf16.mxu1 %vm666_vm3, %v6461_v60  ;;  %v2332_v60 = vshrl.u32 %v5283_v59, 16  ;;  %v6516_v59 = vld [vmem:[%s6583_s25 + $0x98] sm:$0x1]  ;;  %v2356_v33 = vshrl.u32 %v5286_v4, 16  ;;  %v5292_v4 = vld [vmem:[%s6583_s25 + $0xc0] sm:$0xf] }
 0x13f   : > { %v2290_v37 = vor.u32 %v2289_v42, %v2286_v47  ;;  %v8151_v41 = vrot.slane %v2317_v15, 5  ;;  %v2305_v47 = vrot.slane %v2303_v53, 5  ;;  %v2314_v42 = vor.u32 %v2313_v32, %v2310_v24  ;;  %v5289_v15 = vld [vmem:[%s6583_s25 + $0xb4] sm:$0xf] }
 0x140   : > { %v2334_v13 = vrot.slane %v2332_v60, 4  ;;  %v2369_v60 = vshrl.u32 %v6518_v19, 16  ;;  %v2380_v1 = vshrl.u32 %v5289_v15, 16  ;;  %v2383_v46 = vshll.u32 %v5289_v15, 16 }
 0x141   : > { %v2291_v57 = vrot.slane %v2290_v37, 4  ;;  %v2306_v14 = vsel %vm6602_vm2, %v2301_v48, %v2305_v47  ;;  %v2315_v37 = vrot.slane %v2314_v42, 4  ;;  %v2353_v53 = vrot.slane %v2351_v44, 5 }
 0x142   : > { %v2338_v21 = vor.u32 %v2337_v45, %v2334_v13  ;;  %v2358_v24 = vrot.slane %v2356_v33, 4  ;;  %v2371_v45 = vrot.slane %v2369_v60, 4  ;;  %v6522_v33 = vld [vmem:[%s6583_s25 + $0xbc] sm:$0x1] }
 0x143   : > { %v2296_v11 = vsel %vm6602_vm2, %v2291_v57, %v8131_v50  ;;  %v2320_v48 = vsel %vm6602_vm2, %v2315_v37, %v8151_v41  ;;  %v2399_v40 = vshll.u32 %v6522_v33, 16 }
 0x144   : > { %6118 = vmatmul.mubr.msk.bf16.gmra.mrb[8].mxu0 %vm666_vm3, %v5586_v56  ;;  %v2345_v56 = vshrl.u32 %v6514_v62, 16  ;;  %v2339_v6 = vrot.slane %v2338_v21, 4  ;;  %v5307_v50 = vcombine.low %v2296_v11, %v2306_v14 }
 0x145   : > { %5964 = vmatmul.mubr.msk.bf16.gmra.mrb[24].mxu1 %vm666_vm3, %v6462_v26  ;;  %6121 = vmatprep.mubr.msk.bf16.mxu0 %vm666_vm3, %v5587_v23  ;;  %v2323_v23 = vrot.slane %v2321_v20, 4 }
 0x146   : > { %5967 = vmatprep.mubr.msk.bf16.mxu1 %vm666_vm3, %v6463_v38  ;;  %v2347_v26 = vrot.slane %v2345_v56, 4  ;;  %v2327_v38 = vshll.u32 %v6516_v59, 16  ;;  %v2344_v42 = vsel %vm6602_vm2, %v2339_v6, %v8154_v17  ;;  %v2425_v6 = vrot.slane %v2423_v5, 5 }
 0x147   : > { %v2324_v9 = vor.u32 %v2323_v23, %v8151_v41  ;;  %v2361_v23 = vrot.slane %v2359_v25, 5  ;;  %v6520_v41 = vld [vmem:[%s6583_s25 + $0xb0] sm:$0x1] }
 0x148   : > { %v2348_v20 = vor.u32 %v2347_v26, %v8154_v17  ;;  %v2329_v62 = vrot.slane %v2327_v38, 5  ;;  %v2375_v59 = vshll.u32 %v6520_v41, 16  ;;  %v2404_v38 = vshrl.u32 %v5292_v4, 16 }
 0x149   : > { %v2325_v2 = vrot.slane %v2324_v9, 4  ;;  %v2362_v58 = vor.u32 %v2361_v23, %v2358_v24  ;;  %v2407_v17 = vshll.u32 %v5292_v4, 16  ;;  %v6521_v9 = vld [vmem:[%s6583_s25 + $0xc4] sm:$0xf] }
 0x14a   : > { %v2349_v32 = vrot.slane %v2348_v20, 4  ;;  %v2413_v21 = vshll.u32 %v6521_v9, 16  ;;  %v2417_v31 = vshrl.u32 %v6521_v9, 16  ;;  %v2377_v25 = vrot.slane %v2375_v59, 5 }
 0x14b   : > { %v2330_v47 = vsel %vm6602_vm2, %v2325_v2, %v2329_v62  ;;  %v2363_v15 = vrot.slane %v2362_v58, 4  ;;  %v2401_v62 = vrot.slane %v2399_v40, 5 }
 0x14c   : > { %6122 = vmatmul.mubr.msk.bf16.gmra.mrb[12].mxu0 %vm666_vm3, %v5588_v36  ;;  %v2365_v36 = vshll.u32 %v6518_v19, 16  ;;  %v2354_v54 = vsel %vm6602_vm2, %v2349_v32, %v2353_v53  ;;  %v5308_v63 = vcombine.low %v2320_v48, %v2330_v47  ;;  %v2406_v19 = vrot.slane %v2404_v38, 4 }
 0x14d   : > { %5968 = vmatmul.mubr.msk.bf16.gmra.mrb[28].mxu1 %vm666_vm3, %v6464_v18  ;;  %6125 = vmatprep.mubr.msk.bf16.mxu0 %vm666_vm3, %v5589_v43  ;;  %v6519_v43 = vld [vmem:[%s6583_s25 + $0xb8] sm:$0xf]  ;;  %v2382_v18 = vrot.slane %v2380_v1, 4  ;;  %v2415_v60 = vrot.slane %v2413_v21, 5  ;;  %v2419_v11 = vrot.slane %v2417_v31, 4 }
 0x14e   : > { %5989 = vmatprep.mubr.msk.bf16.mxu1 %vm666_vm3, %v5305_v0  ;;  %v2389_v10 = vshll.u32 %v6519_v43, 16  ;;  %v2393_v56 = vshrl.u32 %v6519_v43, 16  ;;  %v2367_v13 = vrot.slane %v2365_v36, 5  ;;  %v2385_v0 = vrot.slane %v2383_v46, 5 }
 0x14f   : > { %v2409_v36 = vrot.slane %v2407_v17, 5 }
 0x150   : > { %v2391_v57 = vrot.slane %v2389_v10, 5  ;;  %v2395_v26 = vrot.slane %v2393_v56, 4  ;;  %v2368_v1 = vsel %vm6602_vm2, %v2363_v15, %v2367_v13  ;;  %v2420_v10 = vor.u32 %v2419_v11, %v2415_v60 }
 0x151   : > { %v2410_v43 = vor.u32 %v2409_v36, %v2406_v19 }
 0x152   : > { %v2396_v44 = vor.u32 %v2395_v26, %v2391_v57  ;;  %v2421_v2 = vrot.slane %v2420_v10, 4  ;;  %v8257_v26 = vld [vmem:[%s8372_s2] ss:$0 sm:$0xff] }
 0x153   : > { %v2411_v56 = vrot.slane %v2410_v43, 4 }
 0x154   : > { %6126 = vmatmul.mubr.msk.bf16.gmra.mrb[16].mxu0 %vm666_vm3, %v5590_v61  ;;  %v2372_v61 = vor.u32 %v2371_v45, %v2367_v13  ;;  %v2397_v37 = vrot.slane %v2396_v44, 4  ;;  %v2426_v24 = vsel %vm6602_vm2, %v2421_v2, %v2425_v6 }
 0x155   : > { %5990 = vmatmul.mubr.msk.bf16.vlgmr.msra.gmra.mrb[16].mxu1 %vm666_vm3, %v7960_v8  ;;  %6129 = vmatprep.mubr.msk.bf16.mxu0 %vm666_vm3, %v5591_v12  ;;  %v2386_v8 = vor.u32 %v2385_v0, %v2382_v18  ;;  %v5309_v12 = vcombine.low %v2344_v42, %v2354_v54  ;;  %v2416_v53 = vsel %vm6602_vm2, %v2411_v56, %v2415_v60 }
 0x156   : > { %5993 = vmatprep.mubr.msk.bf16.mxu1 %vm666_vm3, %v5307_v50  ;;  %v2373_v20 = vrot.slane %v2372_v61, 4  ;;  %v2402_v16 = vsel %vm6602_vm2, %v2397_v37, %v2401_v62  ;;  %v5312_v32 = vcombine.low %v2416_v53, %v2426_v24 }
 0x157   : > { %v2387_v14 = vrot.slane %v2386_v8, 4 }
 0x158   : > { %v2378_v46 = vsel %vm6602_vm2, %v2373_v20, %v2377_v25 }
 0x159   : > { %v5310_v34 = vcombine.low %v2368_v1, %v2378_v46 }
 0x15c   : > { %6130 = vmatmul.mubr.msk.bf16.gmra.mrb[20].mxu0 %vm666_vm3, %v5592_v27  ;;  %v2392_v27 = vsel %vm6602_vm2, %v2387_v14, %v2391_v57 }
 0x15d   : > { %5994 = vmatmul.mubr.msk.bf16.gmra.mrb[20].mxu1 %vm666_vm3, %v5308_v63  ;;  %6133 = vmatprep.mubr.msk.bf16.mxu0 %vm666_vm3, %v5593_v49  ;;  %v5311_v49 = vcombine.low %v2392_v27, %v2402_v16 }
 0x15e   : > { %5997 = vmatprep.mubr.msk.bf16.mxu1 %vm666_vm3, %v5309_v12 }
 0x164   : > { %6134 = vmatmul.mubr.msk.bf16.gmra.mrb[24].mxu0 %vm666_vm3, %v5594_v30 }
 0x165   : > { %5998 = vmatmul.mubr.msk.bf16.gmra.mrb[24].mxu1 %vm666_vm3, %v5310_v34  ;;  %6137 = vmatprep.mubr.msk.bf16.mxu0 %vm666_vm3, %v5595_v35 }
 0x166   : > { %6001 = vmatprep.mubr.msk.bf16.mxu1 %vm666_vm3, %v5311_v49 }
 0x16c   : > { %6138 = vmatmul.mubr.msk.bf16.gmra.mrb[28].mxu0 %vm666_vm3, %v5596_v22 }
 0x16d   : > { %6002 = vmatmul.mubr.msk.bf16.gmra.mrb[28].mxu1 %vm666_vm3, %v5312_v32 }
 0x1e8   : > { %v5941_v55 = vpop.f32.mrb[0].mxu1 }
 0x1e9   : > { %v1836_v29 = vpop.f32.mrb[1].mxu1 }
 0x1ea   : > { %v5942_v30 = vpop.f32.mrb[2].mxu1 }
 0x1eb   : > { %v1839_v3 = vpop.f32.mrb[3].mxu1 }
 0x1f0   : > { %v5945_v39 = vpop.f32.mrb[4].mxu1 }
 0x1f1   : > { %v1852_v35 = vpop.f32.mrb[5].mxu1 }
 0x1f2   : > { %v5946_v23 = vpop.f32.mrb[6].mxu1 }
 0x1f3   : > { %v1855_v13 = vpop.f32.mrb[7].mxu1 }
 0x1f8   : > { %v5949_v45 = vpop.f32.mrb[8].mxu1 }
 0x1f9   : > { %v1868_v28 = vpop.f32.mrb[9].mxu1 }
 0x1fa   : > { %v8242_v50 = vpop.f32.mrb[10].mxu1 }
 0x1fb   : > { %v8244_v18 = vpop.f32.mrb[11].mxu1 }
 0x200   : > { %v8246_v7 = vpop.f32.mrb[12].mxu1 }
 0x201   : > { %v8248_v52 = vpop.f32.mrb[13].mxu1 }
 0x202   : > { %v8250_v22 = vpop.f32.mrb[14].mxu1 }
 0x203   : > { %v8252_v0 = vpop.f32.mrb[15].mxu1 }
 0x207   : > { %v6111_v57 = vpop.f32.mrb[0].mxu0 }
 0x208   : > { %v6143_v4 = vadd.f32 %v6111_v57, %v5941_v55  ;;  %v4607_v48 = vpop.f32.mrb[1].mxu0 }
 0x209   : > { %v6144_v47 = vadd.f32 %v4607_v48, %v1836_v29  ;;  %v6112_v42 = vpop.f32.mrb[2].mxu0 }
 0x20a   : > { %v4775_v54 = vadd.f32 %v6143_v4, %v8257_v26  ;;  %v6145_v58 = vadd.f32 %v6112_v42, %v5942_v30  ;;  %v4610_v61 = vpop.f32.mrb[3].mxu0 }
 0x20b   : > { %v4773_v41 = vadd.f32 %v6144_v47, %v8257_v26  ;;  %v6146_v59 = vadd.f32 %v4610_v61, %v1839_v3 }
 0x20c   : > { %v4807_v38 = vmax.f32 %v4775_v54, 0.0  ;;  %v4776_v17 = vadd.f32 %v6145_v58, %v8257_v26 }
 0x20d   : > { %v4805_v9 = vmax.f32 %v4773_v41, 0.0  ;;  %v4774_v21 = vadd.f32 %v6146_v59, %v8257_v26 }
 0x20e   : > { %v5652_v31 = vpack.c.bf16 %v4807_v38, %v4807_v38  ;;  %v4808_v8 = vmax.f32 %v4776_v17, 0.0 }
 0x20f   : > { %v5650_v44 = vpack.c.bf16 %v4805_v9, %v4805_v9  ;;  %v4806_v33 = vmax.f32 %v4774_v21, 0.0  ;;  %v6115_v40 = vpop.f32.mrb[4].mxu0 }
 0x210   : > { %4968 = vst.msk [vmem:[%s8266_s20 + $0x8] sm:$0xf] %vm4965_vm7, %v5652_v31  ;;  %v5653_v63 = vpack.c.bf16 %v4808_v8, %v4808_v8  ;;  %v6147_v12 = vadd.f32 %v6115_v40, %v5945_v39  ;;  %v4623_v15 = vpop.f32.mrb[5].mxu0 }
 0x211   : > { %4966 = vst.msk [vmem:[%s8266_s20] sm:$0xf] %vm4965_vm7, %v5650_v44  ;;  %v5651_v20 = vpack.c.bf16 %v4806_v33, %v4806_v33  ;;  %v6148_v25 = vadd.f32 %v4623_v15, %v1852_v35  ;;  %v6116_v19 = vpop.f32.mrb[6].mxu0 }
 0x212   : > { %4969 = vst.msk [vmem:[%s8266_s20 + $0xc] sm:$0xf] %vm4965_vm7, %v5653_v63  ;;  %v4779_v36 = vadd.f32 %v6147_v12, %v8257_v26  ;;  %v6149_v60 = vadd.f32 %v6116_v19, %v5946_v23  ;;  %v4626_v11 = vpop.f32.mrb[7].mxu0 }
 0x213   : > { %4967 = vst.msk [vmem:[%s8266_s20 + $0x4] sm:$0xf] %vm4965_vm7, %v5651_v20  ;;  %v4777_v14 = vadd.f32 %v6148_v25, %v8257_v26  ;;  %v6150_v37 = vadd.f32 %v4626_v11, %v1855_v13 }
 0x214   : > { %v4811_v62 = vmax.f32 %v4779_v36, 0.0  ;;  %v4780_v1 = vadd.f32 %v6149_v60, %v8257_v26 }
 0x215   : > { %v4809_v46 = vmax.f32 %v4777_v14, 0.0  ;;  %v4778_v43 = vadd.f32 %v6150_v37, %v8257_v26 }
 0x216   : > { %v5656_v10 = vpack.c.bf16 %v4811_v62, %v4811_v62  ;;  %v4812_v51 = vmax.f32 %v4780_v1, 0.0 }
 0x217   : > { %v5654_v5 = vpack.c.bf16 %v4809_v46, %v4809_v46  ;;  %v4810_v27 = vmax.f32 %v4778_v43, 0.0  ;;  %v6119_v16 = vpop.f32.mrb[8].mxu0 }
 0x218   : > { %4972 = vst.msk [vmem:[%s8266_s20 + $0x18] sm:$0xf] %vm4965_vm7, %v5656_v10  ;;  %v5657_v34 = vpack.c.bf16 %v4812_v51, %v4812_v51  ;;  %v6151_v49 = vadd.f32 %v6119_v16, %v5949_v45  ;;  %v4639_v56 = vpop.f32.mrb[9].mxu0 }
 0x219   : > { %4970 = vst.msk [vmem:[%s8266_s20 + $0x10] sm:$0xf] %vm4965_vm7, %v5654_v5  ;;  %v5655_v2 = vpack.c.bf16 %v4810_v27, %v4810_v27  ;;  %v6152_v6 = vadd.f32 %v4639_v56, %v1868_v28  ;;  %v6120_v53 = vpop.f32.mrb[10].mxu0 }
 0x21a   : > { %4973 = vst.msk [vmem:[%s8266_s20 + $0x1c] sm:$0xf] %vm4965_vm7, %v5657_v34  ;;  %v4783_v24 = vadd.f32 %v6151_v49, %v8257_v26  ;;  %v6153_v32 = vadd.f32 %v6120_v53, %v8242_v50  ;;  %v4642_v55 = vpop.f32.mrb[11].mxu0 }
 0x21b   : > { %4971 = vst.msk [vmem:[%s8266_s20 + $0x14] sm:$0xf] %vm4965_vm7, %v5655_v2  ;;  %v4781_v29 = vadd.f32 %v6152_v6, %v8257_v26  ;;  %v6154_v30 = vadd.f32 %v4642_v55, %v8244_v18 }
 0x21c   : > { %v4815_v3 = vmax.f32 %v4783_v24, 0.0  ;;  %v4784_v39 = vadd.f32 %v6153_v32, %v8257_v26 }
 0x21d   : > { %v4813_v35 = vmax.f32 %v4781_v29, 0.0  ;;  %v4782_v23 = vadd.f32 %v6154_v30, %v8257_v26 }
 0x21e   : > { %v5660_v13 = vpack.c.bf16 %v4815_v3, %v4815_v3  ;;  %v4816_v45 = vmax.f32 %v4784_v39, 0.0 }
 0x21f   : > { %v5658_v28 = vpack.c.bf16 %v4813_v35, %v4813_v35  ;;  %v4814_v50 = vmax.f32 %v4782_v23, 0.0  ;;  %v6123_v57 = vpop.f32.mrb[12].mxu0 }
 0x220   : > { %4976 = vst.msk [vmem:[%s8266_s20 + $0x28] sm:$0xf] %vm4965_vm7, %v5660_v13  ;;  %v5661_v4 = vpack.c.bf16 %v4816_v45, %v4816_v45  ;;  %v6155_v48 = vadd.f32 %v6123_v57, %v8246_v7  ;;  %v4655_v47 = vpop.f32.mrb[13].mxu0 }
 0x221   : > { %4974 = vst.msk [vmem:[%s8266_s20 + $0x20] sm:$0xf] %vm4965_vm7, %v5658_v28  ;;  %v5659_v18 = vpack.c.bf16 %v4814_v50, %v4814_v50  ;;  %v6156_v42 = vadd.f32 %v4655_v47, %v8248_v52  ;;  %v6124_v54 = vpop.f32.mrb[14].mxu0 }
 0x222   : > { %4977 = vst.msk [vmem:[%s8266_s20 + $0x2c] sm:$0xf] %vm4965_vm7, %v5661_v4  ;;  %v4787_v58 = vadd.f32 %v6155_v48, %v8257_v26  ;;  %v6157_v61 = vadd.f32 %v6124_v54, %v8250_v22  ;;  %v4658_v41 = vpop.f32.mrb[15].mxu0 }
 0x223   : > { %4975 = vst.msk [vmem:[%s8266_s20 + $0x24] sm:$0xf] %vm4965_vm7, %v5659_v18  ;;  %v4785_v7 = vadd.f32 %v6156_v42, %v8257_v26  ;;  %v6158_v59 = vadd.f32 %v4658_v41, %v8252_v0 }
 0x224   : > { %v4819_v38 = vmax.f32 %v4787_v58, 0.0  ;;  %v4788_v17 = vadd.f32 %v6157_v61, %v8257_v26 }
 0x225   : > { %v4817_v52 = vmax.f32 %v4785_v7, 0.0  ;;  %v4786_v9 = vadd.f32 %v6158_v59, %v8257_v26 }
 0x226   : > { %v5664_v21 = vpack.c.bf16 %v4819_v38, %v4819_v38  ;;  %v4820_v31 = vmax.f32 %v4788_v17, 0.0 }
 0x227   : > { %v5662_v8 = vpack.c.bf16 %v4817_v52, %v4817_v52  ;;  %v4818_v22 = vmax.f32 %v4786_v9, 0.0  ;;  %v6127_v44 = vpop.f32.mrb[16].mxu0 }
 0x228   : > { %4980 = vst.msk [vmem:[%s8266_s20 + $0x38] sm:$0xf] %vm4965_vm7, %v5664_v21  ;;  %v5665_v33 = vpack.c.bf16 %v4820_v31, %v4820_v31  ;;  %v5991_v40 = vpop.f32.mrb[16].mxu1  ;;  %v4671_v63 = vpop.f32.mrb[17].mxu0 }
 0x229   : > { %4978 = vst.msk [vmem:[%s8266_s20 + $0x30] sm:$0xf] %vm4965_vm7, %v5662_v8  ;;  %v5663_v0 = vpack.c.bf16 %v4818_v22, %v4818_v22  ;;  %v6159_v12 = vadd.f32 %v6127_v44, %v5991_v40  ;;  %v2630_v15 = vpop.f32.mrb[17].mxu1  ;;  %v6128_v20 = vpop.f32.mrb[18].mxu0 }
 0x22a   : > { %4981 = vst.msk [vmem:[%s8266_s20 + $0x3c] sm:$0xf] %vm4965_vm7, %v5665_v33  ;;  %v6160_v25 = vadd.f32 %v4671_v63, %v2630_v15  ;;  %v5992_v19 = vpop.f32.mrb[18].mxu1  ;;  %v4674_v36 = vpop.f32.mrb[19].mxu0 }
 0x22b   : > { %4979 = vst.msk [vmem:[%s8266_s20 + $0x34] sm:$0xf] %vm4965_vm7, %v5663_v0  ;;  %v4791_v60 = vadd.f32 %v6159_v12, %v8257_v26  ;;  %v6161_v11 = vadd.f32 %v6128_v20, %v5992_v19  ;;  %v2633_v14 = vpop.f32.mrb[19].mxu1 }
 0x22c   : > { %v4789_v37 = vadd.f32 %v6160_v25, %v8257_v26  ;;  %v6162_v62 = vadd.f32 %v4674_v36, %v2633_v14 }
 0x22d   : > { %v4823_v1 = vmax.f32 %v4791_v60, 0.0  ;;  %v4792_v46 = vadd.f32 %v6161_v11, %v8257_v26 }
 0x22e   : > { %v4821_v43 = vmax.f32 %v4789_v37, 0.0  ;;  %v4790_v10 = vadd.f32 %v6162_v62, %v8257_v26 }
 0x22f   : > { %v5668_v51 = vpack.c.bf16 %v4823_v1, %v4823_v1  ;;  %v4824_v5 = vmax.f32 %v4792_v46, 0.0  ;;  %v6131_v27 = vpop.f32.mrb[20].mxu0 }
 0x230   : > { %v5666_v16 = vpack.c.bf16 %v4821_v43, %v4821_v43  ;;  %v4822_v34 = vmax.f32 %v4790_v10, 0.0  ;;  %v5995_v49 = vpop.f32.mrb[20].mxu1  ;;  %v4687_v56 = vpop.f32.mrb[21].mxu0 }
 0x231   : > { %4984 = vst.msk [vmem:[%s8266_s20 + $0x48] sm:$0xf] %vm4965_vm7, %v5668_v51  ;;  %v5669_v2 = vpack.c.bf16 %v4824_v5, %v4824_v5  ;;  %v6163_v6 = vadd.f32 %v6131_v27, %v5995_v49  ;;  %v2646_v53 = vpop.f32.mrb[21].mxu1  ;;  %v6132_v24 = vpop.f32.mrb[22].mxu0 }
 0x232   : > { %4982 = vst.msk [vmem:[%s8266_s20 + $0x40] sm:$0xf] %vm4965_vm7, %v5666_v16  ;;  %v5667_v32 = vpack.c.bf16 %v4822_v34, %v4822_v34  ;;  %v6164_v55 = vadd.f32 %v4687_v56, %v2646_v53  ;;  %v5996_v29 = vpop.f32.mrb[22].mxu1  ;;  %v4690_v30 = vpop.f32.mrb[23].mxu0 }
 0x233   : > { %4985 = vst.msk [vmem:[%s8266_s20 + $0x4c] sm:$0xf] %vm4965_vm7, %v5669_v2  ;;  %v4795_v3 = vadd.f32 %v6163_v6, %v8257_v26  ;;  %v6165_v39 = vadd.f32 %v6132_v24, %v5996_v29  ;;  %v2649_v35 = vpop.f32.mrb[23].mxu1 }
 0x234   : > { %4983 = vst.msk [vmem:[%s8266_s20 + $0x44] sm:$0xf] %vm4965_vm7, %v5667_v32  ;;  %v4793_v23 = vadd.f32 %v6164_v55, %v8257_v26  ;;  %v6166_v13 = vadd.f32 %v4690_v30, %v2649_v35 }
 0x235   : > { %v4827_v45 = vmax.f32 %v4795_v3, 0.0  ;;  %v4796_v28 = vadd.f32 %v6165_v39, %v8257_v26 }
 0x236   : > { %v4825_v50 = vmax.f32 %v4793_v23, 0.0  ;;  %v4794_v57 = vadd.f32 %v6166_v13, %v8257_v26 }
 0x237   : > { %v5672_v4 = vpack.c.bf16 %v4827_v45, %v4827_v45  ;;  %v4828_v48 = vmax.f32 %v4796_v28, 0.0  ;;  %v6135_v47 = vpop.f32.mrb[24].mxu0 }
 0x238   : > { %v5670_v18 = vpack.c.bf16 %v4825_v50, %v4825_v50  ;;  %v4826_v42 = vmax.f32 %v4794_v57, 0.0  ;;  %v5999_v54 = vpop.f32.mrb[24].mxu1  ;;  %v4703_v58 = vpop.f32.mrb[25].mxu0 }
 0x239   : > { %4988 = vst.msk [vmem:[%s8266_s20 + $0x58] sm:$0xf] %vm4965_vm7, %v5672_v4  ;;  %v5673_v61 = vpack.c.bf16 %v4828_v48, %v4828_v48  ;;  %v6167_v41 = vadd.f32 %v6135_v47, %v5999_v54  ;;  %v2662_v7 = vpop.f32.mrb[25].mxu1  ;;  %v6136_v59 = vpop.f32.mrb[26].mxu0 }
 0x23a   : > { %4986 = vst.msk [vmem:[%s8266_s20 + $0x50] sm:$0xf] %vm4965_vm7, %v5670_v18  ;;  %v5671_v38 = vpack.c.bf16 %v4826_v42, %v4826_v42  ;;  %v6168_v17 = vadd.f32 %v4703_v58, %v2662_v7  ;;  %v6000_v52 = vpop.f32.mrb[26].mxu1  ;;  %v4706_v9 = vpop.f32.mrb[27].mxu0 }
 0x23b   : > { %4989 = vst.msk [vmem:[%s8266_s20 + $0x5c] sm:$0xf] %vm4965_vm7, %v5673_v61  ;;  %v4799_v21 = vadd.f32 %v6167_v41, %v8257_v26  ;;  %v6169_v31 = vadd.f32 %v6136_v59, %v6000_v52  ;;  %v2665_v8 = vpop.f32.mrb[27].mxu1 }
 0x23c   : > { %4987 = vst.msk [vmem:[%s8266_s20 + $0x54] sm:$0xf] %vm4965_vm7, %v5671_v38  ;;  %v4797_v22 = vadd.f32 %v6168_v17, %v8257_v26  ;;  %v6170_v44 = vadd.f32 %v4706_v9, %v2665_v8 }
 0x23d   : > { %v4831_v33 = vmax.f32 %v4799_v21, 0.0  ;;  %v4800_v40 = vadd.f32 %v6169_v31, %v8257_v26 }
 0x23e   : > { %v4829_v63 = vmax.f32 %v4797_v22, 0.0  ;;  %v4798_v0 = vadd.f32 %v6170_v44, %v8257_v26 }
 0x23f   : > { %v5676_v12 = vpack.c.bf16 %v4831_v33, %v4831_v33  ;;  %v4832_v15 = vmax.f32 %v4800_v40, 0.0  ;;  %v6139_v20 = vpop.f32.mrb[28].mxu0 }
 0x240   : > { %v5674_v25 = vpack.c.bf16 %v4829_v63, %v4829_v63  ;;  %v4830_v19 = vmax.f32 %v4798_v0, 0.0  ;;  %v6003_v36 = vpop.f32.mrb[28].mxu1  ;;  %v4719_v60 = vpop.f32.mrb[29].mxu0 }
 0x241   : > { %4992 = vst.msk [vmem:[%s8266_s20 + $0x68] sm:$0xf] %vm4965_vm7, %v5676_v12  ;;  %v5677_v11 = vpack.c.bf16 %v4832_v15, %v4832_v15  ;;  %v6171_v14 = vadd.f32 %v6139_v20, %v6003_v36  ;;  %v2678_v37 = vpop.f32.mrb[29].mxu1  ;;  %v6140_v62 = vpop.f32.mrb[30].mxu0 }
 0x242   : > { %4990 = vst.msk [vmem:[%s8266_s20 + $0x60] sm:$0xf] %vm4965_vm7, %v5674_v25  ;;  %v5675_v1 = vpack.c.bf16 %v4830_v19, %v4830_v19  ;;  %v6172_v46 = vadd.f32 %v4719_v60, %v2678_v37  ;;  %v6004_v43 = vpop.f32.mrb[30].mxu1  ;;  %v4722_v10 = vpop.f32.mrb[31].mxu0 }
 0x243   : > { %4993 = vst.msk [vmem:[%s8266_s20 + $0x6c] sm:$0xf] %vm4965_vm7, %v5677_v11  ;;  %v4803_v51 = vadd.f32 %v6171_v14, %v8257_v26  ;;  %v6173_v5 = vadd.f32 %v6140_v62, %v6004_v43  ;;  %v2681_v27 = vpop.f32.mrb[31].mxu1 }
 0x244   : > { %4991 = vst.msk [vmem:[%s8266_s20 + $0x64] sm:$0xf] %vm4965_vm7, %v5675_v1  ;;  %v4801_v16 = vadd.f32 %v6172_v46, %v8257_v26  ;;  %v6174_v34 = vadd.f32 %v4722_v10, %v2681_v27 }
 0x245   : > { %v4835_v49 = vmax.f32 %v4803_v51, 0.0  ;;  %v4804_v56 = vadd.f32 %v6173_v5, %v8257_v26 }
 0x246   : > { %v4833_v2 = vmax.f32 %v4801_v16, 0.0  ;;  %v4802_v6 = vadd.f32 %v6174_v34, %v8257_v26 }
 0x247   : > { %v5680_v53 = vpack.c.bf16 %v4835_v49, %v4835_v49  ;;  %v4836_v24 = vmax.f32 %v4804_v56, 0.0 }
 0x248   : > { %v5678_v32 = vpack.c.bf16 %v4833_v2, %v4833_v2  ;;  %v4834_v55 = vmax.f32 %v4802_v6, 0.0 }
 0x249   : > { %4996 = vst.msk [vmem:[%s8266_s20 + $0x78] sm:$0xf] %vm4965_vm7, %v5680_v53  ;;  %v5681_v29 = vpack.c.bf16 %v4836_v24, %v4836_v24 }
 0x24a   : > { %4994 = vst.msk [vmem:[%s8266_s20 + $0x70] sm:$0xf] %vm4965_vm7, %v5678_v32  ;;  %v5679_v30 = vpack.c.bf16 %v4834_v55, %v4834_v55 }
 0x24b   : > { %4997 = vst.msk [vmem:[%s8266_s20 + $0x7c] sm:$0xf] %vm4965_vm7, %v5681_v29 }
 0x24c   : > { %4995 = vst.msk [vmem:[%s8266_s20 + $0x74] sm:$0xf] %vm4965_vm7, %v5679_v30 }
 0x24d PF: > { %s13_s12 = sadd.s32 1, %s6530_s12  }
 0x24e   : > { %p10_p4 = scmp.ge.s32.totalorder %s13_s12, 4  }
 0x250   :  { %12 = sbr.rel (!%p10_p4) target bundleno = 1 (0x1), region = 72 }

// kernel: inception_forward.5
= control target key start
LH: loop header
LB: loop body
LE: loop exit
PB: predicated region body
PF: predicated region fallthrough
CT: control target
= control target key end

     0   :  { %s6689_s12 = smov 0   ;;  %s8548_s0 = inlined_call_operand.vmem [shape: bf16[2,18,18,32], index: 0, kind: input, shape index: {}]   ;;  %s8549_s1 = inlined_call_operand.vmem [shape: bf16[9,32,64], index: 1, kind: input, shape index: {}]   ;;  %s8550_s2 = inlined_call_operand.vmem [shape: f32[1,64], index: 2, kind: input, shape index: {}]   ;;  %s8551_s3 = inlined_call_operand.vmem [shape: bf16[2,256,64], index: 3, kind: output, shape index: {}]  }
   0x1 LB: > { %s5125_s13 = sadd.s32 4294967295, %s6667_s12   ;;  %p5129_p0 = scmp.ge.s32.totalorder %s6667_s12, 1  ;;  %s6667_s12 = sphi %s6689_s12, %s13_s12  }
   0x2   : > { %p137_p1 = scmp.lt.s32.totalorder %s6667_s12, 3 }
   0x4   : > { %p138_p2 = pnand %p5129_p0, %p137_p1 }
   0x6   : > { %141 = sbr.rel (%p138_p2) target bundleno = 589 (0x24d), region = 32 }
   0xd   : > { %v6534_v0 = vld [vmem:[%s8549_s1 + $0x10] sm:$0xff]   ;;  %p161_p3 = scmp.lt.s32.totalorder %s5125_s13, 1  ;;  %v6535_v1 = vld [vmem:[%s8549_s1 + $0x40] sm:$0xff]   ;;  %v6536_v2 = vld [vmem:[%s8549_s1 + $0x18] sm:$0xff]   ;;  %vm224_vm0 = vsmask.f32 3328 }
   0xe   : > { %5941 = vmatprep.subr.bf16.mxu1 %v6534_v0  ;;  %6085 = vmatprep.subr.bf16.mxu0 %v6535_v1  ;;  %v6537_v3 = vld [vmem:[%s8549_s1 + $0x48] sm:$0xff]   ;;  %v6715_v4 = vld [vmem:[%s8549_s1] sm:$0xff]   ;;  %vm225_vm1 = vsmask.f32 7440  ;;  %v6725_v5 = vld [vmem:[%s8549_s1 + $0x50] sm:$0xff]   ;;  %vm676_vm3 = vcmask 261120  }
   0xf   : > { %s8620_s13 = smov (!%p161_p3, %s5125_s13), 1  ;;  %5942 = vmatpush3.bf16.msra.mxu1 %v6534_v0  ;;  %6086 = vmatpush3.bf16.msra.mxu0 %v6535_v1  ;;  %vm6745_vm2 = vmor %vm224_vm0, %vm225_vm1  ;;  %vm1235_vm4 = vcmask 1042432   ;;  %vm1236_vm5 = vcmask 1046532   ;;  %vm5037_vm7 = vcmask 519168  }
  0x10   : > { %5943 = vmatprep.subr.bf16.mxu1 %v6536_v2  ;;  %s6525_s22 = smul.u32 216, %s8620_s13  ;;  %6087 = vmatprep.subr.bf16.mxu0 %v6537_v3  ;;  %vm6973_vm6 = vmor %vm1235_vm4, %vm1236_vm5  ;;  %s5746_s10 = sshll.u32 %s8620_s13, 7 }
  0x11   : > { %s8444_s15 = scalar_lea.vmem %s8551_s3, %s5746_s10 }
  0x12   : > { %s6720_s27 = scalar_lea.vmem %s8548_s0, %s6525_s22 }
  0x13   : > { %5944 = vmatpush3.bf16.msra.mxu1 %v6536_v2  ;;  %v172_v6 = vld [vmem:[%s6720_s27] sm:$0xf]  ;;  %v173_v7 = vld [vmem:[%s6720_s27 + $0x4] sm:$0xf]  ;;  %v208_v8 = vld [vmem:[%s6720_s27 + $0x8] sm:$0x1]  ;;  %6088 = vmatpush3.bf16.msra.mxu0 %v6537_v3 }
  0x14   : > { %v228_v9 = vshrl.u32 %v172_v6, 16  ;;  %v231_v10 = vshll.u32 %v172_v6, 16  ;;  %v237_v11 = vshll.u32 %v173_v7, 16  ;;  %v241_v12 = vshrl.u32 %v173_v7, 16  ;;  %5977 = vmatprep.subr.bf16.mxu1 %v6715_v4  ;;  %v5329_v13 = vld [vmem:[%s6720_s27 + $0xc] sm:$0xf]  ;;  %6121 = vmatprep.subr.bf16.mxu0 %v6725_v5 }
  0x15   : > { %v247_v14 = vshll.u32 %v208_v8, 16  ;;  %v6733_v15 = vld [vmem:[%s6720_s27 + $0x10] sm:$0xf]  ;;  %v6736_v16 = vld [vmem:[%s6720_s27 + $0x14] sm:$0x1]  ;;  %v2076_v22 = vshrl.u32 %v5329_v13, 16 }
  0x16   : > { %v230_v17 = vrot.slane %v228_v9, 4  ;;  %v233_v18 = vrot.slane %v231_v10, 5  ;;  %v239_v19 = vrot.slane %v237_v11, 5  ;;  %v243_v20 = vrot.slane %v241_v12, 4  ;;  %v174_v29 = vld [vmem:[%s6720_s27 + $0xc] sm:$0xf] }
  0x17   : > { %v249_v21 = vrot.slane %v247_v14, 5  ;;  %v2079_v23 = vshll.u32 %v5329_v13, 16  ;;  %v2085_v24 = vshll.u32 %v6733_v15, 16  ;;  %v2089_v27 = vshrl.u32 %v6733_v15, 16  ;;  %v175_v34 = vld [vmem:[%s6720_s27 + $0x10] sm:$0xf] }
  0x18   : > { %v234_v25 = vor.u32 %v233_v18, %v230_v17  ;;  %v244_v26 = vor.u32 %v243_v20, %v239_v19  ;;  %v2095_v28 = vshll.u32 %v6736_v16, 16  ;;  %v2078_v31 = vrot.slane %v2076_v22, 4  ;;  %v209_v40 = vld [vmem:[%s6720_s27 + $0x14] sm:$0x1]  ;;  %v5332_v51 = vld [vmem:[%s6720_s27 + $0x18] sm:$0xf] }
  0x19   : > { %v2081_v32 = vrot.slane %v2079_v23, 5  ;;  %v2087_v33 = vrot.slane %v2085_v24, 5  ;;  %v2091_v37 = vrot.slane %v2089_v27, 4  ;;  %v252_v41 = vshrl.u32 %v174_v29, 16  ;;  %v6757_v56 = vld [vmem:[%s6720_s27 + $0x1c] sm:$0xf] }
  0x1a   : > { %v235_v35 = vrot.slane %v234_v25, 4  ;;  %v245_v36 = vrot.slane %v244_v26, 4  ;;  %v2097_v39 = vrot.slane %v2095_v28, 5  ;;  %v255_v42 = vshll.u32 %v174_v29, 16  ;;  %v6765_v61 = vld [vmem:[%s6720_s27 + $0x20] sm:$0x1] }
  0x1b   : > { %v2082_v38 = vor.u32 %v2081_v32, %v2078_v31  ;;  %v2092_v45 = vor.u32 %v2091_v37, %v2087_v33  ;;  %v261_v46 = vshll.u32 %v175_v34, 16  ;;  %v254_v49 = vrot.slane %v252_v41, 4  ;;  %v176_v12 = vld [vmem:[%s6720_s27 + $0x18] sm:$0xf]  ;;  %v210_v26 = vld [vmem:[%s6720_s27 + $0x20] sm:$0x1] }
  0x1c   : > { %v240_v43 = vsel %vm6745_vm2, %v235_v35, %v239_v19  ;;  %v250_v44 = vsel %vm6745_vm2, %v245_v36, %v249_v21  ;;  %v257_v50 = vrot.slane %v255_v42, 5  ;;  %v265_v54 = vshrl.u32 %v175_v34, 16  ;;  %v177_v19 = vld [vmem:[%s6720_s27 + $0x1c] sm:$0xf]  ;;  %v5335_v34 = vld [vmem:[%s6720_s27 + $0x24] sm:$0xf] }
  0x1d   : > { %v5137_v47 = vcombine.low %v240_v43, %v250_v44  ;;  %v2083_v48 = vrot.slane %v2082_v38, 4  ;;  %v2093_v52 = vrot.slane %v2092_v45, 4  ;;  %v263_v53 = vrot.slane %v261_v46, 5 }
  0x1e   : > { %v271_v55 = vshll.u32 %v209_v40, 16  ;;  %v2831_v58 = vrot.slane %v6733_v15, 5  ;;  %v2834_v59 = vrot.slane %v6736_v16, 5  ;;  %v258_v60 = vor.u32 %v257_v50, %v254_v49  ;;  %v6541_v40 = vld [vmem:[%s8549_s1 + $0x8] sm:$0xff]   ;;  %v6540_v50 = vld [vmem:[%s8549_s1 + $0x58] sm:$0xff]  }
  0x1f   : > { %5945 = vmatprep.mubr.msk.bf16.mxu1 %vm676_vm3, %v5137_v47  ;;  %v2088_v57 = vsel %vm6745_vm2, %v2083_v48, %v2087_v33  ;;  %v2098_v62 = vsel %vm6745_vm2, %v2093_v52, %v2097_v39  ;;  %v267_v63 = vrot.slane %v265_v54, 4  ;;  %v2100_v1 = vshrl.u32 %v5332_v51, 16  ;;  %v6788_v39 = vld [vmem:[%s6720_s27 + $0x28] sm:$0xf]  ;;  %v6797_v47 = vld [vmem:[%s6720_s27 + $0x2c] sm:$0x1] }
  0x20   : > { %v273_v0 = vrot.slane %v271_v55, 5  ;;  %v5381_v2 = vcombine.low %v2088_v57, %v2098_v62  ;;  %v259_v3 = vrot.slane %v258_v60, 4  ;;  %v2103_v6 = vshll.u32 %v5332_v51, 16  ;;  %v178_v55 = vld [vmem:[%s6720_s27 + $0x24] sm:$0xf] }
  0x21   : > { %v2109_v7 = vshll.u32 %v6757_v56, 16  ;;  %v268_v8 = vor.u32 %v267_v63, %v263_v53  ;;  %v2102_v9 = vrot.slane %v2100_v1, 4  ;;  %v2113_v10 = vshrl.u32 %v6757_v56, 16  ;;  %v6544_v1 = vld [vmem:[%s8549_s1 + $0x20] sm:$0xff]  }
  0x22   : > { %v2119_v11 = vshll.u32 %v6765_v61, 16  ;;  %6089 = vmatprep.mubr.msk.bf16.mxu0 %vm676_vm3, %v5381_v2  ;;  %v264_v13 = vsel %vm6745_vm2, %v259_v3, %v263_v53  ;;  %v2105_v14 = vrot.slane %v2103_v6, 5  ;;  %v2838_v18 = vrot.slane %v6757_v56, 5 }
  0x23   : > { %v2111_v17 = vrot.slane %v2109_v7, 5  ;;  %v269_v20 = vrot.slane %v268_v8, 4  ;;  %v2115_v21 = vrot.slane %v2113_v10, 4  ;;  %v2841_v23 = vrot.slane %v6765_v61, 5 }
  0x24   : > { %v2121_v22 = vrot.slane %v2119_v11, 5  ;;  %v2106_v24 = vor.u32 %v2105_v14, %v2102_v9  ;;  %v6781_v25 = vrot.slane %v2838_v18, 4  ;;  %v276_v27 = vshrl.u32 %v176_v12, 16  ;;  %v211_v9 = vld [vmem:[%s6720_s27 + $0x2c] sm:$0x1] }
  0x25   : > { %v279_v28 = vshll.u32 %v176_v12, 16  ;;  %v274_v29 = vsel %vm6745_vm2, %v269_v20, %v273_v0  ;;  %v2116_v31 = vor.u32 %v2115_v21, %v2111_v17  ;;  %v285_v32 = vshll.u32 %v177_v19, 16  ;;  %v179_v0 = vld [vmem:[%s6720_s27 + $0x28] sm:$0xf] }
  0x26   : > { %v289_v33 = vshrl.u32 %v177_v19, 16  ;;  %v5138_v35 = vcombine.low %v264_v13, %v274_v29  ;;  %v2107_v36 = vrot.slane %v2106_v24, 4  ;;  %v278_v37 = vrot.slane %v276_v27, 4  ;;  %v5338_v19 = vld [vmem:[%s6720_s27 + $0x30] sm:$0xf] }
  0x27   : > { %v281_v38 = vrot.slane %v279_v28, 5  ;;  %v2117_v41 = vrot.slane %v2116_v31, 4  ;;  %v287_v42 = vrot.slane %v285_v32, 5  ;;  %v295_v44 = vshll.u32 %v210_v26, 16  ;;  %v6822_v26 = vld [vmem:[%s6720_s27 + $0x34] sm:$0xf] }
  0x28   : > { %v291_v43 = vrot.slane %v289_v33, 4  ;;  %5946 = vmatmul.mubr.msk.bf16.vlgmr.msra.gmra.mrb[0].mxu1 %vm676_vm3, %v5138_v35  ;;  %v2112_v45 = vsel %vm6745_vm2, %v2107_v36, %v2111_v17  ;;  %v2124_v48 = vshrl.u32 %v5335_v34, 16  ;;  %v2127_v49 = vshll.u32 %v5335_v34, 16  ;;  %v6833_v34 = vld [vmem:[%s6720_s27 + $0x38] sm:$0x1] }
  0x29   : > { %v282_v46 = vor.u32 %v281_v38, %v278_v37  ;;  %5978 = vmatpush3.bf16.msra.mxu1 %v6715_v4  ;;  %v2122_v51 = vsel %vm6745_vm2, %v2117_v41, %v2121_v22  ;;  %v297_v53 = vrot.slane %v295_v44, 5  ;;  %v2133_v54 = vshll.u32 %v6788_v39, 16 }
  0x2a   : > { %v292_v52 = vor.u32 %v291_v43, %v287_v42  ;;  %v5382_v57 = vcombine.low %v2112_v45, %v2122_v51  ;;  %v2126_v62 = vrot.slane %v2124_v48, 4  ;;  %v2129_v63 = vrot.slane %v2127_v49, 5  ;;  %5979 = vmatprep.subr.bf16.mxu1 %v6541_v40 }
  0x2b   : > { %v283_v60 = vrot.slane %v282_v46, 4  ;;  %v2135_v2 = vrot.slane %v2133_v54, 5  ;;  %v2137_v3 = vshrl.u32 %v6788_v39, 16  ;;  %v2143_v6 = vshll.u32 %v6797_v47, 16  ;;  %v180_v46 = vld [vmem:[%s6720_s27 + $0x30] sm:$0xf] }
  0x2c   : > { %v293_v4 = vrot.slane %v292_v52, 4  ;;  %6090 = vmatmul.mubr.msk.bf16.vlgmr.msra.gmra.mrb[0].mxu0 %vm676_vm3, %v5382_v57  ;;  %v2130_v8 = vor.u32 %v2129_v63, %v2126_v62  ;;  %v300_v10 = vshrl.u32 %v178_v55, 16  ;;  %v303_v11 = vshll.u32 %v178_v55, 16 }
  0x2d   : > { %v288_v7 = vsel %vm6745_vm2, %v283_v60, %v287_v42  ;;  %6122 = vmatpush3.bf16.msra.mxu0 %v6725_v5  ;;  %v2139_v13 = vrot.slane %v2137_v3, 4  ;;  %v2145_v14 = vrot.slane %v2143_v6, 5  ;;  %v309_v17 = vshll.u32 %v179_v0, 16  ;;  %5980 = vmatpush3.bf16.msra.mxu1 %v6541_v40  ;;  %v6827_v5 = vld [vmem:[%s8549_s1 + $0x60] sm:$0xff]   ;;  %v212_v60 = vld [vmem:[%s6720_s27 + $0x38] sm:$0x1] }
  0x2e   : > { %v298_v12 = vsel %vm6745_vm2, %v293_v4, %v297_v53  ;;  %v2131_v21 = vrot.slane %v2130_v8, 4  ;;  %v302_v22 = vrot.slane %v300_v10, 4  ;;  %v305_v24 = vrot.slane %v303_v11, 5  ;;  %6123 = vmatprep.subr.bf16.mxu0 %v6540_v50  ;;  %6013 = vmatprep.subr.bf16.mxu1 %v6544_v1  ;;  %v181_v53 = vld [vmem:[%s6720_s27 + $0x34] sm:$0xf] }
  0x2f   : > { %v5139_v20 = vcombine.low %v288_v7, %v298_v12  ;;  %v2140_v27 = vor.u32 %v2139_v13, %v2135_v2  ;;  %v311_v28 = vrot.slane %v309_v17, 5  ;;  %v313_v29 = vshrl.u32 %v179_v0, 16  ;;  %v5341_v7 = vld [vmem:[%s6720_s27 + $0x3c] sm:$0xf]  ;;  %v6851_v12 = vld [vmem:[%s6720_s27 + $0x40] sm:$0xf] }
  0x30   : > { %v319_v31 = vshll.u32 %v211_v9, 16  ;;  %v2136_v32 = vsel %vm6745_vm2, %v2131_v21, %v2135_v2  ;;  %v306_v33 = vor.u32 %v305_v24, %v302_v22  ;;  %v2148_v35 = vshrl.u32 %v5338_v19, 16  ;;  %v182_v21 = vld [vmem:[%s6720_s27 + $0x3c] sm:$0xf] }
  0x31   : > { %5949 = vmatprep.mubr.msk.bf16.mxu1 %vm676_vm3, %v5139_v20  ;;  %v2151_v36 = vshll.u32 %v5338_v19, 16  ;;  %v2141_v37 = vrot.slane %v2140_v27, 4  ;;  %v315_v38 = vrot.slane %v313_v29, 4  ;;  %v2157_v41 = vshll.u32 %v6822_v26, 16  ;;  %6124 = vmatpush3.bf16.msra.mxu0 %v6540_v50  ;;  %v6856_v20 = vld [vmem:[%s6720_s27 + $0x44] sm:$0x1] }
  0x32   : > { %v321_v40 = vrot.slane %v319_v31, 5  ;;  %v307_v42 = vrot.slane %v306_v33, 4  ;;  %v2150_v43 = vrot.slane %v2148_v35, 4  ;;  %v2161_v45 = vshrl.u32 %v6822_v26, 16  ;;  %6157 = vmatprep.subr.bf16.mxu0 %v6827_v5 }
  0x33   : > { %v2153_v44 = vrot.slane %v2151_v36, 5  ;;  %v2146_v48 = vsel %vm6745_vm2, %v2141_v37, %v2145_v14  ;;  %v316_v49 = vor.u32 %v315_v38, %v311_v28  ;;  %v2159_v51 = vrot.slane %v2157_v41, 5 }
  0x34   : > { %v2167_v52 = vshll.u32 %v6833_v34, 16  ;;  %v5383_v54 = vcombine.low %v2136_v32, %v2146_v48  ;;  %v312_v50 = vsel %vm6745_vm2, %v307_v42, %v311_v28  ;;  %v2163_v57 = vrot.slane %v2161_v45, 4 }
  0x35   : > { %v2154_v55 = vor.u32 %v2153_v44, %v2150_v43  ;;  %v317_v62 = vrot.slane %v316_v49, 4  ;;  %v324_v0 = vshrl.u32 %v180_v46, 16  ;;  %v327_v1 = vshll.u32 %v180_v46, 16 }
  0x36   : > { %v2169_v63 = vrot.slane %v2167_v52, 5  ;;  %6093 = vmatprep.mubr.msk.bf16.mxu0 %vm676_vm3, %v5383_v54  ;;  %v2164_v2 = vor.u32 %v2163_v57, %v2159_v51  ;;  %v333_v3 = vshll.u32 %v181_v53, 16  ;;  %v337_v6 = vshrl.u32 %v181_v53, 16  ;;  %v213_v54 = vld [vmem:[%s6720_s27 + $0x44] sm:$0x1] }
  0x37   : > { %v2155_v4 = vrot.slane %v2154_v55, 4  ;;  %v322_v8 = vsel %vm6745_vm2, %v317_v62, %v321_v40  ;;  %v326_v9 = vrot.slane %v324_v0, 4  ;;  %v329_v10 = vrot.slane %v327_v1, 5  ;;  %v183_v40 = vld [vmem:[%s6720_s27 + $0x40] sm:$0xf] }
  0x38   : > { %v343_v11 = vshll.u32 %v212_v60, 16  ;;  %v5140_v13 = vcombine.low %v312_v50, %v322_v8  ;;  %v2165_v17 = vrot.slane %v2164_v2, 4  ;;  %v335_v19 = vrot.slane %v333_v3, 5  ;;  %v5344_v55 = vld [vmem:[%s6720_s27 + $0x48] sm:$0xf] }
  0x39   : > { %v2160_v14 = vsel %vm6745_vm2, %v2155_v4, %v2159_v51  ;;  %v330_v22 = vor.u32 %v329_v10, %v326_v9  ;;  %v339_v24 = vrot.slane %v337_v6, 4  ;;  %v2172_v28 = vshrl.u32 %v5341_v7, 16  ;;  %v6874_v0 = vld [vmem:[%s6720_s27 + $0x4c] sm:$0xf] }
  0x3a   : > { %v345_v27 = vrot.slane %v343_v11, 5  ;;  %5950 = vmatmul.mubr.msk.bf16.gmra.mrb[4].mxu1 %vm676_vm3, %v5140_v13  ;;  %v2170_v29 = vsel %vm6745_vm2, %v2165_v17, %v2169_v63  ;;  %v2175_v31 = vshll.u32 %v5341_v7, 16  ;;  %v2181_v32 = vshll.u32 %v6851_v12, 16  ;;  %v6882_v13 = vld [vmem:[%s6720_s27 + $0x50] sm:$0x1] }
  0x3b   : > { %v2185_v33 = vshrl.u32 %v6851_v12, 16  ;;  %v5384_v35 = vcombine.low %v2160_v14, %v2170_v29  ;;  %v331_v36 = vrot.slane %v330_v22, 4  ;;  %v340_v37 = vor.u32 %v339_v24, %v335_v19 }
  0x3c   : > { %v2174_v38 = vrot.slane %v2172_v28, 4  ;;  %v2177_v41 = vrot.slane %v2175_v31, 5  ;;  %v2183_v42 = vrot.slane %v2181_v32, 5  ;;  %v2191_v44 = vshll.u32 %v6856_v20, 16  ;;  %v6889_v28 = vld [vmem:[%s6720_s27 + $0x4c] sm:$0xf] }
  0x3d   : > { %v2187_v43 = vrot.slane %v2185_v33, 4  ;;  %6094 = vmatmul.mubr.msk.bf16.gmra.mrb[4].mxu0 %vm676_vm3, %v5384_v35  ;;  %v336_v45 = vsel %vm6745_vm2, %v331_v36, %v335_v19  ;;  %v341_v46 = vrot.slane %v340_v37, 4  ;;  %v348_v48 = vshrl.u32 %v182_v21, 16  ;;  %v6886_v19 = vld [vmem:[%s6720_s27 + $0x48] sm:$0xf] }
  0x3e   : > { %v351_v49 = vshll.u32 %v182_v21, 16  ;;  %v2178_v51 = vor.u32 %v2177_v41, %v2174_v38  ;;  %v2193_v53 = vrot.slane %v2191_v44, 5  ;;  %v357_v50 = vshll.u32 %v183_v40, 16  ;;  %v214_v38 = vld [vmem:[%s6720_s27 + $0x50] sm:$0x1] }
  0x3f   : > { %v2188_v52 = vor.u32 %v2187_v43, %v2183_v42  ;;  %v346_v57 = vsel %vm6745_vm2, %v341_v46, %v345_v27  ;;  %v350_v60 = vrot.slane %v348_v48, 4  ;;  %v361_v63 = vshrl.u32 %v183_v40, 16 }
  0x40   : > { %v353_v62 = vrot.slane %v351_v49, 5  ;;  %v5141_v1 = vcombine.low %v336_v45, %v346_v57  ;;  %v2179_v4 = vrot.slane %v2178_v51, 4  ;;  %v359_v3 = vrot.slane %v357_v50, 5  ;;  %v5347_v45 = vld [vmem:[%s6720_s27 + $0x54] sm:$0xf] }
  0x41   : > { %v2189_v2 = vrot.slane %v2188_v52, 4  ;;  %v363_v7 = vrot.slane %v361_v63, 4  ;;  %v367_v8 = vshll.u32 %v213_v54, 16  ;;  %v2196_v9 = vshrl.u32 %v5344_v55, 16 }
  0x42   : > { %v354_v6 = vor.u32 %v353_v62, %v350_v60  ;;  %5953 = vmatprep.mubr.msk.bf16.mxu1 %vm676_vm3, %v5141_v1  ;;  %v2184_v10 = vsel %vm6745_vm2, %v2179_v4, %v2183_v42  ;;  %v2199_v14 = vshll.u32 %v5344_v55, 16  ;;  %v2205_v17 = vshll.u32 %v6874_v0, 16  ;;  %v6905_v55 = vld [vmem:[%s6720_s27 + $0x58] sm:$0xf] }
  0x43   : > { %v2194_v11 = vsel %vm6745_vm2, %v2189_v2, %v2193_v53  ;;  %v364_v24 = vor.u32 %v363_v7, %v359_v3  ;;  %v369_v27 = vrot.slane %v367_v8, 5  ;;  %v2198_v29 = vrot.slane %v2196_v9, 4 }
  0x44   : > { %v5385_v21 = vcombine.low %v2184_v10, %v2194_v11  ;;  %v355_v22 = vrot.slane %v354_v6, 4  ;;  %v2201_v31 = vrot.slane %v2199_v14, 5  ;;  %v2207_v32 = vrot.slane %v2205_v17, 5  ;;  %v6915_v11 = vld [vmem:[%s6720_s27 + $0x54] sm:$0xf] }
  0x45   : > { %v2209_v33 = vshrl.u32 %v6874_v0, 16  ;;  %v365_v36 = vrot.slane %v364_v24, 4  ;;  %v2215_v37 = vshll.u32 %v6882_v13, 16  ;;  %v372_v40 = vshrl.u32 %v6886_v19, 16  ;;  %v6921_v24 = vld [vmem:[%s6720_s27 + $0x58] sm:$0xf] }
  0x46   : > { %6097 = vmatprep.mubr.msk.bf16.mxu0 %vm676_vm3, %v5385_v21  ;;  %v360_v35 = vsel %vm6745_vm2, %v355_v22, %v359_v3  ;;  %v2202_v41 = vor.u32 %v2201_v31, %v2198_v29  ;;  %v375_v43 = vshll.u32 %v6886_v19, 16  ;;  %v381_v44 = vshll.u32 %v6889_v28, 16  ;;  %v6911_v3 = vld [vmem:[%s6720_s27 + $0x5c] sm:$0x1] }
  0x47   : > { %v2211_v42 = vrot.slane %v2209_v33, 4  ;;  %v370_v46 = vsel %vm6745_vm2, %v365_v36, %v369_v27  ;;  %v2217_v48 = vrot.slane %v2215_v37, 5  ;;  %v374_v49 = vrot.slane %v372_v40, 4  ;;  %v215_v37 = vld [vmem:[%s6720_s27 + $0x5c] sm:$0x1] }
  0x48   : > { %v385_v51 = vshrl.u32 %v6889_v28, 16  ;;  %v5142_v52 = vcombine.low %v360_v35, %v370_v46  ;;  %v2203_v53 = vrot.slane %v2202_v41, 4  ;;  %v377_v50 = vrot.slane %v375_v43, 5 }
  0x49   : > { %v2212_v54 = vor.u32 %v2211_v42, %v2207_v32  ;;  %v383_v57 = vrot.slane %v381_v44, 5  ;;  %v391_v62 = vshll.u32 %v214_v38, 16  ;;  %v2220_v63 = vshrl.u32 %v5347_v45, 16  ;;  %v5350_v44 = vld [vmem:[%s6720_s27 + $0x60] sm:$0xf] }
  0x4a   : > { %v387_v60 = vrot.slane %v385_v51, 4  ;;  %5954 = vmatmul.mubr.msk.bf16.gmra.mrb[8].mxu1 %vm676_vm3, %v5142_v52  ;;  %v2208_v1 = vsel %vm6745_vm2, %v2203_v53, %v2207_v32  ;;  %v378_v2 = vor.u32 %v377_v50, %v374_v49  ;;  %v2223_v6 = vshll.u32 %v5347_v45, 16  ;;  %v6935_v51 = vld [vmem:[%s6720_s27 + $0x64] sm:$0xf] }
  0x4b   : > { %v2213_v4 = vrot.slane %v2212_v54, 4  ;;  %v393_v8 = vrot.slane %v391_v62, 5  ;;  %v2222_v9 = vrot.slane %v2220_v63, 4  ;;  %v2229_v10 = vshll.u32 %v6905_v55, 16 }
  0x4c   : > { %v388_v7 = vor.u32 %v387_v60, %v383_v57  ;;  %v379_v17 = vrot.slane %v378_v2, 4  ;;  %v2225_v21 = vrot.slane %v2223_v6, 5  ;;  %v2233_v22 = vshrl.u32 %v6905_v55, 16  ;;  %v6942_v60 = vld [vmem:[%s6720_s27 + $0x60] sm:$0xf] }
  0x4d   : > { %v2218_v14 = vsel %vm6745_vm2, %v2213_v4, %v2217_v48  ;;  %v2231_v31 = vrot.slane %v2229_v10, 5  ;;  %v2239_v32 = vshll.u32 %v6911_v3, 16  ;;  %v396_v38 = vshrl.u32 %v6915_v11, 16 }
  0x4e   : > { %v5386_v27 = vcombine.low %v2208_v1, %v2218_v14  ;;  %v389_v29 = vrot.slane %v388_v7, 4  ;;  %v384_v33 = vsel %vm6745_vm2, %v379_v17, %v383_v57  ;;  %v2226_v35 = vor.u32 %v2225_v21, %v2222_v9  ;;  %v6939_v57 = vld [vmem:[%s6720_s27 + $0x68] sm:$0x1]  ;;  %v6952_v21 = vld [vmem:[%s6720_s27 + $0x64] sm:$0xf] }
  0x4f   : > { %v2235_v36 = vrot.slane %v2233_v22, 4  ;;  %v2241_v41 = vrot.slane %v2239_v32, 5  ;;  %v399_v42 = vshll.u32 %v6915_v11, 16  ;;  %v405_v43 = vshll.u32 %v6921_v24, 16  ;;  %v216_v32 = vld [vmem:[%s6720_s27 + $0x68] sm:$0x1] }
  0x50   : > { %6098 = vmatmul.mubr.msk.bf16.gmra.mrb[8].mxu0 %vm676_vm3, %v5386_v27  ;;  %v394_v40 = vsel %vm6745_vm2, %v389_v29, %v393_v8  ;;  %v2227_v46 = vrot.slane %v2226_v35, 4  ;;  %v398_v49 = vrot.slane %v396_v38, 4  ;;  %v409_v54 = vshrl.u32 %v6921_v24, 16 }
  0x51   : > { %v5143_v45 = vcombine.low %v384_v33, %v394_v40  ;;  %v2236_v48 = vor.u32 %v2235_v36, %v2231_v31  ;;  %v401_v52 = vrot.slane %v399_v42, 5  ;;  %v407_v53 = vrot.slane %v405_v43, 5 }
  0x52   : > { %v415_v50 = vshll.u32 %v215_v37, 16  ;;  %v2232_v62 = vsel %vm6745_vm2, %v2227_v46, %v2231_v31  ;;  %v2244_v1 = vshrl.u32 %v5350_v44, 16  ;;  %v2247_v4 = vshll.u32 %v5350_v44, 16 }
  0x53   : > { %5957 = vmatprep.mubr.msk.bf16.mxu1 %vm676_vm3, %v5143_v45  ;;  %v2237_v63 = vrot.slane %v2236_v48, 4  ;;  %v402_v2 = vor.u32 %v401_v52, %v398_v49  ;;  %v411_v6 = vrot.slane %v409_v54, 4  ;;  %v2253_v8 = vshll.u32 %v6935_v51, 16  ;;  %v5415_v48 = vld [vmem:[%s6720_s27 + $0xc] sm:$0xe] }
  0x54   : > { %v417_v7 = vrot.slane %v415_v50, 5  ;;  %v2246_v10 = vrot.slane %v2244_v1, 4  ;;  %v2249_v14 = vrot.slane %v2247_v4, 5  ;;  %v2257_v17 = vshrl.u32 %v6935_v51, 16 }
  0x55   : > { %v2242_v9 = vsel %vm6745_vm2, %v2237_v63, %v2241_v41  ;;  %v403_v27 = vrot.slane %v402_v2, 4  ;;  %v412_v29 = vor.u32 %v411_v6, %v407_v53  ;;  %v2255_v31 = vrot.slane %v2253_v8, 5 }
  0x56   : > { %v5387_v22 = vcombine.low %v2232_v62, %v2242_v9  ;;  %v2250_v33 = vor.u32 %v2249_v14, %v2246_v10  ;;  %v2259_v35 = vrot.slane %v2257_v17, 4  ;;  %v2263_v36 = vshll.u32 %v6939_v57, 16  ;;  %v6967_v62 = vld [vmem:[%s6720_s27 + $0x6c] sm:$0xf]  ;;  %v6980_v10 = vld [vmem:[%s6720_s27 + $0x70] sm:$0xf] }
  0x57   : > { %v420_v37 = vshrl.u32 %v6942_v60, 16  ;;  %v408_v38 = vsel %vm6745_vm2, %v403_v27, %v407_v53  ;;  %v413_v40 = vrot.slane %v412_v29, 4  ;;  %v423_v41 = vshll.u32 %v6942_v60, 16 }
  0x58   : > { %6101 = vmatprep.mubr.msk.bf16.mxu0 %vm676_vm3, %v5387_v22  ;;  %v429_v42 = vshll.u32 %v6952_v21, 16  ;;  %v2251_v43 = vrot.slane %v2250_v33, 4  ;;  %v2260_v44 = vor.u32 %v2259_v35, %v2255_v31  ;;  %v2265_v45 = vrot.slane %v2263_v36, 5  ;;  %v217_v35 = vld [vmem:[%s6720_s27 + $0x74] sm:$0x1] }
  0x59   : > { %v422_v46 = vrot.slane %v420_v37, 4  ;;  %v418_v49 = vsel %vm6745_vm2, %v413_v40, %v417_v7  ;;  %v425_v52 = vrot.slane %v423_v41, 5  ;;  %v433_v50 = vshrl.u32 %v6952_v21, 16  ;;  %v5416_v36 = vld [vmem:[%s6720_s27 + $0x18] sm:$0xe] }
  0x5a   : > { %v431_v54 = vrot.slane %v429_v42, 5  ;;  %v5144_v53 = vcombine.low %v408_v38, %v418_v49  ;;  %v2256_v63 = vsel %vm6745_vm2, %v2251_v43, %v2255_v31  ;;  %v2261_v1 = vrot.slane %v2260_v44, 4  ;;  %v6999_v42 = vld [vmem:[%s6720_s27 + $0x78] sm:$0xf] }
  0x5b   : > { %v439_v4 = vshll.u32 %v216_v32, 16  ;;  %v426_v6 = vor.u32 %v425_v52, %v422_v46  ;;  %v435_v7 = vrot.slane %v433_v50, 4  ;;  %v5431_v8 = vrot.slane %v5415_v48, 9  ;;  %v218_v50 = vld [vmem:[%s6720_s27 + $0x80] sm:$0x1] }
  0x5c   : > { %v2833_v9 = vrot.slane %v2831_v58, 4  ;;  %5958 = vmatmul.mubr.msk.bf16.gmra.mrb[12].mxu1 %vm676_vm3, %v5144_v53  ;;  %v2266_v14 = vsel %vm6745_vm2, %v2261_v1, %v2265_v45  ;;  %v444_v22 = vshrl.u32 %v6967_v62, 16  ;;  %v447_v27 = vshll.u32 %v6967_v62, 16 }
  0x5d   : > { %v441_v17 = vrot.slane %v439_v4, 5  ;;  %v5388_v29 = vcombine.low %v2256_v63, %v2266_v14  ;;  %v427_v31 = vrot.slane %v426_v6, 4  ;;  %v436_v32 = vor.u32 %v435_v7, %v431_v54  ;;  %v5417_v7 = vld [vmem:[%s6720_s27 + $0x24] sm:$0xe] }
  0x5e   : > { %v2832_v33 = vsel %vm6973_vm6, %v5431_v8, %v2831_v58  ;;  %v2835_v37 = vsel %vm6973_vm6, %v2833_v9, %v2834_v59  ;;  %v446_v38 = vrot.slane %v444_v22, 4  ;;  %v449_v40 = vrot.slane %v447_v27, 5  ;;  %v7030_v22 = vld [vmem:[%s6720_s27 + $0x84] sm:$0xf] }
  0x5f   : > { %v453_v41 = vshll.u32 %v6980_v10, 16  ;;  %6102 = vmatmul.mubr.msk.bf16.gmra.mrb[12].mxu0 %vm676_vm3, %v5388_v29  ;;  %v432_v15 = vsel %vm6745_vm2, %v427_v31, %v431_v54  ;;  %v437_v58 = vrot.slane %v436_v32, 4  ;;  %v5451_v43 = vcombine.low %v2832_v33, %v2835_v37  ;;  %v7014_v54 = vld [vmem:[%s6720_s27 + $0x7c] sm:$0xf]  ;;  %v7037_v33 = vld [vmem:[%s6720_s27 + $0x88] sm:$0xf] }
  0x60   : > { %v457_v16 = vshrl.u32 %v6980_v10, 16  ;;  %v450_v44 = vor.u32 %v449_v40, %v446_v38  ;;  %v463_v45 = vshll.u32 %v217_v35, 16  ;;  %v5432_v46 = vrot.slane %v5416_v36, 9  ;;  %v219_v40 = vld [vmem:[%s6720_s27 + $0x8c] sm:$0x1] }
  0x61   : > { %v455_v59 = vrot.slane %v453_v41, 5  ;;  %v442_v48 = vsel %vm6745_vm2, %v437_v58, %v441_v17  ;;  %6125 = vmatprep.mubr.msk.bf16.mxu0 %vm676_vm3, %v5451_v43  ;;  %v2842_v52 = vsel %vm6973_vm6, %v6781_v25, %v2841_v23  ;;  %v468_v53 = vshrl.u32 %v6999_v42, 16 }
  0x62   : > { %v459_v49 = vrot.slane %v457_v16, 4  ;;  %v5145_v63 = vcombine.low %v432_v15, %v442_v48  ;;  %v451_v1 = vrot.slane %v450_v44, 4  ;;  %v465_v4 = vrot.slane %v463_v45, 5 }
  0x63   : > { %v2839_v6 = vsel %vm6973_vm6, %v5432_v46, %v2838_v18  ;;  %v470_v9 = vrot.slane %v468_v53, 4  ;;  %v471_v23 = vshll.u32 %v6999_v42, 16  ;;  %v477_v14 = vshll.u32 %v7014_v54, 16  ;;  %v6545_v18 = vld [vmem:[%s8549_s1 + $0x68] sm:$0xff]  }
  0x64   : > { %v460_v61 = vor.u32 %v459_v49, %v455_v59  ;;  %v5452_v8 = vcombine.low %v2839_v6, %v2842_v52  ;;  %5961 = vmatprep.mubr.msk.bf16.mxu1 %vm676_vm3, %v5145_v63  ;;  %v456_v25 = vsel %vm6745_vm2, %v451_v1, %v455_v59  ;;  %v481_v56 = vshrl.u32 %v7014_v54, 16  ;;  %v7055_v52 = vld [vmem:[%s6720_s27 + $0x90] sm:$0xf] }
  0x65   : > { %v487_v17 = vshll.u32 %v218_v50, 16  ;;  %v473_v29 = vrot.slane %v471_v23, 5  ;;  %v5433_v31 = vrot.slane %v5417_v7, 9  ;;  %v2845_v32 = vrot.slane %v6788_v39, 5  ;;  %v5418_v39 = vld [vmem:[%s6720_s27 + $0x30] sm:$0xe] }
  0x66   : > { %v461_v27 = vrot.slane %v460_v61, 4  ;;  %v479_v35 = vrot.slane %v477_v14, 5  ;;  %v483_v36 = vrot.slane %v481_v56, 4  ;;  %v2848_v38 = vrot.slane %v6797_v47, 5 }
  0x67   : > { %v489_v37 = vrot.slane %v487_v17, 5  ;;  %6126 = vmatmul.mubr.msk.bf16.vlgmr.msra.gmra.mrb[0].mxu0 %vm676_vm3, %v5452_v8  ;;  %v474_v15 = vor.u32 %v473_v29, %v470_v9  ;;  %v2846_v58 = vsel %vm6973_vm6, %v5433_v31, %v2845_v32  ;;  %v2847_v43 = vrot.slane %v2845_v32, 4  ;;  %v220_v9 = vld [vmem:[%s6720_s27 + $0x98] sm:$0x1]  ;;  %v5419_v32 = vld [vmem:[%s6720_s27 + $0x3c] sm:$0xe] }
  0x68   : > { %v466_v41 = vsel %vm6745_vm2, %v461_v27, %v465_v4  ;;  %6158 = vmatpush3.bf16.msra.mxu0 %v6827_v5  ;;  %v484_v44 = vor.u32 %v483_v36, %v479_v35  ;;  %v492_v47 = vshrl.u32 %v7030_v22, 16  ;;  %v495_v59 = vshll.u32 %v7030_v22, 16  ;;  %v7060_v5 = vld [vmem:[%s8549_s1 + $0x70] sm:$0xff]  }
  0x69   : > { %v5146_v16 = vcombine.low %v456_v25, %v466_v41  ;;  %v475_v45 = vrot.slane %v474_v15, 4  ;;  %v2849_v46 = vsel %vm6973_vm6, %v2847_v43, %v2848_v38  ;;  %v501_v48 = vshll.u32 %v7037_v33, 16  ;;  %6159 = vmatprep.subr.bf16.mxu0 %v6545_v18  ;;  %v7064_v4 = vld [vmem:[%s6720_s27 + $0x94] sm:$0xf]  ;;  %v7087_v15 = vld [vmem:[%s6720_s27 + $0xa0] sm:$0xf] }
  0x6a   : > { %v505_v49 = vshrl.u32 %v7037_v33, 16  ;;  %v485_v50 = vrot.slane %v484_v44, 4  ;;  %v5453_v53 = vcombine.low %v2846_v58, %v2849_v46  ;;  %v494_v63 = vrot.slane %v492_v47, 4 }
  0x6b   : > { %5962 = vmatmul.mubr.msk.bf16.gmra.mrb[16].mxu1 %vm676_vm3, %v5146_v16  ;;  %v497_v1 = vrot.slane %v495_v59, 5  ;;  %v480_v6 = vsel %vm6745_vm2, %v475_v45, %v479_v35  ;;  %v503_v7 = vrot.slane %v501_v48, 5  ;;  %v511_v8 = vshll.u32 %v219_v40, 16  ;;  %v7080_v40 = vld [vmem:[%s6720_s27 + $0x9c] sm:$0xf] }
  0x6c   : > { %v507_v61 = vrot.slane %v505_v49, 4  ;;  %v490_v23 = vsel %vm6745_vm2, %v485_v50, %v489_v37  ;;  %6129 = vmatprep.mubr.msk.bf16.mxu0 %vm676_vm3, %v5453_v53  ;;  %v5434_v14 = vrot.slane %v5418_v39, 9  ;;  %v2852_v56 = vrot.slane %v6822_v26, 5  ;;  %6160 = vmatpush3.bf16.msra.mxu0 %v6545_v18  ;;  %v221_v53 = vld [vmem:[%s6720_s27 + $0xa4] sm:$0x1] }
  0x6d   : > { %v498_v25 = vor.u32 %v497_v1, %v494_v63  ;;  %v5147_v17 = vcombine.low %v480_v6, %v490_v23  ;;  %v513_v29 = vrot.slane %v511_v8, 5  ;;  %v2855_v31 = vrot.slane %v6833_v34, 5  ;;  %6193 = vmatprep.subr.bf16.mxu0 %v7060_v5  ;;  %v5420_v63 = vld [vmem:[%s6720_s27 + $0x48] sm:$0xe] }
  0x6e   : > { %v508_v27 = vor.u32 %v507_v61, %v503_v7  ;;  %v2853_v36 = vsel %vm6973_vm6, %v5434_v14, %v2852_v56  ;;  %v2854_v37 = vrot.slane %v2852_v56, 4  ;;  %v516_v38 = vshrl.u32 %v7055_v52, 16 }
  0x6f   : > { %v499_v35 = vrot.slane %v498_v25, 4  ;;  %5965 = vmatprep.mubr.msk.bf16.mxu1 %vm676_vm3, %v5147_v17  ;;  %v519_v18 = vshll.u32 %v7055_v52, 16  ;;  %v525_v34 = vshll.u32 %v7064_v4, 16  ;;  %v529_v41 = vshrl.u32 %v7064_v4, 16 }
  0x70   : > { %v509_v26 = vrot.slane %v508_v27, 4  ;;  %v2856_v43 = vsel %vm6973_vm6, %v2854_v37, %v2855_v31  ;;  %v518_v39 = vrot.slane %v516_v38, 4  ;;  %v535_v16 = vshll.u32 %v220_v9, 16  ;;  %v7108_v27 = vld [vmem:[%s6720_s27 + $0xa8] sm:$0xf] }
  0x71   : > { %v504_v58 = vsel %vm6745_vm2, %v499_v35, %v503_v7  ;;  %v5454_v47 = vcombine.low %v2853_v36, %v2856_v43  ;;  %v521_v59 = vrot.slane %v519_v18, 5  ;;  %v527_v45 = vrot.slane %v525_v34, 5  ;;  %v7111_v35 = vld [vmem:[%s6720_s27 + $0xac] sm:$0xf] }
  0x72   : > { %v514_v44 = vsel %vm6745_vm2, %v509_v26, %v513_v29  ;;  %v531_v48 = vrot.slane %v529_v41, 4  ;;  %v537_v49 = vrot.slane %v535_v16, 5  ;;  %v5435_v50 = vrot.slane %v5419_v32, 9 }
  0x73   : > { %v5148_v46 = vcombine.low %v504_v58, %v514_v44  ;;  %6130 = vmatmul.mubr.msk.bf16.gmra.mrb[4].mxu0 %vm676_vm3, %v5454_v47  ;;  %v522_v1 = vor.u32 %v521_v59, %v518_v39  ;;  %v2859_v6 = vrot.slane %v6851_v12, 5  ;;  %v2862_v7 = vrot.slane %v6856_v20, 5  ;;  %v222_v47 = vld [vmem:[%s6720_s27 + $0xb0] sm:$0x1]  ;;  %v5421_v59 = vld [vmem:[%s6720_s27 + $0x54] sm:$0xe] }
  0x74   : > { %v540_v61 = vshrl.u32 %v7080_v40, 16  ;;  %v532_v8 = vor.u32 %v531_v48, %v527_v45  ;;  %v543_v9 = vshll.u32 %v7080_v40, 16  ;;  %v549_v23 = vshll.u32 %v7087_v15, 16 }
  0x75   : > { %5966 = vmatmul.mubr.msk.bf16.gmra.mrb[20].mxu1 %vm676_vm3, %v5148_v46  ;;  %v553_v25 = vshrl.u32 %v7087_v15, 16  ;;  %v523_v14 = vrot.slane %v522_v1, 4  ;;  %v2860_v56 = vsel %vm6973_vm6, %v5435_v50, %v2859_v6  ;;  %v2861_v17 = vrot.slane %v2859_v6, 4 }
  0x76   : > { %v542_v12 = vrot.slane %v540_v61, 4  ;;  %v533_v20 = vrot.slane %v532_v8, 4  ;;  %v545_v29 = vrot.slane %v543_v9, 5  ;;  %v551_v31 = vrot.slane %v549_v23, 5  ;;  %v7136_v61 = vld [vmem:[%s6720_s27 + $0xb4] sm:$0xf] }
  0x77   : > { %v555_v32 = vrot.slane %v553_v25, 4  ;;  %v528_v36 = vsel %vm6745_vm2, %v523_v14, %v527_v45  ;;  %v2863_v37 = vsel %vm6973_vm6, %v2861_v17, %v2862_v7  ;;  %v559_v38 = vshll.u32 %v221_v53, 16  ;;  %v7141_v14 = vld [vmem:[%s6720_s27 + $0xb8] sm:$0xf] }
  0x78   : > { %v5436_v26 = vrot.slane %v5420_v63, 9  ;;  %v538_v18 = vsel %vm6745_vm2, %v533_v20, %v537_v49  ;;  %v5455_v34 = vcombine.low %v2860_v56, %v2863_v37  ;;  %v546_v41 = vor.u32 %v545_v29, %v542_v12  ;;  %v223_v29 = vld [vmem:[%s6720_s27 + $0xbc] sm:$0x1] }
  0x79   : > { %v556_v58 = vor.u32 %v555_v32, %v551_v31  ;;  %v5149_v43 = vcombine.low %v528_v36, %v538_v18  ;;  %v561_v39 = vrot.slane %v559_v38, 5  ;;  %v2866_v16 = vrot.slane %v6874_v0, 5  ;;  %v5422_v38 = vld [vmem:[%s6720_s27 + $0x60] sm:$0xe] }
  0x7a   : > { %v2869_v44 = vrot.slane %v6882_v13, 5  ;;  %6133 = vmatprep.mubr.msk.bf16.mxu0 %vm676_vm3, %v5455_v34  ;;  %v547_v45 = vrot.slane %v546_v41, 4  ;;  %v564_v48 = vshrl.u32 %v7108_v27, 16  ;;  %v567_v49 = vshll.u32 %v7108_v27, 16 }
  0x7b   : > { %v557_v46 = vrot.slane %v556_v58, 4  ;;  %5969 = vmatprep.mubr.msk.bf16.mxu1 %vm676_vm3, %v5149_v43  ;;  %v2867_v50 = vsel %vm6973_vm6, %v5436_v26, %v2866_v16  ;;  %v2868_v0 = vrot.slane %v2866_v16, 4  ;;  %v573_v13 = vshll.u32 %v7111_v35, 16  ;;  %v5354_v16 = vld [vmem:[%s6720_s27 + $0x70] sm:$0xf] }
  0x7c   : > { %v577_v53 = vshrl.u32 %v7111_v35, 16  ;;  %v552_v63 = vsel %vm6745_vm2, %v547_v45, %v551_v31  ;;  %v566_v6 = vrot.slane %v564_v48, 4  ;;  %v569_v7 = vrot.slane %v567_v49, 5 }
  0x7d   : > { %v562_v1 = vsel %vm6745_vm2, %v557_v46, %v561_v39  ;;  %v2870_v9 = vsel %vm6973_vm6, %v2868_v0, %v2869_v44  ;;  %v575_v23 = vrot.slane %v573_v13, 5  ;;  %v583_v12 = vshll.u32 %v222_v47, 16  ;;  %v5423_v46 = vld [vmem:[%s6720_s27 + $0x6c] sm:$0xe] }
  0x7e   : > { %v5150_v8 = vcombine.low %v552_v63, %v562_v1  ;;  %v579_v25 = vrot.slane %v577_v53, 4  ;;  %v5456_v56 = vcombine.low %v2867_v50, %v2870_v9  ;;  %v570_v17 = vor.u32 %v569_v7, %v566_v6 }
  0x7f   : > { %v5437_v20 = vrot.slane %v5421_v59, 9  ;;  %v2873_v32 = vrot.slane %v6905_v55, 5  ;;  %v2876_v36 = vrot.slane %v6911_v3, 5  ;;  %v588_v37 = vshrl.u32 %v7136_v61, 16  ;;  %v5355_v3 = vld [vmem:[%s6720_s27 + $0x74] sm:$0x1] }
  0x80   : > { %5970 = vmatmul.mubr.msk.bf16.gmra.mrb[24].mxu1 %vm676_vm3, %v5150_v8  ;;  %v580_v31 = vor.u32 %v579_v25, %v575_v23  ;;  %6134 = vmatmul.mubr.msk.bf16.gmra.mrb[8].mxu0 %vm676_vm3, %v5456_v56  ;;  %v571_v26 = vrot.slane %v570_v17, 4  ;;  %v585_v18 = vrot.slane %v583_v12, 5  ;;  %v591_v34 = vshll.u32 %v7136_v61, 16  ;;  %v5424_v12 = vld [vmem:[%s6720_s27 + $0x78] sm:$0xe] }
  0x81   : > { %v597_v41 = vshll.u32 %v7141_v14, 16  ;;  %v2874_v43 = vsel %vm6973_vm6, %v5437_v20, %v2873_v32  ;;  %v2875_v39 = vrot.slane %v2873_v32, 4  ;;  %v590_v55 = vrot.slane %v588_v37, 4 }
  0x82   : > { %v581_v58 = vrot.slane %v580_v31, 4  ;;  %v576_v44 = vsel %vm6745_vm2, %v571_v26, %v575_v23  ;;  %v593_v47 = vrot.slane %v591_v34, 5  ;;  %v601_v45 = vshrl.u32 %v7141_v14, 16  ;;  %v7182_v26 = vld [vmem:[%s6720_s27 + $0x4] sm:$0xf] }
  0x83   : > { %v599_v59 = vrot.slane %v597_v41, 5  ;;  %v2877_v49 = vsel %vm6973_vm6, %v2875_v39, %v2876_v36  ;;  %v607_v50 = vshll.u32 %v223_v29, 16  ;;  %v5438_v0 = vrot.slane %v5422_v38, 9  ;;  %v7176_v36 = vld [vmem:[%s6720_s27 + $0x7c] sm:$0xf] }
  0x84   : > { %v586_v48 = vsel %vm6745_vm2, %v581_v58, %v585_v18  ;;  %v5457_v53 = vcombine.low %v2874_v43, %v2877_v49  ;;  %v594_v63 = vor.u32 %v593_v47, %v590_v55  ;;  %v603_v1 = vrot.slane %v601_v45, 4  ;;  %v6600_v38 = vld [vmem:[%s6720_s27] sm:$0xf]  ;;  %v5425_v41 = vld [vmem:[%s6720_s27 + $0x84] sm:$0xe] }
  0x85   : > { %v5151_v13 = vcombine.low %v576_v44, %v586_v48  ;;  %v609_v6 = vrot.slane %v607_v50, 5  ;;  %v2880_v7 = vrot.slane %v6935_v51, 5  ;;  %v2883_v8 = vrot.slane %v6939_v57, 5  ;;  %v7186_v34 = vld [vmem:[%s6720_s27 + $0x80] sm:$0x1] }
  0x86   : > { %v5439_v9 = vrot.slane %v5423_v46, 9  ;;  %6137 = vmatprep.mubr.msk.bf16.mxu0 %vm676_vm3, %v5457_v53  ;;  %v595_v23 = vrot.slane %v594_v63, 4  ;;  %v604_v25 = vor.u32 %v603_v1, %v599_v59  ;;  %v2887_v56 = vrot.slane %v5354_v16, 5  ;;  %v5360_v16 = vld [vmem:[%s6720_s27 + $0x88] sm:$0xf] }
  0x87   : > { %5973 = vmatprep.mubr.msk.bf16.mxu1 %vm676_vm3, %v5151_v13  ;;  %v2890_v17 = vrot.slane %v5355_v3, 5  ;;  %v2881_v51 = vsel %vm6973_vm6, %v5438_v0, %v2880_v7  ;;  %v2882_v20 = vrot.slane %v2880_v7, 4  ;;  %v5171_v18 = vcombine.low %v6600_v38, %v7182_v26  ;;  %v5361_v3 = vld [vmem:[%s6720_s27 + $0x8c] sm:$0x1]  ;;  %v5364_v0 = vld [vmem:[%s6720_s27 + $0x98] sm:$0x1] }
  0x88   : > { %v600_v57 = vsel %vm6745_vm2, %v595_v23, %v599_v59  ;;  %v605_v29 = vrot.slane %v604_v25, 4  ;;  %v2888_v31 = vsel %vm6973_vm6, %v5439_v9, %v2887_v56  ;;  %v2889_v32 = vrot.slane %v2887_v56, 4  ;;  %v5363_v59 = vld [vmem:[%s6720_s27 + $0x94] sm:$0xf]  ;;  %v5426_v13 = vld [vmem:[%s6720_s27 + $0x90] sm:$0xe] }
  0x89   : > { %v2884_v37 = vsel %vm6973_vm6, %v2882_v20, %v2883_v8  ;;  %v5440_v55 = vrot.slane %v5424_v12, 9  ;;  %v2894_v45 = vrot.slane %v7176_v36, 5  ;;  %v2897_v46 = vrot.slane %v7186_v34, 5  ;;  %v5367_v9 = vld [vmem:[%s6720_s27 + $0xa4] sm:$0x1] }
  0x8a   : > { %v610_v58 = vsel %vm6745_vm2, %v605_v29, %v609_v6  ;;  %v5458_v43 = vcombine.low %v2881_v51, %v2884_v37  ;;  %v2891_v39 = vsel %vm6973_vm6, %v2889_v32, %v2890_v17  ;;  %v5441_v48 = vrot.slane %v5425_v41, 9  ;;  %v5366_v6 = vld [vmem:[%s6720_s27 + $0xa0] sm:$0xf]  ;;  %v5427_v23 = vld [vmem:[%s6720_s27 + $0x9c] sm:$0xe] }
  0x8b   : > { %v5152_v44 = vcombine.low %v600_v57, %v610_v58  ;;  %v5459_v47 = vcombine.low %v2888_v31, %v2891_v39  ;;  %v2901_v49 = vrot.slane %v5360_v16, 5  ;;  %v2904_v50 = vrot.slane %v5361_v3, 5  ;;  %v6602_v25 = vld [vmem:[%s6720_s27 + $0xc] sm:$0xf]  ;;  %v7213_v56 = vld [vmem:[%s6720_s27 + $0x10] sm:$0xf] }
  0x8c   : > { %6138 = vmatmul.mubr.msk.bf16.gmra.mrb[12].mxu0 %vm676_vm3, %v5458_v43  ;;  %v2895_v53 = vsel %vm6973_vm6, %v5440_v55, %v2894_v45  ;;  %v2896_v63 = vrot.slane %v2894_v45, 4  ;;  %v2908_v1 = vrot.slane %v5363_v59, 5  ;;  %v5172_v17 = vcombine.low %v6602_v25, %v7213_v56  ;;  %v6604_v37 = vld [vmem:[%s6720_s27 + $0x18] sm:$0xf]  ;;  %v7222_v38 = vld [vmem:[%s6720_s27 + $0x1c] sm:$0xf] }
  0x8d   : > { %5974 = vmatmul.mubr.msk.bf16.gmra.mrb[28].mxu1 %vm676_vm3, %v5152_v44  ;;  %6141 = vmatprep.mubr.msk.bf16.mxu0 %vm676_vm3, %v5459_v47  ;;  %v2902_v7 = vsel %vm6973_vm6, %v5441_v48, %v2901_v49  ;;  %v2903_v8 = vrot.slane %v2901_v49, 4  ;;  %v5442_v51 = vrot.slane %v5426_v13, 9  ;;  %v2911_v20 = vrot.slane %v5364_v0, 5  ;;  %v5369_v39 = vld [vmem:[%s6720_s27 + $0xac] sm:$0xf]  ;;  %v6606_v45 = vld [vmem:[%s8549_s1 + $0x20] sm:$0xff]  }
  0x8e   : > { %5981 = vmatprep.mubr.msk.bf16.mxu1 %vm676_vm3, %v5171_v18  ;;  %v2898_v12 = vsel %vm6973_vm6, %v2896_v63, %v2897_v46  ;;  %v2910_v31 = vrot.slane %v2908_v1, 4  ;;  %v2915_v32 = vrot.slane %v5366_v6, 5  ;;  %v5173_v18 = vcombine.low %v6604_v37, %v7222_v38  ;;  %v5372_v16 = vld [vmem:[%s6720_s27 + $0xb8] sm:$0xf]  ;;  %v6554_v3 = vld [vmem:[%s8549_s1 + $0x28] sm:$0xff]   ;;  %v7252_v63 = vld [vmem:[%s8549_s1 + $0x30] sm:$0xff]  }
  0x8f   : > { %v5460_v57 = vcombine.low %v2895_v53, %v2898_v12  ;;  %v2905_v29 = vsel %vm6973_vm6, %v2903_v8, %v2904_v50  ;;  %v5443_v58 = vrot.slane %v5427_v23, 9  ;;  %v2918_v43 = vrot.slane %v5367_v9, 5  ;;  %v5370_v49 = vld [vmem:[%s6720_s27 + $0xb0] sm:$0x1]  ;;  %v5428_v50 = vld [vmem:[%s6720_s27 + $0xa8] sm:$0xe] }
  0x90   : > { %v5461_v41 = vcombine.low %v2902_v7, %v2905_v29  ;;  %v2917_v55 = vrot.slane %v2915_v32, 4  ;;  %v2909_v44 = vsel %vm6973_vm6, %v5442_v51, %v2908_v1  ;;  %v2912_v47 = vsel %vm6973_vm6, %v2910_v31, %v2911_v20  ;;  %v5373_v13 = vld [vmem:[%s6720_s27 + $0xbc] sm:$0x1]  ;;  %v5429_v53 = vld [vmem:[%s6720_s27 + $0xb4] sm:$0xe] }
  0x91   : > { %v2922_v59 = vrot.slane %v5369_v39, 5  ;;  %v2916_v46 = vsel %vm6973_vm6, %v5443_v58, %v2915_v32  ;;  %v2929_v0 = vrot.slane %v5372_v16, 5  ;;  %v6607_v1 = vld [vmem:[%s6720_s27 + $0x24] sm:$0xf]  ;;  %v7256_v6 = vld [vmem:[%s6720_s27 + $0x28] sm:$0xf]  ;;  %v5462_v8 = vcombine.low %v2909_v44, %v2912_v47 }
  0x92   : > { %v2919_v48 = vsel %vm6973_vm6, %v2917_v55, %v2918_v43  ;;  %v5174_v7 = vcombine.low %v6607_v1, %v7256_v6  ;;  %v5444_v23 = vrot.slane %v5428_v50, 9  ;;  %v6609_v12 = vld [vmem:[%s6720_s27 + $0x30] sm:$0xf]  ;;  %v7261_v51 = vld [vmem:[%s6720_s27 + $0x34] sm:$0xf]  ;;  %v2932_v31 = vrot.slane %v5373_v13, 5 }
  0x93   : > { %v5463_v9 = vcombine.low %v2916_v46, %v2919_v48  ;;  %v2924_v25 = vrot.slane %v2922_v59, 4  ;;  %v5175_v20 = vcombine.low %v6609_v12, %v7261_v51  ;;  %v2931_v29 = vrot.slane %v2929_v0, 4  ;;  %v5375_v32 = vld [vmem:[%s6720_s27 + $0xc4] sm:$0xf]  ;;  %v5376_v55 = vld [vmem:[%s6720_s27 + $0xc8] sm:$0x1] }
  0x94   : > { %6142 = vmatmul.mubr.msk.bf16.gmra.mrb[16].mxu0 %vm676_vm3, %v5460_v57  ;;  %v5445_v57 = vrot.slane %v5429_v53, 9  ;;  %v2923_v37 = vsel %vm6973_vm6, %v5444_v23, %v2922_v59  ;;  %v2936_v58 = vrot.slane %v5375_v32, 5  ;;  %v6611_v44 = vld [vmem:[%s6720_s27 + $0x3c] sm:$0xf]  ;;  %v7282_v47 = vld [vmem:[%s6720_s27 + $0x40] sm:$0xf]  ;;  %v5178_v53 = vcombine.low %v6915_v11, %v6921_v24 }
  0x95   : > { %5982 = vmatmul.mubr.msk.bf16.vlgmr.msra.gmra.mrb[0].mxu1 %vm676_vm3, %v5172_v17  ;;  %6145 = vmatprep.mubr.msk.bf16.mxu0 %vm676_vm3, %v5461_v41  ;;  %v2925_v17 = vrot.slane %v5370_v49, 5  ;;  %v5430_v41 = vld [vmem:[%s6720_s27 + $0xc0] sm:$0xe]  ;;  %v2933_v39 = vsel %vm6973_vm6, %v2931_v29, %v2932_v31  ;;  %v5176_v59 = vcombine.low %v6611_v44, %v7282_v47  ;;  %v2939_v48 = vrot.slane %v5376_v55, 5  ;;  %v6555_v1 = vld [vmem:[%s6720_s27 + $0x18] sm:$0xff]  }
  0x96   : > { %6014 = vmatpush3.bf16.msra.mxu1 %v6606_v45  ;;  %5985 = vmatprep.mubr.msk.bf16.mxu1 %vm676_vm3, %v5173_v18  ;;  %v2930_v43 = vsel %vm6973_vm6, %v5445_v57, %v2929_v0  ;;  %v2938_v46 = vrot.slane %v2936_v58, 4  ;;  %v5177_v49 = vcombine.low %v6886_v19, %v6889_v28  ;;  %v2301_v13 = vshll.u32 %v7176_v36, 16  ;;  %v1187_v11 = vld [vmem:[%s6720_s27] sm:$0xe]  ;;  %v1189_v24 = vld [vmem:[%s6720_s27 + $0x18] sm:$0xe] }
  0x97   : > { %6015 = vmatprep.subr.bf16.mxu1 %v6554_v3  ;;  %v2926_v18 = vsel %vm6973_vm6, %v2924_v25, %v2925_v17  ;;  %v5465_v45 = vcombine.low %v2930_v43, %v2933_v39  ;;  %v2305_v19 = vshrl.u32 %v7176_v36, 16  ;;  %v1188_v25 = vld [vmem:[%s6720_s27 + $0xc] sm:$0xe]  ;;  %v6613_v17 = vld [vmem:[%s6720_s27 + $0x14] sm:$0x1]  ;;  %v2311_v31 = vshll.u32 %v7186_v34, 16 }
  0x98   : > { %v5464_v16 = vcombine.low %v2923_v37, %v2926_v18  ;;  %v2940_v0 = vsel %vm6973_vm6, %v2938_v46, %v2939_v48  ;;  %v1250_v12 = vrot.slane %v6613_v17, 5  ;;  %v1261_v32 = vrot.slane %v7256_v6, 5  ;;  %v6558_v18 = vld [vmem:[%s6720_s27 + $0x24] sm:$0xff]   ;;  %v6560_v43 = vld [vmem:[%s6720_s27 + $0x30] sm:$0xff]   ;;  %v6615_v55 = vld [vmem:[%s6720_s27 + $0x20] sm:$0x1] }
  0x99   : > { %v2307_v23 = vrot.slane %v2305_v19, 4  ;;  %v5180_v37 = vcombine.low %v6967_v62, %v6980_v10  ;;  %v5183_v34 = vcombine.low %v7055_v52, %v7064_v4  ;;  %v5205_v39 = vrot.slane %v1187_v11, 9  ;;  %v1191_v62 = vld [vmem:[%s6720_s27 + $0x30] sm:$0xe]  ;;  %v6573_v44 = vld [vmem:[%s8549_s1 + $0x78] sm:$0xff]  }
  0x9a   : > { %6016 = vmatpush3.bf16.msra.mxu1 %v6554_v3  ;;  %v5446_v3 = vrot.slane %v5430_v41, 9  ;;  %v1190_v41 = vld [vmem:[%s6720_s27 + $0x24] sm:$0xe]  ;;  %v5207_v6 = vrot.slane %v1189_v24, 9  ;;  %v6616_v46 = vld [vmem:[%s6720_s27 + $0x2c] sm:$0x1] }
  0x9b   : > { %6049 = vmatprep.subr.bf16.mxu1 %v7252_v63  ;;  %v1264_v48 = vrot.slane %v6616_v46, 5  ;;  %v5555_v24 = vld [vmem:[%s6720_s27 + $0x18] sm:$0xf] }
  0x9c   : > { %6146 = vmatmul.mubr.msk.bf16.gmra.mrb[20].mxu0 %vm676_vm3, %v5462_v8  ;;  %v2937_v50 = vsel %vm6973_vm6, %v5446_v3, %v2936_v58  ;;  %v5179_v8 = vcombine.low %v6942_v60, %v6952_v21  ;;  %v1240_v60 = vrot.slane %v7182_v26, 5  ;;  %v5206_v21 = vrot.slane %v1188_v25, 9  ;;  %v5563_v3 = vld [vmem:[%s6720_s27 + $0x38] sm:$0x1] }
  0x9d   : > { %5986 = vmatmul.mubr.msk.bf16.gmra.mrb[4].mxu1 %vm676_vm3, %v5174_v7  ;;  %6149 = vmatprep.mubr.msk.bf16.mxu0 %vm676_vm3, %v5463_v9  ;;  %v5466_v28 = vcombine.low %v2937_v50, %v2940_v0  ;;  %v1247_v7 = vrot.slane %v7213_v56, 5  ;;  %v7303_v9 = vrot.slane %v2301_v13, 5  ;;  %v1254_v56 = vrot.slane %v7222_v38, 5  ;;  %v6617_v13 = vld [vmem:[%s6720_s27 + $0x38] sm:$0x1] }
  0x9e   : > { %5989 = vmatprep.mubr.msk.bf16.mxu1 %vm676_vm3, %v5175_v20  ;;  %v6614_v20 = vld [vmem:[%s6720_s27 + $0x8] sm:$0x1]  ;;  %v5181_v26 = vcombine.low %v6999_v42, %v7014_v54  ;;  %v5182_v38 = vcombine.low %v7030_v22, %v7037_v33  ;;  %v1268_v58 = vrot.slane %v7261_v51, 5  ;;  %v1242_v10 = vrot.slane %v1240_v60, 4 }
  0x9f   : > { %8568 = vst [vmem:[#allocation2_spill] sm:$0xff] %v7303_v9  ;;  %v1249_v36 = vrot.slane %v1247_v7, 4  ;;  %v1243_v57 = vrot.slane %v6614_v20, 5  ;;  %v2308_v29 = vor.u32 %v2307_v23, %v7303_v9  ;;  %v7335_v42 = vsel %vm6973_vm6, %v5206_v21, %v1247_v7  ;;  %v7367_v23 = vld [vmem:[%s6720_s27 + $0x48] sm:$0xe] }
  0xa0   : > { %v1256_v51 = vrot.slane %v1254_v56, 4  ;;  %v5209_v50 = vrot.slane %v1191_v62, 9  ;;  %v1270_v0 = vrot.slane %v1268_v58, 4  ;;  %v1271_v19 = vrot.slane %v6617_v13, 5  ;;  %v6564_v21 = vld [vmem:[%s6720_s27 + $0x48] sm:$0xff]  }
  0xa1   : > { %v7339_v54 = vsel %vm6973_vm6, %v1249_v36, %v1250_v12  ;;  %v7362_v7 = vsel %vm6973_vm6, %v5205_v39, %v1240_v60  ;;  %v7369_v25 = vrot.slane %v2308_v29, 4  ;;  %v7376_v17 = vsel %vm6973_vm6, %v1242_v10, %v1243_v57  ;;  %v7390_v60 = vld [vmem:[%s8549_s1 + $0x80] sm:$0xff]   ;;  %v6618_v57 = vld [vmem:[%s6720_s27 + $0x4c] sm:$0xf]  ;;  %v5559_v13 = vld [vmem:[%s6720_s27 + $0x28] sm:$0xf] }
  0xa2   : > { %v7380_v12 = vsel %vm6973_vm6, %v5207_v6, %v1254_v56  ;;  %v1275_v20 = vrot.slane %v7282_v47, 5  ;;  %v1282_v29 = vrot.slane %v6618_v57, 5  ;;  %v7418_v39 = vld [vmem:[%s6720_s27 + $0x60] sm:$0xe]  ;;  %v5557_v47 = vld [vmem:[%s6720_s27 + $0x20] sm:$0x1] }
  0xa3   : > { %8570 = vst [vmem:[#allocation4_spill] sm:$0xff] %v7369_v25  ;;  %v5211_v10 = vrot.slane %v7367_v23, 9  ;;  %v5562_v62 = vld [vmem:[%s6720_s27 + $0x34] sm:$0xf] }
  0xa4   : > { %6150 = vmatmul.mubr.msk.bf16.gmra.mrb[24].mxu0 %vm676_vm3, %v5464_v16  ;;  %v1257_v16 = vrot.slane %v6615_v55, 5  ;;  %v3667_v55 = vshrl.u32 %v5555_v24, 16  ;;  %v1277_v46 = vrot.slane %v1275_v20, 4  ;;  %v3724_v6 = vshll.u32 %v5562_v62, 16  ;;  %v6626_v9 = vld [vmem:[%s6720_s27 + $0x74] sm:$0x1] }
  0xa5   : > { %5990 = vmatmul.mubr.msk.bf16.gmra.mrb[8].mxu1 %vm676_vm3, %v5176_v59  ;;  %6153 = vmatprep.mubr.msk.bf16.mxu0 %vm676_vm3, %v5465_v45  ;;  %v5208_v59 = vrot.slane %v1190_v41, 9  ;;  %v1263_v45 = vrot.slane %v1261_v32, 4  ;;  %v6619_v41 = vld [vmem:[%s6720_s27 + $0x44] sm:$0x1]  ;;  %v7461_v33 = vsel %vm6973_vm6, %v5211_v10, %v1282_v29  ;;  %v3700_v10 = vshll.u32 %v5559_v13, 16 }
  0xa6   : > { %5993 = vmatprep.mubr.msk.bf16.mxu1 %vm676_vm3, %v5177_v49  ;;  %v7384_v11 = vsel %vm6973_vm6, %v1256_v51, %v1257_v16  ;;  %v3670_v16 = vshll.u32 %v5555_v24, 16  ;;  %v7438_v24 = vld [vmem:[%s6720_s27 + $0x5c] sm:$0x1] }
  0xa7   : > { %v7395_v36 = vsel %vm6973_vm6, %v5208_v59, %v1261_v32  ;;  %v7399_v56 = vsel %vm6973_vm6, %v1263_v45, %v1264_v48  ;;  %v5558_v45 = vld [vmem:[%s6720_s27 + $0x24] sm:$0xf]  ;;  %v1284_v48 = vrot.slane %v1282_v29, 4  ;;  %v7484_v25 = vrot.slane %v3700_v10, 5 }
  0xa8   : > { %v3691_v4 = vshrl.u32 %v5558_v45, 16 }
  0xaa   : > { %v3693_v49 = vrot.slane %v3691_v4, 4  ;;  %v6570_v4 = vld [vmem:[%s6720_s27 + $0x6c] sm:$0xff]  }
  0xac   : > { %6154 = vmatmul.mubr.msk.bf16.gmra.mrb[28].mxu0 %vm676_vm3, %v5466_v28  ;;  %v7352_v28 = vld [vmem:[%s6720_s27 + $0x3c] sm:$0xe] }
  0xad   : > { %5994 = vmatmul.mubr.msk.bf16.gmra.mrb[12].mxu1 %vm676_vm3, %v5178_v53  ;;  %6161 = vmatprep.mubr.msk.bf16.mxu0 %vm676_vm3, %v6555_v1  ;;  %v7354_v53 = vrot.slane %v2311_v31, 5  ;;  %v7404_v31 = vld [vmem:[%s6720_s27 + $0x54] sm:$0xe]  ;;  %v5210_v32 = vrot.slane %v7352_v28, 9  ;;  %v6621_v28 = vld [vmem:[%s6720_s27 + $0x58] sm:$0xf] }
  0xae   : > { %5997 = vmatprep.mubr.msk.bf16.mxu1 %vm676_vm3, %v5179_v8  ;;  %v1289_v23 = vrot.slane %v6621_v28, 5  ;;  %v3672_v28 = vrot.slane %v3670_v16, 5  ;;  %v6624_v16 = vld [vmem:[%s6720_s27 + $0x70] sm:$0xf]  ;;  %v3728_v1 = vshrl.u32 %v5562_v62, 16 }
  0xaf   : > { %8569 = vst [vmem:[#allocation3_spill] sm:$0xff] %v7354_v53  ;;  %v7457_v22 = vsel %vm6973_vm6, %v5210_v32, %v1275_v20  ;;  %v1196_v32 = vld [vmem:[%s6720_s27 + $0x6c] sm:$0xe]  ;;  %v1303_v29 = vrot.slane %v6624_v16, 5 }
  0xb0   : > { %v1291_v20 = vrot.slane %v1289_v23, 4  ;;  %v5214_v57 = vrot.slane %v1196_v32, 9 }
  0xb4   : > { %6162 = vmatmul.mubr.msk.bf16.vlgmr.msra.gmra.mrb[0].mxu0 %vm676_vm3, %v6558_v18  ;;  %v7409_v18 = vsel %vm6973_vm6, %v5209_v50, %v1268_v58  ;;  %v6620_v50 = vld [vmem:[%s6720_s27 + $0x50] sm:$0x1] }
  0xb5   : > { %5998 = vmatmul.mubr.msk.bf16.gmra.mrb[16].mxu1 %vm676_vm3, %v5180_v37  ;;  %6194 = vmatpush3.bf16.msra.mxu0 %v7060_v5  ;;  %v6562_v5 = vld [vmem:[%s6720_s27 + $0x3c] sm:$0xff]  }
  0xb6   : > { %6001 = vmatprep.mubr.msk.bf16.mxu1 %vm676_vm3, %v5181_v26  ;;  %6165 = vmatprep.mubr.msk.bf16.mxu0 %vm676_vm3, %v6560_v43  ;;  %v5556_v37 = vld [vmem:[%s6720_s27 + $0x1c] sm:$0xf]  ;;  %v7413_v26 = vsel %vm6973_vm6, %v1270_v0, %v1271_v19  ;;  %v1278_v43 = vrot.slane %v6619_v41, 5  ;;  %v1285_v0 = vrot.slane %v6620_v50, 5  ;;  %v5212_v19 = vrot.slane %v7404_v31, 9 }
  0xb7   : > { %6195 = vmatprep.subr.bf16.mxu0 %v6573_v44  ;;  %v3676_v51 = vshll.u32 %v5556_v37, 16  ;;  %v3680_v59 = vshrl.u32 %v5556_v37, 16  ;;  %v5213_v37 = vrot.slane %v7418_v39, 9  ;;  %v5561_v41 = vld [vmem:[%s6720_s27 + $0x30] sm:$0xf]  ;;  %v3669_v50 = vrot.slane %v3667_v55, 4 }
  0xb8   : > { %v6566_v39 = vld [vmem:[%s6720_s27 + $0x54] sm:$0xff]   ;;  %v7468_v55 = vsel %vm6973_vm6, %v1277_v46, %v1278_v43  ;;  %v7472_v52 = vsel %vm6973_vm6, %v1284_v48, %v1285_v0  ;;  %v3715_v43 = vshrl.u32 %v5561_v41, 16  ;;  %v3718_v46 = vshll.u32 %v5561_v41, 16  ;;  %v5560_v0 = vld [vmem:[%s6720_s27 + $0x2c] sm:$0x1] }
  0xb9   : > { %6196 = vmatpush3.bf16.msra.mxu0 %v6573_v44  ;;  %v3686_v44 = vshll.u32 %v5557_v47, 16  ;;  %v6568_v47 = vld [vmem:[%s6720_s27 + $0x60] sm:$0xff]   ;;  %v3673_v8 = vor.u32 %v3672_v28, %v3669_v50  ;;  %v8571_v50 = vcombine.low %v7080_v40, %v7087_v15  ;;  %v3710_v32 = vshll.u32 %v5560_v0, 16 }
  0xba   : > { %6229 = vmatprep.subr.bf16.mxu0 %v7390_v60  ;;  %v3720_v28 = vrot.slane %v3718_v46, 5  ;;  %v6628_v46 = vld [vmem:[%s6720_s27 + $0x88] sm:$0xf] }
  0xbb   : > { %v3674_v40 = vrot.slane %v3673_v8, 4  ;;  %v1197_v8 = vld [vmem:[%s6720_s27 + $0x78] sm:$0xe]  ;;  %v3712_v0 = vrot.slane %v3710_v32, 5 }
  0xbc   : > { %6166 = vmatmul.mubr.msk.bf16.gmra.mrb[4].mxu0 %vm676_vm3, %v6562_v5  ;;  %v6623_v5 = vld [vmem:[%s6720_s27 + $0x64] sm:$0xf] }
  0xbd   : > { %6002 = vmatmul.mubr.msk.bf16.gmra.mrb[20].mxu1 %vm676_vm3, %v5182_v38  ;;  %6169 = vmatprep.mubr.msk.bf16.mxu0 %vm676_vm3, %v6564_v21  ;;  %v1296_v31 = vrot.slane %v6623_v5, 5  ;;  %v7463_v38 = vrot.slane %v3676_v51, 5  ;;  %v3682_v21 = vrot.slane %v3680_v59, 4  ;;  %v3704_v51 = vshrl.u32 %v5559_v13, 16  ;;  %v6625_v5 = vld [vmem:[%s6720_s27 + $0x68] sm:$0x1] }
  0xbe   : > { %6005 = vmatprep.mubr.msk.bf16.mxu1 %vm676_vm3, %v5183_v34  ;;  %v3694_v34 = vshll.u32 %v5558_v45, 16  ;;  %v1299_v58 = vrot.slane %v6625_v5, 5  ;;  %v7479_v45 = vrot.slane %v3686_v44, 5  ;;  %v1305_v13 = vrot.slane %v1303_v29, 4 }
  0xbf   : > { %v1298_v59 = vrot.slane %v1296_v31, 4  ;;  %v3683_v48 = vor.u32 %v3682_v21, %v7463_v38  ;;  %v1306_v5 = vrot.slane %v6626_v9, 5  ;;  %v3706_v41 = vrot.slane %v3704_v51, 4 }
  0xc0   : > { %v3696_v16 = vrot.slane %v3694_v34, 5  ;;  %v7495_v44 = vsel %vm6973_vm6, %v5212_v19, %v1289_v23  ;;  %v3717_v9 = vrot.slane %v3715_v43, 4  ;;  %v7501_v21 = vrot.slane %v3724_v6, 5  ;;  %v6627_v6 = vld [vmem:[%s6720_s27 + $0x7c] sm:$0xf] }
  0xc1   : > { %v3684_v15 = vrot.slane %v3683_v48, 4  ;;  %v7508_v23 = vsel %vm6973_vm6, %v5213_v37, %v1296_v31  ;;  %v1310_v10 = vrot.slane %v6627_v6, 5  ;;  %v3734_v51 = vshll.u32 %v5563_v3, 16  ;;  %v6572_v43 = vld [vmem:[%s6720_s27 + $0x78] sm:$0xff]  }
  0xc2   : > { %v3697_v34 = vor.u32 %v3696_v16, %v3693_v49  ;;  %v7522_v49 = vsel %vm6973_vm6, %v1298_v59, %v1299_v58  ;;  %v7530_v37 = vsel %vm6973_vm6, %v1305_v13, %v1306_v5  ;;  %v3721_v31 = vor.u32 %v3720_v28, %v3717_v9  ;;  %v6629_v13 = vld [vmem:[%s6720_s27 + $0x80] sm:$0x1]  ;;  %v1200_v6 = vld [vmem:[%s6720_s27 + $0x9c] sm:$0xe] }
  0xc3   : > { %v3679_v3 = vsel %vm6745_vm2, %v3674_v40, %v7463_v38  ;;  %v3689_v58 = vsel %vm6745_vm2, %v3684_v15, %v7479_v45  ;;  %v1317_v48 = vrot.slane %v6628_v46, 5  ;;  %v5215_v16 = vrot.slane %v1197_v8, 9  ;;  %v6630_v40 = vld [vmem:[%s6720_s27 + $0x8c] sm:$0x1] }
  0xc4   : > { %6170 = vmatmul.mubr.msk.bf16.gmra.mrb[8].mxu0 %vm676_vm3, %v6566_v39  ;;  %v8572_v39 = vcombine.low %v7108_v27, %v7111_v35  ;;  %v8573_v27 = vrot.slane %v7438_v24, 5  ;;  %v7526_v24 = vsel %vm6973_vm6, %v5214_v57, %v1303_v29  ;;  %v5564_v57 = vld [vmem:[%s6720_s27 + $0x3c] sm:$0xf]  ;;  %v3698_v29 = vrot.slane %v3697_v34, 4 }
  0xc5   : > { %6006 = vmatmul.mubr.msk.bf16.gmra.mrb[24].mxu1 %vm676_vm3, %v8571_v50  ;;  %6173 = vmatprep.mubr.msk.bf16.mxu0 %vm676_vm3, %v6568_v47  ;;  %v3730_v47 = vrot.slane %v3728_v1, 4  ;;  %v3707_v1 = vor.u32 %v3706_v41, %v7484_v25  ;;  %v1313_v5 = vrot.slane %v6629_v13, 5  ;;  %v7544_v41 = vld [vmem:[%s6720_s27 + $0x40] sm:$0xf]  ;;  %v1312_v50 = vrot.slane %v1310_v10, 4 }
  0xc6   : > { %6009 = vmatprep.mubr.msk.bf16.mxu1 %vm676_vm3, %v8572_v39  ;;  %v7514_v35 = vsel %vm6973_vm6, %v1291_v20, %v8573_v27  ;;  %v1198_v20 = vld [vmem:[%s6720_s27 + $0x84] sm:$0xe]  ;;  %8574 = vst [vmem:[#allocation5_spill] sm:$0xff] %v7544_v41  ;;  %v3736_v9 = vrot.slane %v3734_v51, 5  ;;  %v8575_v28 = vcombine.low %v7136_v61, %v7141_v14  ;;  %v3722_v39 = vrot.slane %v3721_v31, 4  ;;  %v6575_v51 = vld [vmem:[%s6720_s27 + $0x90] sm:$0xff]  }
  0xc7   : > { %v3731_v59 = vor.u32 %v3730_v47, %v7501_v21  ;;  %v3708_v38 = vrot.slane %v3707_v1, 4  ;;  %v5216_v45 = vrot.slane %v1198_v20, 9  ;;  %v1320_v15 = vrot.slane %v6630_v40, 5  ;;  %v6574_v1 = vld [vmem:[%s6720_s27 + $0x84] sm:$0xff]  }
  0xc8   : > { %v3739_v47 = vshrl.u32 %v5564_v57, 16  ;;  %v3742_v34 = vshll.u32 %v5564_v57, 16  ;;  %v1319_v27 = vrot.slane %v1317_v48, 4  ;;  %v3748_v61 = vshll.u32 %v7544_v41, 16 }
  0xc9   : > { %v3732_v32 = vrot.slane %v3731_v59, 4  ;;  %v3752_v14 = vshrl.u32 %v7544_v41, 16  ;;  %v3713_v31 = vsel %vm6745_vm2, %v3708_v38, %v3712_v0  ;;  %v7576_v20 = vsel %vm6973_vm6, %v5215_v16, %v1310_v10  ;;  %v7584_v59 = vld [vmem:[%s6720_s27 + $0x4c] sm:$0xf]  ;;  %v5570_v10 = vld [vmem:[%s6720_s27 + $0x54] sm:$0xf] }
  0xca   : > { %v3727_v46 = vsel %vm6745_vm2, %v3722_v39, %v7501_v21  ;;  %v3741_v57 = vrot.slane %v3739_v47, 4  ;;  %v7595_v0 = vld [vmem:[%s6720_s27 + $0x58] sm:$0xf]  ;;  %v7607_v21 = vld [vmem:[%s6720_s27 + $0x44] sm:$0x1]  ;;  %v3772_v39 = vshll.u32 %v7584_v59, 16 }
  0xcb   : > { %v6581_v16 = vld [vmem:[%s8549_s1 + $0x38] sm:$0xff]   ;;  %v3737_v13 = vsel %vm6745_vm2, %v3732_v32, %v3736_v9  ;;  %8577 = vst [vmem:[#allocation6_spill] sm:$0xff] %v7607_v21  ;;  %v3754_v38 = vrot.slane %v3752_v14, 4  ;;  %v3776_v40 = vshrl.u32 %v7584_v59, 16  ;;  %v3787_v9 = vshrl.u32 %v5570_v10, 16 }
  0xcc   : > { %6174 = vmatmul.mubr.msk.bf16.gmra.mrb[12].mxu0 %vm676_vm3, %v6570_v4  ;;  %v8576_v4 = vcombine.low %v7362_v7, %v7376_v17  ;;  %v7564_v7 = vcombine.low %v3679_v3, %v3689_v58  ;;  %v7580_v3 = vsel %vm6973_vm6, %v1312_v50, %v1313_v5  ;;  %v5567_v58 = vld [vmem:[%s6720_s27 + $0x48] sm:$0xf]  ;;  %v7604_v5 = vsel %vm6973_vm6, %v1319_v27, %v1320_v15  ;;  %v7612_v50 = vld [vmem:[%s6720_s27 + $0x90] sm:$0xe]  ;;  %v6631_v27 = vld [vmem:[%s6720_s27 + $0x94] sm:$0xf] }
  0xcd   : > { %6010 = vmatmul.mubr.msk.bf16.gmra.mrb[28].mxu1 %vm676_vm3, %v8575_v28  ;;  %6177 = vmatprep.mubr.msk.bf16.mxu0 %vm676_vm3, %v6572_v43  ;;  %v3703_v43 = vsel %vm6745_vm2, %v3698_v29, %v7484_v25  ;;  %v7591_v25 = vsel %vm6973_vm6, %v5216_v45, %v1317_v48  ;;  %v3744_v29 = vrot.slane %v3742_v34, 5  ;;  %v7609_v48 = vrot.slane %v3748_v61, 5  ;;  %v6636_v41 = vld [vmem:[%s6720_s27 + $0xa4] sm:$0x1] }
  0xce   : > { %6017 = vmatprep.mubr.msk.bf16.mxu1 %vm676_vm3, %v8576_v4  ;;  %v3763_v45 = vshrl.u32 %v5567_v58, 16  ;;  %v3766_v28 = vshll.u32 %v5567_v58, 16  ;;  %v3790_v47 = vshll.u32 %v5570_v10, 16  ;;  %v3796_v15 = vshll.u32 %v7595_v0, 16  ;;  %v5573_v58 = vld [vmem:[%s6720_s27 + $0x60] sm:$0xf] }
  0xcf   : > { %v3800_v34 = vshrl.u32 %v7595_v0, 16  ;;  %v8578_v4 = vcombine.low %v7335_v42, %v7339_v54  ;;  %v7624_v32 = vcombine.low %v3703_v43, %v3713_v31  ;;  %v7628_v61 = vcombine.low %v3727_v46, %v3737_v13  ;;  %v7641_v31 = vld [vmem:[%s6720_s27 + $0x50] sm:$0x1]  ;;  %v7647_v10 = vld [vmem:[%s6720_s27 + $0x64] sm:$0xf] }
  0xd0   : > { %v3758_v14 = vshll.u32 %v7607_v21, 16  ;;  %v8579_v42 = vcombine.low %v7380_v12, %v7384_v11  ;;  %v3768_v46 = vrot.slane %v3766_v28, 5  ;;  %v7644_v12 = vrot.slane %v3772_v39, 5  ;;  %v6632_v28 = vld [vmem:[%s6720_s27 + $0x98] sm:$0x1] }
  0xd1   : > { %v3778_v11 = vrot.slane %v3776_v40, 4  ;;  %v3789_v13 = vrot.slane %v3787_v9, 4  ;;  %v1327_v17 = vrot.slane %v6632_v28, 5  ;;  %v3782_v39 = vshll.u32 %v7641_v31, 16  ;;  %v7659_v40 = vld [vmem:[%s6720_s27 + $0x5c] sm:$0x1] }
  0xd2   : > { %v7653_v54 = vrot.slane %v3758_v14, 5  ;;  %v3811_v8 = vshrl.u32 %v5573_v58, 16  ;;  %v3814_v19 = vshll.u32 %v5573_v58, 16  ;;  %v3820_v9 = vshll.u32 %v7647_v10, 16  ;;  %v6633_v14 = vld [vmem:[%s6720_s27 + $0xa0] sm:$0xf] }
  0xd3   : > { %v1331_v28 = vrot.slane %v6633_v14, 5  ;;  %v3784_v14 = vrot.slane %v3782_v39, 5  ;;  %v5218_v43 = vrot.slane %v1200_v6, 9  ;;  %v1334_v6 = vrot.slane %v6636_v41, 5 }
  0xd4   : > { %6178 = vmatmul.mubr.msk.bf16.gmra.mrb[16].mxu0 %vm676_vm3, %v6574_v1  ;;  %v3745_v1 = vor.u32 %v3744_v29, %v3741_v57  ;;  %v6576_v57 = vld [vmem:[%s6720_s27 + $0x9c] sm:$0xff]   ;;  %v6577_v29 = vld [vmem:[%s6720_s27 + $0xa8] sm:$0xff]  }
  0xd5   : > { %6018 = vmatmul.mubr.msk.bf16.vlgmr.msra.gmra.mrb[0].mxu1 %vm676_vm3, %v8578_v4  ;;  %6181 = vmatprep.mubr.msk.bf16.mxu0 %vm676_vm3, %v6575_v51  ;;  %v3755_v51 = vor.u32 %v3754_v38, %v7609_v48  ;;  %v3792_v38 = vrot.slane %v3790_v47, 5  ;;  %v7651_v4 = vrot.slane %v3796_v15, 5  ;;  %v3824_v47 = vshrl.u32 %v7647_v10, 16 }
  0xd6   : > { %6050 = vmatpush3.bf16.msra.mxu1 %v7252_v63  ;;  %6021 = vmatprep.mubr.msk.bf16.mxu1 %vm676_vm3, %v8579_v42  ;;  %v3765_v63 = vrot.slane %v3763_v45, 4  ;;  %v3802_v42 = vrot.slane %v3800_v34, 4  ;;  %v1324_v45 = vrot.slane %v6631_v27, 5  ;;  %v7664_v15 = vrot.slane %v3745_v1, 4 }
  0xd7   : > { %6051 = vmatprep.subr.bf16.mxu1 %v6581_v16  ;;  %v3779_v27 = vor.u32 %v3778_v11, %v7644_v12  ;;  %v3756_v58 = vrot.slane %v3755_v51, 4  ;;  %v3793_v62 = vor.u32 %v3792_v38, %v3789_v13  ;;  %v6635_v51 = vld [vmem:[%s6720_s27 + $0xac] sm:$0xf]  ;;  %v8582_v38 = vcombine.low %v7409_v18, %v7413_v26 }
  0xd8   : > { %v3769_v34 = vor.u32 %v3768_v46, %v3765_v63  ;;  %v3803_v1 = vor.u32 %v3802_v42, %v7651_v4  ;;  %v3806_v63 = vshll.u32 %v7659_v40, 16  ;;  %v8581_v46 = vcombine.low %v7395_v36, %v7399_v56 }
  0xd9   : > { %v1326_v11 = vrot.slane %v1324_v45, 4  ;;  %v1338_v13 = vrot.slane %v6635_v51, 5  ;;  %v3813_v36 = vrot.slane %v3811_v8, 4  ;;  %v3816_v56 = vrot.slane %v3814_v19, 5  ;;  %v6578_v51 = vld [vmem:[%s6720_s27 + $0xb4] sm:$0xff]   ;;  %v6579_v8 = vld [vmem:[%s6720_s27 + $0xc0] sm:$0xff]  }
  0xda   : > { %6052 = vmatpush3.bf16.msra.mxu1 %v6581_v16  ;;  %v7671_v16 = vld [vmem:[%s8549_s1 + $0x40] sm:$0xff]   ;;  %v7688_v42 = vrot.slane %v3820_v9, 5  ;;  %v3780_v21 = vrot.slane %v3779_v27, 4  ;;  %v1333_v39 = vrot.slane %v1331_v28, 4  ;;  %v3794_v18 = vrot.slane %v3793_v62, 4 }
  0xdb   : > { %8580 = vst [vmem:[#allocation7_spill] sm:$0xff] %v7671_v16  ;;  %6265 = vmatprep.subr.bf16.mxu1 %v7671_v16  ;;  %v7692_v16 = vld [vmem:[%s6720_s27 + $0x68] sm:$0x1]  ;;  %v3804_v26 = vrot.slane %v3803_v1, 4  ;;  %v3751_v19 = vsel %vm6745_vm2, %v7664_v15, %v7609_v48  ;;  %v8584_v9 = vrot.slane %v7612_v50, 9  ;;  %v3761_v62 = vsel %vm6745_vm2, %v3756_v58, %v7653_v54 }
  0xdc   : > { %6182 = vmatmul.mubr.msk.bf16.gmra.mrb[20].mxu0 %vm676_vm3, %v6576_v57  ;;  %v1201_v57 = vld [vmem:[%s6720_s27 + $0xa8] sm:$0xe]  ;;  %8583 = vst [vmem:[#allocation8_spill] sm:$0xff] %v7692_v16  ;;  %v3817_v1 = vor.u32 %v3816_v56, %v3813_v36  ;;  %v1202_v48 = vld [vmem:[%s6720_s27 + $0xb4] sm:$0xe]  ;;  %v7716_v50 = vsel %vm6973_vm6, %v1326_v11, %v1327_v17  ;;  %v7723_v54 = vsel %vm6973_vm6, %v5218_v43, %v1331_v28 }
  0xdd   : > { %6022 = vmatmul.mubr.msk.bf16.gmra.mrb[4].mxu1 %vm676_vm3, %v8581_v46  ;;  %6185 = vmatprep.mubr.msk.bf16.mxu0 %vm676_vm3, %v6577_v29  ;;  %v3826_v46 = vrot.slane %v3824_v47, 4  ;;  %v3770_v29 = vrot.slane %v3769_v34, 4  ;;  %v5219_v53 = vrot.slane %v1201_v57, 9  ;;  %v7704_v41 = vsel %vm6973_vm6, %v8584_v9, %v1324_v45  ;;  %v6637_v34 = vld [vmem:[%s6720_s27 + $0xb0] sm:$0x1] }
  0xde   : > { %6025 = vmatprep.mubr.msk.bf16.mxu1 %vm676_vm3, %v8582_v38  ;;  %v3808_v38 = vrot.slane %v3806_v63, 5  ;;  %v1340_v47 = vrot.slane %v1338_v13, 4  ;;  %v1341_v27 = vrot.slane %v6637_v34, 5  ;;  %v3830_v57 = vshll.u32 %v7692_v16, 16  ;;  %v5576_v15 = vld [vmem:[%s6720_s27 + $0x6c] sm:$0xf] }
  0xdf   : > { %v3827_v63 = vor.u32 %v3826_v46, %v7688_v42  ;;  %v3775_v45 = vsel %vm6745_vm2, %v3770_v29, %v7644_v12  ;;  %v7727_v58 = vsel %vm6973_vm6, %v1333_v39, %v1334_v6  ;;  %v3785_v36 = vsel %vm6745_vm2, %v3780_v21, %v3784_v14  ;;  %v6638_v11 = vld [vmem:[%s6720_s27 + $0xb8] sm:$0xf] }
  0xe0   : > { %v3799_v17 = vsel %vm6745_vm2, %v3794_v18, %v7651_v4  ;;  %v3809_v12 = vsel %vm6745_vm2, %v3804_v26, %v3808_v38  ;;  %v7739_v43 = vsel %vm6973_vm6, %v5219_v53, %v1338_v13  ;;  %v8586_v28 = vcombine.low %v7457_v22, %v7468_v55  ;;  %v7752_v53 = vld [vmem:[%s6720_s27 + $0x70] sm:$0xf]  ;;  %v7776_v18 = vld [vmem:[%s6720_s27 + $0x7c] sm:$0xf]  ;;  %v5582_v26 = vld [vmem:[%s6720_s27 + $0x84] sm:$0xf] }
  0xe1   : > { %8585 = vst [vmem:[#allocation9_spill] sm:$0xff] %v7739_v43  ;;  %v7748_v21 = vsel %vm6973_vm6, %v1340_v47, %v1341_v27  ;;  %v5220_v4 = vrot.slane %v1202_v48, 9  ;;  %v1345_v14 = vrot.slane %v6638_v11, 5  ;;  %8588 = vst [vmem:[#allocation11_spill] sm:$0xff] %v7752_v53  ;;  %v3835_v13 = vshrl.u32 %v5576_v15, 16  ;;  %v6580_v38 = vld [vmem:[%s6720_s27 + $0xcc] sm:$0xff]  }
  0xe2   : > { %8587 = vst [vmem:[#allocation10_spill] sm:$0xff] %v7748_v21  ;;  %v8589_v22 = vcombine.low %v7461_v33, %v7472_v52  ;;  %v7758_v55 = vcombine.low %v3751_v19, %v3761_v62  ;;  %v7760_v56 = vrot.slane %v3817_v1, 4  ;;  %v7762_v46 = vrot.slane %v3827_v63, 4  ;;  %v5579_v52 = vld [vmem:[%s6720_s27 + $0x78] sm:$0xf]  ;;  %8590 = vst [vmem:[#allocation12_spill] sm:$0xff] %v7776_v18 }
  0xe3   : > { %v7764_v29 = vrot.slane %v3830_v57, 5  ;;  %v7768_v6 = vcombine.low %v3775_v45, %v3785_v36  ;;  %v7772_v33 = vcombine.low %v3799_v17, %v3809_v12  ;;  %v7783_v19 = vld [vmem:[%s6720_s27 + $0xbc] sm:$0x1]  ;;  %v3838_v47 = vshll.u32 %v5576_v15, 16  ;;  %v7788_v27 = vld [vmem:[%s6720_s27 + $0x88] sm:$0xf] }
  0xe4   : > { %6186 = vmatmul.mubr.msk.bf16.gmra.mrb[24].mxu0 %vm676_vm3, %v6578_v51  ;;  %v3844_v34 = vshll.u32 %v7752_v53, 16  ;;  %8591 = vst [vmem:[#allocation13_spill] sm:$0xff] %v7788_v27  ;;  %v7792_v62 = vsel %vm6973_vm6, %v5220_v4, %v1345_v14  ;;  %v7794_v1 = vrot.slane %v1345_v14, 4  ;;  %v7796_v63 = vrot.slane %v3835_v13, 4  ;;  %v5585_v48 = vld [vmem:[%s6720_s27 + $0x90] sm:$0xf] }
  0xe5   : > { %6026 = vmatmul.mubr.msk.bf16.gmra.mrb[8].mxu1 %vm676_vm3, %v8586_v28  ;;  %6189 = vmatprep.mubr.msk.bf16.mxu0 %vm676_vm3, %v6579_v8  ;;  %v3848_v57 = vshrl.u32 %v7752_v53, 16  ;;  %v3859_v36 = vshrl.u32 %v5579_v52, 16  ;;  %v3862_v17 = vshll.u32 %v5579_v52, 16  ;;  %v7809_v12 = vld [vmem:[%s6720_s27 + $0x94] sm:$0xf]  ;;  %v3868_v4 = vshll.u32 %v7776_v18, 16 }
  0xe6   : > { %6029 = vmatprep.mubr.msk.bf16.mxu1 %vm676_vm3, %v8589_v22  ;;  %8592 = vst [vmem:[#allocation14_spill] sm:$0xff] %v7809_v12  ;;  %v7812_v28 = vld [vmem:[%s6720_s27 + $0x74] sm:$0x1]  ;;  %v3872_v11 = vshrl.u32 %v7776_v18, 16  ;;  %v3883_v14 = vshrl.u32 %v5582_v26, 16  ;;  %v3886_v13 = vshll.u32 %v5582_v26, 16  ;;  %v8594_v15 = vcombine.low %v7495_v44, %v7514_v35 }
  0xe7   : > { %8593 = vst [vmem:[#allocation15_spill] sm:$0xff] %v7812_v28  ;;  %v3892_v22 = vshll.u32 %v7788_v27, 16  ;;  %v3896_v8 = vshrl.u32 %v7788_v27, 16  ;;  %v3907_v51 = vshrl.u32 %v5585_v48, 16  ;;  %v3910_v52 = vshll.u32 %v5585_v48, 16 }
  0xe8   : > { %v3840_v45 = vrot.slane %v3838_v47, 5  ;;  %v7825_v26 = vrot.slane %v3844_v34, 5  ;;  %v3916_v39 = vshll.u32 %v7809_v12, 16  ;;  %v3920_v9 = vshrl.u32 %v7809_v12, 16  ;;  %v5588_v34 = vld [vmem:[%s6720_s27 + $0x9c] sm:$0xf] }
  0xe9   : > { %v8595_v48 = vcombine.low %v7508_v23, %v7522_v49  ;;  %v3850_v44 = vrot.slane %v3848_v57, 4  ;;  %v3854_v35 = vshll.u32 %v7812_v28, 16  ;;  %v3864_v47 = vrot.slane %v3862_v17, 5  ;;  %v7841_v18 = vld [vmem:[%s6720_s27 + $0x8c] sm:$0x1] }
  0xea   : > { %v3874_v27 = vrot.slane %v3872_v11, 4  ;;  %v3885_v53 = vrot.slane %v3883_v14, 4  ;;  %v3888_v12 = vrot.slane %v3886_v13, 5  ;;  %v7843_v21 = vrot.slane %v3892_v22, 5  ;;  %v7849_v57 = vld [vmem:[%s6720_s27 + $0x98] sm:$0x1] }
  0xeb   : > { %v3898_v23 = vrot.slane %v3896_v8, 4  ;;  %v3909_v49 = vrot.slane %v3907_v51, 4  ;;  %v3912_v43 = vrot.slane %v3910_v52, 5  ;;  %v7851_v28 = vrot.slane %v3916_v39, 5  ;;  %v6584_v51 = vld [vmem:[%s8549_s1 + $0x88] sm:$0xff]  }
  0xec   : > { %6190 = vmatmul.mubr.msk.bf16.gmra.mrb[28].mxu0 %vm676_vm3, %v6580_v38  ;;  %v7828_v38 = vld [vmem:[%s6720_s27 + $0x80] sm:$0x1]  ;;  %v3931_v17 = vshrl.u32 %v5588_v34, 16  ;;  %v3841_v11 = vor.u32 %v3840_v45, %v7796_v63  ;;  %v3851_v16 = vor.u32 %v3850_v44, %v7825_v26  ;;  %v3889_v22 = vor.u32 %v3888_v12, %v3885_v53 }
  0xed   : > { %6030 = vmatmul.mubr.msk.bf16.gmra.mrb[12].mxu1 %vm676_vm3, %v8594_v15  ;;  %6197 = vmatprep.mubr.msk.bf16.mxu0 %vm676_vm3, %v7564_v7  ;;  %v3861_v7 = vrot.slane %v3859_v36, 4  ;;  %v7838_v15 = vrot.slane %v3868_v4, 5  ;;  %v3922_v36 = vrot.slane %v3920_v9, 4  ;;  %v3934_v4 = vshll.u32 %v5588_v34, 16 }
  0xee   : > { %6033 = vmatprep.mubr.msk.bf16.mxu1 %vm676_vm3, %v8595_v48  ;;  %v7846_v48 = vld [vmem:[%s6720_s27 + $0xa0] sm:$0xf]  ;;  %v3878_v13 = vshll.u32 %v7828_v38, 16  ;;  %v3899_v63 = vor.u32 %v3898_v23, %v7843_v21  ;;  %v3902_v45 = vshll.u32 %v7841_v18, 16  ;;  %v3913_v52 = vor.u32 %v3912_v43, %v3909_v49 }
  0xef   : > { %v3865_v14 = vor.u32 %v3864_v47, %v3861_v7  ;;  %v3875_v8 = vor.u32 %v3874_v27, %v7838_v15  ;;  %v3940_v39 = vshll.u32 %v7846_v48, 16  ;;  %v3944_v9 = vshrl.u32 %v7846_v48, 16 }
  0xf0   : > { %v3926_v27 = vshll.u32 %v7849_v57, 16  ;;  %v8596_v44 = vcombine.low %v7526_v24, %v7530_v37  ;;  %v3856_v53 = vrot.slane %v3854_v35, 5  ;;  %v3923_v12 = vor.u32 %v3922_v36, %v7851_v28 }
  0xf1   : > { %v3933_v7 = vrot.slane %v3931_v17, 4  ;;  %v8597_v47 = vcombine.low %v7576_v20, %v7580_v3  ;;  %v3842_v43 = vrot.slane %v3841_v11, 4  ;;  %v3852_v24 = vrot.slane %v3851_v16, 4  ;;  %v7886_v16 = vld [vmem:[%s6720_s27 + $0xac] sm:$0xf] }
  0xf2   : > { %v3866_v37 = vrot.slane %v3865_v14, 4  ;;  %v3880_v34 = vrot.slane %v3878_v13, 5  ;;  %v3876_v35 = vrot.slane %v3875_v8, 4  ;;  %v3890_v23 = vrot.slane %v3889_v22, 4 }
  0xf3   : > { %v7880_v49 = vrot.slane %v3940_v39, 5  ;;  %v3946_v36 = vrot.slane %v3944_v9, 4  ;;  %v3900_v17 = vrot.slane %v3899_v63, 4  ;;  %v3904_v20 = vrot.slane %v3902_v45, 5 }
  0xf4   : > { %6198 = vmatmul.mubr.msk.bf16.vlgmr.msra.gmra.mrb[0].mxu0 %vm676_vm3, %v7624_v32  ;;  %v3936_v32 = vrot.slane %v3934_v4, 5  ;;  %v3914_v3 = vrot.slane %v3913_v52, 4  ;;  %v3928_v4 = vrot.slane %v3926_v27, 5  ;;  %v8598_v8 = vrot.slane %v7783_v19, 5 }
  0xf5   : > { %6034 = vmatmul.mubr.msk.bf16.gmra.mrb[16].mxu1 %vm676_vm3, %v8596_v44  ;;  %6230 = vmatpush3.bf16.msra.mxu0 %v7390_v60  ;;  %v5591_v60 = vld [vmem:[%s6720_s27 + $0xa8] sm:$0xf]  ;;  %v7883_v44 = vld [vmem:[%s6720_s27 + $0xa4] sm:$0x1]  ;;  %v3847_v39 = vsel %vm6745_vm2, %v3842_v43, %v7825_v26  ;;  %v3871_v9 = vsel %vm6745_vm2, %v3866_v37, %v7838_v15  ;;  %v3881_v19 = vsel %vm6745_vm2, %v3876_v35, %v3880_v34  ;;  %v3964_v52 = vshll.u32 %v7886_v16, 16 }
  0xf6   : > { %6037 = vmatprep.mubr.msk.bf16.mxu1 %vm676_vm3, %v8597_v47  ;;  %6201 = vmatprep.mubr.msk.bf16.mxu0 %vm676_vm3, %v7628_v61  ;;  %v3924_v61 = vrot.slane %v3923_v12, 4  ;;  %v3937_v11 = vor.u32 %v3936_v32, %v3933_v7  ;;  %v3955_v14 = vshrl.u32 %v5591_v60, 16  ;;  %v3958_v13 = vshll.u32 %v5591_v60, 16 }
  0xf7   : > { %6231 = vmatprep.subr.bf16.mxu0 %v6584_v51  ;;  %v7893_v22 = vsel %vm6973_vm6, %v7794_v1, %v8598_v8  ;;  %v3895_v1 = vsel %vm6745_vm2, %v3890_v23, %v7843_v21  ;;  %v3947_v63 = vor.u32 %v3946_v36, %v7880_v49  ;;  %v3950_v45 = vshll.u32 %v7883_v44, 16  ;;  %v5645_v21 = vld [vmem:[%s6720_s27 + $0x48] sm:$0xe]  ;;  %v5648_v8 = vld [vmem:[%s6720_s27 + $0x6c] sm:$0xe] }
  0xf8   : > { %v3905_v26 = vsel %vm6745_vm2, %v3900_v17, %v3904_v20  ;;  %v3919_v15 = vsel %vm6745_vm2, %v3914_v3, %v7851_v28  ;;  %v3968_v27 = vshrl.u32 %v7886_v16, 16  ;;  %v3938_v12 = vrot.slane %v3937_v11, 4  ;;  %v7929_v28 = vld [vmem:[%s6720_s27 + $0xb0] sm:$0x1] }
  0xf9   : > { %6232 = vmatpush3.bf16.msra.mxu0 %v6584_v51  ;;  %v3857_v51 = vsel %vm6745_vm2, %v3852_v24, %v3856_v53  ;;  %v8599_v53 = vcombine.low %v7591_v25, %v7604_v5  ;;  %v3957_v7 = vrot.slane %v3955_v14, 4  ;;  %v3960_v32 = vrot.slane %v3958_v13, 5 }
  0xfa   : > { %v8600_v47 = vcombine.low %v7704_v41, %v7716_v50  ;;  %v8601_v25 = vsel %vm6745_vm2, %v7762_v46, %v7764_v29  ;;  %v8602_v5 = vsel %vm6745_vm2, %v7760_v56, %v7688_v42  ;;  %v5240_v43 = vcombine.low %v7792_v62, %v7893_v22  ;;  %v5594_v50 = vld [vmem:[%s6720_s27 + $0xb4] sm:$0xf] }
  0xfb   : > { %v7947_v24 = vcombine.low %v3847_v39, %v3857_v51  ;;  %v7949_v41 = vcombine.low %v3871_v9, %v3881_v19  ;;  %v7952_v37 = vcombine.low %v3895_v1, %v3905_v26  ;;  %v3948_v34 = vrot.slane %v3947_v63, 4  ;;  %v5646_v29 = vld [vmem:[%s6720_s27 + $0x54] sm:$0xe] }
  0xfc   : > { %6202 = vmatmul.mubr.msk.bf16.gmra.mrb[4].mxu0 %vm676_vm3, %v7758_v55  ;;  %v3929_v55 = vsel %vm6745_vm2, %v3924_v61, %v3928_v4  ;;  %v3952_v60 = vrot.slane %v3950_v45, 5  ;;  %v5661_v46 = vrot.slane %v5645_v21, 9  ;;  %v7957_v42 = vrot.slane %v3964_v52, 5  ;;  %v5647_v4 = vld [vmem:[%s6720_s27 + $0x60] sm:$0xe]  ;;  %v8604_v45 = vld [vmem:[#allocation8_spill] sm:$0xff] }
  0xfd   : > { %6038 = vmatmul.mubr.msk.bf16.gmra.mrb[20].mxu1 %vm676_vm3, %v8599_v53  ;;  %6205 = vmatprep.mubr.msk.bf16.mxu0 %vm676_vm3, %v7768_v6  ;;  %v5613_v6 = vcombine.low %v8602_v5, %v8601_v25  ;;  %v7955_v35 = vcombine.low %v3919_v15, %v3929_v55  ;;  %v3970_v56 = vrot.slane %v3968_v27, 4  ;;  %v3974_v23 = vshll.u32 %v7929_v28, 16  ;;  %v8605_v52 = vld [vmem:[#allocation9_spill] sm:$0xff]  ;;  %v8606_v27 = vld [vmem:[#allocation10_spill] sm:$0xff]  ;;  %v8608_v53 = vld [vmem:[#allocation11_spill] sm:$0xff] }
  0xfe   : > { %6041 = vmatprep.mubr.msk.bf16.mxu1 %vm676_vm3, %v8600_v47  ;;  %v3943_v36 = vsel %vm6745_vm2, %v3938_v12, %v7880_v49  ;;  %v3961_v17 = vor.u32 %v3960_v32, %v3957_v7  ;;  %v4450_v20 = vrot.slane %v7584_v59, 5  ;;  %v4453_v3 = vrot.slane %v7641_v31, 5  ;;  %v7979_v31 = vld [vmem:[%s6720_s27 + $0xb8] sm:$0xf]  ;;  %v8609_v12 = vld [vmem:[#allocation15_spill] sm:$0xff] }
  0xff   : > { %v3979_v61 = vshrl.u32 %v5594_v50, 16  ;;  %v5662_v11 = vrot.slane %v5646_v29, 9  ;;  %v4457_v14 = vrot.slane %v7595_v0, 5  ;;  %v4460_v13 = vrot.slane %v7659_v40, 5  ;;  %v5597_v32 = vld [vmem:[%s6720_s27 + $0xc0] sm:$0xf] }
 0x100   : > { %v3953_v39 = vsel %vm6745_vm2, %v3948_v34, %v3952_v60  ;;  %v3982_v51 = vshll.u32 %v5594_v50, 16  ;;  %v7973_v49 = vsel %vm6973_vm6, %v5661_v46, %v4450_v20  ;;  %v4452_v9 = vrot.slane %v4450_v20, 4  ;;  %v5649_v46 = vld [vmem:[%s6720_s27 + $0x78] sm:$0xe] }
 0x101   : > { %v3971_v59 = vor.u32 %v3970_v56, %v7957_v42  ;;  %v7983_v0 = vsel %vm6973_vm6, %v5662_v11, %v4457_v14  ;;  %v4459_v40 = vrot.slane %v4457_v14, 4  ;;  %v5663_v19 = vrot.slane %v5647_v4, 9  ;;  %v6583_v4 = vld [vmem:[%s6720_s27 + $0xc] sm:$0xff]  }
 0x102   : > { %v8603_v1 = vcombine.low %v7723_v54, %v7727_v58  ;;  %v4464_v63 = vrot.slane %v7647_v10, 5  ;;  %v4467_v26 = vrot.slane %v8604_v45, 5  ;;  %v5664_v15 = vrot.slane %v5648_v8, 9 }
 0x103   : > { %v8607_v21 = vcombine.low %v8605_v52, %v8606_v27  ;;  %v8004_v58 = vsel %vm6973_vm6, %v4459_v40, %v4460_v13  ;;  %v4471_v55 = vrot.slane %v8608_v53, 5  ;;  %v4474_v10 = vrot.slane %v8609_v12, 5  ;;  %v8041_v13 = vld [vmem:[%s6720_s27 + $0xc4] sm:$0xf]  ;;  %v8611_v52 = vld [vmem:[#allocation3_spill] sm:$0xff]  ;;  %v8612_v27 = vld [vmem:[#allocation4_spill] sm:$0xff] }
 0x104   : > { %6206 = vmatmul.mubr.msk.bf16.gmra.mrb[8].mxu0 %vm676_vm3, %v7772_v33  ;;  %v7992_v33 = vsel %vm6973_vm6, %v4452_v9, %v4453_v3  ;;  %v3988_v7 = vshll.u32 %v7979_v31, 16  ;;  %v5682_v47 = vcombine.low %v7983_v0, %v8004_v58  ;;  %v8014_v25 = vsel %vm6973_vm6, %v5663_v19, %v4464_v63  ;;  %v5356_v3 = vld [vmem:[%s6720_s27 + $0x78] sm:$0xf]  ;;  %v8610_v19 = vld [vmem:[#allocation12_spill] sm:$0xff]  ;;  %v6651_v58 = vld [vmem:[%s6720_s27 + $0xa0] sm:$0xf] }
 0x105   : > { %6042 = vmatmul.mubr.msk.bf16.gmra.mrb[24].mxu1 %vm676_vm3, %v8603_v1  ;;  %6209 = vmatprep.mubr.msk.bf16.mxu0 %vm676_vm3, %v5613_v6  ;;  %v5681_v54 = vcombine.low %v7973_v49, %v7992_v33  ;;  %v4466_v5 = vrot.slane %v4464_v63, 4  ;;  %v8016_v6 = vrot.slane %v3974_v23, 5  ;;  %v3992_v50 = vshrl.u32 %v7979_v31, 16  ;;  %v8613_v12 = vld [vmem:[#allocation13_spill] sm:$0xff] }
 0x106   : > { %6045 = vmatprep.mubr.msk.bf16.mxu1 %vm676_vm3, %v8607_v21  ;;  %v8021_v34 = vsel %vm6973_vm6, %v5664_v15, %v4471_v55  ;;  %v4473_v60 = vrot.slane %v4471_v55, 4  ;;  %v8024_v29 = vcombine.low %v3943_v36, %v3953_v39  ;;  %v8026_v56 = vrot.slane %v3961_v17, 4 }
 0x107   : > { %v8028_v20 = vrot.slane %v3979_v61, 4  ;;  %v8032_v23 = vsel %vm6973_vm6, %v4466_v5, %v4467_v26  ;;  %v8036_v11 = vrot.slane %v3971_v59, 4  ;;  %v8038_v14 = vrot.slane %v3982_v51, 5  ;;  %v5650_v59 = vld [vmem:[%s6720_s27 + $0x84] sm:$0xe] }
 0x108   : > { %v5683_v36 = vcombine.low %v8014_v25, %v8032_v23  ;;  %v8047_v17 = vsel %vm6973_vm6, %v4473_v60, %v4474_v10  ;;  %v8049_v61 = vrot.slane %v3988_v7, 5  ;;  %v4003_v8 = vshrl.u32 %v5597_v32, 16  ;;  %v8057_v51 = vld [vmem:[%s6720_s27 + $0xbc] sm:$0x1]  ;;  %v5600_v5 = vld [vmem:[%s6720_s27 + $0xcc] sm:$0xf] }
 0x109   : > { %v5684_v39 = vcombine.low %v8021_v34, %v8047_v17  ;;  %v5665_v9 = vrot.slane %v5649_v46, 9  ;;  %v4006_v40 = vshll.u32 %v5597_v32, 16  ;;  %v4478_v1 = vrot.slane %v8610_v19, 5  ;;  %v6585_v46 = vld [vmem:[%s6720_s27 + $0x18] sm:$0xff]   ;;  %v5651_v19 = vld [vmem:[%s6720_s27 + $0x90] sm:$0xe] }
 0x10a   : > { %v4481_v63 = vrot.slane %v7828_v38, 5  ;;  %v2292_v45 = vshrl.u32 %v5356_v3, 16  ;;  %v4012_v26 = vshll.u32 %v8041_v13, 16  ;;  %v2295_v15 = vshll.u32 %v5356_v3, 16  ;;  %v6655_v17 = vld [vmem:[%s6720_s27 + $0xac] sm:$0xf] }
 0x10b   : > { %v2314_v38 = vsel %vm6745_vm2, %v8612_v27, %v8611_v52  ;;  %v8076_v62 = vsel %vm6973_vm6, %v5665_v9, %v4478_v1  ;;  %v4480_v22 = vrot.slane %v4478_v1, 4  ;;  %v3994_v21 = vrot.slane %v3992_v50, 4  ;;  %v8614_v27 = vld [vmem:[#allocation14_spill] sm:$0xff] }
 0x10c   : > { %6210 = vmatmul.mubr.msk.bf16.gmra.mrb[12].mxu0 %vm676_vm3, %v7947_v24  ;;  %v4016_v24 = vshrl.u32 %v8041_v13, 16  ;;  %v3998_v53 = vshll.u32 %v8057_v51, 16  ;;  %v2297_v55 = vrot.slane %v2295_v15, 5  ;;  %v4485_v10 = vrot.slane %v8613_v12, 5 }
 0x10d   : > { %6046 = vmatmul.mubr.msk.bf16.gmra.mrb[28].mxu1 %vm676_vm3, %v5240_v43  ;;  %6213 = vmatprep.mubr.msk.bf16.mxu0 %vm676_vm3, %v7949_v41  ;;  %v2294_v43 = vrot.slane %v2292_v45, 4  ;;  %v5666_v41 = vrot.slane %v5650_v59, 9  ;;  %v3967_v7 = vsel %vm6745_vm2, %v8026_v56, %v7957_v42  ;;  %v3985_v32 = vor.u32 %v8038_v14, %v8028_v20  ;;  %v6586_v42 = vld [vmem:[%s6720_s27 + $0x24] sm:$0xff]   ;;  %v8100_v14 = vld [vmem:[%s6720_s27 + $0xd0] sm:$0xf] }
 0x10e   : > { %6053 = vmatprep.mubr.msk.bf16.mxu1 %vm676_vm3, %v6583_v4  ;;  %v8089_v60 = vsel %vm6973_vm6, %v4480_v22, %v4481_v63  ;;  %v4488_v50 = vrot.slane %v7841_v18, 5  ;;  %v4005_v3 = vrot.slane %v4003_v8, 4  ;;  %v4008_v4 = vrot.slane %v4006_v40, 5  ;;  %v8112_v40 = vld [vmem:[%s6720_s27 + $0xc8] sm:$0x1] }
 0x10f   : > { %v5685_v9 = vcombine.low %v8076_v62, %v8089_v60  ;;  %v2298_v59 = vor.u32 %v2297_v55, %v2294_v43  ;;  %v8097_v56 = vrot.slane %v4012_v26, 5  ;;  %v4018_v20 = vrot.slane %v4016_v24, 4  ;;  %v8615_v43 = vld [vmem:[#allocation2_spill] sm:$0xff] }
 0x110   : > { %v8104_v1 = vsel %vm6973_vm6, %v5666_v41, %v4485_v10  ;;  %v4487_v63 = vrot.slane %v4485_v10, 4  ;;  %v3977_v18 = vsel %vm6745_vm2, %v8036_v11, %v8016_v6  ;;  %v3995_v8 = vor.u32 %v3994_v21, %v8049_v61  ;;  %v8616_v21 = vld [vmem:[#allocation7_spill] sm:$0xff] }
 0x111   : > { %v4027_v45 = vshrl.u32 %v5600_v5, 16  ;;  %v2299_v26 = vrot.slane %v2298_v59, 4  ;;  %v4030_v24 = vshll.u32 %v5600_v5, 16  ;;  %v5667_v52 = vrot.slane %v5651_v19, 9 }
 0x112   : > { %v8118_v15 = vsel %vm6973_vm6, %v4487_v63, %v4488_v50  ;;  %v4492_v22 = vrot.slane %v8614_v27, 5  ;;  %v4036_v6 = vshll.u32 %v8100_v14, 16  ;;  %v4040_v11 = vshrl.u32 %v8100_v14, 16  ;;  %v6640_v50 = vld [vmem:[%s8549_s1 + $0x48] sm:$0xff]   ;;  %v6587_v63 = vld [vmem:[%s6720_s27 + $0x30] sm:$0xff]  }
 0x113   : > { %v5686_v41 = vcombine.low %v8104_v1, %v8118_v15  ;;  %v4009_v55 = vor.u32 %v4008_v4, %v4005_v3  ;;  %v4022_v12 = vshll.u32 %v8112_v40, 16  ;;  %v4000_v5 = vrot.slane %v3998_v53, 5  ;;  %v8148_v53 = vld [vmem:[%s6720_s27 + $0xd4] sm:$0x1] }
 0x114   : > { %6214 = vmatmul.mubr.msk.bf16.gmra.mrb[16].mxu0 %vm676_vm3, %v7952_v37  ;;  %v2304_v37 = vsel %vm6745_vm2, %v2299_v26, %v8615_v43  ;;  %v4494_v59 = vrot.slane %v4492_v22, 4  ;;  %v4495_v3 = vrot.slane %v7849_v57, 5  ;;  %v5619_v4 = vcombine.low %v3967_v7, %v3977_v18 }
 0x115   : > { %6054 = vmatmul.mubr.msk.bf16.vlgmr.msra.gmra.mrb[0].mxu1 %vm676_vm3, %v6585_v46  ;;  %6217 = vmatprep.mubr.msk.bf16.mxu0 %vm676_vm3, %v7955_v35  ;;  %v4019_v35 = vor.u32 %v4018_v20, %v8097_v56  ;;  %v8135_v10 = vcombine.low %v2304_v37, %v2314_v38  ;;  %v8142_v46 = vsel %vm6973_vm6, %v5667_v52, %v4492_v22  ;;  %v3986_v19 = vrot.slane %v3985_v32, 4  ;;  %v5652_v38 = vld [vmem:[%s6720_s27 + $0x9c] sm:$0xe] }
 0x116   : > { %6267 = vmatpush3.bf16.msra.mxu1 %v8616_v21  ;;  %6057 = vmatprep.mubr.msk.bf16.mxu1 %vm676_vm3, %v6586_v42  ;;  %v3996_v42 = vrot.slane %v3995_v8, 4  ;;  %v4029_v20 = vrot.slane %v4027_v45, 4  ;;  %v4032_v26 = vrot.slane %v4030_v24, 5  ;;  %v8150_v27 = vrot.slane %v4036_v6, 5  ;;  %v6588_v52 = vld [vmem:[%s6720_s27 + $0x3c] sm:$0xff]  }
 0x117   : > { %6266 = vmatprep.subr.bf16.mxu1 %v6640_v50  ;;  %v4042_v43 = vrot.slane %v4040_v11, 4  ;;  %v8154_v37 = vsel %vm6973_vm6, %v4494_v59, %v4495_v3  ;;  %v4010_v22 = vrot.slane %v4009_v55, 4  ;;  %v4020_v57 = vrot.slane %v4019_v35, 4  ;;  %v5641_v21 = vld [vmem:[%s6720_s27 + $0x18] sm:$0xe] }
 0x118   : > { %v4024_v7 = vrot.slane %v4022_v12, 5  ;;  %v5687_v32 = vcombine.low %v8142_v46, %v8154_v37  ;;  %v5668_v18 = vrot.slane %v5652_v38, 9  ;;  %v4499_v8 = vrot.slane %v7846_v48, 5  ;;  %v6641_v12 = vld [vmem:[%s6720_s27 + $0x1c] sm:$0xf] }
 0x119   : > { %v3991_v45 = vsel %vm6745_vm2, %v3986_v19, %v8049_v61  ;;  %v4001_v24 = vsel %vm6745_vm2, %v3996_v42, %v4000_v5  ;;  %v4046_v6 = vshll.u32 %v8148_v53, 16  ;;  %v4502_v11 = vrot.slane %v7883_v44, 5  ;;  %v5653_v59 = vld [vmem:[%s6720_s27 + $0xa8] sm:$0xe] }
 0x11a   : > { %6268 = vmatpush3.bf16.msra.mxu1 %v6640_v50  ;;  %v4033_v48 = vor.u32 %v4032_v26, %v4029_v20  ;;  %v8175_v61 = vsel %vm6973_vm6, %v5668_v18, %v4499_v8  ;;  %v4501_v55 = vrot.slane %v4499_v8, 4  ;;  %v4015_v44 = vsel %vm6745_vm2, %v4010_v22, %v8097_v56  ;;  %v6589_v20 = vld [vmem:[%s6720_s27 + $0x48] sm:$0xff]   ;;  %v6642_v26 = vld [vmem:[%s6720_s27 + $0x20] sm:$0x1]  ;;  %v5654_v8 = vld [vmem:[%s6720_s27 + $0xb4] sm:$0xe] }
 0x11b   : > { %v4025_v35 = vsel %vm6745_vm2, %v4020_v57, %v4024_v7  ;;  %v4422_v5 = vrot.slane %v6641_v12, 5  ;;  %v5620_v3 = vcombine.low %v3991_v45, %v4001_v24  ;;  %v5657_v19 = vrot.slane %v5641_v21, 9  ;;  %v5643_v12 = vld [vmem:[%s6720_s27 + $0x30] sm:$0xe] }
 0x11c   : > { %6218 = vmatmul.mubr.msk.bf16.gmra.mrb[20].mxu0 %vm676_vm3, %v8024_v29  ;;  %v4043_v29 = vor.u32 %v4042_v43, %v8150_v27  ;;  %v8186_v50 = vsel %vm6973_vm6, %v4501_v55, %v4502_v11  ;;  %v5621_v56 = vcombine.low %v4015_v44, %v4025_v35  ;;  %v4034_v38 = vrot.slane %v4033_v48, 4  ;;  %v5642_v11 = vld [vmem:[%s6720_s27 + $0x24] sm:$0xe]  ;;  %v6643_v48 = vld [vmem:[%s6720_s27 + $0x28] sm:$0xf] }
 0x11d   : > { %6058 = vmatmul.mubr.msk.bf16.gmra.mrb[4].mxu1 %vm676_vm3, %v6587_v63  ;;  %6221 = vmatprep.mubr.msk.bf16.mxu0 %vm676_vm3, %v5619_v4  ;;  %v4048_v4 = vrot.slane %v4046_v6, 5  ;;  %v5688_v42 = vcombine.low %v8175_v61, %v8186_v50  ;;  %v4425_v43 = vrot.slane %v6642_v26, 5  ;;  %v4424_v22 = vrot.slane %v4422_v5, 4  ;;  %v6644_v55 = vld [vmem:[%s6720_s27 + $0x34] sm:$0xf] }
 0x11e   : > { %6061 = vmatprep.mubr.msk.bf16.mxu1 %vm676_vm3, %v6588_v52  ;;  %v4044_v63 = vrot.slane %v4043_v29, 4  ;;  %v6590_v52 = vld [vmem:[%s6720_s27 + $0x54] sm:$0xff]   ;;  %v5669_v57 = vrot.slane %v5653_v59, 9  ;;  %v4506_v7 = vrot.slane %v7886_v16, 5  ;;  %v4509_v18 = vrot.slane %v7929_v28, 5 }
 0x11f   : > { %v4039_v16 = vsel %vm6745_vm2, %v4034_v38, %v8150_v27  ;;  %v4423_v6 = vsel %vm6973_vm6, %v5657_v19, %v4422_v5  ;;  %v4429_v29 = vrot.slane %v6643_v48, 5  ;;  %v4426_v21 = vsel %vm6973_vm6, %v4424_v22, %v4425_v43  ;;  %v6645_v19 = vld [vmem:[%s6720_s27 + $0x2c] sm:$0x1]  ;;  %v6591_v38 = vld [vmem:[%s6720_s27 + $0x60] sm:$0xff]   ;;  %v6660_v61 = vld [vmem:[%s6720_s27 + $0xc8] sm:$0x1] }
 0x120   : > { %v8200_v45 = vsel %vm6973_vm6, %v5669_v57, %v4506_v7  ;;  %v4508_v24 = vrot.slane %v4506_v7, 4  ;;  %v4049_v28 = vsel %vm6745_vm2, %v4044_v63, %v4048_v4  ;;  %v4436_v44 = vrot.slane %v6644_v55, 5  ;;  %v6592_v22 = vld [vmem:[%s6720_s27 + $0x6c] sm:$0xff]  }
 0x121   : > { %v5670_v35 = vrot.slane %v5654_v8, 9  ;;  %v4513_v59 = vrot.slane %v7979_v31, 5  ;;  %v5658_v4 = vrot.slane %v5642_v11, 9  ;;  %v5677_v63 = vcombine.low %v4423_v6, %v4426_v21  ;;  %v6646_v31 = vld [vmem:[%s6720_s27 + $0x38] sm:$0x1] }
 0x122   : > { %v8219_v27 = vsel %vm6973_vm6, %v4508_v24, %v4509_v18  ;;  %v4431_v26 = vrot.slane %v4429_v29, 4  ;;  %v5659_v57 = vrot.slane %v5643_v12, 9  ;;  %v4438_v7 = vrot.slane %v4436_v44, 4  ;;  %v5655_v8 = vld [vmem:[%s6720_s27 + $0xc0] sm:$0xe]  ;;  %v8617_v6 = vld [vmem:[#allocation5_spill] sm:$0xff] }
 0x123   : > { %v5689_v5 = vcombine.low %v8200_v45, %v8219_v27  ;;  %v8230_v43 = vsel %vm6973_vm6, %v5670_v35, %v4513_v59  ;;  %v4439_v18 = vrot.slane %v6646_v31, 5  ;;  %v4443_v11 = vrot.slane %v8617_v6, 5  ;;  %v5644_v35 = vld [vmem:[%s6720_s27 + $0x3c] sm:$0xe]  ;;  %v6647_v6 = vld [vmem:[%s6720_s27 + $0x70] sm:$0xf] }
 0x124   : > { %6222 = vmatmul.mubr.msk.bf16.gmra.mrb[24].mxu0 %vm676_vm3, %v5620_v3  ;;  %v5622_v3 = vcombine.low %v4039_v16, %v4049_v28  ;;  %v4430_v16 = vsel %vm6973_vm6, %v5658_v4, %v4429_v29  ;;  %v5671_v48 = vrot.slane %v5655_v8, 9  ;;  %v4437_v21 = vsel %vm6973_vm6, %v5659_v57, %v4436_v44  ;;  %v5353_v4 = vld [vmem:[%s6720_s27 + $0x6c] sm:$0xf] }
 0x125   : > { %6062 = vmatmul.mubr.msk.bf16.gmra.mrb[8].mxu1 %vm676_vm3, %v6589_v20  ;;  %6225 = vmatprep.mubr.msk.bf16.mxu0 %vm676_vm3, %v5621_v56  ;;  %v4432_v20 = vrot.slane %v6645_v19, 5  ;;  %v4516_v56 = vrot.slane %v8057_v51, 5  ;;  %v4440_v55 = vsel %vm6973_vm6, %v4438_v7, %v4439_v18  ;;  %v4520_v12 = vrot.slane %v8041_v13, 5 }
 0x126   : > { %6065 = vmatprep.mubr.msk.bf16.mxu1 %vm676_vm3, %v6590_v52  ;;  %v4515_v52 = vrot.slane %v4513_v59, 4  ;;  %v4523_v29 = vrot.slane %v8112_v40, 5  ;;  %v5656_v59 = vld [vmem:[%s6720_s27 + $0xcc] sm:$0xe]  ;;  %v4445_v44 = vrot.slane %v4443_v11, 4  ;;  %v2268_v57 = vshrl.u32 %v5353_v4, 16 }
 0x127   : > { %v4433_v28 = vsel %vm6973_vm6, %v4431_v26, %v4432_v20  ;;  %v8261_v19 = vsel %vm6973_vm6, %v5671_v48, %v4520_v12  ;;  %v4522_v20 = vrot.slane %v4520_v12, 4  ;;  %v8618_v26 = vld [vmem:[#allocation6_spill] sm:$0xff]  ;;  %v5672_v40 = vrot.slane %v5656_v59, 9 }
 0x128   : > { %v8237_v24 = vsel %vm6973_vm6, %v4515_v52, %v4516_v56  ;;  %v6593_v56 = vld [vmem:[%s6720_s27 + $0x78] sm:$0xff]   ;;  %v4446_v52 = vrot.slane %v8618_v26, 5  ;;  %v2271_v7 = vshll.u32 %v5353_v4, 16  ;;  %v4527_v18 = vrot.slane %v8100_v14, 5 }
 0x129   : > { %v5690_v51 = vcombine.low %v8230_v43, %v8237_v24  ;;  %v8268_v13 = vsel %vm6973_vm6, %v4522_v20, %v4523_v29  ;;  %v4530_v8 = vrot.slane %v8148_v53, 5  ;;  %v2277_v48 = vshll.u32 %v6647_v6, 16  ;;  %v6595_v29 = vld [vmem:[%s6720_s27 + $0x90] sm:$0xff]   ;;  %v6596_v20 = vld [vmem:[%s6720_s27 + $0x9c] sm:$0xff]  }
 0x12a   : > { %v5691_v31 = vcombine.low %v8261_v19, %v8268_v13  ;;  %v8285_v14 = vsel %vm6973_vm6, %v5672_v40, %v4527_v18  ;;  %v4529_v53 = vrot.slane %v4527_v18, 4  ;;  %v5362_v18 = vld [vmem:[%s6720_s27 + $0x90] sm:$0xf]  ;;  %v2455_v50 = vshll.u32 %v6660_v61, 16 }
 0x12b   : > { %v2279_v59 = vrot.slane %v2277_v48, 5 }
 0x12c   : > { %6226 = vmatmul.mubr.msk.bf16.gmra.mrb[28].mxu0 %vm676_vm3, %v5622_v3  ;;  %v5678_v3 = vcombine.low %v4430_v16, %v4433_v28  ;;  %v4447_v28 = vsel %vm6973_vm6, %v4445_v44, %v4446_v52 }
 0x12d   : > { %6066 = vmatmul.mubr.msk.bf16.gmra.mrb[12].mxu1 %vm676_vm3, %v6591_v38  ;;  %6233 = vmatprep.mubr.msk.bf16.mxu0 %vm676_vm3, %v5677_v63  ;;  %v5679_v38 = vcombine.low %v4437_v21, %v4440_v55  ;;  %v5660_v63 = vrot.slane %v5644_v35, 9  ;;  %v2281_v21 = vshrl.u32 %v6647_v6, 16  ;;  %v2270_v55 = vrot.slane %v2268_v57, 4  ;;  %v6598_v6 = vld [vmem:[%s6720_s27 + $0xb4] sm:$0xff]  }
 0x12e   : > { %6069 = vmatprep.mubr.msk.bf16.mxu1 %vm676_vm3, %v6592_v22  ;;  %v6594_v22 = vld [vmem:[%s6720_s27 + $0x84] sm:$0xff]   ;;  %v2273_v35 = vrot.slane %v2271_v7, 5 }
 0x12f   : > { %v4444_v16 = vsel %vm6973_vm6, %v5660_v63, %v4443_v11  ;;  %v8289_v11 = vsel %vm6973_vm6, %v4529_v53, %v4530_v8  ;;  %v6648_v63 = vld [vmem:[%s6720_s27 + $0x74] sm:$0x1]  ;;  %v6597_v8 = vld [vmem:[%s6720_s27 + $0xa8] sm:$0xff]   ;;  %v2340_v53 = vshrl.u32 %v5362_v18, 16 }
 0x130   : > { %v5680_v12 = vcombine.low %v4444_v16, %v4447_v28  ;;  %v5692_v4 = vcombine.low %v8285_v14, %v8289_v11  ;;  %v2287_v44 = vshll.u32 %v6648_v63, 16  ;;  %v5365_v28 = vld [vmem:[%s6720_s27 + $0x9c] sm:$0xf]  ;;  %v6652_v63 = vld [vmem:[%s6720_s27 + $0x8c] sm:$0x1] }
 0x132   : > { %v2289_v49 = vrot.slane %v2287_v44, 5  ;;  %v2335_v44 = vshll.u32 %v6652_v63, 16 }
 0x134   : > { %6234 = vmatmul.mubr.msk.bf16.vlgmr.msra.gmra.mrb[0].mxu0 %vm676_vm3, %v5678_v3  ;;  %v2283_v3 = vrot.slane %v2281_v21, 4 }
 0x135   : > { %6070 = vmatmul.mubr.msk.bf16.gmra.mrb[16].mxu1 %vm676_vm3, %v6593_v56  ;;  %6237 = vmatprep.mubr.msk.bf16.mxu0 %vm676_vm3, %v5679_v38  ;;  %v5359_v56 = vld [vmem:[%s6720_s27 + $0x84] sm:$0xf]  ;;  %v2274_v38 = vor.u32 %v2273_v35, %v2270_v55  ;;  %v2343_v55 = vshll.u32 %v5362_v18, 16 }
 0x136   : > { %6073 = vmatprep.mubr.msk.bf16.mxu1 %vm676_vm3, %v6594_v22  ;;  %v2284_v2 = vor.u32 %v2283_v3, %v2279_v59  ;;  %v2316_v26 = vshrl.u32 %v5359_v56, 16  ;;  %v2319_v52 = vshll.u32 %v5359_v56, 16  ;;  %v6649_v22 = vld [vmem:[%s6720_s27 + $0x88] sm:$0xf]  ;;  %v2367_v56 = vshll.u32 %v5365_v28, 16 }
 0x137   : > { %v2325_v40 = vshll.u32 %v6649_v22, 16  ;;  %v2329_v57 = vshrl.u32 %v6649_v22, 16  ;;  %v2275_v7 = vrot.slane %v2274_v38, 4  ;;  %v2373_v38 = vshll.u32 %v6651_v58, 16 }
 0x138   : > { %v2285_v16 = vrot.slane %v2284_v2, 4  ;;  %v2318_v33 = vrot.slane %v2316_v26, 4  ;;  %v2342_v26 = vrot.slane %v2340_v53, 4  ;;  %v2345_v25 = vrot.slane %v2343_v55, 5  ;;  %v6654_v55 = vld [vmem:[%s6720_s27 + $0xa4] sm:$0x1] }
 0x139   : > { %v8309_v48 = vrot.slane %v2325_v40, 5  ;;  %v2331_v21 = vrot.slane %v2329_v57, 4  ;;  %v2280_v35 = vsel %vm6745_vm2, %v2275_v7, %v2279_v59  ;;  %v2369_v22 = vrot.slane %v2367_v56, 5  ;;  %v6599_v40 = vld [vmem:[%s6720_s27 + $0xc0] sm:$0xff]  }
 0x13a   : > { %v2290_v59 = vsel %vm6745_vm2, %v2285_v16, %v2289_v49  ;;  %v8332_v18 = vrot.slane %v2373_v38, 5  ;;  %v5368_v16 = vld [vmem:[%s6720_s27 + $0xa8] sm:$0xf] }
 0x13b   : > { %v2332_v2 = vor.u32 %v2331_v21, %v8309_v48  ;;  %v5389_v57 = vcombine.low %v2280_v35, %v2290_v59  ;;  %v2383_v35 = vshll.u32 %v6654_v55, 16  ;;  %v2391_v34 = vshll.u32 %v5368_v16, 16 }
 0x13c   : > { %6238 = vmatmul.mubr.msk.bf16.gmra.mrb[4].mxu0 %vm676_vm3, %v5680_v12  ;;  %v6650_v12 = vld [vmem:[%s6720_s27 + $0x94] sm:$0xf] }
 0x13d   : > { %6074 = vmatmul.mubr.msk.bf16.gmra.mrb[20].mxu1 %vm676_vm3, %v6595_v29  ;;  %6241 = vmatprep.mubr.msk.bf16.mxu0 %vm676_vm3, %v5681_v54  ;;  %v2321_v54 = vrot.slane %v2319_v52, 5  ;;  %v2349_v29 = vshll.u32 %v6650_v12, 16  ;;  %v2353_v3 = vshrl.u32 %v6650_v12, 16  ;;  %v2333_v49 = vrot.slane %v2332_v2, 4 }
 0x13e   : > { %6077 = vmatprep.mubr.msk.bf16.mxu1 %vm676_vm3, %v6596_v20  ;;  %v2364_v20 = vshrl.u32 %v5365_v28, 16  ;;  %v6653_v28 = vld [vmem:[%s6720_s27 + $0x98] sm:$0x1]  ;;  %v2388_v12 = vshrl.u32 %v5368_v16, 16  ;;  %v5374_v16 = vld [vmem:[%s6720_s27 + $0xc0] sm:$0xf] }
 0x13f   : > { %v2322_v0 = vor.u32 %v2321_v54, %v2318_v33  ;;  %v8329_v23 = vrot.slane %v2349_v29, 5  ;;  %v2337_v33 = vrot.slane %v2335_v44, 5  ;;  %v2346_v54 = vor.u32 %v2345_v25, %v2342_v26  ;;  %v5371_v29 = vld [vmem:[%s6720_s27 + $0xb4] sm:$0xf] }
 0x140   : > { %v2366_v52 = vrot.slane %v2364_v20, 4  ;;  %v2401_v20 = vshrl.u32 %v6655_v17, 16  ;;  %v2412_v62 = vshrl.u32 %v5371_v29, 16  ;;  %v2415_v60 = vshll.u32 %v5371_v29, 16 }
 0x141   : > { %v2323_v7 = vrot.slane %v2322_v0, 4  ;;  %v2338_v59 = vsel %vm6745_vm2, %v2333_v49, %v2337_v33  ;;  %v2347_v0 = vrot.slane %v2346_v54, 4  ;;  %v2385_v44 = vrot.slane %v2383_v35, 5 }
 0x142   : > { %v2370_v53 = vor.u32 %v2369_v22, %v2366_v52  ;;  %v2390_v26 = vrot.slane %v2388_v12, 4  ;;  %v2403_v22 = vrot.slane %v2401_v20, 4  ;;  %v6659_v12 = vld [vmem:[%s6720_s27 + $0xbc] sm:$0x1] }
 0x143   : > { %v2328_v56 = vsel %vm6745_vm2, %v2323_v7, %v8309_v48  ;;  %v2352_v49 = vsel %vm6745_vm2, %v2347_v0, %v8329_v23  ;;  %v2431_v46 = vshll.u32 %v6659_v12, 16 }
 0x144   : > { %6242 = vmatmul.mubr.msk.bf16.gmra.mrb[8].mxu0 %vm676_vm3, %v5682_v47  ;;  %v2377_v47 = vshrl.u32 %v6651_v58, 16  ;;  %v2371_v63 = vrot.slane %v2370_v53, 4  ;;  %v5391_v48 = vcombine.low %v2328_v56, %v2338_v59 }
 0x145   : > { %6078 = vmatmul.mubr.msk.bf16.gmra.mrb[24].mxu1 %vm676_vm3, %v6597_v8  ;;  %6245 = vmatprep.mubr.msk.bf16.mxu0 %vm676_vm3, %v5683_v36  ;;  %v2355_v36 = vrot.slane %v2353_v3, 4 }
 0x146   : > { %6081 = vmatprep.mubr.msk.bf16.mxu1 %vm676_vm3, %v6598_v6  ;;  %v2379_v8 = vrot.slane %v2377_v47, 4  ;;  %v2359_v6 = vshll.u32 %v6653_v28, 16  ;;  %v2376_v54 = vsel %vm6745_vm2, %v2371_v63, %v8332_v18  ;;  %v2457_v63 = vrot.slane %v2455_v50, 5 }
 0x147   : > { %v2356_v21 = vor.u32 %v2355_v36, %v8329_v23  ;;  %v2393_v36 = vrot.slane %v2391_v34, 5  ;;  %v6657_v23 = vld [vmem:[%s6720_s27 + $0xb0] sm:$0x1] }
 0x148   : > { %v2380_v3 = vor.u32 %v2379_v8, %v8332_v18  ;;  %v2361_v58 = vrot.slane %v2359_v6, 5  ;;  %v2407_v28 = vshll.u32 %v6657_v23, 16  ;;  %v2436_v6 = vshrl.u32 %v5374_v16, 16 }
 0x149   : > { %v2357_v2 = vrot.slane %v2356_v21, 4  ;;  %v2394_v15 = vor.u32 %v2393_v36, %v2390_v26  ;;  %v2439_v18 = vshll.u32 %v5374_v16, 16  ;;  %v6658_v21 = vld [vmem:[%s6720_s27 + $0xc4] sm:$0xf] }
 0x14a   : > { %v2381_v25 = vrot.slane %v2380_v3, 4  ;;  %v2445_v53 = vshll.u32 %v6658_v21, 16  ;;  %v2449_v55 = vshrl.u32 %v6658_v21, 16  ;;  %v2409_v34 = vrot.slane %v2407_v28, 5 }
 0x14b   : > { %v2362_v33 = vsel %vm6745_vm2, %v2357_v2, %v2361_v58  ;;  %v2395_v29 = vrot.slane %v2394_v15, 4  ;;  %v2433_v58 = vrot.slane %v2431_v46, 5 }
 0x14c   : > { %6246 = vmatmul.mubr.msk.bf16.gmra.mrb[12].mxu0 %vm676_vm3, %v5684_v39  ;;  %v2397_v39 = vshll.u32 %v6655_v17, 16  ;;  %v2386_v1 = vsel %vm6745_vm2, %v2381_v25, %v2385_v44  ;;  %v5392_v37 = vcombine.low %v2352_v49, %v2362_v33  ;;  %v2438_v17 = vrot.slane %v2436_v6, 4 }
 0x14d   : > { %6082 = vmatmul.mubr.msk.bf16.gmra.mrb[28].mxu1 %vm676_vm3, %v6599_v40  ;;  %6249 = vmatprep.mubr.msk.bf16.mxu0 %vm676_vm3, %v5685_v9  ;;  %v6656_v9 = vld [vmem:[%s6720_s27 + $0xb8] sm:$0xf]  ;;  %v2414_v40 = vrot.slane %v2412_v62, 4  ;;  %v2447_v20 = vrot.slane %v2445_v53, 5  ;;  %v2451_v56 = vrot.slane %v2449_v55, 4 }
 0x14e   : > { %6105 = vmatprep.mubr.msk.bf16.mxu1 %vm676_vm3, %v5389_v57  ;;  %v2421_v38 = vshll.u32 %v6656_v9, 16  ;;  %v2425_v47 = vshrl.u32 %v6656_v9, 16  ;;  %v2399_v52 = vrot.slane %v2397_v39, 5  ;;  %v2417_v57 = vrot.slane %v2415_v60, 5 }
 0x14f   : > { %v2441_v39 = vrot.slane %v2439_v18, 5 }
 0x150   : > { %v2423_v7 = vrot.slane %v2421_v38, 5  ;;  %v2427_v8 = vrot.slane %v2425_v47, 4  ;;  %v2400_v62 = vsel %vm6745_vm2, %v2395_v29, %v2399_v52  ;;  %v2452_v38 = vor.u32 %v2451_v56, %v2447_v20 }
 0x151   : > { %v2442_v9 = vor.u32 %v2441_v39, %v2438_v17 }
 0x152   : > { %v2428_v35 = vor.u32 %v2427_v8, %v2423_v7  ;;  %v2453_v2 = vrot.slane %v2452_v38, 4  ;;  %v8435_v8 = vld [vmem:[%s8550_s2] ss:$0 sm:$0xff] }
 0x153   : > { %v2443_v47 = vrot.slane %v2442_v9, 4 }
 0x154   : > { %6250 = vmatmul.mubr.msk.bf16.gmra.mrb[16].mxu0 %vm676_vm3, %v5686_v41  ;;  %v2404_v41 = vor.u32 %v2403_v22, %v2399_v52  ;;  %v2429_v0 = vrot.slane %v2428_v35, 4  ;;  %v2458_v26 = vsel %vm6745_vm2, %v2453_v2, %v2457_v63 }
 0x155   : > { %6106 = vmatmul.mubr.msk.bf16.vlgmr.msra.gmra.mrb[16].mxu1 %vm676_vm3, %v8135_v10  ;;  %6253 = vmatprep.mubr.msk.bf16.mxu0 %vm676_vm3, %v5687_v32  ;;  %v2418_v10 = vor.u32 %v2417_v57, %v2414_v40  ;;  %v5393_v32 = vcombine.low %v2376_v54, %v2386_v1  ;;  %v2448_v44 = vsel %vm6745_vm2, %v2443_v47, %v2447_v20 }
 0x156   : > { %6109 = vmatprep.mubr.msk.bf16.mxu1 %vm676_vm3, %v5391_v48  ;;  %v2405_v3 = vrot.slane %v2404_v41, 4  ;;  %v2434_v45 = vsel %vm6745_vm2, %v2429_v0, %v2433_v58  ;;  %v5396_v25 = vcombine.low %v2448_v44, %v2458_v26 }
 0x157   : > { %v2419_v59 = vrot.slane %v2418_v10, 4 }
 0x158   : > { %v2410_v60 = vsel %vm6745_vm2, %v2405_v3, %v2409_v34 }
 0x159   : > { %v5394_v27 = vcombine.low %v2400_v62, %v2410_v60 }
 0x15c   : > { %6254 = vmatmul.mubr.msk.bf16.gmra.mrb[20].mxu0 %vm676_vm3, %v5688_v42  ;;  %v2424_v42 = vsel %vm6745_vm2, %v2419_v59, %v2423_v7 }
 0x15d   : > { %6110 = vmatmul.mubr.msk.bf16.gmra.mrb[20].mxu1 %vm676_vm3, %v5392_v37  ;;  %6257 = vmatprep.mubr.msk.bf16.mxu0 %vm676_vm3, %v5689_v5  ;;  %v5395_v5 = vcombine.low %v2424_v42, %v2434_v45 }
 0x15e   : > { %6113 = vmatprep.mubr.msk.bf16.mxu1 %vm676_vm3, %v5393_v32 }
 0x164   : > { %6258 = vmatmul.mubr.msk.bf16.gmra.mrb[24].mxu0 %vm676_vm3, %v5690_v51 }
 0x165   : > { %6114 = vmatmul.mubr.msk.bf16.gmra.mrb[24].mxu1 %vm676_vm3, %v5394_v27  ;;  %6261 = vmatprep.mubr.msk.bf16.mxu0 %vm676_vm3, %v5691_v31 }
 0x166   : > { %6117 = vmatprep.mubr.msk.bf16.mxu1 %vm676_vm3, %v5395_v5 }
 0x16c   : > { %6262 = vmatmul.mubr.msk.bf16.gmra.mrb[28].mxu0 %vm676_vm3, %v5692_v4 }
 0x16d   : > { %6118 = vmatmul.mubr.msk.bf16.gmra.mrb[28].mxu1 %vm676_vm3, %v5396_v25 }
 0x1e8   : > { %v6055_v43 = vpop.f32.mrb[0].mxu1 }
 0x1e9   : > { %v1868_v24 = vpop.f32.mrb[1].mxu1 }
 0x1ea   : > { %v6056_v51 = vpop.f32.mrb[2].mxu1 }
 0x1eb   : > { %v1871_v19 = vpop.f32.mrb[3].mxu1 }
 0x1f0   : > { %v6059_v13 = vpop.f32.mrb[4].mxu1 }
 0x1f1   : > { %v1884_v31 = vpop.f32.mrb[5].mxu1 }
 0x1f2   : > { %v6060_v36 = vpop.f32.mrb[6].mxu1 }
 0x1f3   : > { %v1887_v52 = vpop.f32.mrb[7].mxu1 }
 0x1f8   : > { %v6063_v22 = vpop.f32.mrb[8].mxu1 }
 0x1f9   : > { %v1900_v30 = vpop.f32.mrb[9].mxu1 }
 0x1fa   : > { %v8420_v48 = vpop.f32.mrb[10].mxu1 }
 0x1fb   : > { %v8422_v40 = vpop.f32.mrb[11].mxu1 }
 0x200   : > { %v8424_v14 = vpop.f32.mrb[12].mxu1 }
 0x201   : > { %v8426_v11 = vpop.f32.mrb[13].mxu1 }
 0x202   : > { %v8428_v4 = vpop.f32.mrb[14].mxu1 }
 0x203   : > { %v8430_v57 = vpop.f32.mrb[15].mxu1 }
 0x207   : > { %v6235_v7 = vpop.f32.mrb[0].mxu0 }
 0x208   : > { %v6269_v16 = vadd.f32 %v6235_v7, %v6055_v43  ;;  %v4679_v49 = vpop.f32.mrb[1].mxu0 }
 0x209   : > { %v6270_v33 = vadd.f32 %v4679_v49, %v1868_v24  ;;  %v6236_v54 = vpop.f32.mrb[2].mxu0 }
 0x20a   : > { %v4847_v1 = vadd.f32 %v6269_v16, %v8435_v8  ;;  %v6271_v15 = vadd.f32 %v6236_v54, %v6056_v51  ;;  %v4682_v41 = vpop.f32.mrb[3].mxu0 }
 0x20b   : > { %v4845_v23 = vadd.f32 %v6270_v33, %v8435_v8  ;;  %v6272_v28 = vadd.f32 %v4682_v41, %v1871_v19 }
 0x20c   : > { %v4879_v6 = vmax.f32 %v4847_v1, 0.0  ;;  %v4848_v18 = vadd.f32 %v6271_v15, %v8435_v8 }
 0x20d   : > { %v4877_v21 = vmax.f32 %v4845_v23, 0.0  ;;  %v4846_v53 = vadd.f32 %v6272_v28, %v8435_v8 }
 0x20e   : > { %v5749_v55 = vpack.c.bf16 %v4879_v6, %v4879_v6  ;;  %v4880_v10 = vmax.f32 %v4848_v18, 0.0 }
 0x20f   : > { %v5747_v35 = vpack.c.bf16 %v4877_v21, %v4877_v21  ;;  %v4878_v12 = vmax.f32 %v4846_v53, 0.0  ;;  %v6239_v46 = vpop.f32.mrb[4].mxu0 }
 0x210   : > { %5040 = vst.msk [vmem:[%s8444_s15 + $0x8] sm:$0xf] %vm5037_vm7, %v5749_v55  ;;  %v5750_v37 = vpack.c.bf16 %v4880_v10, %v4880_v10  ;;  %v6273_v32 = vadd.f32 %v6239_v46, %v6059_v13  ;;  %v4695_v29 = vpop.f32.mrb[5].mxu0 }
 0x211   : > { %5038 = vst.msk [vmem:[%s8444_s15] sm:$0xf] %vm5037_vm7, %v5747_v35  ;;  %v5748_v3 = vpack.c.bf16 %v4878_v12, %v4878_v12  ;;  %v6274_v34 = vadd.f32 %v4695_v29, %v1884_v31  ;;  %v6240_v17 = vpop.f32.mrb[6].mxu0 }
 0x212   : > { %5041 = vst.msk [vmem:[%s8444_s15 + $0xc] sm:$0xf] %vm5037_vm7, %v5750_v37  ;;  %v4851_v39 = vadd.f32 %v6273_v32, %v8435_v8  ;;  %v6275_v20 = vadd.f32 %v6240_v17, %v6060_v36  ;;  %v4698_v56 = vpop.f32.mrb[7].mxu0 }
 0x213   : > { %5039 = vst.msk [vmem:[%s8444_s15 + $0x4] sm:$0xf] %vm5037_vm7, %v5748_v3  ;;  %v4849_v59 = vadd.f32 %v6274_v34, %v8435_v8  ;;  %v6276_v0 = vadd.f32 %v4698_v56, %v1887_v52 }
 0x214   : > { %v4883_v58 = vmax.f32 %v4851_v39, 0.0  ;;  %v4852_v62 = vadd.f32 %v6275_v20, %v8435_v8 }
 0x215   : > { %v4881_v60 = vmax.f32 %v4849_v59, 0.0  ;;  %v4850_v9 = vadd.f32 %v6276_v0, %v8435_v8 }
 0x216   : > { %v5753_v38 = vpack.c.bf16 %v4883_v58, %v4883_v58  ;;  %v4884_v61 = vmax.f32 %v4852_v62, 0.0 }
 0x217   : > { %v5751_v50 = vpack.c.bf16 %v4881_v60, %v4881_v60  ;;  %v4882_v42 = vmax.f32 %v4850_v9, 0.0  ;;  %v6243_v45 = vpop.f32.mrb[8].mxu0 }
 0x218   : > { %5044 = vst.msk [vmem:[%s8444_s15 + $0x18] sm:$0xf] %vm5037_vm7, %v5753_v38  ;;  %v5754_v27 = vpack.c.bf16 %v4884_v61, %v4884_v61  ;;  %v6277_v5 = vadd.f32 %v6243_v45, %v6063_v22  ;;  %v4711_v47 = vpop.f32.mrb[9].mxu0 }
 0x219   : > { %5042 = vst.msk [vmem:[%s8444_s15 + $0x10] sm:$0xf] %vm5037_vm7, %v5751_v50  ;;  %v5752_v2 = vpack.c.bf16 %v4882_v42, %v4882_v42  ;;  %v6278_v63 = vadd.f32 %v4711_v47, %v1900_v30  ;;  %v6244_v44 = vpop.f32.mrb[10].mxu0 }
 0x21a   : > { %5045 = vst.msk [vmem:[%s8444_s15 + $0x1c] sm:$0xf] %vm5037_vm7, %v5754_v27  ;;  %v4855_v26 = vadd.f32 %v6277_v5, %v8435_v8  ;;  %v6279_v25 = vadd.f32 %v6244_v44, %v8420_v48  ;;  %v4714_v43 = vpop.f32.mrb[11].mxu0 }
 0x21b   : > { %5043 = vst.msk [vmem:[%s8444_s15 + $0x14] sm:$0xf] %vm5037_vm7, %v5752_v2  ;;  %v4853_v24 = vadd.f32 %v6278_v63, %v8435_v8  ;;  %v6280_v51 = vadd.f32 %v4714_v43, %v8422_v40 }
 0x21c   : > { %v4887_v19 = vmax.f32 %v4855_v26, 0.0  ;;  %v4856_v13 = vadd.f32 %v6279_v25, %v8435_v8 }
 0x21d   : > { %v4885_v31 = vmax.f32 %v4853_v24, 0.0  ;;  %v4854_v36 = vadd.f32 %v6280_v51, %v8435_v8 }
 0x21e   : > { %v5757_v52 = vpack.c.bf16 %v4887_v19, %v4887_v19  ;;  %v4888_v22 = vmax.f32 %v4856_v13, 0.0 }
 0x21f   : > { %v5755_v30 = vpack.c.bf16 %v4885_v31, %v4885_v31  ;;  %v4886_v48 = vmax.f32 %v4854_v36, 0.0  ;;  %v6247_v7 = vpop.f32.mrb[12].mxu0 }
 0x220   : > { %5048 = vst.msk [vmem:[%s8444_s15 + $0x28] sm:$0xf] %vm5037_vm7, %v5757_v52  ;;  %v5758_v16 = vpack.c.bf16 %v4888_v22, %v4888_v22  ;;  %v6281_v49 = vadd.f32 %v6247_v7, %v8424_v14  ;;  %v4727_v33 = vpop.f32.mrb[13].mxu0 }
 0x221   : > { %5046 = vst.msk [vmem:[%s8444_s15 + $0x20] sm:$0xf] %vm5037_vm7, %v5755_v30  ;;  %v5756_v40 = vpack.c.bf16 %v4886_v48, %v4886_v48  ;;  %v6282_v54 = vadd.f32 %v4727_v33, %v8426_v11  ;;  %v6248_v1 = vpop.f32.mrb[14].mxu0 }
 0x222   : > { %5049 = vst.msk [vmem:[%s8444_s15 + $0x2c] sm:$0xf] %vm5037_vm7, %v5758_v16  ;;  %v4859_v15 = vadd.f32 %v6281_v49, %v8435_v8  ;;  %v6283_v41 = vadd.f32 %v6248_v1, %v8428_v4  ;;  %v4730_v23 = vpop.f32.mrb[15].mxu0 }
 0x223   : > { %5047 = vst.msk [vmem:[%s8444_s15 + $0x24] sm:$0xf] %vm5037_vm7, %v5756_v40  ;;  %v4857_v14 = vadd.f32 %v6282_v54, %v8435_v8  ;;  %v6284_v28 = vadd.f32 %v4730_v23, %v8430_v57 }
 0x224   : > { %v4891_v6 = vmax.f32 %v4859_v15, 0.0  ;;  %v4860_v18 = vadd.f32 %v6283_v41, %v8435_v8 }
 0x225   : > { %v4889_v11 = vmax.f32 %v4857_v14, 0.0  ;;  %v4858_v21 = vadd.f32 %v6284_v28, %v8435_v8 }
 0x226   : > { %v5761_v53 = vpack.c.bf16 %v4891_v6, %v4891_v6  ;;  %v4892_v55 = vmax.f32 %v4860_v18, 0.0 }
 0x227   : > { %v5759_v10 = vpack.c.bf16 %v4889_v11, %v4889_v11  ;;  %v4890_v4 = vmax.f32 %v4858_v21, 0.0  ;;  %v6251_v35 = vpop.f32.mrb[16].mxu0 }
 0x228   : > { %5052 = vst.msk [vmem:[%s8444_s15 + $0x38] sm:$0xf] %vm5037_vm7, %v5761_v53  ;;  %v5762_v12 = vpack.c.bf16 %v4892_v55, %v4892_v55  ;;  %v6107_v46 = vpop.f32.mrb[16].mxu1  ;;  %v4743_v37 = vpop.f32.mrb[17].mxu0 }
 0x229   : > { %5050 = vst.msk [vmem:[%s8444_s15 + $0x30] sm:$0xf] %vm5037_vm7, %v5759_v10  ;;  %v5760_v57 = vpack.c.bf16 %v4890_v4, %v4890_v4  ;;  %v6285_v32 = vadd.f32 %v6251_v35, %v6107_v46  ;;  %v2670_v29 = vpop.f32.mrb[17].mxu1  ;;  %v6252_v3 = vpop.f32.mrb[18].mxu0 }
 0x22a   : > { %5053 = vst.msk [vmem:[%s8444_s15 + $0x3c] sm:$0xf] %vm5037_vm7, %v5762_v12  ;;  %v6286_v34 = vadd.f32 %v4743_v37, %v2670_v29  ;;  %v6108_v17 = vpop.f32.mrb[18].mxu1  ;;  %v4746_v39 = vpop.f32.mrb[19].mxu0 }
 0x22b   : > { %5051 = vst.msk [vmem:[%s8444_s15 + $0x34] sm:$0xf] %vm5037_vm7, %v5760_v57  ;;  %v4863_v20 = vadd.f32 %v6285_v32, %v8435_v8  ;;  %v6287_v56 = vadd.f32 %v6252_v3, %v6108_v17  ;;  %v2673_v59 = vpop.f32.mrb[19].mxu1 }
 0x22c   : > { %v4861_v0 = vadd.f32 %v6286_v34, %v8435_v8  ;;  %v6288_v58 = vadd.f32 %v4746_v39, %v2673_v59 }
 0x22d   : > { %v4895_v62 = vmax.f32 %v4863_v20, 0.0  ;;  %v4864_v60 = vadd.f32 %v6287_v56, %v8435_v8 }
 0x22e   : > { %v4893_v9 = vmax.f32 %v4861_v0, 0.0  ;;  %v4862_v38 = vadd.f32 %v6288_v58, %v8435_v8 }
 0x22f   : > { %v5765_v61 = vpack.c.bf16 %v4895_v62, %v4895_v62  ;;  %v4896_v50 = vmax.f32 %v4864_v60, 0.0  ;;  %v6255_v42 = vpop.f32.mrb[20].mxu0 }
 0x230   : > { %v5763_v45 = vpack.c.bf16 %v4893_v9, %v4893_v9  ;;  %v4894_v27 = vmax.f32 %v4862_v38, 0.0  ;;  %v6111_v5 = vpop.f32.mrb[20].mxu1  ;;  %v4759_v47 = vpop.f32.mrb[21].mxu0 }
 0x231   : > { %5056 = vst.msk [vmem:[%s8444_s15 + $0x48] sm:$0xf] %vm5037_vm7, %v5765_v61  ;;  %v5766_v2 = vpack.c.bf16 %v4896_v50, %v4896_v50  ;;  %v6289_v63 = vadd.f32 %v6255_v42, %v6111_v5  ;;  %v2686_v44 = vpop.f32.mrb[21].mxu1  ;;  %v6256_v26 = vpop.f32.mrb[22].mxu0 }
 0x232   : > { %5054 = vst.msk [vmem:[%s8444_s15 + $0x40] sm:$0xf] %vm5037_vm7, %v5763_v45  ;;  %v5764_v25 = vpack.c.bf16 %v4894_v27, %v4894_v27  ;;  %v6290_v43 = vadd.f32 %v4759_v47, %v2686_v44  ;;  %v6112_v24 = vpop.f32.mrb[22].mxu1  ;;  %v4762_v51 = vpop.f32.mrb[23].mxu0 }
 0x233   : > { %5057 = vst.msk [vmem:[%s8444_s15 + $0x4c] sm:$0xf] %vm5037_vm7, %v5766_v2  ;;  %v4867_v19 = vadd.f32 %v6289_v63, %v8435_v8  ;;  %v6291_v13 = vadd.f32 %v6256_v26, %v6112_v24  ;;  %v2689_v31 = vpop.f32.mrb[23].mxu1 }
 0x234   : > { %5055 = vst.msk [vmem:[%s8444_s15 + $0x44] sm:$0xf] %vm5037_vm7, %v5764_v25  ;;  %v4865_v36 = vadd.f32 %v6290_v43, %v8435_v8  ;;  %v6292_v52 = vadd.f32 %v4762_v51, %v2689_v31 }
 0x235   : > { %v4899_v22 = vmax.f32 %v4867_v19, 0.0  ;;  %v4868_v30 = vadd.f32 %v6291_v13, %v8435_v8 }
 0x236   : > { %v4897_v48 = vmax.f32 %v4865_v36, 0.0  ;;  %v4866_v7 = vadd.f32 %v6292_v52, %v8435_v8 }
 0x237   : > { %v5769_v16 = vpack.c.bf16 %v4899_v22, %v4899_v22  ;;  %v4900_v49 = vmax.f32 %v4868_v30, 0.0  ;;  %v6259_v33 = vpop.f32.mrb[24].mxu0 }
 0x238   : > { %v5767_v40 = vpack.c.bf16 %v4897_v48, %v4897_v48  ;;  %v4898_v54 = vmax.f32 %v4866_v7, 0.0  ;;  %v6115_v1 = vpop.f32.mrb[24].mxu1  ;;  %v4775_v15 = vpop.f32.mrb[25].mxu0 }
 0x239   : > { %5060 = vst.msk [vmem:[%s8444_s15 + $0x58] sm:$0xf] %vm5037_vm7, %v5769_v16  ;;  %v5770_v41 = vpack.c.bf16 %v4900_v49, %v4900_v49  ;;  %v6293_v23 = vadd.f32 %v6259_v33, %v6115_v1  ;;  %v2702_v14 = vpop.f32.mrb[25].mxu1  ;;  %v6260_v28 = vpop.f32.mrb[26].mxu0 }
 0x23a   : > { %5058 = vst.msk [vmem:[%s8444_s15 + $0x50] sm:$0xf] %vm5037_vm7, %v5767_v40  ;;  %v5768_v6 = vpack.c.bf16 %v4898_v54, %v4898_v54  ;;  %v6294_v18 = vadd.f32 %v4775_v15, %v2702_v14  ;;  %v6116_v11 = vpop.f32.mrb[26].mxu1  ;;  %v4778_v21 = vpop.f32.mrb[27].mxu0 }
 0x23b   : > { %5061 = vst.msk [vmem:[%s8444_s15 + $0x5c] sm:$0xf] %vm5037_vm7, %v5770_v41  ;;  %v4871_v53 = vadd.f32 %v6293_v23, %v8435_v8  ;;  %v6295_v55 = vadd.f32 %v6260_v28, %v6116_v11  ;;  %v2705_v10 = vpop.f32.mrb[27].mxu1 }
 0x23c   : > { %5059 = vst.msk [vmem:[%s8444_s15 + $0x54] sm:$0xf] %vm5037_vm7, %v5768_v6  ;;  %v4869_v4 = vadd.f32 %v6294_v18, %v8435_v8  ;;  %v6296_v35 = vadd.f32 %v4778_v21, %v2705_v10 }
 0x23d   : > { %v4903_v12 = vmax.f32 %v4871_v53, 0.0  ;;  %v4872_v46 = vadd.f32 %v6295_v55, %v8435_v8 }
 0x23e   : > { %v4901_v37 = vmax.f32 %v4869_v4, 0.0  ;;  %v4870_v57 = vadd.f32 %v6296_v35, %v8435_v8 }
 0x23f   : > { %v5773_v32 = vpack.c.bf16 %v4903_v12, %v4903_v12  ;;  %v4904_v29 = vmax.f32 %v4872_v46, 0.0  ;;  %v6263_v3 = vpop.f32.mrb[28].mxu0 }
 0x240   : > { %v5771_v34 = vpack.c.bf16 %v4901_v37, %v4901_v37  ;;  %v4902_v17 = vmax.f32 %v4870_v57, 0.0  ;;  %v6119_v39 = vpop.f32.mrb[28].mxu1  ;;  %v4791_v20 = vpop.f32.mrb[29].mxu0 }
 0x241   : > { %5064 = vst.msk [vmem:[%s8444_s15 + $0x68] sm:$0xf] %vm5037_vm7, %v5773_v32  ;;  %v5774_v56 = vpack.c.bf16 %v4904_v29, %v4904_v29  ;;  %v6297_v59 = vadd.f32 %v6263_v3, %v6119_v39  ;;  %v2718_v0 = vpop.f32.mrb[29].mxu1  ;;  %v6264_v58 = vpop.f32.mrb[30].mxu0 }
 0x242   : > { %5062 = vst.msk [vmem:[%s8444_s15 + $0x60] sm:$0xf] %vm5037_vm7, %v5771_v34  ;;  %v5772_v62 = vpack.c.bf16 %v4902_v17, %v4902_v17  ;;  %v6298_v60 = vadd.f32 %v4791_v20, %v2718_v0  ;;  %v6120_v9 = vpop.f32.mrb[30].mxu1  ;;  %v4794_v38 = vpop.f32.mrb[31].mxu0 }
 0x243   : > { %5065 = vst.msk [vmem:[%s8444_s15 + $0x6c] sm:$0xf] %vm5037_vm7, %v5774_v56  ;;  %v4875_v61 = vadd.f32 %v6297_v59, %v8435_v8  ;;  %v6299_v50 = vadd.f32 %v6264_v58, %v6120_v9  ;;  %v2721_v42 = vpop.f32.mrb[31].mxu1 }
 0x244   : > { %5063 = vst.msk [vmem:[%s8444_s15 + $0x64] sm:$0xf] %vm5037_vm7, %v5772_v62  ;;  %v4873_v45 = vadd.f32 %v6298_v60, %v8435_v8  ;;  %v6300_v27 = vadd.f32 %v4794_v38, %v2721_v42 }
 0x245   : > { %v4907_v5 = vmax.f32 %v4875_v61, 0.0  ;;  %v4876_v47 = vadd.f32 %v6299_v50, %v8435_v8 }
 0x246   : > { %v4905_v2 = vmax.f32 %v4873_v45, 0.0  ;;  %v4874_v63 = vadd.f32 %v6300_v27, %v8435_v8 }
 0x247   : > { %v5777_v44 = vpack.c.bf16 %v4907_v5, %v4907_v5  ;;  %v4908_v26 = vmax.f32 %v4876_v47, 0.0 }
 0x248   : > { %v5775_v25 = vpack.c.bf16 %v4905_v2, %v4905_v2  ;;  %v4906_v43 = vmax.f32 %v4874_v63, 0.0 }
 0x249   : > { %5068 = vst.msk [vmem:[%s8444_s15 + $0x78] sm:$0xf] %vm5037_vm7, %v5777_v44  ;;  %v5778_v24 = vpack.c.bf16 %v4908_v26, %v4908_v26 }
 0x24a   : > { %5066 = vst.msk [vmem:[%s8444_s15 + $0x70] sm:$0xf] %vm5037_vm7, %v5775_v25  ;;  %v5776_v51 = vpack.c.bf16 %v4906_v43, %v4906_v43 }
 0x24b   : > { %5069 = vst.msk [vmem:[%s8444_s15 + $0x7c] sm:$0xf] %vm5037_vm7, %v5778_v24 }
 0x24c   : > { %5067 = vst.msk [vmem:[%s8444_s15 + $0x74] sm:$0xf] %vm5037_vm7, %v5776_v51 }
 0x24d PF: > { %s13_s12 = sadd.s32 1, %s6667_s12  }
 0x24e   : > { %p10_p4 = scmp.ge.s32.totalorder %s13_s12, 4  }
 0x250   :  { %12 = sbr.rel (!%p10_p4) target bundleno = 1 (0x1), region = 72 }

</bundles_post_ra>
